<compile_context>
chip_gen: v7x
topology: tpu7x:2x2x1
jax: 0.10.0
libtpu: 0.0.40
codegen_flags: <defaults>
</compile_context>

<pallas_src>
import functools

import jax
import jax.numpy as jnp
from jax.experimental import pallas as pl
from jax.experimental.pallas import tpu as pltpu

LANE = 128
SUBLANE = 8
VMEM_LIMIT = 32 * 1024 * 1024        # safe scoped-VMEM limit on all generations


def _round_up(x, m):
    return (x + m - 1) // m * m


def _conv_out(s, k, st):
    return (s - k) // st + 1


# ----------------------------------------------------------------------------
# The fused kernel.  One grid step == one image.  All activations stay in VMEM
# scratch, all weights stay resident across grid steps, and only the final
# (8, 128)-padded Q tile per image is written back to HBM.
# ----------------------------------------------------------------------------
def _dqn_kernel(x_ref,
                c1w, c1b, c2w, c2b, c3w, c3b,
                f1w, f1b, f2w, f2b, f3w, f3b, f4w, f4b,
                o_ref,
                s1, s2, s3,
                *, dims):
    h1, w1, h2, w2, h3, w3 = dims      # conv1 / conv2 / conv3 output spatial

    def conv_from_scratch(src, dst, w_ref, b_ref, wi, kh, kw, stride, ho, wo):
        """Valid conv over a (rows=h*w, 128-lane channels) VMEM scratch."""
        npad = w_ref.shape[1]
        bias = jnp.broadcast_to(b_ref[...], (wo, npad))          # hoisted once
        for oh in range(ho):                                     # static unroll
            acc = bias
            for i in range(kh):
                base = (oh * stride + i) * wi
                slab = src[base:base + wi, :]                    # (wi, 128) f32
                for j in range(kw):
                    if stride == 1:
                        g = slab[j:j + wo, :]                    # contiguous
                    else:                                        # strided gather
                        g = jnp.concatenate(
                            [slab[j + stride * t:j + stride * t + 1, :]
                             for t in range(wo)], axis=0)
                    wt = w_ref[(i * kw + j) * LANE:(i * kw + j + 1) * LANE, :]
                    acc = acc + jnp.dot(g.astype(jnp.bfloat16), wt,
                                        preferred_element_type=jnp.float32)
            dst[oh * wo:(oh + 1) * wo, :] = jnp.maximum(acc, 0.0)

    # conv1: pre-gathered patch GEMM (cast after load, f32 accumulate + ReLU).
    p1 = h1 * w1
    a1 = jnp.dot(x_ref[0].astype(jnp.bfloat16), c1w[...],
                 preferred_element_type=jnp.float32)
    s1[0:p1, :] = jnp.maximum(a1 + c1b[...], 0.0)

    # conv2 (4x4 / stride 2) and conv3 (3x3 / stride 1), entirely in VMEM.
    conv_from_scratch(s1, s2, c2w, c2b, w1, 4, 4, 2, h2, w2)
    conv_from_scratch(s2, s3, c3w, c3b, w2, 3, 3, 1, h3, w3)

    # FC head: f1 consumes the conv3 rows directly (row-blocked f1 weights, so
    # torch's NCHW Flatten never materializes); f2/f3/f4 are resident GEMMs.
    h = f1b[...]
    for t in range(h3 * w3):
        h = h + jnp.dot(s3[t:t + 1, :].astype(jnp.bfloat16),
                        f1w[t * LANE:(t + 1) * LANE, :],
                        preferred_element_type=jnp.float32)
    h = jnp.maximum(h, 0.0)
    h = jnp.maximum(jnp.dot(h.astype(jnp.bfloat16), f2w[...],
                            preferred_element_type=jnp.float32) + f2b[...], 0.0)
    h = jnp.maximum(jnp.dot(h.astype(jnp.bfloat16), f3w[...],
                            preferred_element_type=jnp.float32) + f3b[...], 0.0)
    q = jnp.dot(h.astype(jnp.bfloat16), f4w[...],
                preferred_element_type=jnp.float32) + f4b[...]
    # Lane- and sublane-dense store (broadcast over the 8 padded rows).
    o_ref[0, :, :] = jnp.broadcast_to(q, (SUBLANE, q.shape[1])).astype(o_ref.dtype)


# ----------------------------------------------------------------------------
# Wrapper: conv1 patch gather (fused XLA glue incl. the bf16 cast) + the single
# pallas_call + final slice of the padded Q tile.
# ----------------------------------------------------------------------------
def _conv1_im2col(x, kh=8, kw=8, stride=4):
    n, hgt, wdt, c = x.shape
    ho, wo = _conv_out(hgt, kh, stride), _conv_out(wdt, kw, stride)
    parts = []
    for i in range(kh):
        for j in range(kw):
            parts.append(x[:, i:i + (ho - 1) * stride + 1:stride,
                            j:j + (wo - 1) * stride + 1:stride, :])
    patches = jnp.stack(parts, axis=3).reshape(n, ho * wo, kh * kw * c)
    return patches.astype(jnp.bfloat16), ho, wo       # cast fuses into the gather


def dqn_forward(pp, x, *, n_actions, weight_buffering=1):
    """x: (N, H, W, C) float32 NHWC — same input the PyTorch module receives."""
    n, _, _, c = x.shape
    patches, h1, w1 = _conv1_im2col(x)
    h2, w2 = _conv_out(h1, 4, 2), _conv_out(w1, 4, 2)
    h3, w3 = _conv_out(h2, 3, 1), _conv_out(w2, 3, 1)
    p1, k1 = h1 * w1, 64 * c
    npad = pp["f4_w"].shape[1]

    def const_spec(arr):
        # Resident weights/biases: constant index_map; single-buffer if allowed.
        if weight_buffering == 1:
            return pl.BlockSpec(arr.shape, lambda i: (0, 0),
                                pipeline_mode=pl.Buffered(1))
        return pl.BlockSpec(arr.shape, lambda i: (0, 0))

    weights = [pp["c1_w"], pp["c1_b"], pp["c2_w"], pp["c2_b"],
               pp["c3_w"], pp["c3_b"], pp["f1_w"], pp["f1_b"],
               pp["f2_w"], pp["f2_b"], pp["f3_w"], pp["f3_b"],
               pp["f4_w"], pp["f4_b"]]

    out = pl.pallas_call(
        functools.partial(_dqn_kernel, dims=(h1, w1, h2, w2, h3, w3)),
        out_shape=jax.ShapeDtypeStruct((n, SUBLANE, npad), jnp.float32),
        grid=(n,),
        in_specs=[pl.BlockSpec((1, p1, k1), lambda i: (i, 0, 0))]
                 + [const_spec(a) for a in weights],
        out_specs=pl.BlockSpec((1, SUBLANE, npad), lambda i: (i, 0, 0)),
        scratch_shapes=[
            pltpu.VMEM((_round_up(h1 * w1, SUBLANE), LANE), jnp.float32),
            pltpu.VMEM((_round_up(h2 * w2, SUBLANE), LANE), jnp.float32),
            pltpu.VMEM((_round_up(h3 * w3, SUBLANE), LANE), jnp.float32),
        ],
        compiler_params=pltpu.CompilerParams(
            dimension_semantics=("parallel",),
            vmem_limit_bytes=VMEM_LIMIT,
        ),
    )(patches, *weights)
    return out[:, 0, :n_actions]


# ----------------------------------------------------------------------------
# Parameters: synthetic init in the PyTorch module's logical layout, then a
# one-time preprocessing pass (pad / permute / reshape / cast) for the kernel.
# ----------------------------------------------------------------------------
def init_dqn_params(key, input_shape, n_actions):
    """input_shape = (H, W, C). f1_w rows follow torch's NCHW Flatten order."""
    hgt, wdt, c = input_shape
    h1, w1 = _conv_out(hgt, 8, 4), _conv_out(wdt, 8, 4)
    h2, w2 = _conv_out(h1, 4, 2), _conv_out(w1, 4, 2)
    h3, w3 = _conv_out(h2, 3, 1), _conv_out(w2, 3, 1)
    conv_out_size = 64 * h3 * w3

    keys = jax.random.split(key, 7)
    scale = 0.05

    def w_init(k, shape):
        return scale * jax.random.normal(k, shape, dtype=jnp.float32)

    params = {
        "c1_w": w_init(keys[0], (8, 8, c, 32)),  "c1_b": jnp.zeros((32,), jnp.float32),
        "c2_w": w_init(keys[1], (4, 4, 32, 64)), "c2_b": jnp.zeros((64,), jnp.float32),
        "c3_w": w_init(keys[2], (3, 3, 64, 64)), "c3_b": jnp.zeros((64,), jnp.float32),
        "f1_w": w_init(keys[3], (conv_out_size, 512)), "f1_b": jnp.zeros((512,), jnp.float32),
        "f2_w": w_init(keys[4], (512, 256)),           "f2_b": jnp.zeros((256,), jnp.float32),
        "f3_w": w_init(keys[5], (256, 512)),           "f3_b": jnp.zeros((512,), jnp.float32),
        "f4_w": w_init(keys[6], (512, n_actions)),     "f4_b": jnp.zeros((n_actions,), jnp.float32),
    }
    meta = {"h3": h3, "w3": w3, "conv_out_size": conv_out_size}
    return params, meta


def _pad_to(a, axis, size):
    pad = [(0, 0)] * a.ndim
    pad[axis] = (0, size - a.shape[axis])
    return jnp.pad(a, pad)


def preprocess_params(params, meta):
    """One-time prep so the hot path is a single kernel launch:
    * conv weights -> (kh*kw*Cin_pad, Cout_pad128) bf16 rows; biases (1, Cout_pad) f32
    * conv2/conv3 input channels zero-padded to the 128 lanes the previous
      layer's activations occupy (padded lanes are exactly zero -> no slices)
    * f1_w rows permuted from torch NCHW-flatten (c*h3*w3 + p) to the kernel's
      (p*128 + c) layout with zero rows for the padded channels
    * all lane dims padded to multiples of 128; MXU operands bf16.
    """
    h3w3 = meta["h3"] * meta["w3"]
    pp = {}

    def conv_prep(w, b, cin_pad):
        kh, kw, _, cout = w.shape
        cout_pad = _round_up(cout, LANE)
        w = _pad_to(_pad_to(w, 2, cin_pad), 3, cout_pad)
        w = w.reshape(kh * kw * cin_pad, cout_pad).astype(jnp.bfloat16)
        b = _pad_to(b, 0, cout_pad).reshape(1, cout_pad).astype(jnp.float32)
        return w, b

    pp["c1_w"], pp["c1_b"] = conv_prep(params["c1_w"], params["c1_b"],
                                       params["c1_w"].shape[2])
    pp["c2_w"], pp["c2_b"] = conv_prep(params["c2_w"], params["c2_b"], LANE)
    pp["c3_w"], pp["c3_b"] = conv_prep(params["c3_w"], params["c3_b"], LANE)

    f1 = params["f1_w"].reshape(64, h3w3, 512).transpose(1, 0, 2)
    f1 = _pad_to(f1, 1, LANE).reshape(h3w3 * LANE, 512)
    pp["f1_w"] = f1.astype(jnp.bfloat16)
    pp["f1_b"] = params["f1_b"].reshape(1, -1).astype(jnp.float32)

    pp["f2_w"] = params["f2_w"].astype(jnp.bfloat16)
    pp["f2_b"] = params["f2_b"].reshape(1, -1).astype(jnp.float32)
    pp["f3_w"] = params["f3_w"].astype(jnp.bfloat16)
    pp["f3_b"] = params["f3_b"].reshape(1, -1).astype(jnp.float32)

    nact = params["f4_w"].shape[1]
    npad = _round_up(nact, LANE)
    pp["f4_w"] = _pad_to(params["f4_w"], 1, npad).astype(jnp.bfloat16)
    pp["f4_b"] = _pad_to(params["f4_b"], 0, npad).reshape(1, npad).astype(jnp.float32)
    return pp


if __name__ == "__main__":
    # Smallest spatial size the conv stack admits: 36 -> 8 -> 3 -> 1.
    hgt, wdt, c = 36, 36, 4
    n_actions = 6
    batch = 2

    key = jax.random.PRNGKey(0)
    pkey, xkey = jax.random.split(key)
    params, meta = init_dqn_params(pkey, (hgt, wdt, c), n_actions)
    pp = preprocess_params(params, meta)              # one-time host-side prep

    x = jax.random.normal(xkey, (batch, hgt, wdt, c), dtype=jnp.float32)

    def make_fwd(buffering):
        return jax.jit(functools.partial(dqn_forward, n_actions=n_actions,
                                         weight_buffering=buffering))

    try:
        q_values = jax.block_until_ready(make_fwd(1)(pp, x))
    except Exception:
        # Fallback for JAX builds that reject single-buffered (Buffered(1))
        # resident operands; the kernel is otherwise identical.
        q_values = jax.block_until_ready(make_fwd(2)(pp, x))

    assert q_values.shape == (batch, n_actions), q_values.shape
    assert q_values.dtype == jnp.float32
    assert bool(jnp.all(jnp.isfinite(q_values)))
    print("KERNEL_OK")
</pallas_src>

<mosaic_0001>
module attributes {stable_mosaic.version = 11 : i64} {
  func.func @_dqn_kernel(%arg0: i32, %arg1: memref<1x64x256xbf16, #tpu.memory_space<vmem>>, %arg2: memref<256x128xbf16, #tpu.memory_space<vmem>>, %arg3: memref<1x128xf32, #tpu.memory_space<vmem>>, %arg4: memref<2048x128xbf16, #tpu.memory_space<vmem>>, %arg5: memref<1x128xf32, #tpu.memory_space<vmem>>, %arg6: memref<1152x128xbf16, #tpu.memory_space<vmem>>, %arg7: memref<1x128xf32, #tpu.memory_space<vmem>>, %arg8: memref<128x512xbf16, #tpu.memory_space<vmem>>, %arg9: memref<1x512xf32, #tpu.memory_space<vmem>>, %arg10: memref<512x256xbf16, #tpu.memory_space<vmem>>, %arg11: memref<1x256xf32, #tpu.memory_space<vmem>>, %arg12: memref<256x512xbf16, #tpu.memory_space<vmem>>, %arg13: memref<1x512xf32, #tpu.memory_space<vmem>>, %arg14: memref<512x128xbf16, #tpu.memory_space<vmem>>, %arg15: memref<1x128xf32, #tpu.memory_space<vmem>>, %arg16: memref<1x8x128xf32, #tpu.memory_space<vmem>>, %arg17: memref<64x128xf32, #tpu.memory_space<vmem>>, %arg18: memref<16x128xf32, #tpu.memory_space<vmem>>, %arg19: memref<8x128xf32, #tpu.memory_space<vmem>>) attributes {dimension_semantics = [#tpu.dimension_semantics<parallel>], iteration_bounds = array<i64: 2>, scalar_prefetch = 0 : i64, scratch_operands = 3 : i64, tpu.core_type = #tpu.core_type<tc>, window_params = [{transform_indices = @transform_0, window_bounds = array<i64: 1, 64, 256>}, {pipeline_mode = #tpu.pipeline_mode<synchronous>, transform_indices = @transform_1, window_bounds = array<i64: 256, 128>}, {pipeline_mode = #tpu.pipeline_mode<synchronous>, transform_indices = @transform_2, window_bounds = array<i64: 1, 128>}, {pipeline_mode = #tpu.pipeline_mode<synchronous>, transform_indices = @transform_3, window_bounds = array<i64: 2048, 128>}, {pipeline_mode = #tpu.pipeline_mode<synchronous>, transform_indices = @transform_4, window_bounds = array<i64: 1, 128>}, {pipeline_mode = #tpu.pipeline_mode<synchronous>, transform_indices = @transform_5, window_bounds = array<i64: 1152, 128>}, {pipeline_mode = #tpu.pipeline_mode<synchronous>, transform_indices = @transform_6, window_bounds = array<i64: 1, 128>}, {pipeline_mode = #tpu.pipeline_mode<synchronous>, transform_indices = @transform_7, window_bounds = array<i64: 128, 512>}, {pipeline_mode = #tpu.pipeline_mode<synchronous>, transform_indices = @transform_8, window_bounds = array<i64: 1, 512>}, {pipeline_mode = #tpu.pipeline_mode<synchronous>, transform_indices = @transform_9, window_bounds = array<i64: 512, 256>}, {pipeline_mode = #tpu.pipeline_mode<synchronous>, transform_indices = @transform_10, window_bounds = array<i64: 1, 256>}, {pipeline_mode = #tpu.pipeline_mode<synchronous>, transform_indices = @transform_11, window_bounds = array<i64: 256, 512>}, {pipeline_mode = #tpu.pipeline_mode<synchronous>, transform_indices = @transform_12, window_bounds = array<i64: 1, 512>}, {pipeline_mode = #tpu.pipeline_mode<synchronous>, transform_indices = @transform_13, window_bounds = array<i64: 512, 128>}, {pipeline_mode = #tpu.pipeline_mode<synchronous>, transform_indices = @transform_14, window_bounds = array<i64: 1, 128>}, {transform_indices = @transform_15, window_bounds = array<i64: 1, 8, 128>}]} {
    %c0 = arith.constant 0 : index
    %c0_0 = arith.constant 0 : index
    %c0_1 = arith.constant 0 : index
    %0 = vector.load %arg1[%c0, %c0_0, %c0_1] : memref<1x64x256xbf16, #tpu.memory_space<vmem>>, vector<1x64x256xbf16>
    %1 = vector.shape_cast %0 : vector<1x64x256xbf16> to vector<64x256xbf16>
    %c0_2 = arith.constant 0 : index
    %c0_3 = arith.constant 0 : index
    %2 = vector.load %arg2[%c0_2, %c0_3] : memref<256x128xbf16, #tpu.memory_space<vmem>>, vector<256x128xbf16>
    %cst = arith.constant dense<0.000000e+00> : vector<64x128xf32>
    %3 = tpu.matmul %1, %2, %cst {dimension_numbers = #tpu.dot_dimension_numbers<[1], [0], [0], [1], [0, 0, 1, 1], [], []>} : vector<64x256xbf16>, vector<256x128xbf16>, vector<64x128xf32> -> vector<64x128xf32>
    %c0_4 = arith.constant 0 : index
    %c0_5 = arith.constant 0 : index
    %4 = vector.load %arg3[%c0_4, %c0_5] : memref<1x128xf32, #tpu.memory_space<vmem>>, vector<1x128xf32>
    %5 = vector.broadcast %4 : vector<1x128xf32> to vector<64x128xf32>
    %6 = arith.addf %3, %5 : vector<64x128xf32>
    %cst_6 = arith.constant 0.000000e+00 : f32
    %7 = vector.broadcast %cst_6 : f32 to vector<64x128xf32>
    %8 = arith.maximumf %6, %7 : vector<64x128xf32>
    %c0_7 = arith.constant 0 : index
    %c0_8 = arith.constant 0 : index
    %9 = vector.load %arg17[%c0_7, %c0_8] : memref<64x128xf32, #tpu.memory_space<vmem>>, vector<64x128xf32>
    tpu.vector_store %arg17[%c0_7, %c0_8], %8 {strides = array<i32>} : memref<64x128xf32, #tpu.memory_space<vmem>>, vector<64x128xf32>,
    %c0_9 = arith.constant 0 : index
    %c0_10 = arith.constant 0 : index
    %10 = vector.load %arg5[%c0_9, %c0_10] : memref<1x128xf32, #tpu.memory_space<vmem>>, vector<1x128xf32>
    %11 = vector.shape_cast %10 : vector<1x128xf32> to vector<1x128xf32>
    %12 = vector.broadcast %11 : vector<1x128xf32> to vector<3x128xf32>
    %c0_11 = arith.constant 0 : index
    %c0_12 = arith.constant 0 : index
    %13 = vector.load %arg17[%c0_11, %c0_12] : memref<64x128xf32, #tpu.memory_space<vmem>>, vector<8x128xf32>
    %14 = vector.extract_strided_slice %13 {offsets = [0, 0], sizes = [1, 128], strides = [1, 1]} : vector<8x128xf32> to vector<1x128xf32>
    %15 = vector.extract_strided_slice %13 {offsets = [2, 0], sizes = [1, 128], strides = [1, 1]} : vector<8x128xf32> to vector<1x128xf32>
    %16 = vector.extract_strided_slice %13 {offsets = [4, 0], sizes = [1, 128], strides = [1, 1]} : vector<8x128xf32> to vector<1x128xf32>
    %17 = tpu.concatenate %14, %15, %16 in 0 : vector<1x128xf32>, vector<1x128xf32>, vector<1x128xf32> -> vector<3x128xf32>
    %c0_13 = arith.constant 0 : index
    %c0_14 = arith.constant 0 : index
    %18 = vector.load %arg4[%c0_13, %c0_14] : memref<2048x128xbf16, #tpu.memory_space<vmem>>, vector<128x128xbf16>
    %19 = arith.truncf %17 : vector<3x128xf32> to vector<3x128xbf16>
    %cst_15 = arith.constant dense<0.000000e+00> : vector<3x128xf32>
    %20 = tpu.matmul %19, %18, %cst_15 {dimension_numbers = #tpu.dot_dimension_numbers<[1], [0], [0], [1], [0, 0, 1, 1], [], []>} : vector<3x128xbf16>, vector<128x128xbf16>, vector<3x128xf32> -> vector<3x128xf32>
    %21 = arith.addf %12, %20 : vector<3x128xf32>
    %22 = vector.extract_strided_slice %13 {offsets = [1, 0], sizes = [1, 128], strides = [1, 1]} : vector<8x128xf32> to vector<1x128xf32>
    %23 = vector.extract_strided_slice %13 {offsets = [3, 0], sizes = [1, 128], strides = [1, 1]} : vector<8x128xf32> to vector<1x128xf32>
    %24 = vector.extract_strided_slice %13 {offsets = [5, 0], sizes = [1, 128], strides = [1, 1]} : vector<8x128xf32> to vector<1x128xf32>
    %25 = tpu.concatenate %22, %23, %24 in 0 : vector<1x128xf32>, vector<1x128xf32>, vector<1x128xf32> -> vector<3x128xf32>
    %c128 = arith.constant 128 : index
    %c0_16 = arith.constant 0 : index
    %26 = vector.load %arg4[%c128, %c0_16] : memref<2048x128xbf16, #tpu.memory_space<vmem>>, vector<128x128xbf16>
    %27 = arith.truncf %25 : vector<3x128xf32> to vector<3x128xbf16>
    %cst_17 = arith.constant dense<0.000000e+00> : vector<3x128xf32>
    %28 = tpu.matmul %27, %26, %cst_17 {dimension_numbers = #tpu.dot_dimension_numbers<[1], [0], [0], [1], [0, 0, 1, 1], [], []>} : vector<3x128xbf16>, vector<128x128xbf16>, vector<3x128xf32> -> vector<3x128xf32>
    %29 = arith.addf %21, %28 : vector<3x128xf32>
    %30 = vector.extract_strided_slice %13 {offsets = [2, 0], sizes = [1, 128], strides = [1, 1]} : vector<8x128xf32> to vector<1x128xf32>
    %31 = vector.extract_strided_slice %13 {offsets = [4, 0], sizes = [1, 128], strides = [1, 1]} : vector<8x128xf32> to vector<1x128xf32>
    %32 = vector.extract_strided_slice %13 {offsets = [6, 0], sizes = [1, 128], strides = [1, 1]} : vector<8x128xf32> to vector<1x128xf32>
    %33 = tpu.concatenate %30, %31, %32 in 0 : vector<1x128xf32>, vector<1x128xf32>, vector<1x128xf32> -> vector<3x128xf32>
    %c256 = arith.constant 256 : index
    %c0_18 = arith.constant 0 : index
    %34 = vector.load %arg4[%c256, %c0_18] : memref<2048x128xbf16, #tpu.memory_space<vmem>>, vector<128x128xbf16>
    %35 = arith.truncf %33 : vector<3x128xf32> to vector<3x128xbf16>
    %cst_19 = arith.constant dense<0.000000e+00> : vector<3x128xf32>
    %36 = tpu.matmul %35, %34, %cst_19 {dimension_numbers = #tpu.dot_dimension_numbers<[1], [0], [0], [1], [0, 0, 1, 1], [], []>} : vector<3x128xbf16>, vector<128x128xbf16>, vector<3x128xf32> -> vector<3x128xf32>
    %37 = arith.addf %29, %36 : vector<3x128xf32>
    %38 = vector.extract_strided_slice %13 {offsets = [3, 0], sizes = [1, 128], strides = [1, 1]} : vector<8x128xf32> to vector<1x128xf32>
    %39 = vector.extract_strided_slice %13 {offsets = [5, 0], sizes = [1, 128], strides = [1, 1]} : vector<8x128xf32> to vector<1x128xf32>
    %40 = vector.extract_strided_slice %13 {offsets = [7, 0], sizes = [1, 128], strides = [1, 1]} : vector<8x128xf32> to vector<1x128xf32>
    %41 = tpu.concatenate %38, %39, %40 in 0 : vector<1x128xf32>, vector<1x128xf32>, vector<1x128xf32> -> vector<3x128xf32>
    %c384 = arith.constant 384 : index
    %c0_20 = arith.constant 0 : index
    %42 = vector.load %arg4[%c384, %c0_20] : memref<2048x128xbf16, #tpu.memory_space<vmem>>, vector<128x128xbf16>
    %43 = arith.truncf %41 : vector<3x128xf32> to vector<3x128xbf16>
    %cst_21 = arith.constant dense<0.000000e+00> : vector<3x128xf32>
    %44 = tpu.matmul %43, %42, %cst_21 {dimension_numbers = #tpu.dot_dimension_numbers<[1], [0], [0], [1], [0, 0, 1, 1], [], []>} : vector<3x128xbf16>, vector<128x128xbf16>, vector<3x128xf32> -> vector<3x128xf32>
    %45 = arith.addf %37, %44 : vector<3x128xf32>
    %c8 = arith.constant 8 : index
    %c0_22 = arith.constant 0 : index
    %46 = vector.load %arg17[%c8, %c0_22] : memref<64x128xf32, #tpu.memory_space<vmem>>, vector<8x128xf32>
    %47 = vector.extract_strided_slice %46 {offsets = [0, 0], sizes = [1, 128], strides = [1, 1]} : vector<8x128xf32> to vector<1x128xf32>
    %48 = vector.extract_strided_slice %46 {offsets = [2, 0], sizes = [1, 128], strides = [1, 1]} : vector<8x128xf32> to vector<1x128xf32>
    %49 = vector.extract_strided_slice %46 {offsets = [4, 0], sizes = [1, 128], strides = [1, 1]} : vector<8x128xf32> to vector<1x128xf32>
    %50 = tpu.concatenate %47, %48, %49 in 0 : vector<1x128xf32>, vector<1x128xf32>, vector<1x128xf32> -> vector<3x128xf32>
    %c512 = arith.constant 512 : index
    %c0_23 = arith.constant 0 : index
    %51 = vector.load %arg4[%c512, %c0_23] : memref<2048x128xbf16, #tpu.memory_space<vmem>>, vector<128x128xbf16>
    %52 = arith.truncf %50 : vector<3x128xf32> to vector<3x128xbf16>
    %cst_24 = arith.constant dense<0.000000e+00> : vector<3x128xf32>
    %53 = tpu.matmul %52, %51, %cst_24 {dimension_numbers = #tpu.dot_dimension_numbers<[1], [0], [0], [1], [0, 0, 1, 1], [], []>} : vector<3x128xbf16>, vector<128x128xbf16>, vector<3x128xf32> -> vector<3x128xf32>
    %54 = arith.addf %45, %53 : vector<3x128xf32>
    %55 = vector.extract_strided_slice %46 {offsets = [1, 0], sizes = [1, 128], strides = [1, 1]} : vector<8x128xf32> to vector<1x128xf32>
    %56 = vector.extract_strided_slice %46 {offsets = [3, 0], sizes = [1, 128], strides = [1, 1]} : vector<8x128xf32> to vector<1x128xf32>
    %57 = vector.extract_strided_slice %46 {offsets = [5, 0], sizes = [1, 128], strides = [1, 1]} : vector<8x128xf32> to vector<1x128xf32>
    %58 = tpu.concatenate %55, %56, %57 in 0 : vector<1x128xf32>, vector<1x128xf32>, vector<1x128xf32> -> vector<3x128xf32>
    %c640 = arith.constant 640 : index
    %c0_25 = arith.constant 0 : index
    %59 = vector.load %arg4[%c640, %c0_25] : memref<2048x128xbf16, #tpu.memory_space<vmem>>, vector<128x128xbf16>
    %60 = arith.truncf %58 : vector<3x128xf32> to vector<3x128xbf16>
    %cst_26 = arith.constant dense<0.000000e+00> : vector<3x128xf32>
    %61 = tpu.matmul %60, %59, %cst_26 {dimension_numbers = #tpu.dot_dimension_numbers<[1], [0], [0], [1], [0, 0, 1, 1], [], []>} : vector<3x128xbf16>, vector<128x128xbf16>, vector<3x128xf32> -> vector<3x128xf32>
    %62 = arith.addf %54, %61 : vector<3x128xf32>
    %63 = vector.extract_strided_slice %46 {offsets = [2, 0], sizes = [1, 128], strides = [1, 1]} : vector<8x128xf32> to vector<1x128xf32>
    %64 = vector.extract_strided_slice %46 {offsets = [4, 0], sizes = [1, 128], strides = [1, 1]} : vector<8x128xf32> to vector<1x128xf32>
    %65 = vector.extract_strided_slice %46 {offsets = [6, 0], sizes = [1, 128], strides = [1, 1]} : vector<8x128xf32> to vector<1x128xf32>
    %66 = tpu.concatenate %63, %64, %65 in 0 : vector<1x128xf32>, vector<1x128xf32>, vector<1x128xf32> -> vector<3x128xf32>
    %c768 = arith.constant 768 : index
    %c0_27 = arith.constant 0 : index
    %67 = vector.load %arg4[%c768, %c0_27] : memref<2048x128xbf16, #tpu.memory_space<vmem>>, vector<128x128xbf16>
    %68 = arith.truncf %66 : vector<3x128xf32> to vector<3x128xbf16>
    %cst_28 = arith.constant dense<0.000000e+00> : vector<3x128xf32>
    %69 = tpu.matmul %68, %67, %cst_28 {dimension_numbers = #tpu.dot_dimension_numbers<[1], [0], [0], [1], [0, 0, 1, 1], [], []>} : vector<3x128xbf16>, vector<128x128xbf16>, vector<3x128xf32> -> vector<3x128xf32>
    %70 = arith.addf %62, %69 : vector<3x128xf32>
    %71 = vector.extract_strided_slice %46 {offsets = [3, 0], sizes = [1, 128], strides = [1, 1]} : vector<8x128xf32> to vector<1x128xf32>
    %72 = vector.extract_strided_slice %46 {offsets = [5, 0], sizes = [1, 128], strides = [1, 1]} : vector<8x128xf32> to vector<1x128xf32>
    %73 = vector.extract_strided_slice %46 {offsets = [7, 0], sizes = [1, 128], strides = [1, 1]} : vector<8x128xf32> to vector<1x128xf32>
    %74 = tpu.concatenate %71, %72, %73 in 0 : vector<1x128xf32>, vector<1x128xf32>, vector<1x128xf32> -> vector<3x128xf32>
    %c896 = arith.constant 896 : index
    %c0_29 = arith.constant 0 : index
    %75 = vector.load %arg4[%c896, %c0_29] : memref<2048x128xbf16, #tpu.memory_space<vmem>>, vector<128x128xbf16>
    %76 = arith.truncf %74 : vector<3x128xf32> to vector<3x128xbf16>
    %cst_30 = arith.constant dense<0.000000e+00> : vector<3x128xf32>
    %77 = tpu.matmul %76, %75, %cst_30 {dimension_numbers = #tpu.dot_dimension_numbers<[1], [0], [0], [1], [0, 0, 1, 1], [], []>} : vector<3x128xbf16>, vector<128x128xbf16>, vector<3x128xf32> -> vector<3x128xf32>
    %78 = arith.addf %70, %77 : vector<3x128xf32>
    %c16 = arith.constant 16 : index
    %c0_31 = arith.constant 0 : index
    %79 = vector.load %arg17[%c16, %c0_31] : memref<64x128xf32, #tpu.memory_space<vmem>>, vector<8x128xf32>
    %80 = vector.extract_strided_slice %79 {offsets = [0, 0], sizes = [1, 128], strides = [1, 1]} : vector<8x128xf32> to vector<1x128xf32>
    %81 = vector.extract_strided_slice %79 {offsets = [2, 0], sizes = [1, 128], strides = [1, 1]} : vector<8x128xf32> to vector<1x128xf32>
    %82 = vector.extract_strided_slice %79 {offsets = [4, 0], sizes = [1, 128], strides = [1, 1]} : vector<8x128xf32> to vector<1x128xf32>
    %83 = tpu.concatenate %80, %81, %82 in 0 : vector<1x128xf32>, vector<1x128xf32>, vector<1x128xf32> -> vector<3x128xf32>
    %c1024 = arith.constant 1024 : index
    %c0_32 = arith.constant 0 : index
    %84 = vector.load %arg4[%c1024, %c0_32] : memref<2048x128xbf16, #tpu.memory_space<vmem>>, vector<128x128xbf16>
    %85 = arith.truncf %83 : vector<3x128xf32> to vector<3x128xbf16>
    %cst_33 = arith.constant dense<0.000000e+00> : vector<3x128xf32>
    %86 = tpu.matmul %85, %84, %cst_33 {dimension_numbers = #tpu.dot_dimension_numbers<[1], [0], [0], [1], [0, 0, 1, 1], [], []>} : vector<3x128xbf16>, vector<128x128xbf16>, vector<3x128xf32> -> vector<3x128xf32>
    %87 = arith.addf %78, %86 : vector<3x128xf32>
    %88 = vector.extract_strided_slice %79 {offsets = [1, 0], sizes = [1, 128], strides = [1, 1]} : vector<8x128xf32> to vector<1x128xf32>
    %89 = vector.extract_strided_slice %79 {offsets = [3, 0], sizes = [1, 128], strides = [1, 1]} : vector<8x128xf32> to vector<1x128xf32>
    %90 = vector.extract_strided_slice %79 {offsets = [5, 0], sizes = [1, 128], strides = [1, 1]} : vector<8x128xf32> to vector<1x128xf32>
    %91 = tpu.concatenate %88, %89, %90 in 0 : vector<1x128xf32>, vector<1x128xf32>, vector<1x128xf32> -> vector<3x128xf32>
    %c1152 = arith.constant 1152 : index
    %c0_34 = arith.constant 0 : index
    %92 = vector.load %arg4[%c1152, %c0_34] : memref<2048x128xbf16, #tpu.memory_space<vmem>>, vector<128x128xbf16>
    %93 = arith.truncf %91 : vector<3x128xf32> to vector<3x128xbf16>
    %cst_35 = arith.constant dense<0.000000e+00> : vector<3x128xf32>
    %94 = tpu.matmul %93, %92, %cst_35 {dimension_numbers = #tpu.dot_dimension_numbers<[1], [0], [0], [1], [0, 0, 1, 1], [], []>} : vector<3x128xbf16>, vector<128x128xbf16>, vector<3x128xf32> -> vector<3x128xf32>
    %95 = arith.addf %87, %94 : vector<3x128xf32>
    %96 = vector.extract_strided_slice %79 {offsets = [2, 0], sizes = [1, 128], strides = [1, 1]} : vector<8x128xf32> to vector<1x128xf32>
    %97 = vector.extract_strided_slice %79 {offsets = [4, 0], sizes = [1, 128], strides = [1, 1]} : vector<8x128xf32> to vector<1x128xf32>
    %98 = vector.extract_strided_slice %79 {offsets = [6, 0], sizes = [1, 128], strides = [1, 1]} : vector<8x128xf32> to vector<1x128xf32>
    %99 = tpu.concatenate %96, %97, %98 in 0 : vector<1x128xf32>, vector<1x128xf32>, vector<1x128xf32> -> vector<3x128xf32>
    %c1280 = arith.constant 1280 : index
    %c0_36 = arith.constant 0 : index
    %100 = vector.load %arg4[%c1280, %c0_36] : memref<2048x128xbf16, #tpu.memory_space<vmem>>, vector<128x128xbf16>
    %101 = arith.truncf %99 : vector<3x128xf32> to vector<3x128xbf16>
    %cst_37 = arith.constant dense<0.000000e+00> : vector<3x128xf32>
    %102 = tpu.matmul %101, %100, %cst_37 {dimension_numbers = #tpu.dot_dimension_numbers<[1], [0], [0], [1], [0, 0, 1, 1], [], []>} : vector<3x128xbf16>, vector<128x128xbf16>, vector<3x128xf32> -> vector<3x128xf32>
    %103 = arith.addf %95, %102 : vector<3x128xf32>
    %104 = vector.extract_strided_slice %79 {offsets = [3, 0], sizes = [1, 128], strides = [1, 1]} : vector<8x128xf32> to vector<1x128xf32>
    %105 = vector.extract_strided_slice %79 {offsets = [5, 0], sizes = [1, 128], strides = [1, 1]} : vector<8x128xf32> to vector<1x128xf32>
    %106 = vector.extract_strided_slice %79 {offsets = [7, 0], sizes = [1, 128], strides = [1, 1]} : vector<8x128xf32> to vector<1x128xf32>
    %107 = tpu.concatenate %104, %105, %106 in 0 : vector<1x128xf32>, vector<1x128xf32>, vector<1x128xf32> -> vector<3x128xf32>
    %c1408 = arith.constant 1408 : index
    %c0_38 = arith.constant 0 : index
    %108 = vector.load %arg4[%c1408, %c0_38] : memref<2048x128xbf16, #tpu.memory_space<vmem>>, vector<128x128xbf16>
    %109 = arith.truncf %107 : vector<3x128xf32> to vector<3x128xbf16>
    %cst_39 = arith.constant dense<0.000000e+00> : vector<3x128xf32>
    %110 = tpu.matmul %109, %108, %cst_39 {dimension_numbers = #tpu.dot_dimension_numbers<[1], [0], [0], [1], [0, 0, 1, 1], [], []>} : vector<3x128xbf16>, vector<128x128xbf16>, vector<3x128xf32> -> vector<3x128xf32>
    %111 = arith.addf %103, %110 : vector<3x128xf32>
    %c24 = arith.constant 24 : index
    %c0_40 = arith.constant 0 : index
    %112 = vector.load %arg17[%c24, %c0_40] : memref<64x128xf32, #tpu.memory_space<vmem>>, vector<8x128xf32>
    %113 = vector.extract_strided_slice %112 {offsets = [0, 0], sizes = [1, 128], strides = [1, 1]} : vector<8x128xf32> to vector<1x128xf32>
    %114 = vector.extract_strided_slice %112 {offsets = [2, 0], sizes = [1, 128], strides = [1, 1]} : vector<8x128xf32> to vector<1x128xf32>
    %115 = vector.extract_strided_slice %112 {offsets = [4, 0], sizes = [1, 128], strides = [1, 1]} : vector<8x128xf32> to vector<1x128xf32>
    %116 = tpu.concatenate %113, %114, %115 in 0 : vector<1x128xf32>, vector<1x128xf32>, vector<1x128xf32> -> vector<3x128xf32>
    %c1536 = arith.constant 1536 : index
    %c0_41 = arith.constant 0 : index
    %117 = vector.load %arg4[%c1536, %c0_41] : memref<2048x128xbf16, #tpu.memory_space<vmem>>, vector<128x128xbf16>
    %118 = arith.truncf %116 : vector<3x128xf32> to vector<3x128xbf16>
    %cst_42 = arith.constant dense<0.000000e+00> : vector<3x128xf32>
    %119 = tpu.matmul %118, %117, %cst_42 {dimension_numbers = #tpu.dot_dimension_numbers<[1], [0], [0], [1], [0, 0, 1, 1], [], []>} : vector<3x128xbf16>, vector<128x128xbf16>, vector<3x128xf32> -> vector<3x128xf32>
    %120 = arith.addf %111, %119 : vector<3x128xf32>
    %121 = vector.extract_strided_slice %112 {offsets = [1, 0], sizes = [1, 128], strides = [1, 1]} : vector<8x128xf32> to vector<1x128xf32>
    %122 = vector.extract_strided_slice %112 {offsets = [3, 0], sizes = [1, 128], strides = [1, 1]} : vector<8x128xf32> to vector<1x128xf32>
    %123 = vector.extract_strided_slice %112 {offsets = [5, 0], sizes = [1, 128], strides = [1, 1]} : vector<8x128xf32> to vector<1x128xf32>
    %124 = tpu.concatenate %121, %122, %123 in 0 : vector<1x128xf32>, vector<1x128xf32>, vector<1x128xf32> -> vector<3x128xf32>
    %c1664 = arith.constant 1664 : index
    %c0_43 = arith.constant 0 : index
    %125 = vector.load %arg4[%c1664, %c0_43] : memref<2048x128xbf16, #tpu.memory_space<vmem>>, vector<128x128xbf16>
    %126 = arith.truncf %124 : vector<3x128xf32> to vector<3x128xbf16>
    %cst_44 = arith.constant dense<0.000000e+00> : vector<3x128xf32>
    %127 = tpu.matmul %126, %125, %cst_44 {dimension_numbers = #tpu.dot_dimension_numbers<[1], [0], [0], [1], [0, 0, 1, 1], [], []>} : vector<3x128xbf16>, vector<128x128xbf16>, vector<3x128xf32> -> vector<3x128xf32>
    %128 = arith.addf %120, %127 : vector<3x128xf32>
    %129 = vector.extract_strided_slice %112 {offsets = [2, 0], sizes = [1, 128], strides = [1, 1]} : vector<8x128xf32> to vector<1x128xf32>
    %130 = vector.extract_strided_slice %112 {offsets = [4, 0], sizes = [1, 128], strides = [1, 1]} : vector<8x128xf32> to vector<1x128xf32>
    %131 = vector.extract_strided_slice %112 {offsets = [6, 0], sizes = [1, 128], strides = [1, 1]} : vector<8x128xf32> to vector<1x128xf32>
    %132 = tpu.concatenate %129, %130, %131 in 0 : vector<1x128xf32>, vector<1x128xf32>, vector<1x128xf32> -> vector<3x128xf32>
    %c1792 = arith.constant 1792 : index
    %c0_45 = arith.constant 0 : index
    %133 = vector.load %arg4[%c1792, %c0_45] : memref<2048x128xbf16, #tpu.memory_space<vmem>>, vector<128x128xbf16>
    %134 = arith.truncf %132 : vector<3x128xf32> to vector<3x128xbf16>
    %cst_46 = arith.constant dense<0.000000e+00> : vector<3x128xf32>
    %135 = tpu.matmul %134, %133, %cst_46 {dimension_numbers = #tpu.dot_dimension_numbers<[1], [0], [0], [1], [0, 0, 1, 1], [], []>} : vector<3x128xbf16>, vector<128x128xbf16>, vector<3x128xf32> -> vector<3x128xf32>
    %136 = arith.addf %128, %135 : vector<3x128xf32>
    %137 = vector.extract_strided_slice %112 {offsets = [3, 0], sizes = [1, 128], strides = [1, 1]} : vector<8x128xf32> to vector<1x128xf32>
    %138 = vector.extract_strided_slice %112 {offsets = [5, 0], sizes = [1, 128], strides = [1, 1]} : vector<8x128xf32> to vector<1x128xf32>
    %139 = vector.extract_strided_slice %112 {offsets = [7, 0], sizes = [1, 128], strides = [1, 1]} : vector<8x128xf32> to vector<1x128xf32>
    %140 = tpu.concatenate %137, %138, %139 in 0 : vector<1x128xf32>, vector<1x128xf32>, vector<1x128xf32> -> vector<3x128xf32>
    %c1920 = arith.constant 1920 : index
    %c0_47 = arith.constant 0 : index
    %141 = vector.load %arg4[%c1920, %c0_47] : memref<2048x128xbf16, #tpu.memory_space<vmem>>, vector<128x128xbf16>
    %142 = arith.truncf %140 : vector<3x128xf32> to vector<3x128xbf16>
    %cst_48 = arith.constant dense<0.000000e+00> : vector<3x128xf32>
    %143 = tpu.matmul %142, %141, %cst_48 {dimension_numbers = #tpu.dot_dimension_numbers<[1], [0], [0], [1], [0, 0, 1, 1], [], []>} : vector<3x128xbf16>, vector<128x128xbf16>, vector<3x128xf32> -> vector<3x128xf32>
    %144 = arith.addf %136, %143 : vector<3x128xf32>
    %cst_49 = arith.constant 0.000000e+00 : f32
    %145 = vector.broadcast %cst_49 : f32 to vector<3x128xf32>
    %146 = arith.maximumf %144, %145 : vector<3x128xf32>
    %c0_50 = arith.constant 0 : index
    %c0_51 = arith.constant 0 : index
    %147 = vector.load %arg18[%c0_50, %c0_51] : memref<16x128xf32, #tpu.memory_space<vmem>>, vector<3x128xf32>
    tpu.vector_store %arg18[%c0_50, %c0_51], %146 {strides = array<i32>} : memref<16x128xf32, #tpu.memory_space<vmem>>, vector<3x128xf32>,
    %c16_52 = arith.constant 16 : index
    %c0_53 = arith.constant 0 : index
    %148 = vector.load %arg17[%c16_52, %c0_53] : memref<64x128xf32, #tpu.memory_space<vmem>>, vector<8x128xf32>
    %149 = vector.extract_strided_slice %148 {offsets = [0, 0], sizes = [1, 128], strides = [1, 1]} : vector<8x128xf32> to vector<1x128xf32>
    %150 = vector.extract_strided_slice %148 {offsets = [2, 0], sizes = [1, 128], strides = [1, 1]} : vector<8x128xf32> to vector<1x128xf32>
    %151 = vector.extract_strided_slice %148 {offsets = [4, 0], sizes = [1, 128], strides = [1, 1]} : vector<8x128xf32> to vector<1x128xf32>
    %152 = tpu.concatenate %149, %150, %151 in 0 : vector<1x128xf32>, vector<1x128xf32>, vector<1x128xf32> -> vector<3x128xf32>
    %c0_54 = arith.constant 0 : index
    %c0_55 = arith.constant 0 : index
    %153 = vector.load %arg4[%c0_54, %c0_55] : memref<2048x128xbf16, #tpu.memory_space<vmem>>, vector<128x128xbf16>
    %154 = arith.truncf %152 : vector<3x128xf32> to vector<3x128xbf16>
    %cst_56 = arith.constant dense<0.000000e+00> : vector<3x128xf32>
    %155 = tpu.matmul %154, %153, %cst_56 {dimension_numbers = #tpu.dot_dimension_numbers<[1], [0], [0], [1], [0, 0, 1, 1], [], []>} : vector<3x128xbf16>, vector<128x128xbf16>, vector<3x128xf32> -> vector<3x128xf32>
    %156 = arith.addf %12, %155 : vector<3x128xf32>
    %157 = vector.extract_strided_slice %148 {offsets = [1, 0], sizes = [1, 128], strides = [1, 1]} : vector<8x128xf32> to vector<1x128xf32>
    %158 = vector.extract_strided_slice %148 {offsets = [3, 0], sizes = [1, 128], strides = [1, 1]} : vector<8x128xf32> to vector<1x128xf32>
    %159 = vector.extract_strided_slice %148 {offsets = [5, 0], sizes = [1, 128], strides = [1, 1]} : vector<8x128xf32> to vector<1x128xf32>
    %160 = tpu.concatenate %157, %158, %159 in 0 : vector<1x128xf32>, vector<1x128xf32>, vector<1x128xf32> -> vector<3x128xf32>
    %c128_57 = arith.constant 128 : index
    %c0_58 = arith.constant 0 : index
    %161 = vector.load %arg4[%c128_57, %c0_58] : memref<2048x128xbf16, #tpu.memory_space<vmem>>, vector<128x128xbf16>
    %162 = arith.truncf %160 : vector<3x128xf32> to vector<3x128xbf16>
    %cst_59 = arith.constant dense<0.000000e+00> : vector<3x128xf32>
    %163 = tpu.matmul %162, %161, %cst_59 {dimension_numbers = #tpu.dot_dimension_numbers<[1], [0], [0], [1], [0, 0, 1, 1], [], []>} : vector<3x128xbf16>, vector<128x128xbf16>, vector<3x128xf32> -> vector<3x128xf32>
    %164 = arith.addf %156, %163 : vector<3x128xf32>
    %165 = vector.extract_strided_slice %148 {offsets = [2, 0], sizes = [1, 128], strides = [1, 1]} : vector<8x128xf32> to vector<1x128xf32>
    %166 = vector.extract_strided_slice %148 {offsets = [4, 0], sizes = [1, 128], strides = [1, 1]} : vector<8x128xf32> to vector<1x128xf32>
    %167 = vector.extract_strided_slice %148 {offsets = [6, 0], sizes = [1, 128], strides = [1, 1]} : vector<8x128xf32> to vector<1x128xf32>
    %168 = tpu.concatenate %165, %166, %167 in 0 : vector<1x128xf32>, vector<1x128xf32>, vector<1x128xf32> -> vector<3x128xf32>
    %c256_60 = arith.constant 256 : index
    %c0_61 = arith.constant 0 : index
    %169 = vector.load %arg4[%c256_60, %c0_61] : memref<2048x128xbf16, #tpu.memory_space<vmem>>, vector<128x128xbf16>
    %170 = arith.truncf %168 : vector<3x128xf32> to vector<3x128xbf16>
    %cst_62 = arith.constant dense<0.000000e+00> : vector<3x128xf32>
    %171 = tpu.matmul %170, %169, %cst_62 {dimension_numbers = #tpu.dot_dimension_numbers<[1], [0], [0], [1], [0, 0, 1, 1], [], []>} : vector<3x128xbf16>, vector<128x128xbf16>, vector<3x128xf32> -> vector<3x128xf32>
    %172 = arith.addf %164, %171 : vector<3x128xf32>
    %173 = vector.extract_strided_slice %148 {offsets = [3, 0], sizes = [1, 128], strides = [1, 1]} : vector<8x128xf32> to vector<1x128xf32>
    %174 = vector.extract_strided_slice %148 {offsets = [5, 0], sizes = [1, 128], strides = [1, 1]} : vector<8x128xf32> to vector<1x128xf32>
    %175 = vector.extract_strided_slice %148 {offsets = [7, 0], sizes = [1, 128], strides = [1, 1]} : vector<8x128xf32> to vector<1x128xf32>
    %176 = tpu.concatenate %173, %174, %175 in 0 : vector<1x128xf32>, vector<1x128xf32>, vector<1x128xf32> -> vector<3x128xf32>
    %c384_63 = arith.constant 384 : index
    %c0_64 = arith.constant 0 : index
    %177 = vector.load %arg4[%c384_63, %c0_64] : memref<2048x128xbf16, #tpu.memory_space<vmem>>, vector<128x128xbf16>
    %178 = arith.truncf %176 : vector<3x128xf32> to vector<3x128xbf16>
    %cst_65 = arith.constant dense<0.000000e+00> : vector<3x128xf32>
    %179 = tpu.matmul %178, %177, %cst_65 {dimension_numbers = #tpu.dot_dimension_numbers<[1], [0], [0], [1], [0, 0, 1, 1], [], []>} : vector<3x128xbf16>, vector<128x128xbf16>, vector<3x128xf32> -> vector<3x128xf32>
    %180 = arith.addf %172, %179 : vector<3x128xf32>
    %c24_66 = arith.constant 24 : index
    %c0_67 = arith.constant 0 : index
    %181 = vector.load %arg17[%c24_66, %c0_67] : memref<64x128xf32, #tpu.memory_space<vmem>>, vector<8x128xf32>
    %182 = vector.extract_strided_slice %181 {offsets = [0, 0], sizes = [1, 128], strides = [1, 1]} : vector<8x128xf32> to vector<1x128xf32>
    %183 = vector.extract_strided_slice %181 {offsets = [2, 0], sizes = [1, 128], strides = [1, 1]} : vector<8x128xf32> to vector<1x128xf32>
    %184 = vector.extract_strided_slice %181 {offsets = [4, 0], sizes = [1, 128], strides = [1, 1]} : vector<8x128xf32> to vector<1x128xf32>
    %185 = tpu.concatenate %182, %183, %184 in 0 : vector<1x128xf32>, vector<1x128xf32>, vector<1x128xf32> -> vector<3x128xf32>
    %c512_68 = arith.constant 512 : index
    %c0_69 = arith.constant 0 : index
    %186 = vector.load %arg4[%c512_68, %c0_69] : memref<2048x128xbf16, #tpu.memory_space<vmem>>, vector<128x128xbf16>
    %187 = arith.truncf %185 : vector<3x128xf32> to vector<3x128xbf16>
    %cst_70 = arith.constant dense<0.000000e+00> : vector<3x128xf32>
    %188 = tpu.matmul %187, %186, %cst_70 {dimension_numbers = #tpu.dot_dimension_numbers<[1], [0], [0], [1], [0, 0, 1, 1], [], []>} : vector<3x128xbf16>, vector<128x128xbf16>, vector<3x128xf32> -> vector<3x128xf32>
    %189 = arith.addf %180, %188 : vector<3x128xf32>
    %190 = vector.extract_strided_slice %181 {offsets = [1, 0], sizes = [1, 128], strides = [1, 1]} : vector<8x128xf32> to vector<1x128xf32>
    %191 = vector.extract_strided_slice %181 {offsets = [3, 0], sizes = [1, 128], strides = [1, 1]} : vector<8x128xf32> to vector<1x128xf32>
    %192 = vector.extract_strided_slice %181 {offsets = [5, 0], sizes = [1, 128], strides = [1, 1]} : vector<8x128xf32> to vector<1x128xf32>
    %193 = tpu.concatenate %190, %191, %192 in 0 : vector<1x128xf32>, vector<1x128xf32>, vector<1x128xf32> -> vector<3x128xf32>
    %c640_71 = arith.constant 640 : index
    %c0_72 = arith.constant 0 : index
    %194 = vector.load %arg4[%c640_71, %c0_72] : memref<2048x128xbf16, #tpu.memory_space<vmem>>, vector<128x128xbf16>
    %195 = arith.truncf %193 : vector<3x128xf32> to vector<3x128xbf16>
    %cst_73 = arith.constant dense<0.000000e+00> : vector<3x128xf32>
    %196 = tpu.matmul %195, %194, %cst_73 {dimension_numbers = #tpu.dot_dimension_numbers<[1], [0], [0], [1], [0, 0, 1, 1], [], []>} : vector<3x128xbf16>, vector<128x128xbf16>, vector<3x128xf32> -> vector<3x128xf32>
    %197 = arith.addf %189, %196 : vector<3x128xf32>
    %198 = vector.extract_strided_slice %181 {offsets = [2, 0], sizes = [1, 128], strides = [1, 1]} : vector<8x128xf32> to vector<1x128xf32>
    %199 = vector.extract_strided_slice %181 {offsets = [4, 0], sizes = [1, 128], strides = [1, 1]} : vector<8x128xf32> to vector<1x128xf32>
    %200 = vector.extract_strided_slice %181 {offsets = [6, 0], sizes = [1, 128], strides = [1, 1]} : vector<8x128xf32> to vector<1x128xf32>
    %201 = tpu.concatenate %198, %199, %200 in 0 : vector<1x128xf32>, vector<1x128xf32>, vector<1x128xf32> -> vector<3x128xf32>
    %c768_74 = arith.constant 768 : index
    %c0_75 = arith.constant 0 : index
    %202 = vector.load %arg4[%c768_74, %c0_75] : memref<2048x128xbf16, #tpu.memory_space<vmem>>, vector<128x128xbf16>
    %203 = arith.truncf %201 : vector<3x128xf32> to vector<3x128xbf16>
    %cst_76 = arith.constant dense<0.000000e+00> : vector<3x128xf32>
    %204 = tpu.matmul %203, %202, %cst_76 {dimension_numbers = #tpu.dot_dimension_numbers<[1], [0], [0], [1], [0, 0, 1, 1], [], []>} : vector<3x128xbf16>, vector<128x128xbf16>, vector<3x128xf32> -> vector<3x128xf32>
    %205 = arith.addf %197, %204 : vector<3x128xf32>
    %206 = vector.extract_strided_slice %181 {offsets = [3, 0], sizes = [1, 128], strides = [1, 1]} : vector<8x128xf32> to vector<1x128xf32>
    %207 = vector.extract_strided_slice %181 {offsets = [5, 0], sizes = [1, 128], strides = [1, 1]} : vector<8x128xf32> to vector<1x128xf32>
    %208 = vector.extract_strided_slice %181 {offsets = [7, 0], sizes = [1, 128], strides = [1, 1]} : vector<8x128xf32> to vector<1x128xf32>
    %209 = tpu.concatenate %206, %207, %208 in 0 : vector<1x128xf32>, vector<1x128xf32>, vector<1x128xf32> -> vector<3x128xf32>
    %c896_77 = arith.constant 896 : index
    %c0_78 = arith.constant 0 : index
    %210 = vector.load %arg4[%c896_77, %c0_78] : memref<2048x128xbf16, #tpu.memory_space<vmem>>, vector<128x128xbf16>
    %211 = arith.truncf %209 : vector<3x128xf32> to vector<3x128xbf16>
    %cst_79 = arith.constant dense<0.000000e+00> : vector<3x128xf32>
    %212 = tpu.matmul %211, %210, %cst_79 {dimension_numbers = #tpu.dot_dimension_numbers<[1], [0], [0], [1], [0, 0, 1, 1], [], []>} : vector<3x128xbf16>, vector<128x128xbf16>, vector<3x128xf32> -> vector<3x128xf32>
    %213 = arith.addf %205, %212 : vector<3x128xf32>
    %c32 = arith.constant 32 : index
    %c0_80 = arith.constant 0 : index
    %214 = vector.load %arg17[%c32, %c0_80] : memref<64x128xf32, #tpu.memory_space<vmem>>, vector<8x128xf32>
    %215 = vector.extract_strided_slice %214 {offsets = [0, 0], sizes = [1, 128], strides = [1, 1]} : vector<8x128xf32> to vector<1x128xf32>
    %216 = vector.extract_strided_slice %214 {offsets = [2, 0], sizes = [1, 128], strides = [1, 1]} : vector<8x128xf32> to vector<1x128xf32>
    %217 = vector.extract_strided_slice %214 {offsets = [4, 0], sizes = [1, 128], strides = [1, 1]} : vector<8x128xf32> to vector<1x128xf32>
    %218 = tpu.concatenate %215, %216, %217 in 0 : vector<1x128xf32>, vector<1x128xf32>, vector<1x128xf32> -> vector<3x128xf32>
    %c1024_81 = arith.constant 1024 : index
    %c0_82 = arith.constant 0 : index
    %219 = vector.load %arg4[%c1024_81, %c0_82] : memref<2048x128xbf16, #tpu.memory_space<vmem>>, vector<128x128xbf16>
    %220 = arith.truncf %218 : vector<3x128xf32> to vector<3x128xbf16>
    %cst_83 = arith.constant dense<0.000000e+00> : vector<3x128xf32>
    %221 = tpu.matmul %220, %219, %cst_83 {dimension_numbers = #tpu.dot_dimension_numbers<[1], [0], [0], [1], [0, 0, 1, 1], [], []>} : vector<3x128xbf16>, vector<128x128xbf16>, vector<3x128xf32> -> vector<3x128xf32>
    %222 = arith.addf %213, %221 : vector<3x128xf32>
    %223 = vector.extract_strided_slice %214 {offsets = [1, 0], sizes = [1, 128], strides = [1, 1]} : vector<8x128xf32> to vector<1x128xf32>
    %224 = vector.extract_strided_slice %214 {offsets = [3, 0], sizes = [1, 128], strides = [1, 1]} : vector<8x128xf32> to vector<1x128xf32>
    %225 = vector.extract_strided_slice %214 {offsets = [5, 0], sizes = [1, 128], strides = [1, 1]} : vector<8x128xf32> to vector<1x128xf32>
    %226 = tpu.concatenate %223, %224, %225 in 0 : vector<1x128xf32>, vector<1x128xf32>, vector<1x128xf32> -> vector<3x128xf32>
    %c1152_84 = arith.constant 1152 : index
    %c0_85 = arith.constant 0 : index
    %227 = vector.load %arg4[%c1152_84, %c0_85] : memref<2048x128xbf16, #tpu.memory_space<vmem>>, vector<128x128xbf16>
    %228 = arith.truncf %226 : vector<3x128xf32> to vector<3x128xbf16>
    %cst_86 = arith.constant dense<0.000000e+00> : vector<3x128xf32>
    %229 = tpu.matmul %228, %227, %cst_86 {dimension_numbers = #tpu.dot_dimension_numbers<[1], [0], [0], [1], [0, 0, 1, 1], [], []>} : vector<3x128xbf16>, vector<128x128xbf16>, vector<3x128xf32> -> vector<3x128xf32>
    %230 = arith.addf %222, %229 : vector<3x128xf32>
    %231 = vector.extract_strided_slice %214 {offsets = [2, 0], sizes = [1, 128], strides = [1, 1]} : vector<8x128xf32> to vector<1x128xf32>
    %232 = vector.extract_strided_slice %214 {offsets = [4, 0], sizes = [1, 128], strides = [1, 1]} : vector<8x128xf32> to vector<1x128xf32>
    %233 = vector.extract_strided_slice %214 {offsets = [6, 0], sizes = [1, 128], strides = [1, 1]} : vector<8x128xf32> to vector<1x128xf32>
    %234 = tpu.concatenate %231, %232, %233 in 0 : vector<1x128xf32>, vector<1x128xf32>, vector<1x128xf32> -> vector<3x128xf32>
    %c1280_87 = arith.constant 1280 : index
    %c0_88 = arith.constant 0 : index
    %235 = vector.load %arg4[%c1280_87, %c0_88] : memref<2048x128xbf16, #tpu.memory_space<vmem>>, vector<128x128xbf16>
    %236 = arith.truncf %234 : vector<3x128xf32> to vector<3x128xbf16>
    %cst_89 = arith.constant dense<0.000000e+00> : vector<3x128xf32>
    %237 = tpu.matmul %236, %235, %cst_89 {dimension_numbers = #tpu.dot_dimension_numbers<[1], [0], [0], [1], [0, 0, 1, 1], [], []>} : vector<3x128xbf16>, vector<128x128xbf16>, vector<3x128xf32> -> vector<3x128xf32>
    %238 = arith.addf %230, %237 : vector<3x128xf32>
    %239 = vector.extract_strided_slice %214 {offsets = [3, 0], sizes = [1, 128], strides = [1, 1]} : vector<8x128xf32> to vector<1x128xf32>
    %240 = vector.extract_strided_slice %214 {offsets = [5, 0], sizes = [1, 128], strides = [1, 1]} : vector<8x128xf32> to vector<1x128xf32>
    %241 = vector.extract_strided_slice %214 {offsets = [7, 0], sizes = [1, 128], strides = [1, 1]} : vector<8x128xf32> to vector<1x128xf32>
    %242 = tpu.concatenate %239, %240, %241 in 0 : vector<1x128xf32>, vector<1x128xf32>, vector<1x128xf32> -> vector<3x128xf32>
    %c1408_90 = arith.constant 1408 : index
    %c0_91 = arith.constant 0 : index
    %243 = vector.load %arg4[%c1408_90, %c0_91] : memref<2048x128xbf16, #tpu.memory_space<vmem>>, vector<128x128xbf16>
    %244 = arith.truncf %242 : vector<3x128xf32> to vector<3x128xbf16>
    %cst_92 = arith.constant dense<0.000000e+00> : vector<3x128xf32>
    %245 = tpu.matmul %244, %243, %cst_92 {dimension_numbers = #tpu.dot_dimension_numbers<[1], [0], [0], [1], [0, 0, 1, 1], [], []>} : vector<3x128xbf16>, vector<128x128xbf16>, vector<3x128xf32> -> vector<3x128xf32>
    %246 = arith.addf %238, %245 : vector<3x128xf32>
    %c40 = arith.constant 40 : index
    %c0_93 = arith.constant 0 : index
    %247 = vector.load %arg17[%c40, %c0_93] : memref<64x128xf32, #tpu.memory_space<vmem>>, vector<8x128xf32>
    %248 = vector.extract_strided_slice %247 {offsets = [0, 0], sizes = [1, 128], strides = [1, 1]} : vector<8x128xf32> to vector<1x128xf32>
    %249 = vector.extract_strided_slice %247 {offsets = [2, 0], sizes = [1, 128], strides = [1, 1]} : vector<8x128xf32> to vector<1x128xf32>
    %250 = vector.extract_strided_slice %247 {offsets = [4, 0], sizes = [1, 128], strides = [1, 1]} : vector<8x128xf32> to vector<1x128xf32>
    %251 = tpu.concatenate %248, %249, %250 in 0 : vector<1x128xf32>, vector<1x128xf32>, vector<1x128xf32> -> vector<3x128xf32>
    %c1536_94 = arith.constant 1536 : index
    %c0_95 = arith.constant 0 : index
    %252 = vector.load %arg4[%c1536_94, %c0_95] : memref<2048x128xbf16, #tpu.memory_space<vmem>>, vector<128x128xbf16>
    %253 = arith.truncf %251 : vector<3x128xf32> to vector<3x128xbf16>
    %cst_96 = arith.constant dense<0.000000e+00> : vector<3x128xf32>
    %254 = tpu.matmul %253, %252, %cst_96 {dimension_numbers = #tpu.dot_dimension_numbers<[1], [0], [0], [1], [0, 0, 1, 1], [], []>} : vector<3x128xbf16>, vector<128x128xbf16>, vector<3x128xf32> -> vector<3x128xf32>
    %255 = arith.addf %246, %254 : vector<3x128xf32>
    %256 = vector.extract_strided_slice %247 {offsets = [1, 0], sizes = [1, 128], strides = [1, 1]} : vector<8x128xf32> to vector<1x128xf32>
    %257 = vector.extract_strided_slice %247 {offsets = [3, 0], sizes = [1, 128], strides = [1, 1]} : vector<8x128xf32> to vector<1x128xf32>
    %258 = vector.extract_strided_slice %247 {offsets = [5, 0], sizes = [1, 128], strides = [1, 1]} : vector<8x128xf32> to vector<1x128xf32>
    %259 = tpu.concatenate %256, %257, %258 in 0 : vector<1x128xf32>, vector<1x128xf32>, vector<1x128xf32> -> vector<3x128xf32>
    %c1664_97 = arith.constant 1664 : index
    %c0_98 = arith.constant 0 : index
    %260 = vector.load %arg4[%c1664_97, %c0_98] : memref<2048x128xbf16, #tpu.memory_space<vmem>>, vector<128x128xbf16>
    %261 = arith.truncf %259 : vector<3x128xf32> to vector<3x128xbf16>
    %cst_99 = arith.constant dense<0.000000e+00> : vector<3x128xf32>
    %262 = tpu.matmul %261, %260, %cst_99 {dimension_numbers = #tpu.dot_dimension_numbers<[1], [0], [0], [1], [0, 0, 1, 1], [], []>} : vector<3x128xbf16>, vector<128x128xbf16>, vector<3x128xf32> -> vector<3x128xf32>
    %263 = arith.addf %255, %262 : vector<3x128xf32>
    %264 = vector.extract_strided_slice %247 {offsets = [2, 0], sizes = [1, 128], strides = [1, 1]} : vector<8x128xf32> to vector<1x128xf32>
    %265 = vector.extract_strided_slice %247 {offsets = [4, 0], sizes = [1, 128], strides = [1, 1]} : vector<8x128xf32> to vector<1x128xf32>
    %266 = vector.extract_strided_slice %247 {offsets = [6, 0], sizes = [1, 128], strides = [1, 1]} : vector<8x128xf32> to vector<1x128xf32>
    %267 = tpu.concatenate %264, %265, %266 in 0 : vector<1x128xf32>, vector<1x128xf32>, vector<1x128xf32> -> vector<3x128xf32>
    %c1792_100 = arith.constant 1792 : index
    %c0_101 = arith.constant 0 : index
    %268 = vector.load %arg4[%c1792_100, %c0_101] : memref<2048x128xbf16, #tpu.memory_space<vmem>>, vector<128x128xbf16>
    %269 = arith.truncf %267 : vector<3x128xf32> to vector<3x128xbf16>
    %cst_102 = arith.constant dense<0.000000e+00> : vector<3x128xf32>
    %270 = tpu.matmul %269, %268, %cst_102 {dimension_numbers = #tpu.dot_dimension_numbers<[1], [0], [0], [1], [0, 0, 1, 1], [], []>} : vector<3x128xbf16>, vector<128x128xbf16>, vector<3x128xf32> -> vector<3x128xf32>
    %271 = arith.addf %263, %270 : vector<3x128xf32>
    %272 = vector.extract_strided_slice %247 {offsets = [3, 0], sizes = [1, 128], strides = [1, 1]} : vector<8x128xf32> to vector<1x128xf32>
    %273 = vector.extract_strided_slice %247 {offsets = [5, 0], sizes = [1, 128], strides = [1, 1]} : vector<8x128xf32> to vector<1x128xf32>
    %274 = vector.extract_strided_slice %247 {offsets = [7, 0], sizes = [1, 128], strides = [1, 1]} : vector<8x128xf32> to vector<1x128xf32>
    %275 = tpu.concatenate %272, %273, %274 in 0 : vector<1x128xf32>, vector<1x128xf32>, vector<1x128xf32> -> vector<3x128xf32>
    %c1920_103 = arith.constant 1920 : index
    %c0_104 = arith.constant 0 : index
    %276 = vector.load %arg4[%c1920_103, %c0_104] : memref<2048x128xbf16, #tpu.memory_space<vmem>>, vector<128x128xbf16>
    %277 = arith.truncf %275 : vector<3x128xf32> to vector<3x128xbf16>
    %cst_105 = arith.constant dense<0.000000e+00> : vector<3x128xf32>
    %278 = tpu.matmul %277, %276, %cst_105 {dimension_numbers = #tpu.dot_dimension_numbers<[1], [0], [0], [1], [0, 0, 1, 1], [], []>} : vector<3x128xbf16>, vector<128x128xbf16>, vector<3x128xf32> -> vector<3x128xf32>
    %279 = arith.addf %271, %278 : vector<3x128xf32>
    %cst_106 = arith.constant 0.000000e+00 : f32
    %280 = vector.broadcast %cst_106 : f32 to vector<3x128xf32>
    %281 = arith.maximumf %279, %280 : vector<3x128xf32>
    %c3 = arith.constant 3 : index
    %c0_107 = arith.constant 0 : index
    %282 = vector.load %arg18[%c3, %c0_107] : memref<16x128xf32, #tpu.memory_space<vmem>>, vector<3x128xf32>
    tpu.vector_store %arg18[%c3, %c0_107], %281 {strides = array<i32>} : memref<16x128xf32, #tpu.memory_space<vmem>>, vector<3x128xf32>,
    %c32_108 = arith.constant 32 : index
    %c0_109 = arith.constant 0 : index
    %283 = vector.load %arg17[%c32_108, %c0_109] : memref<64x128xf32, #tpu.memory_space<vmem>>, vector<8x128xf32>
    %284 = vector.extract_strided_slice %283 {offsets = [0, 0], sizes = [1, 128], strides = [1, 1]} : vector<8x128xf32> to vector<1x128xf32>
    %285 = vector.extract_strided_slice %283 {offsets = [2, 0], sizes = [1, 128], strides = [1, 1]} : vector<8x128xf32> to vector<1x128xf32>
    %286 = vector.extract_strided_slice %283 {offsets = [4, 0], sizes = [1, 128], strides = [1, 1]} : vector<8x128xf32> to vector<1x128xf32>
    %287 = tpu.concatenate %284, %285, %286 in 0 : vector<1x128xf32>, vector<1x128xf32>, vector<1x128xf32> -> vector<3x128xf32>
    %c0_110 = arith.constant 0 : index
    %c0_111 = arith.constant 0 : index
    %288 = vector.load %arg4[%c0_110, %c0_111] : memref<2048x128xbf16, #tpu.memory_space<vmem>>, vector<128x128xbf16>
    %289 = arith.truncf %287 : vector<3x128xf32> to vector<3x128xbf16>
    %cst_112 = arith.constant dense<0.000000e+00> : vector<3x128xf32>
    %290 = tpu.matmul %289, %288, %cst_112 {dimension_numbers = #tpu.dot_dimension_numbers<[1], [0], [0], [1], [0, 0, 1, 1], [], []>} : vector<3x128xbf16>, vector<128x128xbf16>, vector<3x128xf32> -> vector<3x128xf32>
    %291 = arith.addf %12, %290 : vector<3x128xf32>
    %292 = vector.extract_strided_slice %283 {offsets = [1, 0], sizes = [1, 128], strides = [1, 1]} : vector<8x128xf32> to vector<1x128xf32>
    %293 = vector.extract_strided_slice %283 {offsets = [3, 0], sizes = [1, 128], strides = [1, 1]} : vector<8x128xf32> to vector<1x128xf32>
    %294 = vector.extract_strided_slice %283 {offsets = [5, 0], sizes = [1, 128], strides = [1, 1]} : vector<8x128xf32> to vector<1x128xf32>
    %295 = tpu.concatenate %292, %293, %294 in 0 : vector<1x128xf32>, vector<1x128xf32>, vector<1x128xf32> -> vector<3x128xf32>
    %c128_113 = arith.constant 128 : index
    %c0_114 = arith.constant 0 : index
    %296 = vector.load %arg4[%c128_113, %c0_114] : memref<2048x128xbf16, #tpu.memory_space<vmem>>, vector<128x128xbf16>
    %297 = arith.truncf %295 : vector<3x128xf32> to vector<3x128xbf16>
    %cst_115 = arith.constant dense<0.000000e+00> : vector<3x128xf32>
    %298 = tpu.matmul %297, %296, %cst_115 {dimension_numbers = #tpu.dot_dimension_numbers<[1], [0], [0], [1], [0, 0, 1, 1], [], []>} : vector<3x128xbf16>, vector<128x128xbf16>, vector<3x128xf32> -> vector<3x128xf32>
    %299 = arith.addf %291, %298 : vector<3x128xf32>
    %300 = vector.extract_strided_slice %283 {offsets = [2, 0], sizes = [1, 128], strides = [1, 1]} : vector<8x128xf32> to vector<1x128xf32>
    %301 = vector.extract_strided_slice %283 {offsets = [4, 0], sizes = [1, 128], strides = [1, 1]} : vector<8x128xf32> to vector<1x128xf32>
    %302 = vector.extract_strided_slice %283 {offsets = [6, 0], sizes = [1, 128], strides = [1, 1]} : vector<8x128xf32> to vector<1x128xf32>
    %303 = tpu.concatenate %300, %301, %302 in 0 : vector<1x128xf32>, vector<1x128xf32>, vector<1x128xf32> -> vector<3x128xf32>
    %c256_116 = arith.constant 256 : index
    %c0_117 = arith.constant 0 : index
    %304 = vector.load %arg4[%c256_116, %c0_117] : memref<2048x128xbf16, #tpu.memory_space<vmem>>, vector<128x128xbf16>
    %305 = arith.truncf %303 : vector<3x128xf32> to vector<3x128xbf16>
    %cst_118 = arith.constant dense<0.000000e+00> : vector<3x128xf32>
    %306 = tpu.matmul %305, %304, %cst_118 {dimension_numbers = #tpu.dot_dimension_numbers<[1], [0], [0], [1], [0, 0, 1, 1], [], []>} : vector<3x128xbf16>, vector<128x128xbf16>, vector<3x128xf32> -> vector<3x128xf32>
    %307 = arith.addf %299, %306 : vector<3x128xf32>
    %308 = vector.extract_strided_slice %283 {offsets = [3, 0], sizes = [1, 128], strides = [1, 1]} : vector<8x128xf32> to vector<1x128xf32>
    %309 = vector.extract_strided_slice %283 {offsets = [5, 0], sizes = [1, 128], strides = [1, 1]} : vector<8x128xf32> to vector<1x128xf32>
    %310 = vector.extract_strided_slice %283 {offsets = [7, 0], sizes = [1, 128], strides = [1, 1]} : vector<8x128xf32> to vector<1x128xf32>
    %311 = tpu.concatenate %308, %309, %310 in 0 : vector<1x128xf32>, vector<1x128xf32>, vector<1x128xf32> -> vector<3x128xf32>
    %c384_119 = arith.constant 384 : index
    %c0_120 = arith.constant 0 : index
    %312 = vector.load %arg4[%c384_119, %c0_120] : memref<2048x128xbf16, #tpu.memory_space<vmem>>, vector<128x128xbf16>
    %313 = arith.truncf %311 : vector<3x128xf32> to vector<3x128xbf16>
    %cst_121 = arith.constant dense<0.000000e+00> : vector<3x128xf32>
    %314 = tpu.matmul %313, %312, %cst_121 {dimension_numbers = #tpu.dot_dimension_numbers<[1], [0], [0], [1], [0, 0, 1, 1], [], []>} : vector<3x128xbf16>, vector<128x128xbf16>, vector<3x128xf32> -> vector<3x128xf32>
    %315 = arith.addf %307, %314 : vector<3x128xf32>
    %c40_122 = arith.constant 40 : index
    %c0_123 = arith.constant 0 : index
    %316 = vector.load %arg17[%c40_122, %c0_123] : memref<64x128xf32, #tpu.memory_space<vmem>>, vector<8x128xf32>
    %317 = vector.extract_strided_slice %316 {offsets = [0, 0], sizes = [1, 128], strides = [1, 1]} : vector<8x128xf32> to vector<1x128xf32>
    %318 = vector.extract_strided_slice %316 {offsets = [2, 0], sizes = [1, 128], strides = [1, 1]} : vector<8x128xf32> to vector<1x128xf32>
    %319 = vector.extract_strided_slice %316 {offsets = [4, 0], sizes = [1, 128], strides = [1, 1]} : vector<8x128xf32> to vector<1x128xf32>
    %320 = tpu.concatenate %317, %318, %319 in 0 : vector<1x128xf32>, vector<1x128xf32>, vector<1x128xf32> -> vector<3x128xf32>
    %c512_124 = arith.constant 512 : index
    %c0_125 = arith.constant 0 : index
    %321 = vector.load %arg4[%c512_124, %c0_125] : memref<2048x128xbf16, #tpu.memory_space<vmem>>, vector<128x128xbf16>
    %322 = arith.truncf %320 : vector<3x128xf32> to vector<3x128xbf16>
    %cst_126 = arith.constant dense<0.000000e+00> : vector<3x128xf32>
    %323 = tpu.matmul %322, %321, %cst_126 {dimension_numbers = #tpu.dot_dimension_numbers<[1], [0], [0], [1], [0, 0, 1, 1], [], []>} : vector<3x128xbf16>, vector<128x128xbf16>, vector<3x128xf32> -> vector<3x128xf32>
    %324 = arith.addf %315, %323 : vector<3x128xf32>
    %325 = vector.extract_strided_slice %316 {offsets = [1, 0], sizes = [1, 128], strides = [1, 1]} : vector<8x128xf32> to vector<1x128xf32>
    %326 = vector.extract_strided_slice %316 {offsets = [3, 0], sizes = [1, 128], strides = [1, 1]} : vector<8x128xf32> to vector<1x128xf32>
    %327 = vector.extract_strided_slice %316 {offsets = [5, 0], sizes = [1, 128], strides = [1, 1]} : vector<8x128xf32> to vector<1x128xf32>
    %328 = tpu.concatenate %325, %326, %327 in 0 : vector<1x128xf32>, vector<1x128xf32>, vector<1x128xf32> -> vector<3x128xf32>
    %c640_127 = arith.constant 640 : index
    %c0_128 = arith.constant 0 : index
    %329 = vector.load %arg4[%c640_127, %c0_128] : memref<2048x128xbf16, #tpu.memory_space<vmem>>, vector<128x128xbf16>
    %330 = arith.truncf %328 : vector<3x128xf32> to vector<3x128xbf16>
    %cst_129 = arith.constant dense<0.000000e+00> : vector<3x128xf32>
    %331 = tpu.matmul %330, %329, %cst_129 {dimension_numbers = #tpu.dot_dimension_numbers<[1], [0], [0], [1], [0, 0, 1, 1], [], []>} : vector<3x128xbf16>, vector<128x128xbf16>, vector<3x128xf32> -> vector<3x128xf32>
    %332 = arith.addf %324, %331 : vector<3x128xf32>
    %333 = vector.extract_strided_slice %316 {offsets = [2, 0], sizes = [1, 128], strides = [1, 1]} : vector<8x128xf32> to vector<1x128xf32>
    %334 = vector.extract_strided_slice %316 {offsets = [4, 0], sizes = [1, 128], strides = [1, 1]} : vector<8x128xf32> to vector<1x128xf32>
    %335 = vector.extract_strided_slice %316 {offsets = [6, 0], sizes = [1, 128], strides = [1, 1]} : vector<8x128xf32> to vector<1x128xf32>
    %336 = tpu.concatenate %333, %334, %335 in 0 : vector<1x128xf32>, vector<1x128xf32>, vector<1x128xf32> -> vector<3x128xf32>
    %c768_130 = arith.constant 768 : index
    %c0_131 = arith.constant 0 : index
    %337 = vector.load %arg4[%c768_130, %c0_131] : memref<2048x128xbf16, #tpu.memory_space<vmem>>, vector<128x128xbf16>
    %338 = arith.truncf %336 : vector<3x128xf32> to vector<3x128xbf16>
    %cst_132 = arith.constant dense<0.000000e+00> : vector<3x128xf32>
    %339 = tpu.matmul %338, %337, %cst_132 {dimension_numbers = #tpu.dot_dimension_numbers<[1], [0], [0], [1], [0, 0, 1, 1], [], []>} : vector<3x128xbf16>, vector<128x128xbf16>, vector<3x128xf32> -> vector<3x128xf32>
    %340 = arith.addf %332, %339 : vector<3x128xf32>
    %341 = vector.extract_strided_slice %316 {offsets = [3, 0], sizes = [1, 128], strides = [1, 1]} : vector<8x128xf32> to vector<1x128xf32>
    %342 = vector.extract_strided_slice %316 {offsets = [5, 0], sizes = [1, 128], strides = [1, 1]} : vector<8x128xf32> to vector<1x128xf32>
    %343 = vector.extract_strided_slice %316 {offsets = [7, 0], sizes = [1, 128], strides = [1, 1]} : vector<8x128xf32> to vector<1x128xf32>
    %344 = tpu.concatenate %341, %342, %343 in 0 : vector<1x128xf32>, vector<1x128xf32>, vector<1x128xf32> -> vector<3x128xf32>
    %c896_133 = arith.constant 896 : index
    %c0_134 = arith.constant 0 : index
    %345 = vector.load %arg4[%c896_133, %c0_134] : memref<2048x128xbf16, #tpu.memory_space<vmem>>, vector<128x128xbf16>
    %346 = arith.truncf %344 : vector<3x128xf32> to vector<3x128xbf16>
    %cst_135 = arith.constant dense<0.000000e+00> : vector<3x128xf32>
    %347 = tpu.matmul %346, %345, %cst_135 {dimension_numbers = #tpu.dot_dimension_numbers<[1], [0], [0], [1], [0, 0, 1, 1], [], []>} : vector<3x128xbf16>, vector<128x128xbf16>, vector<3x128xf32> -> vector<3x128xf32>
    %348 = arith.addf %340, %347 : vector<3x128xf32>
    %c48 = arith.constant 48 : index
    %c0_136 = arith.constant 0 : index
    %349 = vector.load %arg17[%c48, %c0_136] : memref<64x128xf32, #tpu.memory_space<vmem>>, vector<8x128xf32>
    %350 = vector.extract_strided_slice %349 {offsets = [0, 0], sizes = [1, 128], strides = [1, 1]} : vector<8x128xf32> to vector<1x128xf32>
    %351 = vector.extract_strided_slice %349 {offsets = [2, 0], sizes = [1, 128], strides = [1, 1]} : vector<8x128xf32> to vector<1x128xf32>
    %352 = vector.extract_strided_slice %349 {offsets = [4, 0], sizes = [1, 128], strides = [1, 1]} : vector<8x128xf32> to vector<1x128xf32>
    %353 = tpu.concatenate %350, %351, %352 in 0 : vector<1x128xf32>, vector<1x128xf32>, vector<1x128xf32> -> vector<3x128xf32>
    %c1024_137 = arith.constant 1024 : index
    %c0_138 = arith.constant 0 : index
    %354 = vector.load %arg4[%c1024_137, %c0_138] : memref<2048x128xbf16, #tpu.memory_space<vmem>>, vector<128x128xbf16>
    %355 = arith.truncf %353 : vector<3x128xf32> to vector<3x128xbf16>
    %cst_139 = arith.constant dense<0.000000e+00> : vector<3x128xf32>
    %356 = tpu.matmul %355, %354, %cst_139 {dimension_numbers = #tpu.dot_dimension_numbers<[1], [0], [0], [1], [0, 0, 1, 1], [], []>} : vector<3x128xbf16>, vector<128x128xbf16>, vector<3x128xf32> -> vector<3x128xf32>
    %357 = arith.addf %348, %356 : vector<3x128xf32>
    %358 = vector.extract_strided_slice %349 {offsets = [1, 0], sizes = [1, 128], strides = [1, 1]} : vector<8x128xf32> to vector<1x128xf32>
    %359 = vector.extract_strided_slice %349 {offsets = [3, 0], sizes = [1, 128], strides = [1, 1]} : vector<8x128xf32> to vector<1x128xf32>
    %360 = vector.extract_strided_slice %349 {offsets = [5, 0], sizes = [1, 128], strides = [1, 1]} : vector<8x128xf32> to vector<1x128xf32>
    %361 = tpu.concatenate %358, %359, %360 in 0 : vector<1x128xf32>, vector<1x128xf32>, vector<1x128xf32> -> vector<3x128xf32>
    %c1152_140 = arith.constant 1152 : index
    %c0_141 = arith.constant 0 : index
    %362 = vector.load %arg4[%c1152_140, %c0_141] : memref<2048x128xbf16, #tpu.memory_space<vmem>>, vector<128x128xbf16>
    %363 = arith.truncf %361 : vector<3x128xf32> to vector<3x128xbf16>
    %cst_142 = arith.constant dense<0.000000e+00> : vector<3x128xf32>
    %364 = tpu.matmul %363, %362, %cst_142 {dimension_numbers = #tpu.dot_dimension_numbers<[1], [0], [0], [1], [0, 0, 1, 1], [], []>} : vector<3x128xbf16>, vector<128x128xbf16>, vector<3x128xf32> -> vector<3x128xf32>
    %365 = arith.addf %357, %364 : vector<3x128xf32>
    %366 = vector.extract_strided_slice %349 {offsets = [2, 0], sizes = [1, 128], strides = [1, 1]} : vector<8x128xf32> to vector<1x128xf32>
    %367 = vector.extract_strided_slice %349 {offsets = [4, 0], sizes = [1, 128], strides = [1, 1]} : vector<8x128xf32> to vector<1x128xf32>
    %368 = vector.extract_strided_slice %349 {offsets = [6, 0], sizes = [1, 128], strides = [1, 1]} : vector<8x128xf32> to vector<1x128xf32>
    %369 = tpu.concatenate %366, %367, %368 in 0 : vector<1x128xf32>, vector<1x128xf32>, vector<1x128xf32> -> vector<3x128xf32>
    %c1280_143 = arith.constant 1280 : index
    %c0_144 = arith.constant 0 : index
    %370 = vector.load %arg4[%c1280_143, %c0_144] : memref<2048x128xbf16, #tpu.memory_space<vmem>>, vector<128x128xbf16>
    %371 = arith.truncf %369 : vector<3x128xf32> to vector<3x128xbf16>
    %cst_145 = arith.constant dense<0.000000e+00> : vector<3x128xf32>
    %372 = tpu.matmul %371, %370, %cst_145 {dimension_numbers = #tpu.dot_dimension_numbers<[1], [0], [0], [1], [0, 0, 1, 1], [], []>} : vector<3x128xbf16>, vector<128x128xbf16>, vector<3x128xf32> -> vector<3x128xf32>
    %373 = arith.addf %365, %372 : vector<3x128xf32>
    %374 = vector.extract_strided_slice %349 {offsets = [3, 0], sizes = [1, 128], strides = [1, 1]} : vector<8x128xf32> to vector<1x128xf32>
    %375 = vector.extract_strided_slice %349 {offsets = [5, 0], sizes = [1, 128], strides = [1, 1]} : vector<8x128xf32> to vector<1x128xf32>
    %376 = vector.extract_strided_slice %349 {offsets = [7, 0], sizes = [1, 128], strides = [1, 1]} : vector<8x128xf32> to vector<1x128xf32>
    %377 = tpu.concatenate %374, %375, %376 in 0 : vector<1x128xf32>, vector<1x128xf32>, vector<1x128xf32> -> vector<3x128xf32>
    %c1408_146 = arith.constant 1408 : index
    %c0_147 = arith.constant 0 : index
    %378 = vector.load %arg4[%c1408_146, %c0_147] : memref<2048x128xbf16, #tpu.memory_space<vmem>>, vector<128x128xbf16>
    %379 = arith.truncf %377 : vector<3x128xf32> to vector<3x128xbf16>
    %cst_148 = arith.constant dense<0.000000e+00> : vector<3x128xf32>
    %380 = tpu.matmul %379, %378, %cst_148 {dimension_numbers = #tpu.dot_dimension_numbers<[1], [0], [0], [1], [0, 0, 1, 1], [], []>} : vector<3x128xbf16>, vector<128x128xbf16>, vector<3x128xf32> -> vector<3x128xf32>
    %381 = arith.addf %373, %380 : vector<3x128xf32>
    %c56 = arith.constant 56 : index
    %c0_149 = arith.constant 0 : index
    %382 = vector.load %arg17[%c56, %c0_149] : memref<64x128xf32, #tpu.memory_space<vmem>>, vector<8x128xf32>
    %383 = vector.extract_strided_slice %382 {offsets = [0, 0], sizes = [1, 128], strides = [1, 1]} : vector<8x128xf32> to vector<1x128xf32>
    %384 = vector.extract_strided_slice %382 {offsets = [2, 0], sizes = [1, 128], strides = [1, 1]} : vector<8x128xf32> to vector<1x128xf32>
    %385 = vector.extract_strided_slice %382 {offsets = [4, 0], sizes = [1, 128], strides = [1, 1]} : vector<8x128xf32> to vector<1x128xf32>
    %386 = tpu.concatenate %383, %384, %385 in 0 : vector<1x128xf32>, vector<1x128xf32>, vector<1x128xf32> -> vector<3x128xf32>
    %c1536_150 = arith.constant 1536 : index
    %c0_151 = arith.constant 0 : index
    %387 = vector.load %arg4[%c1536_150, %c0_151] : memref<2048x128xbf16, #tpu.memory_space<vmem>>, vector<128x128xbf16>
    %388 = arith.truncf %386 : vector<3x128xf32> to vector<3x128xbf16>
    %cst_152 = arith.constant dense<0.000000e+00> : vector<3x128xf32>
    %389 = tpu.matmul %388, %387, %cst_152 {dimension_numbers = #tpu.dot_dimension_numbers<[1], [0], [0], [1], [0, 0, 1, 1], [], []>} : vector<3x128xbf16>, vector<128x128xbf16>, vector<3x128xf32> -> vector<3x128xf32>
    %390 = arith.addf %381, %389 : vector<3x128xf32>
    %391 = vector.extract_strided_slice %382 {offsets = [1, 0], sizes = [1, 128], strides = [1, 1]} : vector<8x128xf32> to vector<1x128xf32>
    %392 = vector.extract_strided_slice %382 {offsets = [3, 0], sizes = [1, 128], strides = [1, 1]} : vector<8x128xf32> to vector<1x128xf32>
    %393 = vector.extract_strided_slice %382 {offsets = [5, 0], sizes = [1, 128], strides = [1, 1]} : vector<8x128xf32> to vector<1x128xf32>
    %394 = tpu.concatenate %391, %392, %393 in 0 : vector<1x128xf32>, vector<1x128xf32>, vector<1x128xf32> -> vector<3x128xf32>
    %c1664_153 = arith.constant 1664 : index
    %c0_154 = arith.constant 0 : index
    %395 = vector.load %arg4[%c1664_153, %c0_154] : memref<2048x128xbf16, #tpu.memory_space<vmem>>, vector<128x128xbf16>
    %396 = arith.truncf %394 : vector<3x128xf32> to vector<3x128xbf16>
    %cst_155 = arith.constant dense<0.000000e+00> : vector<3x128xf32>
    %397 = tpu.matmul %396, %395, %cst_155 {dimension_numbers = #tpu.dot_dimension_numbers<[1], [0], [0], [1], [0, 0, 1, 1], [], []>} : vector<3x128xbf16>, vector<128x128xbf16>, vector<3x128xf32> -> vector<3x128xf32>
    %398 = arith.addf %390, %397 : vector<3x128xf32>
    %399 = vector.extract_strided_slice %382 {offsets = [2, 0], sizes = [1, 128], strides = [1, 1]} : vector<8x128xf32> to vector<1x128xf32>
    %400 = vector.extract_strided_slice %382 {offsets = [4, 0], sizes = [1, 128], strides = [1, 1]} : vector<8x128xf32> to vector<1x128xf32>
    %401 = vector.extract_strided_slice %382 {offsets = [6, 0], sizes = [1, 128], strides = [1, 1]} : vector<8x128xf32> to vector<1x128xf32>
    %402 = tpu.concatenate %399, %400, %401 in 0 : vector<1x128xf32>, vector<1x128xf32>, vector<1x128xf32> -> vector<3x128xf32>
    %c1792_156 = arith.constant 1792 : index
    %c0_157 = arith.constant 0 : index
    %403 = vector.load %arg4[%c1792_156, %c0_157] : memref<2048x128xbf16, #tpu.memory_space<vmem>>, vector<128x128xbf16>
    %404 = arith.truncf %402 : vector<3x128xf32> to vector<3x128xbf16>
    %cst_158 = arith.constant dense<0.000000e+00> : vector<3x128xf32>
    %405 = tpu.matmul %404, %403, %cst_158 {dimension_numbers = #tpu.dot_dimension_numbers<[1], [0], [0], [1], [0, 0, 1, 1], [], []>} : vector<3x128xbf16>, vector<128x128xbf16>, vector<3x128xf32> -> vector<3x128xf32>
    %406 = arith.addf %398, %405 : vector<3x128xf32>
    %407 = vector.extract_strided_slice %382 {offsets = [3, 0], sizes = [1, 128], strides = [1, 1]} : vector<8x128xf32> to vector<1x128xf32>
    %408 = vector.extract_strided_slice %382 {offsets = [5, 0], sizes = [1, 128], strides = [1, 1]} : vector<8x128xf32> to vector<1x128xf32>
    %409 = vector.extract_strided_slice %382 {offsets = [7, 0], sizes = [1, 128], strides = [1, 1]} : vector<8x128xf32> to vector<1x128xf32>
    %410 = tpu.concatenate %407, %408, %409 in 0 : vector<1x128xf32>, vector<1x128xf32>, vector<1x128xf32> -> vector<3x128xf32>
    %c1920_159 = arith.constant 1920 : index
    %c0_160 = arith.constant 0 : index
    %411 = vector.load %arg4[%c1920_159, %c0_160] : memref<2048x128xbf16, #tpu.memory_space<vmem>>, vector<128x128xbf16>
    %412 = arith.truncf %410 : vector<3x128xf32> to vector<3x128xbf16>
    %cst_161 = arith.constant dense<0.000000e+00> : vector<3x128xf32>
    %413 = tpu.matmul %412, %411, %cst_161 {dimension_numbers = #tpu.dot_dimension_numbers<[1], [0], [0], [1], [0, 0, 1, 1], [], []>} : vector<3x128xbf16>, vector<128x128xbf16>, vector<3x128xf32> -> vector<3x128xf32>
    %414 = arith.addf %406, %413 : vector<3x128xf32>
    %cst_162 = arith.constant 0.000000e+00 : f32
    %415 = vector.broadcast %cst_162 : f32 to vector<3x128xf32>
    %416 = arith.maximumf %414, %415 : vector<3x128xf32>
    %c6 = arith.constant 6 : index
    %c0_163 = arith.constant 0 : index
    %417 = vector.load %arg18[%c6, %c0_163] : memref<16x128xf32, #tpu.memory_space<vmem>>, vector<3x128xf32>
    tpu.vector_store %arg18[%c6, %c0_163], %416 {strides = array<i32>} : memref<16x128xf32, #tpu.memory_space<vmem>>, vector<3x128xf32>,
    %c0_164 = arith.constant 0 : index
    %c0_165 = arith.constant 0 : index
    %418 = vector.load %arg7[%c0_164, %c0_165] : memref<1x128xf32, #tpu.memory_space<vmem>>, vector<1x128xf32>
    %c0_166 = arith.constant 0 : index
    %c0_167 = arith.constant 0 : index
    %419 = vector.load %arg18[%c0_166, %c0_167] : memref<16x128xf32, #tpu.memory_space<vmem>>, vector<3x128xf32>
    %420 = vector.extract_strided_slice %419 {offsets = [0, 0], sizes = [1, 128], strides = [1, 1]} : vector<3x128xf32> to vector<1x128xf32>
    %c0_168 = arith.constant 0 : index
    %c0_169 = arith.constant 0 : index
    %421 = vector.load %arg6[%c0_168, %c0_169] : memref<1152x128xbf16, #tpu.memory_space<vmem>>, vector<128x128xbf16>
    %422 = arith.truncf %420 : vector<1x128xf32> to vector<1x128xbf16>
    %cst_170 = arith.constant dense<0.000000e+00> : vector<1x128xf32>
    %423 = tpu.matmul %422, %421, %cst_170 {dimension_numbers = #tpu.dot_dimension_numbers<[1], [0], [0], [1], [0, 0, 1, 1], [], []>} : vector<1x128xbf16>, vector<128x128xbf16>, vector<1x128xf32> -> vector<1x128xf32>
    %424 = arith.addf %418, %423 : vector<1x128xf32>
    %425 = vector.extract_strided_slice %419 {offsets = [1, 0], sizes = [1, 128], strides = [1, 1]} : vector<3x128xf32> to vector<1x128xf32>
    %c128_171 = arith.constant 128 : index
    %c0_172 = arith.constant 0 : index
    %426 = vector.load %arg6[%c128_171, %c0_172] : memref<1152x128xbf16, #tpu.memory_space<vmem>>, vector<128x128xbf16>
    %427 = arith.truncf %425 : vector<1x128xf32> to vector<1x128xbf16>
    %cst_173 = arith.constant dense<0.000000e+00> : vector<1x128xf32>
    %428 = tpu.matmul %427, %426, %cst_173 {dimension_numbers = #tpu.dot_dimension_numbers<[1], [0], [0], [1], [0, 0, 1, 1], [], []>} : vector<1x128xbf16>, vector<128x128xbf16>, vector<1x128xf32> -> vector<1x128xf32>
    %429 = arith.addf %424, %428 : vector<1x128xf32>
    %430 = vector.extract_strided_slice %419 {offsets = [2, 0], sizes = [1, 128], strides = [1, 1]} : vector<3x128xf32> to vector<1x128xf32>
    %c256_174 = arith.constant 256 : index
    %c0_175 = arith.constant 0 : index
    %431 = vector.load %arg6[%c256_174, %c0_175] : memref<1152x128xbf16, #tpu.memory_space<vmem>>, vector<128x128xbf16>
    %432 = arith.truncf %430 : vector<1x128xf32> to vector<1x128xbf16>
    %cst_176 = arith.constant dense<0.000000e+00> : vector<1x128xf32>
    %433 = tpu.matmul %432, %431, %cst_176 {dimension_numbers = #tpu.dot_dimension_numbers<[1], [0], [0], [1], [0, 0, 1, 1], [], []>} : vector<1x128xbf16>, vector<128x128xbf16>, vector<1x128xf32> -> vector<1x128xf32>
    %434 = arith.addf %429, %433 : vector<1x128xf32>
    %c3_177 = arith.constant 3 : index
    %c0_178 = arith.constant 0 : index
    %435 = vector.load %arg18[%c3_177, %c0_178] : memref<16x128xf32, #tpu.memory_space<vmem>>, vector<3x128xf32>
    %436 = vector.extract_strided_slice %435 {offsets = [0, 0], sizes = [1, 128], strides = [1, 1]} : vector<3x128xf32> to vector<1x128xf32>
    %c384_179 = arith.constant 384 : index
    %c0_180 = arith.constant 0 : index
    %437 = vector.load %arg6[%c384_179, %c0_180] : memref<1152x128xbf16, #tpu.memory_space<vmem>>, vector<128x128xbf16>
    %438 = arith.truncf %436 : vector<1x128xf32> to vector<1x128xbf16>
    %cst_181 = arith.constant dense<0.000000e+00> : vector<1x128xf32>
    %439 = tpu.matmul %438, %437, %cst_181 {dimension_numbers = #tpu.dot_dimension_numbers<[1], [0], [0], [1], [0, 0, 1, 1], [], []>} : vector<1x128xbf16>, vector<128x128xbf16>, vector<1x128xf32> -> vector<1x128xf32>
    %440 = arith.addf %434, %439 : vector<1x128xf32>
    %441 = vector.extract_strided_slice %435 {offsets = [1, 0], sizes = [1, 128], strides = [1, 1]} : vector<3x128xf32> to vector<1x128xf32>
    %c512_182 = arith.constant 512 : index
    %c0_183 = arith.constant 0 : index
    %442 = vector.load %arg6[%c512_182, %c0_183] : memref<1152x128xbf16, #tpu.memory_space<vmem>>, vector<128x128xbf16>
    %443 = arith.truncf %441 : vector<1x128xf32> to vector<1x128xbf16>
    %cst_184 = arith.constant dense<0.000000e+00> : vector<1x128xf32>
    %444 = tpu.matmul %443, %442, %cst_184 {dimension_numbers = #tpu.dot_dimension_numbers<[1], [0], [0], [1], [0, 0, 1, 1], [], []>} : vector<1x128xbf16>, vector<128x128xbf16>, vector<1x128xf32> -> vector<1x128xf32>
    %445 = arith.addf %440, %444 : vector<1x128xf32>
    %446 = vector.extract_strided_slice %435 {offsets = [2, 0], sizes = [1, 128], strides = [1, 1]} : vector<3x128xf32> to vector<1x128xf32>
    %c640_185 = arith.constant 640 : index
    %c0_186 = arith.constant 0 : index
    %447 = vector.load %arg6[%c640_185, %c0_186] : memref<1152x128xbf16, #tpu.memory_space<vmem>>, vector<128x128xbf16>
    %448 = arith.truncf %446 : vector<1x128xf32> to vector<1x128xbf16>
    %cst_187 = arith.constant dense<0.000000e+00> : vector<1x128xf32>
    %449 = tpu.matmul %448, %447, %cst_187 {dimension_numbers = #tpu.dot_dimension_numbers<[1], [0], [0], [1], [0, 0, 1, 1], [], []>} : vector<1x128xbf16>, vector<128x128xbf16>, vector<1x128xf32> -> vector<1x128xf32>
    %450 = arith.addf %445, %449 : vector<1x128xf32>
    %c6_188 = arith.constant 6 : index
    %c0_189 = arith.constant 0 : index
    %451 = vector.load %arg18[%c6_188, %c0_189] : memref<16x128xf32, #tpu.memory_space<vmem>>, vector<3x128xf32>
    %452 = vector.extract_strided_slice %451 {offsets = [0, 0], sizes = [1, 128], strides = [1, 1]} : vector<3x128xf32> to vector<1x128xf32>
    %c768_190 = arith.constant 768 : index
    %c0_191 = arith.constant 0 : index
    %453 = vector.load %arg6[%c768_190, %c0_191] : memref<1152x128xbf16, #tpu.memory_space<vmem>>, vector<128x128xbf16>
    %454 = arith.truncf %452 : vector<1x128xf32> to vector<1x128xbf16>
    %cst_192 = arith.constant dense<0.000000e+00> : vector<1x128xf32>
    %455 = tpu.matmul %454, %453, %cst_192 {dimension_numbers = #tpu.dot_dimension_numbers<[1], [0], [0], [1], [0, 0, 1, 1], [], []>} : vector<1x128xbf16>, vector<128x128xbf16>, vector<1x128xf32> -> vector<1x128xf32>
    %456 = arith.addf %450, %455 : vector<1x128xf32>
    %457 = vector.extract_strided_slice %451 {offsets = [1, 0], sizes = [1, 128], strides = [1, 1]} : vector<3x128xf32> to vector<1x128xf32>
    %c896_193 = arith.constant 896 : index
    %c0_194 = arith.constant 0 : index
    %458 = vector.load %arg6[%c896_193, %c0_194] : memref<1152x128xbf16, #tpu.memory_space<vmem>>, vector<128x128xbf16>
    %459 = arith.truncf %457 : vector<1x128xf32> to vector<1x128xbf16>
    %cst_195 = arith.constant dense<0.000000e+00> : vector<1x128xf32>
    %460 = tpu.matmul %459, %458, %cst_195 {dimension_numbers = #tpu.dot_dimension_numbers<[1], [0], [0], [1], [0, 0, 1, 1], [], []>} : vector<1x128xbf16>, vector<128x128xbf16>, vector<1x128xf32> -> vector<1x128xf32>
    %461 = arith.addf %456, %460 : vector<1x128xf32>
    %462 = vector.extract_strided_slice %451 {offsets = [2, 0], sizes = [1, 128], strides = [1, 1]} : vector<3x128xf32> to vector<1x128xf32>
    %c1024_196 = arith.constant 1024 : index
    %c0_197 = arith.constant 0 : index
    %463 = vector.load %arg6[%c1024_196, %c0_197] : memref<1152x128xbf16, #tpu.memory_space<vmem>>, vector<128x128xbf16>
    %464 = arith.truncf %462 : vector<1x128xf32> to vector<1x128xbf16>
    %cst_198 = arith.constant dense<0.000000e+00> : vector<1x128xf32>
    %465 = tpu.matmul %464, %463, %cst_198 {dimension_numbers = #tpu.dot_dimension_numbers<[1], [0], [0], [1], [0, 0, 1, 1], [], []>} : vector<1x128xbf16>, vector<128x128xbf16>, vector<1x128xf32> -> vector<1x128xf32>
    %466 = arith.addf %461, %465 : vector<1x128xf32>
    %cst_199 = arith.constant 0.000000e+00 : f32
    %467 = vector.broadcast %cst_199 : f32 to vector<1x128xf32>
    %468 = arith.maximumf %466, %467 : vector<1x128xf32>
    %c0_200 = arith.constant 0 : index
    %c0_201 = arith.constant 0 : index
    %469 = vector.load %arg19[%c0_200, %c0_201] : memref<8x128xf32, #tpu.memory_space<vmem>>, vector<1x128xf32>
    tpu.vector_store %arg19[%c0_200, %c0_201], %468 {strides = array<i32>} : memref<8x128xf32, #tpu.memory_space<vmem>>, vector<1x128xf32>,
    %c0_202 = arith.constant 0 : index
    %c0_203 = arith.constant 0 : index
    %470 = vector.load %arg9[%c0_202, %c0_203] : memref<1x512xf32, #tpu.memory_space<vmem>>, vector<1x512xf32>
    %c0_204 = arith.constant 0 : index
    %c0_205 = arith.constant 0 : index
    %471 = vector.load %arg19[%c0_204, %c0_205] : memref<8x128xf32, #tpu.memory_space<vmem>>, vector<1x128xf32>
    %472 = arith.truncf %471 : vector<1x128xf32> to vector<1x128xbf16>
    %c0_206 = arith.constant 0 : index
    %c0_207 = arith.constant 0 : index
    %473 = vector.load %arg8[%c0_206, %c0_207] : memref<128x512xbf16, #tpu.memory_space<vmem>>, vector<128x512xbf16>
    %cst_208 = arith.constant dense<0.000000e+00> : vector<1x512xf32>
    %474 = tpu.matmul %472, %473, %cst_208 {dimension_numbers = #tpu.dot_dimension_numbers<[1], [0], [0], [1], [0, 0, 1, 1], [], []>} : vector<1x128xbf16>, vector<128x512xbf16>, vector<1x512xf32> -> vector<1x512xf32>
    %475 = arith.addf %470, %474 : vector<1x512xf32>
    %cst_209 = arith.constant 0.000000e+00 : f32
    %476 = vector.broadcast %cst_209 : f32 to vector<1x512xf32>
    %477 = arith.maximumf %475, %476 : vector<1x512xf32>
    %478 = arith.truncf %477 : vector<1x512xf32> to vector<1x512xbf16>
    %c0_210 = arith.constant 0 : index
    %c0_211 = arith.constant 0 : index
    %479 = vector.load %arg10[%c0_210, %c0_211] : memref<512x256xbf16, #tpu.memory_space<vmem>>, vector<512x256xbf16>
    %cst_212 = arith.constant dense<0.000000e+00> : vector<1x256xf32>
    %480 = tpu.matmul %478, %479, %cst_212 {dimension_numbers = #tpu.dot_dimension_numbers<[1], [0], [0], [1], [0, 0, 1, 1], [], []>} : vector<1x512xbf16>, vector<512x256xbf16>, vector<1x256xf32> -> vector<1x256xf32>
    %c0_213 = arith.constant 0 : index
    %c0_214 = arith.constant 0 : index
    %481 = vector.load %arg11[%c0_213, %c0_214] : memref<1x256xf32, #tpu.memory_space<vmem>>, vector<1x256xf32>
    %482 = arith.addf %480, %481 : vector<1x256xf32>
    %cst_215 = arith.constant 0.000000e+00 : f32
    %483 = vector.broadcast %cst_215 : f32 to vector<1x256xf32>
    %484 = arith.maximumf %482, %483 : vector<1x256xf32>
    %485 = arith.truncf %484 : vector<1x256xf32> to vector<1x256xbf16>
    %c0_216 = arith.constant 0 : index
    %c0_217 = arith.constant 0 : index
    %486 = vector.load %arg12[%c0_216, %c0_217] : memref<256x512xbf16, #tpu.memory_space<vmem>>, vector<256x512xbf16>
    %cst_218 = arith.constant dense<0.000000e+00> : vector<1x512xf32>
    %487 = tpu.matmul %485, %486, %cst_218 {dimension_numbers = #tpu.dot_dimension_numbers<[1], [0], [0], [1], [0, 0, 1, 1], [], []>} : vector<1x256xbf16>, vector<256x512xbf16>, vector<1x512xf32> -> vector<1x512xf32>
    %c0_219 = arith.constant 0 : index
    %c0_220 = arith.constant 0 : index
    %488 = vector.load %arg13[%c0_219, %c0_220] : memref<1x512xf32, #tpu.memory_space<vmem>>, vector<1x512xf32>
    %489 = arith.addf %487, %488 : vector<1x512xf32>
    %cst_221 = arith.constant 0.000000e+00 : f32
    %490 = vector.broadcast %cst_221 : f32 to vector<1x512xf32>
    %491 = arith.maximumf %489, %490 : vector<1x512xf32>
    %492 = arith.truncf %491 : vector<1x512xf32> to vector<1x512xbf16>
    %c0_222 = arith.constant 0 : index
    %c0_223 = arith.constant 0 : index
    %493 = vector.load %arg14[%c0_222, %c0_223] : memref<512x128xbf16, #tpu.memory_space<vmem>>, vector<512x128xbf16>
    %cst_224 = arith.constant dense<0.000000e+00> : vector<1x128xf32>
    %494 = tpu.matmul %492, %493, %cst_224 {dimension_numbers = #tpu.dot_dimension_numbers<[1], [0], [0], [1], [0, 0, 1, 1], [], []>} : vector<1x512xbf16>, vector<512x128xbf16>, vector<1x128xf32> -> vector<1x128xf32>
    %c0_225 = arith.constant 0 : index
    %c0_226 = arith.constant 0 : index
    %495 = vector.load %arg15[%c0_225, %c0_226] : memref<1x128xf32, #tpu.memory_space<vmem>>, vector<1x128xf32>
    %496 = arith.addf %494, %495 : vector<1x128xf32>
    %497 = vector.shape_cast %496 : vector<1x128xf32> to vector<1x128xf32>
    %498 = vector.broadcast %497 : vector<1x128xf32> to vector<8x128xf32>
    %c0_227 = arith.constant 0 : index
    %c0_228 = arith.constant 0 : index
    %c0_229 = arith.constant 0 : index
    %499 = vector.load %arg16[%c0_227, %c0_228, %c0_229] : memref<1x8x128xf32, #tpu.memory_space<vmem>>, vector<1x8x128xf32>
    %500 = vector.shape_cast %499 : vector<1x8x128xf32> to vector<8x128xf32>
    %501 = vector.shape_cast %498 : vector<8x128xf32> to vector<1x8x128xf32>
    tpu.vector_store %arg16[%c0_227, %c0_228, %c0_229], %501 {strides = array<i32>} : memref<1x8x128xf32, #tpu.memory_space<vmem>>, vector<1x8x128xf32>,
    return
  }
  func.func @transform_0(%arg0: i32) -> (i32, i32, i32) {
    %c0_i32 = arith.constant 0 : i32
    %c0_i32_0 = arith.constant 0 : i32
    %c0_i32_1 = arith.constant 0 : i32
    return %arg0, %c0_i32, %c0_i32_0 : i32, i32, i32
  }
  func.func @transform_1(%arg0: i32) -> (i32, i32) {
    %c0_i32 = arith.constant 0 : i32
    %c0_i32_0 = arith.constant 0 : i32
    %c0_i32_1 = arith.constant 0 : i32
    return %c0_i32, %c0_i32_0 : i32, i32
  }
  func.func @transform_2(%arg0: i32) -> (i32, i32) {
    %c0_i32 = arith.constant 0 : i32
    %c0_i32_0 = arith.constant 0 : i32
    %c0_i32_1 = arith.constant 0 : i32
    return %c0_i32, %c0_i32_0 : i32, i32
  }
  func.func @transform_3(%arg0: i32) -> (i32, i32) {
    %c0_i32 = arith.constant 0 : i32
    %c0_i32_0 = arith.constant 0 : i32
    %c0_i32_1 = arith.constant 0 : i32
    return %c0_i32, %c0_i32_0 : i32, i32
  }
  func.func @transform_4(%arg0: i32) -> (i32, i32) {
    %c0_i32 = arith.constant 0 : i32
    %c0_i32_0 = arith.constant 0 : i32
    %c0_i32_1 = arith.constant 0 : i32
    return %c0_i32, %c0_i32_0 : i32, i32
  }
  func.func @transform_5(%arg0: i32) -> (i32, i32) {
    %c0_i32 = arith.constant 0 : i32
    %c0_i32_0 = arith.constant 0 : i32
    %c0_i32_1 = arith.constant 0 : i32
    return %c0_i32, %c0_i32_0 : i32, i32
  }
  func.func @transform_6(%arg0: i32) -> (i32, i32) {
    %c0_i32 = arith.constant 0 : i32
    %c0_i32_0 = arith.constant 0 : i32
    %c0_i32_1 = arith.constant 0 : i32
    return %c0_i32, %c0_i32_0 : i32, i32
  }
  func.func @transform_7(%arg0: i32) -> (i32, i32) {
    %c0_i32 = arith.constant 0 : i32
    %c0_i32_0 = arith.constant 0 : i32
    %c0_i32_1 = arith.constant 0 : i32
    return %c0_i32, %c0_i32_0 : i32, i32
  }
  func.func @transform_8(%arg0: i32) -> (i32, i32) {
    %c0_i32 = arith.constant 0 : i32
    %c0_i32_0 = arith.constant 0 : i32
    %c0_i32_1 = arith.constant 0 : i32
    return %c0_i32, %c0_i32_0 : i32, i32
  }
  func.func @transform_9(%arg0: i32) -> (i32, i32) {
    %c0_i32 = arith.constant 0 : i32
    %c0_i32_0 = arith.constant 0 : i32
    %c0_i32_1 = arith.constant 0 : i32
    return %c0_i32, %c0_i32_0 : i32, i32
  }
  func.func @transform_10(%arg0: i32) -> (i32, i32) {
    %c0_i32 = arith.constant 0 : i32
    %c0_i32_0 = arith.constant 0 : i32
    %c0_i32_1 = arith.constant 0 : i32
    return %c0_i32, %c0_i32_0 : i32, i32
  }
  func.func @transform_11(%arg0: i32) -> (i32, i32) {
    %c0_i32 = arith.constant 0 : i32
    %c0_i32_0 = arith.constant 0 : i32
    %c0_i32_1 = arith.constant 0 : i32
    return %c0_i32, %c0_i32_0 : i32, i32
  }
  func.func @transform_12(%arg0: i32) -> (i32, i32) {
    %c0_i32 = arith.constant 0 : i32
    %c0_i32_0 = arith.constant 0 : i32
    %c0_i32_1 = arith.constant 0 : i32
    return %c0_i32, %c0_i32_0 : i32, i32
  }
  func.func @transform_13(%arg0: i32) -> (i32, i32) {
    %c0_i32 = arith.constant 0 : i32
    %c0_i32_0 = arith.constant 0 : i32
    %c0_i32_1 = arith.constant 0 : i32
    return %c0_i32, %c0_i32_0 : i32, i32
  }
  func.func @transform_14(%arg0: i32) -> (i32, i32) {
    %c0_i32 = arith.constant 0 : i32
    %c0_i32_0 = arith.constant 0 : i32
    %c0_i32_1 = arith.constant 0 : i32
    return %c0_i32, %c0_i32_0 : i32, i32
  }
  func.func @transform_15(%arg0: i32) -> (i32, i32, i32) {
    %c0_i32 = arith.constant 0 : i32
    %c0_i32_0 = arith.constant 0 : i32
    %c0_i32_1 = arith.constant 0 : i32
    return %arg0, %c0_i32, %c0_i32_0 : i32, i32, i32
  }
}

module attributes {stable_mosaic.version = 11 : i64} {
  func.func @_dqn_kernel(%arg0: i32, %arg1: memref<1x64x256xbf16, #tpu.memory_space<vmem>>, %arg2: memref<256x128xbf16, #tpu.memory_space<vmem>>, %arg3: memref<1x128xf32, #tpu.memory_space<vmem>>, %arg4: memref<2048x128xbf16, #tpu.memory_space<vmem>>, %arg5: memref<1x128xf32, #tpu.memory_space<vmem>>, %arg6: memref<1152x128xbf16, #tpu.memory_space<vmem>>, %arg7: memref<1x128xf32, #tpu.memory_space<vmem>>, %arg8: memref<128x512xbf16, #tpu.memory_space<vmem>>, %arg9: memref<1x512xf32, #tpu.memory_space<vmem>>, %arg10: memref<512x256xbf16, #tpu.memory_space<vmem>>, %arg11: memref<1x256xf32, #tpu.memory_space<vmem>>, %arg12: memref<256x512xbf16, #tpu.memory_space<vmem>>, %arg13: memref<1x512xf32, #tpu.memory_space<vmem>>, %arg14: memref<512x128xbf16, #tpu.memory_space<vmem>>, %arg15: memref<1x128xf32, #tpu.memory_space<vmem>>, %arg16: memref<1x8x128xf32, #tpu.memory_space<vmem>>, %arg17: memref<64x128xf32, #tpu.memory_space<vmem>>, %arg18: memref<16x128xf32, #tpu.memory_space<vmem>>, %arg19: memref<8x128xf32, #tpu.memory_space<vmem>>) attributes {dimension_semantics = [#tpu.dimension_semantics<parallel>], iteration_bounds = array<i64: 2>, scalar_prefetch = 0 : i64, scratch_operands = 3 : i64, tpu.core_type = #tpu.core_type<tc>, window_params = [{transform_indices = @transform_0, window_bounds = array<i64: 1, 64, 256>}, {pipeline_mode = #tpu.pipeline_mode<synchronous>, transform_indices = @transform_1, window_bounds = array<i64: 256, 128>}, {pipeline_mode = #tpu.pipeline_mode<synchronous>, transform_indices = @transform_2, window_bounds = array<i64: 1, 128>}, {pipeline_mode = #tpu.pipeline_mode<synchronous>, transform_indices = @transform_3, window_bounds = array<i64: 2048, 128>}, {pipeline_mode = #tpu.pipeline_mode<synchronous>, transform_indices = @transform_4, window_bounds = array<i64: 1, 128>}, {pipeline_mode = #tpu.pipeline_mode<synchronous>, transform_indices = @transform_5, window_bounds = array<i64: 1152, 128>}, {pipeline_mode = #tpu.pipeline_mode<synchronous>, transform_indices = @transform_6, window_bounds = array<i64: 1, 128>}, {pipeline_mode = #tpu.pipeline_mode<synchronous>, transform_indices = @transform_7, window_bounds = array<i64: 128, 512>}, {pipeline_mode = #tpu.pipeline_mode<synchronous>, transform_indices = @transform_8, window_bounds = array<i64: 1, 512>}, {pipeline_mode = #tpu.pipeline_mode<synchronous>, transform_indices = @transform_9, window_bounds = array<i64: 512, 256>}, {pipeline_mode = #tpu.pipeline_mode<synchronous>, transform_indices = @transform_10, window_bounds = array<i64: 1, 256>}, {pipeline_mode = #tpu.pipeline_mode<synchronous>, transform_indices = @transform_11, window_bounds = array<i64: 256, 512>}, {pipeline_mode = #tpu.pipeline_mode<synchronous>, transform_indices = @transform_12, window_bounds = array<i64: 1, 512>}, {pipeline_mode = #tpu.pipeline_mode<synchronous>, transform_indices = @transform_13, window_bounds = array<i64: 512, 128>}, {pipeline_mode = #tpu.pipeline_mode<synchronous>, transform_indices = @transform_14, window_bounds = array<i64: 1, 128>}, {transform_indices = @transform_15, window_bounds = array<i64: 1, 8, 128>}]} {
    %c0 = arith.constant 0 : index
    %c0_0 = arith.constant 0 : index
    %c0_1 = arith.constant 0 : index
    %0 = vector.load %arg1[%c0, %c0_0, %c0_1] : memref<1x64x256xbf16, #tpu.memory_space<vmem>>, vector<1x64x256xbf16>
    %1 = vector.shape_cast %0 : vector<1x64x256xbf16> to vector<64x256xbf16>
    %c0_2 = arith.constant 0 : index
    %c0_3 = arith.constant 0 : index
    %2 = vector.load %arg2[%c0_2, %c0_3] : memref<256x128xbf16, #tpu.memory_space<vmem>>, vector<256x128xbf16>
    %cst = arith.constant dense<0.000000e+00> : vector<64x128xf32>
    %3 = tpu.matmul %1, %2, %cst {dimension_numbers = #tpu.dot_dimension_numbers<[1], [0], [0], [1], [0, 0, 1, 1], [], []>} : vector<64x256xbf16>, vector<256x128xbf16>, vector<64x128xf32> -> vector<64x128xf32>
    %c0_4 = arith.constant 0 : index
    %c0_5 = arith.constant 0 : index
    %4 = vector.load %arg3[%c0_4, %c0_5] : memref<1x128xf32, #tpu.memory_space<vmem>>, vector<1x128xf32>
    %5 = vector.broadcast %4 : vector<1x128xf32> to vector<64x128xf32>
    %6 = arith.addf %3, %5 : vector<64x128xf32>
    %cst_6 = arith.constant 0.000000e+00 : f32
    %7 = vector.broadcast %cst_6 : f32 to vector<64x128xf32>
    %8 = arith.maximumf %6, %7 : vector<64x128xf32>
    %c0_7 = arith.constant 0 : index
    %c0_8 = arith.constant 0 : index
    %9 = vector.load %arg17[%c0_7, %c0_8] : memref<64x128xf32, #tpu.memory_space<vmem>>, vector<64x128xf32>
    tpu.vector_store %arg17[%c0_7, %c0_8], %8 {strides = array<i32>} : memref<64x128xf32, #tpu.memory_space<vmem>>, vector<64x128xf32>,
    %c0_9 = arith.constant 0 : index
    %c0_10 = arith.constant 0 : index
    %10 = vector.load %arg5[%c0_9, %c0_10] : memref<1x128xf32, #tpu.memory_space<vmem>>, vector<1x128xf32>
    %11 = vector.shape_cast %10 : vector<1x128xf32> to vector<1x128xf32>
    %12 = vector.broadcast %11 : vector<1x128xf32> to vector<3x128xf32>
    %c0_11 = arith.constant 0 : index
    %c0_12 = arith.constant 0 : index
    %13 = vector.load %arg17[%c0_11, %c0_12] : memref<64x128xf32, #tpu.memory_space<vmem>>, vector<8x128xf32>
    %14 = vector.extract_strided_slice %13 {offsets = [0, 0], sizes = [1, 128], strides = [1, 1]} : vector<8x128xf32> to vector<1x128xf32>
    %15 = vector.extract_strided_slice %13 {offsets = [2, 0], sizes = [1, 128], strides = [1, 1]} : vector<8x128xf32> to vector<1x128xf32>
    %16 = vector.extract_strided_slice %13 {offsets = [4, 0], sizes = [1, 128], strides = [1, 1]} : vector<8x128xf32> to vector<1x128xf32>
    %17 = tpu.concatenate %14, %15, %16 in 0 : vector<1x128xf32>, vector<1x128xf32>, vector<1x128xf32> -> vector<3x128xf32>
    %c0_13 = arith.constant 0 : index
    %c0_14 = arith.constant 0 : index
    %18 = vector.load %arg4[%c0_13, %c0_14] : memref<2048x128xbf16, #tpu.memory_space<vmem>>, vector<128x128xbf16>
    %19 = arith.truncf %17 : vector<3x128xf32> to vector<3x128xbf16>
    %cst_15 = arith.constant dense<0.000000e+00> : vector<3x128xf32>
    %20 = tpu.matmul %19, %18, %cst_15 {dimension_numbers = #tpu.dot_dimension_numbers<[1], [0], [0], [1], [0, 0, 1, 1], [], []>} : vector<3x128xbf16>, vector<128x128xbf16>, vector<3x128xf32> -> vector<3x128xf32>
    %21 = arith.addf %12, %20 : vector<3x128xf32>
    %22 = vector.extract_strided_slice %13 {offsets = [1, 0], sizes = [1, 128], strides = [1, 1]} : vector<8x128xf32> to vector<1x128xf32>
    %23 = vector.extract_strided_slice %13 {offsets = [3, 0], sizes = [1, 128], strides = [1, 1]} : vector<8x128xf32> to vector<1x128xf32>
    %24 = vector.extract_strided_slice %13 {offsets = [5, 0], sizes = [1, 128], strides = [1, 1]} : vector<8x128xf32> to vector<1x128xf32>
    %25 = tpu.concatenate %22, %23, %24 in 0 : vector<1x128xf32>, vector<1x128xf32>, vector<1x128xf32> -> vector<3x128xf32>
    %c128 = arith.constant 128 : index
    %c0_16 = arith.constant 0 : index
    %26 = vector.load %arg4[%c128, %c0_16] : memref<2048x128xbf16, #tpu.memory_space<vmem>>, vector<128x128xbf16>
    %27 = arith.truncf %25 : vector<3x128xf32> to vector<3x128xbf16>
    %cst_17 = arith.constant dense<0.000000e+00> : vector<3x128xf32>
    %28 = tpu.matmul %27, %26, %cst_17 {dimension_numbers = #tpu.dot_dimension_numbers<[1], [0], [0], [1], [0, 0, 1, 1], [], []>} : vector<3x128xbf16>, vector<128x128xbf16>, vector<3x128xf32> -> vector<3x128xf32>
    %29 = arith.addf %21, %28 : vector<3x128xf32>
    %30 = vector.extract_strided_slice %13 {offsets = [2, 0], sizes = [1, 128], strides = [1, 1]} : vector<8x128xf32> to vector<1x128xf32>
    %31 = vector.extract_strided_slice %13 {offsets = [4, 0], sizes = [1, 128], strides = [1, 1]} : vector<8x128xf32> to vector<1x128xf32>
    %32 = vector.extract_strided_slice %13 {offsets = [6, 0], sizes = [1, 128], strides = [1, 1]} : vector<8x128xf32> to vector<1x128xf32>
    %33 = tpu.concatenate %30, %31, %32 in 0 : vector<1x128xf32>, vector<1x128xf32>, vector<1x128xf32> -> vector<3x128xf32>
    %c256 = arith.constant 256 : index
    %c0_18 = arith.constant 0 : index
    %34 = vector.load %arg4[%c256, %c0_18] : memref<2048x128xbf16, #tpu.memory_space<vmem>>, vector<128x128xbf16>
    %35 = arith.truncf %33 : vector<3x128xf32> to vector<3x128xbf16>
    %cst_19 = arith.constant dense<0.000000e+00> : vector<3x128xf32>
    %36 = tpu.matmul %35, %34, %cst_19 {dimension_numbers = #tpu.dot_dimension_numbers<[1], [0], [0], [1], [0, 0, 1, 1], [], []>} : vector<3x128xbf16>, vector<128x128xbf16>, vector<3x128xf32> -> vector<3x128xf32>
    %37 = arith.addf %29, %36 : vector<3x128xf32>
    %38 = vector.extract_strided_slice %13 {offsets = [3, 0], sizes = [1, 128], strides = [1, 1]} : vector<8x128xf32> to vector<1x128xf32>
    %39 = vector.extract_strided_slice %13 {offsets = [5, 0], sizes = [1, 128], strides = [1, 1]} : vector<8x128xf32> to vector<1x128xf32>
    %40 = vector.extract_strided_slice %13 {offsets = [7, 0], sizes = [1, 128], strides = [1, 1]} : vector<8x128xf32> to vector<1x128xf32>
    %41 = tpu.concatenate %38, %39, %40 in 0 : vector<1x128xf32>, vector<1x128xf32>, vector<1x128xf32> -> vector<3x128xf32>
    %c384 = arith.constant 384 : index
    %c0_20 = arith.constant 0 : index
    %42 = vector.load %arg4[%c384, %c0_20] : memref<2048x128xbf16, #tpu.memory_space<vmem>>, vector<128x128xbf16>
    %43 = arith.truncf %41 : vector<3x128xf32> to vector<3x128xbf16>
    %cst_21 = arith.constant dense<0.000000e+00> : vector<3x128xf32>
    %44 = tpu.matmul %43, %42, %cst_21 {dimension_numbers = #tpu.dot_dimension_numbers<[1], [0], [0], [1], [0, 0, 1, 1], [], []>} : vector<3x128xbf16>, vector<128x128xbf16>, vector<3x128xf32> -> vector<3x128xf32>
    %45 = arith.addf %37, %44 : vector<3x128xf32>
    %c8 = arith.constant 8 : index
    %c0_22 = arith.constant 0 : index
    %46 = vector.load %arg17[%c8, %c0_22] : memref<64x128xf32, #tpu.memory_space<vmem>>, vector<8x128xf32>
    %47 = vector.extract_strided_slice %46 {offsets = [0, 0], sizes = [1, 128], strides = [1, 1]} : vector<8x128xf32> to vector<1x128xf32>
    %48 = vector.extract_strided_slice %46 {offsets = [2, 0], sizes = [1, 128], strides = [1, 1]} : vector<8x128xf32> to vector<1x128xf32>
    %49 = vector.extract_strided_slice %46 {offsets = [4, 0], sizes = [1, 128], strides = [1, 1]} : vector<8x128xf32> to vector<1x128xf32>
    %50 = tpu.concatenate %47, %48, %49 in 0 : vector<1x128xf32>, vector<1x128xf32>, vector<1x128xf32> -> vector<3x128xf32>
    %c512 = arith.constant 512 : index
    %c0_23 = arith.constant 0 : index
    %51 = vector.load %arg4[%c512, %c0_23] : memref<2048x128xbf16, #tpu.memory_space<vmem>>, vector<128x128xbf16>
    %52 = arith.truncf %50 : vector<3x128xf32> to vector<3x128xbf16>
    %cst_24 = arith.constant dense<0.000000e+00> : vector<3x128xf32>
    %53 = tpu.matmul %52, %51, %cst_24 {dimension_numbers = #tpu.dot_dimension_numbers<[1], [0], [0], [1], [0, 0, 1, 1], [], []>} : vector<3x128xbf16>, vector<128x128xbf16>, vector<3x128xf32> -> vector<3x128xf32>
    %54 = arith.addf %45, %53 : vector<3x128xf32>
    %55 = vector.extract_strided_slice %46 {offsets = [1, 0], sizes = [1, 128], strides = [1, 1]} : vector<8x128xf32> to vector<1x128xf32>
    %56 = vector.extract_strided_slice %46 {offsets = [3, 0], sizes = [1, 128], strides = [1, 1]} : vector<8x128xf32> to vector<1x128xf32>
    %57 = vector.extract_strided_slice %46 {offsets = [5, 0], sizes = [1, 128], strides = [1, 1]} : vector<8x128xf32> to vector<1x128xf32>
    %58 = tpu.concatenate %55, %56, %57 in 0 : vector<1x128xf32>, vector<1x128xf32>, vector<1x128xf32> -> vector<3x128xf32>
    %c640 = arith.constant 640 : index
    %c0_25 = arith.constant 0 : index
    %59 = vector.load %arg4[%c640, %c0_25] : memref<2048x128xbf16, #tpu.memory_space<vmem>>, vector<128x128xbf16>
    %60 = arith.truncf %58 : vector<3x128xf32> to vector<3x128xbf16>
    %cst_26 = arith.constant dense<0.000000e+00> : vector<3x128xf32>
    %61 = tpu.matmul %60, %59, %cst_26 {dimension_numbers = #tpu.dot_dimension_numbers<[1], [0], [0], [1], [0, 0, 1, 1], [], []>} : vector<3x128xbf16>, vector<128x128xbf16>, vector<3x128xf32> -> vector<3x128xf32>
    %62 = arith.addf %54, %61 : vector<3x128xf32>
    %63 = vector.extract_strided_slice %46 {offsets = [2, 0], sizes = [1, 128], strides = [1, 1]} : vector<8x128xf32> to vector<1x128xf32>
    %64 = vector.extract_strided_slice %46 {offsets = [4, 0], sizes = [1, 128], strides = [1, 1]} : vector<8x128xf32> to vector<1x128xf32>
    %65 = vector.extract_strided_slice %46 {offsets = [6, 0], sizes = [1, 128], strides = [1, 1]} : vector<8x128xf32> to vector<1x128xf32>
    %66 = tpu.concatenate %63, %64, %65 in 0 : vector<1x128xf32>, vector<1x128xf32>, vector<1x128xf32> -> vector<3x128xf32>
    %c768 = arith.constant 768 : index
    %c0_27 = arith.constant 0 : index
    %67 = vector.load %arg4[%c768, %c0_27] : memref<2048x128xbf16, #tpu.memory_space<vmem>>, vector<128x128xbf16>
    %68 = arith.truncf %66 : vector<3x128xf32> to vector<3x128xbf16>
    %cst_28 = arith.constant dense<0.000000e+00> : vector<3x128xf32>
    %69 = tpu.matmul %68, %67, %cst_28 {dimension_numbers = #tpu.dot_dimension_numbers<[1], [0], [0], [1], [0, 0, 1, 1], [], []>} : vector<3x128xbf16>, vector<128x128xbf16>, vector<3x128xf32> -> vector<3x128xf32>
    %70 = arith.addf %62, %69 : vector<3x128xf32>
    %71 = vector.extract_strided_slice %46 {offsets = [3, 0], sizes = [1, 128], strides = [1, 1]} : vector<8x128xf32> to vector<1x128xf32>
    %72 = vector.extract_strided_slice %46 {offsets = [5, 0], sizes = [1, 128], strides = [1, 1]} : vector<8x128xf32> to vector<1x128xf32>
    %73 = vector.extract_strided_slice %46 {offsets = [7, 0], sizes = [1, 128], strides = [1, 1]} : vector<8x128xf32> to vector<1x128xf32>
    %74 = tpu.concatenate %71, %72, %73 in 0 : vector<1x128xf32>, vector<1x128xf32>, vector<1x128xf32> -> vector<3x128xf32>
    %c896 = arith.constant 896 : index
    %c0_29 = arith.constant 0 : index
    %75 = vector.load %arg4[%c896, %c0_29] : memref<2048x128xbf16, #tpu.memory_space<vmem>>, vector<128x128xbf16>
    %76 = arith.truncf %74 : vector<3x128xf32> to vector<3x128xbf16>
    %cst_30 = arith.constant dense<0.000000e+00> : vector<3x128xf32>
    %77 = tpu.matmul %76, %75, %cst_30 {dimension_numbers = #tpu.dot_dimension_numbers<[1], [0], [0], [1], [0, 0, 1, 1], [], []>} : vector<3x128xbf16>, vector<128x128xbf16>, vector<3x128xf32> -> vector<3x128xf32>
    %78 = arith.addf %70, %77 : vector<3x128xf32>
    %c16 = arith.constant 16 : index
    %c0_31 = arith.constant 0 : index
    %79 = vector.load %arg17[%c16, %c0_31] : memref<64x128xf32, #tpu.memory_space<vmem>>, vector<8x128xf32>
    %80 = vector.extract_strided_slice %79 {offsets = [0, 0], sizes = [1, 128], strides = [1, 1]} : vector<8x128xf32> to vector<1x128xf32>
    %81 = vector.extract_strided_slice %79 {offsets = [2, 0], sizes = [1, 128], strides = [1, 1]} : vector<8x128xf32> to vector<1x128xf32>
    %82 = vector.extract_strided_slice %79 {offsets = [4, 0], sizes = [1, 128], strides = [1, 1]} : vector<8x128xf32> to vector<1x128xf32>
    %83 = tpu.concatenate %80, %81, %82 in 0 : vector<1x128xf32>, vector<1x128xf32>, vector<1x128xf32> -> vector<3x128xf32>
    %c1024 = arith.constant 1024 : index
    %c0_32 = arith.constant 0 : index
    %84 = vector.load %arg4[%c1024, %c0_32] : memref<2048x128xbf16, #tpu.memory_space<vmem>>, vector<128x128xbf16>
    %85 = arith.truncf %83 : vector<3x128xf32> to vector<3x128xbf16>
    %cst_33 = arith.constant dense<0.000000e+00> : vector<3x128xf32>
    %86 = tpu.matmul %85, %84, %cst_33 {dimension_numbers = #tpu.dot_dimension_numbers<[1], [0], [0], [1], [0, 0, 1, 1], [], []>} : vector<3x128xbf16>, vector<128x128xbf16>, vector<3x128xf32> -> vector<3x128xf32>
    %87 = arith.addf %78, %86 : vector<3x128xf32>
    %88 = vector.extract_strided_slice %79 {offsets = [1, 0], sizes = [1, 128], strides = [1, 1]} : vector<8x128xf32> to vector<1x128xf32>
    %89 = vector.extract_strided_slice %79 {offsets = [3, 0], sizes = [1, 128], strides = [1, 1]} : vector<8x128xf32> to vector<1x128xf32>
    %90 = vector.extract_strided_slice %79 {offsets = [5, 0], sizes = [1, 128], strides = [1, 1]} : vector<8x128xf32> to vector<1x128xf32>
    %91 = tpu.concatenate %88, %89, %90 in 0 : vector<1x128xf32>, vector<1x128xf32>, vector<1x128xf32> -> vector<3x128xf32>
    %c1152 = arith.constant 1152 : index
    %c0_34 = arith.constant 0 : index
    %92 = vector.load %arg4[%c1152, %c0_34] : memref<2048x128xbf16, #tpu.memory_space<vmem>>, vector<128x128xbf16>
    %93 = arith.truncf %91 : vector<3x128xf32> to vector<3x128xbf16>
    %cst_35 = arith.constant dense<0.000000e+00> : vector<3x128xf32>
    %94 = tpu.matmul %93, %92, %cst_35 {dimension_numbers = #tpu.dot_dimension_numbers<[1], [0], [0], [1], [0, 0, 1, 1], [], []>} : vector<3x128xbf16>, vector<128x128xbf16>, vector<3x128xf32> -> vector<3x128xf32>
    %95 = arith.addf %87, %94 : vector<3x128xf32>
    %96 = vector.extract_strided_slice %79 {offsets = [2, 0], sizes = [1, 128], strides = [1, 1]} : vector<8x128xf32> to vector<1x128xf32>
    %97 = vector.extract_strided_slice %79 {offsets = [4, 0], sizes = [1, 128], strides = [1, 1]} : vector<8x128xf32> to vector<1x128xf32>
    %98 = vector.extract_strided_slice %79 {offsets = [6, 0], sizes = [1, 128], strides = [1, 1]} : vector<8x128xf32> to vector<1x128xf32>
    %99 = tpu.concatenate %96, %97, %98 in 0 : vector<1x128xf32>, vector<1x128xf32>, vector<1x128xf32> -> vector<3x128xf32>
    %c1280 = arith.constant 1280 : index
    %c0_36 = arith.constant 0 : index
    %100 = vector.load %arg4[%c1280, %c0_36] : memref<2048x128xbf16, #tpu.memory_space<vmem>>, vector<128x128xbf16>
    %101 = arith.truncf %99 : vector<3x128xf32> to vector<3x128xbf16>
    %cst_37 = arith.constant dense<0.000000e+00> : vector<3x128xf32>
    %102 = tpu.matmul %101, %100, %cst_37 {dimension_numbers = #tpu.dot_dimension_numbers<[1], [0], [0], [1], [0, 0, 1, 1], [], []>} : vector<3x128xbf16>, vector<128x128xbf16>, vector<3x128xf32> -> vector<3x128xf32>
    %103 = arith.addf %95, %102 : vector<3x128xf32>
    %104 = vector.extract_strided_slice %79 {offsets = [3, 0], sizes = [1, 128], strides = [1, 1]} : vector<8x128xf32> to vector<1x128xf32>
    %105 = vector.extract_strided_slice %79 {offsets = [5, 0], sizes = [1, 128], strides = [1, 1]} : vector<8x128xf32> to vector<1x128xf32>
    %106 = vector.extract_strided_slice %79 {offsets = [7, 0], sizes = [1, 128], strides = [1, 1]} : vector<8x128xf32> to vector<1x128xf32>
    %107 = tpu.concatenate %104, %105, %106 in 0 : vector<1x128xf32>, vector<1x128xf32>, vector<1x128xf32> -> vector<3x128xf32>
    %c1408 = arith.constant 1408 : index
    %c0_38 = arith.constant 0 : index
    %108 = vector.load %arg4[%c1408, %c0_38] : memref<2048x128xbf16, #tpu.memory_space<vmem>>, vector<128x128xbf16>
    %109 = arith.truncf %107 : vector<3x128xf32> to vector<3x128xbf16>
    %cst_39 = arith.constant dense<0.000000e+00> : vector<3x128xf32>
    %110 = tpu.matmul %109, %108, %cst_39 {dimension_numbers = #tpu.dot_dimension_numbers<[1], [0], [0], [1], [0, 0, 1, 1], [], []>} : vector<3x128xbf16>, vector<128x128xbf16>, vector<3x128xf32> -> vector<3x128xf32>
    %111 = arith.addf %103, %110 : vector<3x128xf32>
    %c24 = arith.constant 24 : index
    %c0_40 = arith.constant 0 : index
    %112 = vector.load %arg17[%c24, %c0_40] : memref<64x128xf32, #tpu.memory_space<vmem>>, vector<8x128xf32>
    %113 = vector.extract_strided_slice %112 {offsets = [0, 0], sizes = [1, 128], strides = [1, 1]} : vector<8x128xf32> to vector<1x128xf32>
    %114 = vector.extract_strided_slice %112 {offsets = [2, 0], sizes = [1, 128], strides = [1, 1]} : vector<8x128xf32> to vector<1x128xf32>
    %115 = vector.extract_strided_slice %112 {offsets = [4, 0], sizes = [1, 128], strides = [1, 1]} : vector<8x128xf32> to vector<1x128xf32>
    %116 = tpu.concatenate %113, %114, %115 in 0 : vector<1x128xf32>, vector<1x128xf32>, vector<1x128xf32> -> vector<3x128xf32>
    %c1536 = arith.constant 1536 : index
    %c0_41 = arith.constant 0 : index
    %117 = vector.load %arg4[%c1536, %c0_41] : memref<2048x128xbf16, #tpu.memory_space<vmem>>, vector<128x128xbf16>
    %118 = arith.truncf %116 : vector<3x128xf32> to vector<3x128xbf16>
    %cst_42 = arith.constant dense<0.000000e+00> : vector<3x128xf32>
    %119 = tpu.matmul %118, %117, %cst_42 {dimension_numbers = #tpu.dot_dimension_numbers<[1], [0], [0], [1], [0, 0, 1, 1], [], []>} : vector<3x128xbf16>, vector<128x128xbf16>, vector<3x128xf32> -> vector<3x128xf32>
    %120 = arith.addf %111, %119 : vector<3x128xf32>
    %121 = vector.extract_strided_slice %112 {offsets = [1, 0], sizes = [1, 128], strides = [1, 1]} : vector<8x128xf32> to vector<1x128xf32>
    %122 = vector.extract_strided_slice %112 {offsets = [3, 0], sizes = [1, 128], strides = [1, 1]} : vector<8x128xf32> to vector<1x128xf32>
    %123 = vector.extract_strided_slice %112 {offsets = [5, 0], sizes = [1, 128], strides = [1, 1]} : vector<8x128xf32> to vector<1x128xf32>
    %124 = tpu.concatenate %121, %122, %123 in 0 : vector<1x128xf32>, vector<1x128xf32>, vector<1x128xf32> -> vector<3x128xf32>
    %c1664 = arith.constant 1664 : index
    %c0_43 = arith.constant 0 : index
    %125 = vector.load %arg4[%c1664, %c0_43] : memref<2048x128xbf16, #tpu.memory_space<vmem>>, vector<128x128xbf16>
    %126 = arith.truncf %124 : vector<3x128xf32> to vector<3x128xbf16>
    %cst_44 = arith.constant dense<0.000000e+00> : vector<3x128xf32>
    %127 = tpu.matmul %126, %125, %cst_44 {dimension_numbers = #tpu.dot_dimension_numbers<[1], [0], [0], [1], [0, 0, 1, 1], [], []>} : vector<3x128xbf16>, vector<128x128xbf16>, vector<3x128xf32> -> vector<3x128xf32>
    %128 = arith.addf %120, %127 : vector<3x128xf32>
    %129 = vector.extract_strided_slice %112 {offsets = [2, 0], sizes = [1, 128], strides = [1, 1]} : vector<8x128xf32> to vector<1x128xf32>
    %130 = vector.extract_strided_slice %112 {offsets = [4, 0], sizes = [1, 128], strides = [1, 1]} : vector<8x128xf32> to vector<1x128xf32>
    %131 = vector.extract_strided_slice %112 {offsets = [6, 0], sizes = [1, 128], strides = [1, 1]} : vector<8x128xf32> to vector<1x128xf32>
    %132 = tpu.concatenate %129, %130, %131 in 0 : vector<1x128xf32>, vector<1x128xf32>, vector<1x128xf32> -> vector<3x128xf32>
    %c1792 = arith.constant 1792 : index
    %c0_45 = arith.constant 0 : index
    %133 = vector.load %arg4[%c1792, %c0_45] : memref<2048x128xbf16, #tpu.memory_space<vmem>>, vector<128x128xbf16>
    %134 = arith.truncf %132 : vector<3x128xf32> to vector<3x128xbf16>
    %cst_46 = arith.constant dense<0.000000e+00> : vector<3x128xf32>
    %135 = tpu.matmul %134, %133, %cst_46 {dimension_numbers = #tpu.dot_dimension_numbers<[1], [0], [0], [1], [0, 0, 1, 1], [], []>} : vector<3x128xbf16>, vector<128x128xbf16>, vector<3x128xf32> -> vector<3x128xf32>
    %136 = arith.addf %128, %135 : vector<3x128xf32>
    %137 = vector.extract_strided_slice %112 {offsets = [3, 0], sizes = [1, 128], strides = [1, 1]} : vector<8x128xf32> to vector<1x128xf32>
    %138 = vector.extract_strided_slice %112 {offsets = [5, 0], sizes = [1, 128], strides = [1, 1]} : vector<8x128xf32> to vector<1x128xf32>
    %139 = vector.extract_strided_slice %112 {offsets = [7, 0], sizes = [1, 128], strides = [1, 1]} : vector<8x128xf32> to vector<1x128xf32>
    %140 = tpu.concatenate %137, %138, %139 in 0 : vector<1x128xf32>, vector<1x128xf32>, vector<1x128xf32> -> vector<3x128xf32>
    %c1920 = arith.constant 1920 : index
    %c0_47 = arith.constant 0 : index
    %141 = vector.load %arg4[%c1920, %c0_47] : memref<2048x128xbf16, #tpu.memory_space<vmem>>, vector<128x128xbf16>
    %142 = arith.truncf %140 : vector<3x128xf32> to vector<3x128xbf16>
    %cst_48 = arith.constant dense<0.000000e+00> : vector<3x128xf32>
    %143 = tpu.matmul %142, %141, %cst_48 {dimension_numbers = #tpu.dot_dimension_numbers<[1], [0], [0], [1], [0, 0, 1, 1], [], []>} : vector<3x128xbf16>, vector<128x128xbf16>, vector<3x128xf32> -> vector<3x128xf32>
    %144 = arith.addf %136, %143 : vector<3x128xf32>
    %cst_49 = arith.constant 0.000000e+00 : f32
    %145 = vector.broadcast %cst_49 : f32 to vector<3x128xf32>
    %146 = arith.maximumf %144, %145 : vector<3x128xf32>
    %c0_50 = arith.constant 0 : index
    %c0_51 = arith.constant 0 : index
    %147 = vector.load %arg18[%c0_50, %c0_51] : memref<16x128xf32, #tpu.memory_space<vmem>>, vector<3x128xf32>
    tpu.vector_store %arg18[%c0_50, %c0_51], %146 {strides = array<i32>} : memref<16x128xf32, #tpu.memory_space<vmem>>, vector<3x128xf32>,
    %c16_52 = arith.constant 16 : index
    %c0_53 = arith.constant 0 : index
    %148 = vector.load %arg17[%c16_52, %c0_53] : memref<64x128xf32, #tpu.memory_space<vmem>>, vector<8x128xf32>
    %149 = vector.extract_strided_slice %148 {offsets = [0, 0], sizes = [1, 128], strides = [1, 1]} : vector<8x128xf32> to vector<1x128xf32>
    %150 = vector.extract_strided_slice %148 {offsets = [2, 0], sizes = [1, 128], strides = [1, 1]} : vector<8x128xf32> to vector<1x128xf32>
    %151 = vector.extract_strided_slice %148 {offsets = [4, 0], sizes = [1, 128], strides = [1, 1]} : vector<8x128xf32> to vector<1x128xf32>
    %152 = tpu.concatenate %149, %150, %151 in 0 : vector<1x128xf32>, vector<1x128xf32>, vector<1x128xf32> -> vector<3x128xf32>
    %c0_54 = arith.constant 0 : index
    %c0_55 = arith.constant 0 : index
    %153 = vector.load %arg4[%c0_54, %c0_55] : memref<2048x128xbf16, #tpu.memory_space<vmem>>, vector<128x128xbf16>
    %154 = arith.truncf %152 : vector<3x128xf32> to vector<3x128xbf16>
    %cst_56 = arith.constant dense<0.000000e+00> : vector<3x128xf32>
    %155 = tpu.matmul %154, %153, %cst_56 {dimension_numbers = #tpu.dot_dimension_numbers<[1], [0], [0], [1], [0, 0, 1, 1], [], []>} : vector<3x128xbf16>, vector<128x128xbf16>, vector<3x128xf32> -> vector<3x128xf32>
    %156 = arith.addf %12, %155 : vector<3x128xf32>
    %157 = vector.extract_strided_slice %148 {offsets = [1, 0], sizes = [1, 128], strides = [1, 1]} : vector<8x128xf32> to vector<1x128xf32>
    %158 = vector.extract_strided_slice %148 {offsets = [3, 0], sizes = [1, 128], strides = [1, 1]} : vector<8x128xf32> to vector<1x128xf32>
    %159 = vector.extract_strided_slice %148 {offsets = [5, 0], sizes = [1, 128], strides = [1, 1]} : vector<8x128xf32> to vector<1x128xf32>
    %160 = tpu.concatenate %157, %158, %159 in 0 : vector<1x128xf32>, vector<1x128xf32>, vector<1x128xf32> -> vector<3x128xf32>
    %c128_57 = arith.constant 128 : index
    %c0_58 = arith.constant 0 : index
    %161 = vector.load %arg4[%c128_57, %c0_58] : memref<2048x128xbf16, #tpu.memory_space<vmem>>, vector<128x128xbf16>
    %162 = arith.truncf %160 : vector<3x128xf32> to vector<3x128xbf16>
    %cst_59 = arith.constant dense<0.000000e+00> : vector<3x128xf32>
    %163 = tpu.matmul %162, %161, %cst_59 {dimension_numbers = #tpu.dot_dimension_numbers<[1], [0], [0], [1], [0, 0, 1, 1], [], []>} : vector<3x128xbf16>, vector<128x128xbf16>, vector<3x128xf32> -> vector<3x128xf32>
    %164 = arith.addf %156, %163 : vector<3x128xf32>
    %165 = vector.extract_strided_slice %148 {offsets = [2, 0], sizes = [1, 128], strides = [1, 1]} : vector<8x128xf32> to vector<1x128xf32>
    %166 = vector.extract_strided_slice %148 {offsets = [4, 0], sizes = [1, 128], strides = [1, 1]} : vector<8x128xf32> to vector<1x128xf32>
    %167 = vector.extract_strided_slice %148 {offsets = [6, 0], sizes = [1, 128], strides = [1, 1]} : vector<8x128xf32> to vector<1x128xf32>
    %168 = tpu.concatenate %165, %166, %167 in 0 : vector<1x128xf32>, vector<1x128xf32>, vector<1x128xf32> -> vector<3x128xf32>
    %c256_60 = arith.constant 256 : index
    %c0_61 = arith.constant 0 : index
    %169 = vector.load %arg4[%c256_60, %c0_61] : memref<2048x128xbf16, #tpu.memory_space<vmem>>, vector<128x128xbf16>
    %170 = arith.truncf %168 : vector<3x128xf32> to vector<3x128xbf16>
    %cst_62 = arith.constant dense<0.000000e+00> : vector<3x128xf32>
    %171 = tpu.matmul %170, %169, %cst_62 {dimension_numbers = #tpu.dot_dimension_numbers<[1], [0], [0], [1], [0, 0, 1, 1], [], []>} : vector<3x128xbf16>, vector<128x128xbf16>, vector<3x128xf32> -> vector<3x128xf32>
    %172 = arith.addf %164, %171 : vector<3x128xf32>
    %173 = vector.extract_strided_slice %148 {offsets = [3, 0], sizes = [1, 128], strides = [1, 1]} : vector<8x128xf32> to vector<1x128xf32>
    %174 = vector.extract_strided_slice %148 {offsets = [5, 0], sizes = [1, 128], strides = [1, 1]} : vector<8x128xf32> to vector<1x128xf32>
    %175 = vector.extract_strided_slice %148 {offsets = [7, 0], sizes = [1, 128], strides = [1, 1]} : vector<8x128xf32> to vector<1x128xf32>
    %176 = tpu.concatenate %173, %174, %175 in 0 : vector<1x128xf32>, vector<1x128xf32>, vector<1x128xf32> -> vector<3x128xf32>
    %c384_63 = arith.constant 384 : index
    %c0_64 = arith.constant 0 : index
    %177 = vector.load %arg4[%c384_63, %c0_64] : memref<2048x128xbf16, #tpu.memory_space<vmem>>, vector<128x128xbf16>
    %178 = arith.truncf %176 : vector<3x128xf32> to vector<3x128xbf16>
    %cst_65 = arith.constant dense<0.000000e+00> : vector<3x128xf32>
    %179 = tpu.matmul %178, %177, %cst_65 {dimension_numbers = #tpu.dot_dimension_numbers<[1], [0], [0], [1], [0, 0, 1, 1], [], []>} : vector<3x128xbf16>, vector<128x128xbf16>, vector<3x128xf32> -> vector<3x128xf32>
    %180 = arith.addf %172, %179 : vector<3x128xf32>
    %c24_66 = arith.constant 24 : index
    %c0_67 = arith.constant 0 : index
    %181 = vector.load %arg17[%c24_66, %c0_67] : memref<64x128xf32, #tpu.memory_space<vmem>>, vector<8x128xf32>
    %182 = vector.extract_strided_slice %181 {offsets = [0, 0], sizes = [1, 128], strides = [1, 1]} : vector<8x128xf32> to vector<1x128xf32>
    %183 = vector.extract_strided_slice %181 {offsets = [2, 0], sizes = [1, 128], strides = [1, 1]} : vector<8x128xf32> to vector<1x128xf32>
    %184 = vector.extract_strided_slice %181 {offsets = [4, 0], sizes = [1, 128], strides = [1, 1]} : vector<8x128xf32> to vector<1x128xf32>
    %185 = tpu.concatenate %182, %183, %184 in 0 : vector<1x128xf32>, vector<1x128xf32>, vector<1x128xf32> -> vector<3x128xf32>
    %c512_68 = arith.constant 512 : index
    %c0_69 = arith.constant 0 : index
    %186 = vector.load %arg4[%c512_68, %c0_69] : memref<2048x128xbf16, #tpu.memory_space<vmem>>, vector<128x128xbf16>
    %187 = arith.truncf %185 : vector<3x128xf32> to vector<3x128xbf16>
    %cst_70 = arith.constant dense<0.000000e+00> : vector<3x128xf32>
    %188 = tpu.matmul %187, %186, %cst_70 {dimension_numbers = #tpu.dot_dimension_numbers<[1], [0], [0], [1], [0, 0, 1, 1], [], []>} : vector<3x128xbf16>, vector<128x128xbf16>, vector<3x128xf32> -> vector<3x128xf32>
    %189 = arith.addf %180, %188 : vector<3x128xf32>
    %190 = vector.extract_strided_slice %181 {offsets = [1, 0], sizes = [1, 128], strides = [1, 1]} : vector<8x128xf32> to vector<1x128xf32>
    %191 = vector.extract_strided_slice %181 {offsets = [3, 0], sizes = [1, 128], strides = [1, 1]} : vector<8x128xf32> to vector<1x128xf32>
    %192 = vector.extract_strided_slice %181 {offsets = [5, 0], sizes = [1, 128], strides = [1, 1]} : vector<8x128xf32> to vector<1x128xf32>
    %193 = tpu.concatenate %190, %191, %192 in 0 : vector<1x128xf32>, vector<1x128xf32>, vector<1x128xf32> -> vector<3x128xf32>
    %c640_71 = arith.constant 640 : index
    %c0_72 = arith.constant 0 : index
    %194 = vector.load %arg4[%c640_71, %c0_72] : memref<2048x128xbf16, #tpu.memory_space<vmem>>, vector<128x128xbf16>
    %195 = arith.truncf %193 : vector<3x128xf32> to vector<3x128xbf16>
    %cst_73 = arith.constant dense<0.000000e+00> : vector<3x128xf32>
    %196 = tpu.matmul %195, %194, %cst_73 {dimension_numbers = #tpu.dot_dimension_numbers<[1], [0], [0], [1], [0, 0, 1, 1], [], []>} : vector<3x128xbf16>, vector<128x128xbf16>, vector<3x128xf32> -> vector<3x128xf32>
    %197 = arith.addf %189, %196 : vector<3x128xf32>
    %198 = vector.extract_strided_slice %181 {offsets = [2, 0], sizes = [1, 128], strides = [1, 1]} : vector<8x128xf32> to vector<1x128xf32>
    %199 = vector.extract_strided_slice %181 {offsets = [4, 0], sizes = [1, 128], strides = [1, 1]} : vector<8x128xf32> to vector<1x128xf32>
    %200 = vector.extract_strided_slice %181 {offsets = [6, 0], sizes = [1, 128], strides = [1, 1]} : vector<8x128xf32> to vector<1x128xf32>
    %201 = tpu.concatenate %198, %199, %200 in 0 : vector<1x128xf32>, vector<1x128xf32>, vector<1x128xf32> -> vector<3x128xf32>
    %c768_74 = arith.constant 768 : index
    %c0_75 = arith.constant 0 : index
    %202 = vector.load %arg4[%c768_74, %c0_75] : memref<2048x128xbf16, #tpu.memory_space<vmem>>, vector<128x128xbf16>
    %203 = arith.truncf %201 : vector<3x128xf32> to vector<3x128xbf16>
    %cst_76 = arith.constant dense<0.000000e+00> : vector<3x128xf32>
    %204 = tpu.matmul %203, %202, %cst_76 {dimension_numbers = #tpu.dot_dimension_numbers<[1], [0], [0], [1], [0, 0, 1, 1], [], []>} : vector<3x128xbf16>, vector<128x128xbf16>, vector<3x128xf32> -> vector<3x128xf32>
    %205 = arith.addf %197, %204 : vector<3x128xf32>
    %206 = vector.extract_strided_slice %181 {offsets = [3, 0], sizes = [1, 128], strides = [1, 1]} : vector<8x128xf32> to vector<1x128xf32>
    %207 = vector.extract_strided_slice %181 {offsets = [5, 0], sizes = [1, 128], strides = [1, 1]} : vector<8x128xf32> to vector<1x128xf32>
    %208 = vector.extract_strided_slice %181 {offsets = [7, 0], sizes = [1, 128], strides = [1, 1]} : vector<8x128xf32> to vector<1x128xf32>
    %209 = tpu.concatenate %206, %207, %208 in 0 : vector<1x128xf32>, vector<1x128xf32>, vector<1x128xf32> -> vector<3x128xf32>
    %c896_77 = arith.constant 896 : index
    %c0_78 = arith.constant 0 : index
    %210 = vector.load %arg4[%c896_77, %c0_78] : memref<2048x128xbf16, #tpu.memory_space<vmem>>, vector<128x128xbf16>
    %211 = arith.truncf %209 : vector<3x128xf32> to vector<3x128xbf16>
    %cst_79 = arith.constant dense<0.000000e+00> : vector<3x128xf32>
    %212 = tpu.matmul %211, %210, %cst_79 {dimension_numbers = #tpu.dot_dimension_numbers<[1], [0], [0], [1], [0, 0, 1, 1], [], []>} : vector<3x128xbf16>, vector<128x128xbf16>, vector<3x128xf32> -> vector<3x128xf32>
    %213 = arith.addf %205, %212 : vector<3x128xf32>
    %c32 = arith.constant 32 : index
    %c0_80 = arith.constant 0 : index
    %214 = vector.load %arg17[%c32, %c0_80] : memref<64x128xf32, #tpu.memory_space<vmem>>, vector<8x128xf32>
    %215 = vector.extract_strided_slice %214 {offsets = [0, 0], sizes = [1, 128], strides = [1, 1]} : vector<8x128xf32> to vector<1x128xf32>
    %216 = vector.extract_strided_slice %214 {offsets = [2, 0], sizes = [1, 128], strides = [1, 1]} : vector<8x128xf32> to vector<1x128xf32>
    %217 = vector.extract_strided_slice %214 {offsets = [4, 0], sizes = [1, 128], strides = [1, 1]} : vector<8x128xf32> to vector<1x128xf32>
    %218 = tpu.concatenate %215, %216, %217 in 0 : vector<1x128xf32>, vector<1x128xf32>, vector<1x128xf32> -> vector<3x128xf32>
    %c1024_81 = arith.constant 1024 : index
    %c0_82 = arith.constant 0 : index
    %219 = vector.load %arg4[%c1024_81, %c0_82] : memref<2048x128xbf16, #tpu.memory_space<vmem>>, vector<128x128xbf16>
    %220 = arith.truncf %218 : vector<3x128xf32> to vector<3x128xbf16>
    %cst_83 = arith.constant dense<0.000000e+00> : vector<3x128xf32>
    %221 = tpu.matmul %220, %219, %cst_83 {dimension_numbers = #tpu.dot_dimension_numbers<[1], [0], [0], [1], [0, 0, 1, 1], [], []>} : vector<3x128xbf16>, vector<128x128xbf16>, vector<3x128xf32> -> vector<3x128xf32>
    %222 = arith.addf %213, %221 : vector<3x128xf32>
    %223 = vector.extract_strided_slice %214 {offsets = [1, 0], sizes = [1, 128], strides = [1, 1]} : vector<8x128xf32> to vector<1x128xf32>
    %224 = vector.extract_strided_slice %214 {offsets = [3, 0], sizes = [1, 128], strides = [1, 1]} : vector<8x128xf32> to vector<1x128xf32>
    %225 = vector.extract_strided_slice %214 {offsets = [5, 0], sizes = [1, 128], strides = [1, 1]} : vector<8x128xf32> to vector<1x128xf32>
    %226 = tpu.concatenate %223, %224, %225 in 0 : vector<1x128xf32>, vector<1x128xf32>, vector<1x128xf32> -> vector<3x128xf32>
    %c1152_84 = arith.constant 1152 : index
    %c0_85 = arith.constant 0 : index
    %227 = vector.load %arg4[%c1152_84, %c0_85] : memref<2048x128xbf16, #tpu.memory_space<vmem>>, vector<128x128xbf16>
    %228 = arith.truncf %226 : vector<3x128xf32> to vector<3x128xbf16>
    %cst_86 = arith.constant dense<0.000000e+00> : vector<3x128xf32>
    %229 = tpu.matmul %228, %227, %cst_86 {dimension_numbers = #tpu.dot_dimension_numbers<[1], [0], [0], [1], [0, 0, 1, 1], [], []>} : vector<3x128xbf16>, vector<128x128xbf16>, vector<3x128xf32> -> vector<3x128xf32>
    %230 = arith.addf %222, %229 : vector<3x128xf32>
    %231 = vector.extract_strided_slice %214 {offsets = [2, 0], sizes = [1, 128], strides = [1, 1]} : vector<8x128xf32> to vector<1x128xf32>
    %232 = vector.extract_strided_slice %214 {offsets = [4, 0], sizes = [1, 128], strides = [1, 1]} : vector<8x128xf32> to vector<1x128xf32>
    %233 = vector.extract_strided_slice %214 {offsets = [6, 0], sizes = [1, 128], strides = [1, 1]} : vector<8x128xf32> to vector<1x128xf32>
    %234 = tpu.concatenate %231, %232, %233 in 0 : vector<1x128xf32>, vector<1x128xf32>, vector<1x128xf32> -> vector<3x128xf32>
    %c1280_87 = arith.constant 1280 : index
    %c0_88 = arith.constant 0 : index
    %235 = vector.load %arg4[%c1280_87, %c0_88] : memref<2048x128xbf16, #tpu.memory_space<vmem>>, vector<128x128xbf16>
    %236 = arith.truncf %234 : vector<3x128xf32> to vector<3x128xbf16>
    %cst_89 = arith.constant dense<0.000000e+00> : vector<3x128xf32>
    %237 = tpu.matmul %236, %235, %cst_89 {dimension_numbers = #tpu.dot_dimension_numbers<[1], [0], [0], [1], [0, 0, 1, 1], [], []>} : vector<3x128xbf16>, vector<128x128xbf16>, vector<3x128xf32> -> vector<3x128xf32>
    %238 = arith.addf %230, %237 : vector<3x128xf32>
    %239 = vector.extract_strided_slice %214 {offsets = [3, 0], sizes = [1, 128], strides = [1, 1]} : vector<8x128xf32> to vector<1x128xf32>
    %240 = vector.extract_strided_slice %214 {offsets = [5, 0], sizes = [1, 128], strides = [1, 1]} : vector<8x128xf32> to vector<1x128xf32>
    %241 = vector.extract_strided_slice %214 {offsets = [7, 0], sizes = [1, 128], strides = [1, 1]} : vector<8x128xf32> to vector<1x128xf32>
    %242 = tpu.concatenate %239, %240, %241 in 0 : vector<1x128xf32>, vector<1x128xf32>, vector<1x128xf32> -> vector<3x128xf32>
    %c1408_90 = arith.constant 1408 : index
    %c0_91 = arith.constant 0 : index
    %243 = vector.load %arg4[%c1408_90, %c0_91] : memref<2048x128xbf16, #tpu.memory_space<vmem>>, vector<128x128xbf16>
    %244 = arith.truncf %242 : vector<3x128xf32> to vector<3x128xbf16>
    %cst_92 = arith.constant dense<0.000000e+00> : vector<3x128xf32>
    %245 = tpu.matmul %244, %243, %cst_92 {dimension_numbers = #tpu.dot_dimension_numbers<[1], [0], [0], [1], [0, 0, 1, 1], [], []>} : vector<3x128xbf16>, vector<128x128xbf16>, vector<3x128xf32> -> vector<3x128xf32>
    %246 = arith.addf %238, %245 : vector<3x128xf32>
    %c40 = arith.constant 40 : index
    %c0_93 = arith.constant 0 : index
    %247 = vector.load %arg17[%c40, %c0_93] : memref<64x128xf32, #tpu.memory_space<vmem>>, vector<8x128xf32>
    %248 = vector.extract_strided_slice %247 {offsets = [0, 0], sizes = [1, 128], strides = [1, 1]} : vector<8x128xf32> to vector<1x128xf32>
    %249 = vector.extract_strided_slice %247 {offsets = [2, 0], sizes = [1, 128], strides = [1, 1]} : vector<8x128xf32> to vector<1x128xf32>
    %250 = vector.extract_strided_slice %247 {offsets = [4, 0], sizes = [1, 128], strides = [1, 1]} : vector<8x128xf32> to vector<1x128xf32>
    %251 = tpu.concatenate %248, %249, %250 in 0 : vector<1x128xf32>, vector<1x128xf32>, vector<1x128xf32> -> vector<3x128xf32>
    %c1536_94 = arith.constant 1536 : index
    %c0_95 = arith.constant 0 : index
    %252 = vector.load %arg4[%c1536_94, %c0_95] : memref<2048x128xbf16, #tpu.memory_space<vmem>>, vector<128x128xbf16>
    %253 = arith.truncf %251 : vector<3x128xf32> to vector<3x128xbf16>
    %cst_96 = arith.constant dense<0.000000e+00> : vector<3x128xf32>
    %254 = tpu.matmul %253, %252, %cst_96 {dimension_numbers = #tpu.dot_dimension_numbers<[1], [0], [0], [1], [0, 0, 1, 1], [], []>} : vector<3x128xbf16>, vector<128x128xbf16>, vector<3x128xf32> -> vector<3x128xf32>
    %255 = arith.addf %246, %254 : vector<3x128xf32>
    %256 = vector.extract_strided_slice %247 {offsets = [1, 0], sizes = [1, 128], strides = [1, 1]} : vector<8x128xf32> to vector<1x128xf32>
    %257 = vector.extract_strided_slice %247 {offsets = [3, 0], sizes = [1, 128], strides = [1, 1]} : vector<8x128xf32> to vector<1x128xf32>
    %258 = vector.extract_strided_slice %247 {offsets = [5, 0], sizes = [1, 128], strides = [1, 1]} : vector<8x128xf32> to vector<1x128xf32>
    %259 = tpu.concatenate %256, %257, %258 in 0 : vector<1x128xf32>, vector<1x128xf32>, vector<1x128xf32> -> vector<3x128xf32>
    %c1664_97 = arith.constant 1664 : index
    %c0_98 = arith.constant 0 : index
    %260 = vector.load %arg4[%c1664_97, %c0_98] : memref<2048x128xbf16, #tpu.memory_space<vmem>>, vector<128x128xbf16>
    %261 = arith.truncf %259 : vector<3x128xf32> to vector<3x128xbf16>
    %cst_99 = arith.constant dense<0.000000e+00> : vector<3x128xf32>
    %262 = tpu.matmul %261, %260, %cst_99 {dimension_numbers = #tpu.dot_dimension_numbers<[1], [0], [0], [1], [0, 0, 1, 1], [], []>} : vector<3x128xbf16>, vector<128x128xbf16>, vector<3x128xf32> -> vector<3x128xf32>
    %263 = arith.addf %255, %262 : vector<3x128xf32>
    %264 = vector.extract_strided_slice %247 {offsets = [2, 0], sizes = [1, 128], strides = [1, 1]} : vector<8x128xf32> to vector<1x128xf32>
    %265 = vector.extract_strided_slice %247 {offsets = [4, 0], sizes = [1, 128], strides = [1, 1]} : vector<8x128xf32> to vector<1x128xf32>
    %266 = vector.extract_strided_slice %247 {offsets = [6, 0], sizes = [1, 128], strides = [1, 1]} : vector<8x128xf32> to vector<1x128xf32>
    %267 = tpu.concatenate %264, %265, %266 in 0 : vector<1x128xf32>, vector<1x128xf32>, vector<1x128xf32> -> vector<3x128xf32>
    %c1792_100 = arith.constant 1792 : index
    %c0_101 = arith.constant 0 : index
    %268 = vector.load %arg4[%c1792_100, %c0_101] : memref<2048x128xbf16, #tpu.memory_space<vmem>>, vector<128x128xbf16>
    %269 = arith.truncf %267 : vector<3x128xf32> to vector<3x128xbf16>
    %cst_102 = arith.constant dense<0.000000e+00> : vector<3x128xf32>
    %270 = tpu.matmul %269, %268, %cst_102 {dimension_numbers = #tpu.dot_dimension_numbers<[1], [0], [0], [1], [0, 0, 1, 1], [], []>} : vector<3x128xbf16>, vector<128x128xbf16>, vector<3x128xf32> -> vector<3x128xf32>
    %271 = arith.addf %263, %270 : vector<3x128xf32>
    %272 = vector.extract_strided_slice %247 {offsets = [3, 0], sizes = [1, 128], strides = [1, 1]} : vector<8x128xf32> to vector<1x128xf32>
    %273 = vector.extract_strided_slice %247 {offsets = [5, 0], sizes = [1, 128], strides = [1, 1]} : vector<8x128xf32> to vector<1x128xf32>
    %274 = vector.extract_strided_slice %247 {offsets = [7, 0], sizes = [1, 128], strides = [1, 1]} : vector<8x128xf32> to vector<1x128xf32>
    %275 = tpu.concatenate %272, %273, %274 in 0 : vector<1x128xf32>, vector<1x128xf32>, vector<1x128xf32> -> vector<3x128xf32>
    %c1920_103 = arith.constant 1920 : index
    %c0_104 = arith.constant 0 : index
    %276 = vector.load %arg4[%c1920_103, %c0_104] : memref<2048x128xbf16, #tpu.memory_space<vmem>>, vector<128x128xbf16>
    %277 = arith.truncf %275 : vector<3x128xf32> to vector<3x128xbf16>
    %cst_105 = arith.constant dense<0.000000e+00> : vector<3x128xf32>
    %278 = tpu.matmul %277, %276, %cst_105 {dimension_numbers = #tpu.dot_dimension_numbers<[1], [0], [0], [1], [0, 0, 1, 1], [], []>} : vector<3x128xbf16>, vector<128x128xbf16>, vector<3x128xf32> -> vector<3x128xf32>
    %279 = arith.addf %271, %278 : vector<3x128xf32>
    %cst_106 = arith.constant 0.000000e+00 : f32
    %280 = vector.broadcast %cst_106 : f32 to vector<3x128xf32>
    %281 = arith.maximumf %279, %280 : vector<3x128xf32>
    %c3 = arith.constant 3 : index
    %c0_107 = arith.constant 0 : index
    %282 = vector.load %arg18[%c3, %c0_107] : memref<16x128xf32, #tpu.memory_space<vmem>>, vector<3x128xf32>
    tpu.vector_store %arg18[%c3, %c0_107], %281 {strides = array<i32>} : memref<16x128xf32, #tpu.memory_space<vmem>>, vector<3x128xf32>,
    %c32_108 = arith.constant 32 : index
    %c0_109 = arith.constant 0 : index
    %283 = vector.load %arg17[%c32_108, %c0_109] : memref<64x128xf32, #tpu.memory_space<vmem>>, vector<8x128xf32>
    %284 = vector.extract_strided_slice %283 {offsets = [0, 0], sizes = [1, 128], strides = [1, 1]} : vector<8x128xf32> to vector<1x128xf32>
    %285 = vector.extract_strided_slice %283 {offsets = [2, 0], sizes = [1, 128], strides = [1, 1]} : vector<8x128xf32> to vector<1x128xf32>
    %286 = vector.extract_strided_slice %283 {offsets = [4, 0], sizes = [1, 128], strides = [1, 1]} : vector<8x128xf32> to vector<1x128xf32>
    %287 = tpu.concatenate %284, %285, %286 in 0 : vector<1x128xf32>, vector<1x128xf32>, vector<1x128xf32> -> vector<3x128xf32>
    %c0_110 = arith.constant 0 : index
    %c0_111 = arith.constant 0 : index
    %288 = vector.load %arg4[%c0_110, %c0_111] : memref<2048x128xbf16, #tpu.memory_space<vmem>>, vector<128x128xbf16>
    %289 = arith.truncf %287 : vector<3x128xf32> to vector<3x128xbf16>
    %cst_112 = arith.constant dense<0.000000e+00> : vector<3x128xf32>
    %290 = tpu.matmul %289, %288, %cst_112 {dimension_numbers = #tpu.dot_dimension_numbers<[1], [0], [0], [1], [0, 0, 1, 1], [], []>} : vector<3x128xbf16>, vector<128x128xbf16>, vector<3x128xf32> -> vector<3x128xf32>
    %291 = arith.addf %12, %290 : vector<3x128xf32>
    %292 = vector.extract_strided_slice %283 {offsets = [1, 0], sizes = [1, 128], strides = [1, 1]} : vector<8x128xf32> to vector<1x128xf32>
    %293 = vector.extract_strided_slice %283 {offsets = [3, 0], sizes = [1, 128], strides = [1, 1]} : vector<8x128xf32> to vector<1x128xf32>
    %294 = vector.extract_strided_slice %283 {offsets = [5, 0], sizes = [1, 128], strides = [1, 1]} : vector<8x128xf32> to vector<1x128xf32>
    %295 = tpu.concatenate %292, %293, %294 in 0 : vector<1x128xf32>, vector<1x128xf32>, vector<1x128xf32> -> vector<3x128xf32>
    %c128_113 = arith.constant 128 : index
    %c0_114 = arith.constant 0 : index
    %296 = vector.load %arg4[%c128_113, %c0_114] : memref<2048x128xbf16, #tpu.memory_space<vmem>>, vector<128x128xbf16>
    %297 = arith.truncf %295 : vector<3x128xf32> to vector<3x128xbf16>
    %cst_115 = arith.constant dense<0.000000e+00> : vector<3x128xf32>
    %298 = tpu.matmul %297, %296, %cst_115 {dimension_numbers = #tpu.dot_dimension_numbers<[1], [0], [0], [1], [0, 0, 1, 1], [], []>} : vector<3x128xbf16>, vector<128x128xbf16>, vector<3x128xf32> -> vector<3x128xf32>
    %299 = arith.addf %291, %298 : vector<3x128xf32>
    %300 = vector.extract_strided_slice %283 {offsets = [2, 0], sizes = [1, 128], strides = [1, 1]} : vector<8x128xf32> to vector<1x128xf32>
    %301 = vector.extract_strided_slice %283 {offsets = [4, 0], sizes = [1, 128], strides = [1, 1]} : vector<8x128xf32> to vector<1x128xf32>
    %302 = vector.extract_strided_slice %283 {offsets = [6, 0], sizes = [1, 128], strides = [1, 1]} : vector<8x128xf32> to vector<1x128xf32>
    %303 = tpu.concatenate %300, %301, %302 in 0 : vector<1x128xf32>, vector<1x128xf32>, vector<1x128xf32> -> vector<3x128xf32>
    %c256_116 = arith.constant 256 : index
    %c0_117 = arith.constant 0 : index
    %304 = vector.load %arg4[%c256_116, %c0_117] : memref<2048x128xbf16, #tpu.memory_space<vmem>>, vector<128x128xbf16>
    %305 = arith.truncf %303 : vector<3x128xf32> to vector<3x128xbf16>
    %cst_118 = arith.constant dense<0.000000e+00> : vector<3x128xf32>
    %306 = tpu.matmul %305, %304, %cst_118 {dimension_numbers = #tpu.dot_dimension_numbers<[1], [0], [0], [1], [0, 0, 1, 1], [], []>} : vector<3x128xbf16>, vector<128x128xbf16>, vector<3x128xf32> -> vector<3x128xf32>
    %307 = arith.addf %299, %306 : vector<3x128xf32>
    %308 = vector.extract_strided_slice %283 {offsets = [3, 0], sizes = [1, 128], strides = [1, 1]} : vector<8x128xf32> to vector<1x128xf32>
    %309 = vector.extract_strided_slice %283 {offsets = [5, 0], sizes = [1, 128], strides = [1, 1]} : vector<8x128xf32> to vector<1x128xf32>
    %310 = vector.extract_strided_slice %283 {offsets = [7, 0], sizes = [1, 128], strides = [1, 1]} : vector<8x128xf32> to vector<1x128xf32>
    %311 = tpu.concatenate %308, %309, %310 in 0 : vector<1x128xf32>, vector<1x128xf32>, vector<1x128xf32> -> vector<3x128xf32>
    %c384_119 = arith.constant 384 : index
    %c0_120 = arith.constant 0 : index
    %312 = vector.load %arg4[%c384_119, %c0_120] : memref<2048x128xbf16, #tpu.memory_space<vmem>>, vector<128x128xbf16>
    %313 = arith.truncf %311 : vector<3x128xf32> to vector<3x128xbf16>
    %cst_121 = arith.constant dense<0.000000e+00> : vector<3x128xf32>
    %314 = tpu.matmul %313, %312, %cst_121 {dimension_numbers = #tpu.dot_dimension_numbers<[1], [0], [0], [1], [0, 0, 1, 1], [], []>} : vector<3x128xbf16>, vector<128x128xbf16>, vector<3x128xf32> -> vector<3x128xf32>
    %315 = arith.addf %307, %314 : vector<3x128xf32>
    %c40_122 = arith.constant 40 : index
    %c0_123 = arith.constant 0 : index
    %316 = vector.load %arg17[%c40_122, %c0_123] : memref<64x128xf32, #tpu.memory_space<vmem>>, vector<8x128xf32>
    %317 = vector.extract_strided_slice %316 {offsets = [0, 0], sizes = [1, 128], strides = [1, 1]} : vector<8x128xf32> to vector<1x128xf32>
    %318 = vector.extract_strided_slice %316 {offsets = [2, 0], sizes = [1, 128], strides = [1, 1]} : vector<8x128xf32> to vector<1x128xf32>
    %319 = vector.extract_strided_slice %316 {offsets = [4, 0], sizes = [1, 128], strides = [1, 1]} : vector<8x128xf32> to vector<1x128xf32>
    %320 = tpu.concatenate %317, %318, %319 in 0 : vector<1x128xf32>, vector<1x128xf32>, vector<1x128xf32> -> vector<3x128xf32>
    %c512_124 = arith.constant 512 : index
    %c0_125 = arith.constant 0 : index
    %321 = vector.load %arg4[%c512_124, %c0_125] : memref<2048x128xbf16, #tpu.memory_space<vmem>>, vector<128x128xbf16>
    %322 = arith.truncf %320 : vector<3x128xf32> to vector<3x128xbf16>
    %cst_126 = arith.constant dense<0.000000e+00> : vector<3x128xf32>
    %323 = tpu.matmul %322, %321, %cst_126 {dimension_numbers = #tpu.dot_dimension_numbers<[1], [0], [0], [1], [0, 0, 1, 1], [], []>} : vector<3x128xbf16>, vector<128x128xbf16>, vector<3x128xf32> -> vector<3x128xf32>
    %324 = arith.addf %315, %323 : vector<3x128xf32>
    %325 = vector.extract_strided_slice %316 {offsets = [1, 0], sizes = [1, 128], strides = [1, 1]} : vector<8x128xf32> to vector<1x128xf32>
    %326 = vector.extract_strided_slice %316 {offsets = [3, 0], sizes = [1, 128], strides = [1, 1]} : vector<8x128xf32> to vector<1x128xf32>
    %327 = vector.extract_strided_slice %316 {offsets = [5, 0], sizes = [1, 128], strides = [1, 1]} : vector<8x128xf32> to vector<1x128xf32>
    %328 = tpu.concatenate %325, %326, %327 in 0 : vector<1x128xf32>, vector<1x128xf32>, vector<1x128xf32> -> vector<3x128xf32>
    %c640_127 = arith.constant 640 : index
    %c0_128 = arith.constant 0 : index
    %329 = vector.load %arg4[%c640_127, %c0_128] : memref<2048x128xbf16, #tpu.memory_space<vmem>>, vector<128x128xbf16>
    %330 = arith.truncf %328 : vector<3x128xf32> to vector<3x128xbf16>
    %cst_129 = arith.constant dense<0.000000e+00> : vector<3x128xf32>
    %331 = tpu.matmul %330, %329, %cst_129 {dimension_numbers = #tpu.dot_dimension_numbers<[1], [0], [0], [1], [0, 0, 1, 1], [], []>} : vector<3x128xbf16>, vector<128x128xbf16>, vector<3x128xf32> -> vector<3x128xf32>
    %332 = arith.addf %324, %331 : vector<3x128xf32>
    %333 = vector.extract_strided_slice %316 {offsets = [2, 0], sizes = [1, 128], strides = [1, 1]} : vector<8x128xf32> to vector<1x128xf32>
    %334 = vector.extract_strided_slice %316 {offsets = [4, 0], sizes = [1, 128], strides = [1, 1]} : vector<8x128xf32> to vector<1x128xf32>
    %335 = vector.extract_strided_slice %316 {offsets = [6, 0], sizes = [1, 128], strides = [1, 1]} : vector<8x128xf32> to vector<1x128xf32>
    %336 = tpu.concatenate %333, %334, %335 in 0 : vector<1x128xf32>, vector<1x128xf32>, vector<1x128xf32> -> vector<3x128xf32>
    %c768_130 = arith.constant 768 : index
    %c0_131 = arith.constant 0 : index
    %337 = vector.load %arg4[%c768_130, %c0_131] : memref<2048x128xbf16, #tpu.memory_space<vmem>>, vector<128x128xbf16>
    %338 = arith.truncf %336 : vector<3x128xf32> to vector<3x128xbf16>
    %cst_132 = arith.constant dense<0.000000e+00> : vector<3x128xf32>
    %339 = tpu.matmul %338, %337, %cst_132 {dimension_numbers = #tpu.dot_dimension_numbers<[1], [0], [0], [1], [0, 0, 1, 1], [], []>} : vector<3x128xbf16>, vector<128x128xbf16>, vector<3x128xf32> -> vector<3x128xf32>
    %340 = arith.addf %332, %339 : vector<3x128xf32>
    %341 = vector.extract_strided_slice %316 {offsets = [3, 0], sizes = [1, 128], strides = [1, 1]} : vector<8x128xf32> to vector<1x128xf32>
    %342 = vector.extract_strided_slice %316 {offsets = [5, 0], sizes = [1, 128], strides = [1, 1]} : vector<8x128xf32> to vector<1x128xf32>
    %343 = vector.extract_strided_slice %316 {offsets = [7, 0], sizes = [1, 128], strides = [1, 1]} : vector<8x128xf32> to vector<1x128xf32>
    %344 = tpu.concatenate %341, %342, %343 in 0 : vector<1x128xf32>, vector<1x128xf32>, vector<1x128xf32> -> vector<3x128xf32>
    %c896_133 = arith.constant 896 : index
    %c0_134 = arith.constant 0 : index
    %345 = vector.load %arg4[%c896_133, %c0_134] : memref<2048x128xbf16, #tpu.memory_space<vmem>>, vector<128x128xbf16>
    %346 = arith.truncf %344 : vector<3x128xf32> to vector<3x128xbf16>
    %cst_135 = arith.constant dense<0.000000e+00> : vector<3x128xf32>
    %347 = tpu.matmul %346, %345, %cst_135 {dimension_numbers = #tpu.dot_dimension_numbers<[1], [0], [0], [1], [0, 0, 1, 1], [], []>} : vector<3x128xbf16>, vector<128x128xbf16>, vector<3x128xf32> -> vector<3x128xf32>
    %348 = arith.addf %340, %347 : vector<3x128xf32>
    %c48 = arith.constant 48 : index
    %c0_136 = arith.constant 0 : index
    %349 = vector.load %arg17[%c48, %c0_136] : memref<64x128xf32, #tpu.memory_space<vmem>>, vector<8x128xf32>
    %350 = vector.extract_strided_slice %349 {offsets = [0, 0], sizes = [1, 128], strides = [1, 1]} : vector<8x128xf32> to vector<1x128xf32>
    %351 = vector.extract_strided_slice %349 {offsets = [2, 0], sizes = [1, 128], strides = [1, 1]} : vector<8x128xf32> to vector<1x128xf32>
    %352 = vector.extract_strided_slice %349 {offsets = [4, 0], sizes = [1, 128], strides = [1, 1]} : vector<8x128xf32> to vector<1x128xf32>
    %353 = tpu.concatenate %350, %351, %352 in 0 : vector<1x128xf32>, vector<1x128xf32>, vector<1x128xf32> -> vector<3x128xf32>
    %c1024_137 = arith.constant 1024 : index
    %c0_138 = arith.constant 0 : index
    %354 = vector.load %arg4[%c1024_137, %c0_138] : memref<2048x128xbf16, #tpu.memory_space<vmem>>, vector<128x128xbf16>
    %355 = arith.truncf %353 : vector<3x128xf32> to vector<3x128xbf16>
    %cst_139 = arith.constant dense<0.000000e+00> : vector<3x128xf32>
    %356 = tpu.matmul %355, %354, %cst_139 {dimension_numbers = #tpu.dot_dimension_numbers<[1], [0], [0], [1], [0, 0, 1, 1], [], []>} : vector<3x128xbf16>, vector<128x128xbf16>, vector<3x128xf32> -> vector<3x128xf32>
    %357 = arith.addf %348, %356 : vector<3x128xf32>
    %358 = vector.extract_strided_slice %349 {offsets = [1, 0], sizes = [1, 128], strides = [1, 1]} : vector<8x128xf32> to vector<1x128xf32>
    %359 = vector.extract_strided_slice %349 {offsets = [3, 0], sizes = [1, 128], strides = [1, 1]} : vector<8x128xf32> to vector<1x128xf32>
    %360 = vector.extract_strided_slice %349 {offsets = [5, 0], sizes = [1, 128], strides = [1, 1]} : vector<8x128xf32> to vector<1x128xf32>
    %361 = tpu.concatenate %358, %359, %360 in 0 : vector<1x128xf32>, vector<1x128xf32>, vector<1x128xf32> -> vector<3x128xf32>
    %c1152_140 = arith.constant 1152 : index
    %c0_141 = arith.constant 0 : index
    %362 = vector.load %arg4[%c1152_140, %c0_141] : memref<2048x128xbf16, #tpu.memory_space<vmem>>, vector<128x128xbf16>
    %363 = arith.truncf %361 : vector<3x128xf32> to vector<3x128xbf16>
    %cst_142 = arith.constant dense<0.000000e+00> : vector<3x128xf32>
    %364 = tpu.matmul %363, %362, %cst_142 {dimension_numbers = #tpu.dot_dimension_numbers<[1], [0], [0], [1], [0, 0, 1, 1], [], []>} : vector<3x128xbf16>, vector<128x128xbf16>, vector<3x128xf32> -> vector<3x128xf32>
    %365 = arith.addf %357, %364 : vector<3x128xf32>
    %366 = vector.extract_strided_slice %349 {offsets = [2, 0], sizes = [1, 128], strides = [1, 1]} : vector<8x128xf32> to vector<1x128xf32>
    %367 = vector.extract_strided_slice %349 {offsets = [4, 0], sizes = [1, 128], strides = [1, 1]} : vector<8x128xf32> to vector<1x128xf32>
    %368 = vector.extract_strided_slice %349 {offsets = [6, 0], sizes = [1, 128], strides = [1, 1]} : vector<8x128xf32> to vector<1x128xf32>
    %369 = tpu.concatenate %366, %367, %368 in 0 : vector<1x128xf32>, vector<1x128xf32>, vector<1x128xf32> -> vector<3x128xf32>
    %c1280_143 = arith.constant 1280 : index
    %c0_144 = arith.constant 0 : index
    %370 = vector.load %arg4[%c1280_143, %c0_144] : memref<2048x128xbf16, #tpu.memory_space<vmem>>, vector<128x128xbf16>
    %371 = arith.truncf %369 : vector<3x128xf32> to vector<3x128xbf16>
    %cst_145 = arith.constant dense<0.000000e+00> : vector<3x128xf32>
    %372 = tpu.matmul %371, %370, %cst_145 {dimension_numbers = #tpu.dot_dimension_numbers<[1], [0], [0], [1], [0, 0, 1, 1], [], []>} : vector<3x128xbf16>, vector<128x128xbf16>, vector<3x128xf32> -> vector<3x128xf32>
    %373 = arith.addf %365, %372 : vector<3x128xf32>
    %374 = vector.extract_strided_slice %349 {offsets = [3, 0], sizes = [1, 128], strides = [1, 1]} : vector<8x128xf32> to vector<1x128xf32>
    %375 = vector.extract_strided_slice %349 {offsets = [5, 0], sizes = [1, 128], strides = [1, 1]} : vector<8x128xf32> to vector<1x128xf32>
    %376 = vector.extract_strided_slice %349 {offsets = [7, 0], sizes = [1, 128], strides = [1, 1]} : vector<8x128xf32> to vector<1x128xf32>
    %377 = tpu.concatenate %374, %375, %376 in 0 : vector<1x128xf32>, vector<1x128xf32>, vector<1x128xf32> -> vector<3x128xf32>
    %c1408_146 = arith.constant 1408 : index
    %c0_147 = arith.constant 0 : index
    %378 = vector.load %arg4[%c1408_146, %c0_147] : memref<2048x128xbf16, #tpu.memory_space<vmem>>, vector<128x128xbf16>
    %379 = arith.truncf %377 : vector<3x128xf32> to vector<3x128xbf16>
    %cst_148 = arith.constant dense<0.000000e+00> : vector<3x128xf32>
    %380 = tpu.matmul %379, %378, %cst_148 {dimension_numbers = #tpu.dot_dimension_numbers<[1], [0], [0], [1], [0, 0, 1, 1], [], []>} : vector<3x128xbf16>, vector<128x128xbf16>, vector<3x128xf32> -> vector<3x128xf32>
    %381 = arith.addf %373, %380 : vector<3x128xf32>
    %c56 = arith.constant 56 : index
    %c0_149 = arith.constant 0 : index
    %382 = vector.load %arg17[%c56, %c0_149] : memref<64x128xf32, #tpu.memory_space<vmem>>, vector<8x128xf32>
    %383 = vector.extract_strided_slice %382 {offsets = [0, 0], sizes = [1, 128], strides = [1, 1]} : vector<8x128xf32> to vector<1x128xf32>
    %384 = vector.extract_strided_slice %382 {offsets = [2, 0], sizes = [1, 128], strides = [1, 1]} : vector<8x128xf32> to vector<1x128xf32>
    %385 = vector.extract_strided_slice %382 {offsets = [4, 0], sizes = [1, 128], strides = [1, 1]} : vector<8x128xf32> to vector<1x128xf32>
    %386 = tpu.concatenate %383, %384, %385 in 0 : vector<1x128xf32>, vector<1x128xf32>, vector<1x128xf32> -> vector<3x128xf32>
    %c1536_150 = arith.constant 1536 : index
    %c0_151 = arith.constant 0 : index
    %387 = vector.load %arg4[%c1536_150, %c0_151] : memref<2048x128xbf16, #tpu.memory_space<vmem>>, vector<128x128xbf16>
    %388 = arith.truncf %386 : vector<3x128xf32> to vector<3x128xbf16>
    %cst_152 = arith.constant dense<0.000000e+00> : vector<3x128xf32>
    %389 = tpu.matmul %388, %387, %cst_152 {dimension_numbers = #tpu.dot_dimension_numbers<[1], [0], [0], [1], [0, 0, 1, 1], [], []>} : vector<3x128xbf16>, vector<128x128xbf16>, vector<3x128xf32> -> vector<3x128xf32>
    %390 = arith.addf %381, %389 : vector<3x128xf32>
    %391 = vector.extract_strided_slice %382 {offsets = [1, 0], sizes = [1, 128], strides = [1, 1]} : vector<8x128xf32> to vector<1x128xf32>
    %392 = vector.extract_strided_slice %382 {offsets = [3, 0], sizes = [1, 128], strides = [1, 1]} : vector<8x128xf32> to vector<1x128xf32>
    %393 = vector.extract_strided_slice %382 {offsets = [5, 0], sizes = [1, 128], strides = [1, 1]} : vector<8x128xf32> to vector<1x128xf32>
    %394 = tpu.concatenate %391, %392, %393 in 0 : vector<1x128xf32>, vector<1x128xf32>, vector<1x128xf32> -> vector<3x128xf32>
    %c1664_153 = arith.constant 1664 : index
    %c0_154 = arith.constant 0 : index
    %395 = vector.load %arg4[%c1664_153, %c0_154] : memref<2048x128xbf16, #tpu.memory_space<vmem>>, vector<128x128xbf16>
    %396 = arith.truncf %394 : vector<3x128xf32> to vector<3x128xbf16>
    %cst_155 = arith.constant dense<0.000000e+00> : vector<3x128xf32>
    %397 = tpu.matmul %396, %395, %cst_155 {dimension_numbers = #tpu.dot_dimension_numbers<[1], [0], [0], [1], [0, 0, 1, 1], [], []>} : vector<3x128xbf16>, vector<128x128xbf16>, vector<3x128xf32> -> vector<3x128xf32>
    %398 = arith.addf %390, %397 : vector<3x128xf32>
    %399 = vector.extract_strided_slice %382 {offsets = [2, 0], sizes = [1, 128], strides = [1, 1]} : vector<8x128xf32> to vector<1x128xf32>
    %400 = vector.extract_strided_slice %382 {offsets = [4, 0], sizes = [1, 128], strides = [1, 1]} : vector<8x128xf32> to vector<1x128xf32>
    %401 = vector.extract_strided_slice %382 {offsets = [6, 0], sizes = [1, 128], strides = [1, 1]} : vector<8x128xf32> to vector<1x128xf32>
    %402 = tpu.concatenate %399, %400, %401 in 0 : vector<1x128xf32>, vector<1x128xf32>, vector<1x128xf32> -> vector<3x128xf32>
    %c1792_156 = arith.constant 1792 : index
    %c0_157 = arith.constant 0 : index
    %403 = vector.load %arg4[%c1792_156, %c0_157] : memref<2048x128xbf16, #tpu.memory_space<vmem>>, vector<128x128xbf16>
    %404 = arith.truncf %402 : vector<3x128xf32> to vector<3x128xbf16>
    %cst_158 = arith.constant dense<0.000000e+00> : vector<3x128xf32>
    %405 = tpu.matmul %404, %403, %cst_158 {dimension_numbers = #tpu.dot_dimension_numbers<[1], [0], [0], [1], [0, 0, 1, 1], [], []>} : vector<3x128xbf16>, vector<128x128xbf16>, vector<3x128xf32> -> vector<3x128xf32>
    %406 = arith.addf %398, %405 : vector<3x128xf32>
    %407 = vector.extract_strided_slice %382 {offsets = [3, 0], sizes = [1, 128], strides = [1, 1]} : vector<8x128xf32> to vector<1x128xf32>
    %408 = vector.extract_strided_slice %382 {offsets = [5, 0], sizes = [1, 128], strides = [1, 1]} : vector<8x128xf32> to vector<1x128xf32>
    %409 = vector.extract_strided_slice %382 {offsets = [7, 0], sizes = [1, 128], strides = [1, 1]} : vector<8x128xf32> to vector<1x128xf32>
    %410 = tpu.concatenate %407, %408, %409 in 0 : vector<1x128xf32>, vector<1x128xf32>, vector<1x128xf32> -> vector<3x128xf32>
    %c1920_159 = arith.constant 1920 : index
    %c0_160 = arith.constant 0 : index
    %411 = vector.load %arg4[%c1920_159, %c0_160] : memref<2048x128xbf16, #tpu.memory_space<vmem>>, vector<128x128xbf16>
    %412 = arith.truncf %410 : vector<3x128xf32> to vector<3x128xbf16>
    %cst_161 = arith.constant dense<0.000000e+00> : vector<3x128xf32>
    %413 = tpu.matmul %412, %411, %cst_161 {dimension_numbers = #tpu.dot_dimension_numbers<[1], [0], [0], [1], [0, 0, 1, 1], [], []>} : vector<3x128xbf16>, vector<128x128xbf16>, vector<3x128xf32> -> vector<3x128xf32>
    %414 = arith.addf %406, %413 : vector<3x128xf32>
    %cst_162 = arith.constant 0.000000e+00 : f32
    %415 = vector.broadcast %cst_162 : f32 to vector<3x128xf32>
    %416 = arith.maximumf %414, %415 : vector<3x128xf32>
    %c6 = arith.constant 6 : index
    %c0_163 = arith.constant 0 : index
    %417 = vector.load %arg18[%c6, %c0_163] : memref<16x128xf32, #tpu.memory_space<vmem>>, vector<3x128xf32>
    tpu.vector_store %arg18[%c6, %c0_163], %416 {strides = array<i32>} : memref<16x128xf32, #tpu.memory_space<vmem>>, vector<3x128xf32>,
    %c0_164 = arith.constant 0 : index
    %c0_165 = arith.constant 0 : index
    %418 = vector.load %arg7[%c0_164, %c0_165] : memref<1x128xf32, #tpu.memory_space<vmem>>, vector<1x128xf32>
    %c0_166 = arith.constant 0 : index
    %c0_167 = arith.constant 0 : index
    %419 = vector.load %arg18[%c0_166, %c0_167] : memref<16x128xf32, #tpu.memory_space<vmem>>, vector<3x128xf32>
    %420 = vector.extract_strided_slice %419 {offsets = [0, 0], sizes = [1, 128], strides = [1, 1]} : vector<3x128xf32> to vector<1x128xf32>
    %c0_168 = arith.constant 0 : index
    %c0_169 = arith.constant 0 : index
    %421 = vector.load %arg6[%c0_168, %c0_169] : memref<1152x128xbf16, #tpu.memory_space<vmem>>, vector<128x128xbf16>
    %422 = arith.truncf %420 : vector<1x128xf32> to vector<1x128xbf16>
    %cst_170 = arith.constant dense<0.000000e+00> : vector<1x128xf32>
    %423 = tpu.matmul %422, %421, %cst_170 {dimension_numbers = #tpu.dot_dimension_numbers<[1], [0], [0], [1], [0, 0, 1, 1], [], []>} : vector<1x128xbf16>, vector<128x128xbf16>, vector<1x128xf32> -> vector<1x128xf32>
    %424 = arith.addf %418, %423 : vector<1x128xf32>
    %425 = vector.extract_strided_slice %419 {offsets = [1, 0], sizes = [1, 128], strides = [1, 1]} : vector<3x128xf32> to vector<1x128xf32>
    %c128_171 = arith.constant 128 : index
    %c0_172 = arith.constant 0 : index
    %426 = vector.load %arg6[%c128_171, %c0_172] : memref<1152x128xbf16, #tpu.memory_space<vmem>>, vector<128x128xbf16>
    %427 = arith.truncf %425 : vector<1x128xf32> to vector<1x128xbf16>
    %cst_173 = arith.constant dense<0.000000e+00> : vector<1x128xf32>
    %428 = tpu.matmul %427, %426, %cst_173 {dimension_numbers = #tpu.dot_dimension_numbers<[1], [0], [0], [1], [0, 0, 1, 1], [], []>} : vector<1x128xbf16>, vector<128x128xbf16>, vector<1x128xf32> -> vector<1x128xf32>
    %429 = arith.addf %424, %428 : vector<1x128xf32>
    %430 = vector.extract_strided_slice %419 {offsets = [2, 0], sizes = [1, 128], strides = [1, 1]} : vector<3x128xf32> to vector<1x128xf32>
    %c256_174 = arith.constant 256 : index
    %c0_175 = arith.constant 0 : index
    %431 = vector.load %arg6[%c256_174, %c0_175] : memref<1152x128xbf16, #tpu.memory_space<vmem>>, vector<128x128xbf16>
    %432 = arith.truncf %430 : vector<1x128xf32> to vector<1x128xbf16>
    %cst_176 = arith.constant dense<0.000000e+00> : vector<1x128xf32>
    %433 = tpu.matmul %432, %431, %cst_176 {dimension_numbers = #tpu.dot_dimension_numbers<[1], [0], [0], [1], [0, 0, 1, 1], [], []>} : vector<1x128xbf16>, vector<128x128xbf16>, vector<1x128xf32> -> vector<1x128xf32>
    %434 = arith.addf %429, %433 : vector<1x128xf32>
    %c3_177 = arith.constant 3 : index
    %c0_178 = arith.constant 0 : index
    %435 = vector.load %arg18[%c3_177, %c0_178] : memref<16x128xf32, #tpu.memory_space<vmem>>, vector<3x128xf32>
    %436 = vector.extract_strided_slice %435 {offsets = [0, 0], sizes = [1, 128], strides = [1, 1]} : vector<3x128xf32> to vector<1x128xf32>
    %c384_179 = arith.constant 384 : index
    %c0_180 = arith.constant 0 : index
    %437 = vector.load %arg6[%c384_179, %c0_180] : memref<1152x128xbf16, #tpu.memory_space<vmem>>, vector<128x128xbf16>
    %438 = arith.truncf %436 : vector<1x128xf32> to vector<1x128xbf16>
    %cst_181 = arith.constant dense<0.000000e+00> : vector<1x128xf32>
    %439 = tpu.matmul %438, %437, %cst_181 {dimension_numbers = #tpu.dot_dimension_numbers<[1], [0], [0], [1], [0, 0, 1, 1], [], []>} : vector<1x128xbf16>, vector<128x128xbf16>, vector<1x128xf32> -> vector<1x128xf32>
    %440 = arith.addf %434, %439 : vector<1x128xf32>
    %441 = vector.extract_strided_slice %435 {offsets = [1, 0], sizes = [1, 128], strides = [1, 1]} : vector<3x128xf32> to vector<1x128xf32>
    %c512_182 = arith.constant 512 : index
    %c0_183 = arith.constant 0 : index
    %442 = vector.load %arg6[%c512_182, %c0_183] : memref<1152x128xbf16, #tpu.memory_space<vmem>>, vector<128x128xbf16>
    %443 = arith.truncf %441 : vector<1x128xf32> to vector<1x128xbf16>
    %cst_184 = arith.constant dense<0.000000e+00> : vector<1x128xf32>
    %444 = tpu.matmul %443, %442, %cst_184 {dimension_numbers = #tpu.dot_dimension_numbers<[1], [0], [0], [1], [0, 0, 1, 1], [], []>} : vector<1x128xbf16>, vector<128x128xbf16>, vector<1x128xf32> -> vector<1x128xf32>
    %445 = arith.addf %440, %444 : vector<1x128xf32>
    %446 = vector.extract_strided_slice %435 {offsets = [2, 0], sizes = [1, 128], strides = [1, 1]} : vector<3x128xf32> to vector<1x128xf32>
    %c640_185 = arith.constant 640 : index
    %c0_186 = arith.constant 0 : index
    %447 = vector.load %arg6[%c640_185, %c0_186] : memref<1152x128xbf16, #tpu.memory_space<vmem>>, vector<128x128xbf16>
    %448 = arith.truncf %446 : vector<1x128xf32> to vector<1x128xbf16>
    %cst_187 = arith.constant dense<0.000000e+00> : vector<1x128xf32>
    %449 = tpu.matmul %448, %447, %cst_187 {dimension_numbers = #tpu.dot_dimension_numbers<[1], [0], [0], [1], [0, 0, 1, 1], [], []>} : vector<1x128xbf16>, vector<128x128xbf16>, vector<1x128xf32> -> vector<1x128xf32>
    %450 = arith.addf %445, %449 : vector<1x128xf32>
    %c6_188 = arith.constant 6 : index
    %c0_189 = arith.constant 0 : index
    %451 = vector.load %arg18[%c6_188, %c0_189] : memref<16x128xf32, #tpu.memory_space<vmem>>, vector<3x128xf32>
    %452 = vector.extract_strided_slice %451 {offsets = [0, 0], sizes = [1, 128], strides = [1, 1]} : vector<3x128xf32> to vector<1x128xf32>
    %c768_190 = arith.constant 768 : index
    %c0_191 = arith.constant 0 : index
    %453 = vector.load %arg6[%c768_190, %c0_191] : memref<1152x128xbf16, #tpu.memory_space<vmem>>, vector<128x128xbf16>
    %454 = arith.truncf %452 : vector<1x128xf32> to vector<1x128xbf16>
    %cst_192 = arith.constant dense<0.000000e+00> : vector<1x128xf32>
    %455 = tpu.matmul %454, %453, %cst_192 {dimension_numbers = #tpu.dot_dimension_numbers<[1], [0], [0], [1], [0, 0, 1, 1], [], []>} : vector<1x128xbf16>, vector<128x128xbf16>, vector<1x128xf32> -> vector<1x128xf32>
    %456 = arith.addf %450, %455 : vector<1x128xf32>
    %457 = vector.extract_strided_slice %451 {offsets = [1, 0], sizes = [1, 128], strides = [1, 1]} : vector<3x128xf32> to vector<1x128xf32>
    %c896_193 = arith.constant 896 : index
    %c0_194 = arith.constant 0 : index
    %458 = vector.load %arg6[%c896_193, %c0_194] : memref<1152x128xbf16, #tpu.memory_space<vmem>>, vector<128x128xbf16>
    %459 = arith.truncf %457 : vector<1x128xf32> to vector<1x128xbf16>
    %cst_195 = arith.constant dense<0.000000e+00> : vector<1x128xf32>
    %460 = tpu.matmul %459, %458, %cst_195 {dimension_numbers = #tpu.dot_dimension_numbers<[1], [0], [0], [1], [0, 0, 1, 1], [], []>} : vector<1x128xbf16>, vector<128x128xbf16>, vector<1x128xf32> -> vector<1x128xf32>
    %461 = arith.addf %456, %460 : vector<1x128xf32>
    %462 = vector.extract_strided_slice %451 {offsets = [2, 0], sizes = [1, 128], strides = [1, 1]} : vector<3x128xf32> to vector<1x128xf32>
    %c1024_196 = arith.constant 1024 : index
    %c0_197 = arith.constant 0 : index
    %463 = vector.load %arg6[%c1024_196, %c0_197] : memref<1152x128xbf16, #tpu.memory_space<vmem>>, vector<128x128xbf16>
    %464 = arith.truncf %462 : vector<1x128xf32> to vector<1x128xbf16>
    %cst_198 = arith.constant dense<0.000000e+00> : vector<1x128xf32>
    %465 = tpu.matmul %464, %463, %cst_198 {dimension_numbers = #tpu.dot_dimension_numbers<[1], [0], [0], [1], [0, 0, 1, 1], [], []>} : vector<1x128xbf16>, vector<128x128xbf16>, vector<1x128xf32> -> vector<1x128xf32>
    %466 = arith.addf %461, %465 : vector<1x128xf32>
    %cst_199 = arith.constant 0.000000e+00 : f32
    %467 = vector.broadcast %cst_199 : f32 to vector<1x128xf32>
    %468 = arith.maximumf %466, %467 : vector<1x128xf32>
    %c0_200 = arith.constant 0 : index
    %c0_201 = arith.constant 0 : index
    %469 = vector.load %arg19[%c0_200, %c0_201] : memref<8x128xf32, #tpu.memory_space<vmem>>, vector<1x128xf32>
    tpu.vector_store %arg19[%c0_200, %c0_201], %468 {strides = array<i32>} : memref<8x128xf32, #tpu.memory_space<vmem>>, vector<1x128xf32>,
    %c0_202 = arith.constant 0 : index
    %c0_203 = arith.constant 0 : index
    %470 = vector.load %arg9[%c0_202, %c0_203] : memref<1x512xf32, #tpu.memory_space<vmem>>, vector<1x512xf32>
    %c0_204 = arith.constant 0 : index
    %c0_205 = arith.constant 0 : index
    %471 = vector.load %arg19[%c0_204, %c0_205] : memref<8x128xf32, #tpu.memory_space<vmem>>, vector<1x128xf32>
    %472 = arith.truncf %471 : vector<1x128xf32> to vector<1x128xbf16>
    %c0_206 = arith.constant 0 : index
    %c0_207 = arith.constant 0 : index
    %473 = vector.load %arg8[%c0_206, %c0_207] : memref<128x512xbf16, #tpu.memory_space<vmem>>, vector<128x512xbf16>
    %cst_208 = arith.constant dense<0.000000e+00> : vector<1x512xf32>
    %474 = tpu.matmul %472, %473, %cst_208 {dimension_numbers = #tpu.dot_dimension_numbers<[1], [0], [0], [1], [0, 0, 1, 1], [], []>} : vector<1x128xbf16>, vector<128x512xbf16>, vector<1x512xf32> -> vector<1x512xf32>
    %475 = arith.addf %470, %474 : vector<1x512xf32>
    %cst_209 = arith.constant 0.000000e+00 : f32
    %476 = vector.broadcast %cst_209 : f32 to vector<1x512xf32>
    %477 = arith.maximumf %475, %476 : vector<1x512xf32>
    %478 = arith.truncf %477 : vector<1x512xf32> to vector<1x512xbf16>
    %c0_210 = arith.constant 0 : index
    %c0_211 = arith.constant 0 : index
    %479 = vector.load %arg10[%c0_210, %c0_211] : memref<512x256xbf16, #tpu.memory_space<vmem>>, vector<512x256xbf16>
    %cst_212 = arith.constant dense<0.000000e+00> : vector<1x256xf32>
    %480 = tpu.matmul %478, %479, %cst_212 {dimension_numbers = #tpu.dot_dimension_numbers<[1], [0], [0], [1], [0, 0, 1, 1], [], []>} : vector<1x512xbf16>, vector<512x256xbf16>, vector<1x256xf32> -> vector<1x256xf32>
    %c0_213 = arith.constant 0 : index
    %c0_214 = arith.constant 0 : index
    %481 = vector.load %arg11[%c0_213, %c0_214] : memref<1x256xf32, #tpu.memory_space<vmem>>, vector<1x256xf32>
    %482 = arith.addf %480, %481 : vector<1x256xf32>
    %cst_215 = arith.constant 0.000000e+00 : f32
    %483 = vector.broadcast %cst_215 : f32 to vector<1x256xf32>
    %484 = arith.maximumf %482, %483 : vector<1x256xf32>
    %485 = arith.truncf %484 : vector<1x256xf32> to vector<1x256xbf16>
    %c0_216 = arith.constant 0 : index
    %c0_217 = arith.constant 0 : index
    %486 = vector.load %arg12[%c0_216, %c0_217] : memref<256x512xbf16, #tpu.memory_space<vmem>>, vector<256x512xbf16>
    %cst_218 = arith.constant dense<0.000000e+00> : vector<1x512xf32>
    %487 = tpu.matmul %485, %486, %cst_218 {dimension_numbers = #tpu.dot_dimension_numbers<[1], [0], [0], [1], [0, 0, 1, 1], [], []>} : vector<1x256xbf16>, vector<256x512xbf16>, vector<1x512xf32> -> vector<1x512xf32>
    %c0_219 = arith.constant 0 : index
    %c0_220 = arith.constant 0 : index
    %488 = vector.load %arg13[%c0_219, %c0_220] : memref<1x512xf32, #tpu.memory_space<vmem>>, vector<1x512xf32>
    %489 = arith.addf %487, %488 : vector<1x512xf32>
    %cst_221 = arith.constant 0.000000e+00 : f32
    %490 = vector.broadcast %cst_221 : f32 to vector<1x512xf32>
    %491 = arith.maximumf %489, %490 : vector<1x512xf32>
    %492 = arith.truncf %491 : vector<1x512xf32> to vector<1x512xbf16>
    %c0_222 = arith.constant 0 : index
    %c0_223 = arith.constant 0 : index
    %493 = vector.load %arg14[%c0_222, %c0_223] : memref<512x128xbf16, #tpu.memory_space<vmem>>, vector<512x128xbf16>
    %cst_224 = arith.constant dense<0.000000e+00> : vector<1x128xf32>
    %494 = tpu.matmul %492, %493, %cst_224 {dimension_numbers = #tpu.dot_dimension_numbers<[1], [0], [0], [1], [0, 0, 1, 1], [], []>} : vector<1x512xbf16>, vector<512x128xbf16>, vector<1x128xf32> -> vector<1x128xf32>
    %c0_225 = arith.constant 0 : index
    %c0_226 = arith.constant 0 : index
    %495 = vector.load %arg15[%c0_225, %c0_226] : memref<1x128xf32, #tpu.memory_space<vmem>>, vector<1x128xf32>
    %496 = arith.addf %494, %495 : vector<1x128xf32>
    %497 = vector.shape_cast %496 : vector<1x128xf32> to vector<1x128xf32>
    %498 = vector.broadcast %497 : vector<1x128xf32> to vector<8x128xf32>
    %c0_227 = arith.constant 0 : index
    %c0_228 = arith.constant 0 : index
    %c0_229 = arith.constant 0 : index
    %499 = vector.load %arg16[%c0_227, %c0_228, %c0_229] : memref<1x8x128xf32, #tpu.memory_space<vmem>>, vector<1x8x128xf32>
    %500 = vector.shape_cast %499 : vector<1x8x128xf32> to vector<8x128xf32>
    %501 = vector.shape_cast %498 : vector<8x128xf32> to vector<1x8x128xf32>
    tpu.vector_store %arg16[%c0_227, %c0_228, %c0_229], %501 {strides = array<i32>} : memref<1x8x128xf32, #tpu.memory_space<vmem>>, vector<1x8x128xf32>,
    return
  }
  func.func @transform_0(%arg0: i32) -> (i32, i32, i32) {
    %c0_i32 = arith.constant 0 : i32
    %c0_i32_0 = arith.constant 0 : i32
    %c0_i32_1 = arith.constant 0 : i32
    return %arg0, %c0_i32, %c0_i32_0 : i32, i32, i32
  }
  func.func @transform_1(%arg0: i32) -> (i32, i32) {
    %c0_i32 = arith.constant 0 : i32
    %c0_i32_0 = arith.constant 0 : i32
    %c0_i32_1 = arith.constant 0 : i32
    return %c0_i32, %c0_i32_0 : i32, i32
  }
  func.func @transform_2(%arg0: i32) -> (i32, i32) {
    %c0_i32 = arith.constant 0 : i32
    %c0_i32_0 = arith.constant 0 : i32
    %c0_i32_1 = arith.constant 0 : i32
    return %c0_i32, %c0_i32_0 : i32, i32
  }
  func.func @transform_3(%arg0: i32) -> (i32, i32) {
    %c0_i32 = arith.constant 0 : i32
    %c0_i32_0 = arith.constant 0 : i32
    %c0_i32_1 = arith.constant 0 : i32
    return %c0_i32, %c0_i32_0 : i32, i32
  }
  func.func @transform_4(%arg0: i32) -> (i32, i32) {
    %c0_i32 = arith.constant 0 : i32
    %c0_i32_0 = arith.constant 0 : i32
    %c0_i32_1 = arith.constant 0 : i32
    return %c0_i32, %c0_i32_0 : i32, i32
  }
  func.func @transform_5(%arg0: i32) -> (i32, i32) {
    %c0_i32 = arith.constant 0 : i32
    %c0_i32_0 = arith.constant 0 : i32
    %c0_i32_1 = arith.constant 0 : i32
    return %c0_i32, %c0_i32_0 : i32, i32
  }
  func.func @transform_6(%arg0: i32) -> (i32, i32) {
    %c0_i32 = arith.constant 0 : i32
    %c0_i32_0 = arith.constant 0 : i32
    %c0_i32_1 = arith.constant 0 : i32
    return %c0_i32, %c0_i32_0 : i32, i32
  }
  func.func @transform_7(%arg0: i32) -> (i32, i32) {
    %c0_i32 = arith.constant 0 : i32
    %c0_i32_0 = arith.constant 0 : i32
    %c0_i32_1 = arith.constant 0 : i32
    return %c0_i32, %c0_i32_0 : i32, i32
  }
  func.func @transform_8(%arg0: i32) -> (i32, i32) {
    %c0_i32 = arith.constant 0 : i32
    %c0_i32_0 = arith.constant 0 : i32
    %c0_i32_1 = arith.constant 0 : i32
    return %c0_i32, %c0_i32_0 : i32, i32
  }
  func.func @transform_9(%arg0: i32) -> (i32, i32) {
    %c0_i32 = arith.constant 0 : i32
    %c0_i32_0 = arith.constant 0 : i32
    %c0_i32_1 = arith.constant 0 : i32
    return %c0_i32, %c0_i32_0 : i32, i32
  }
  func.func @transform_10(%arg0: i32) -> (i32, i32) {
    %c0_i32 = arith.constant 0 : i32
    %c0_i32_0 = arith.constant 0 : i32
    %c0_i32_1 = arith.constant 0 : i32
    return %c0_i32, %c0_i32_0 : i32, i32
  }
  func.func @transform_11(%arg0: i32) -> (i32, i32) {
    %c0_i32 = arith.constant 0 : i32
    %c0_i32_0 = arith.constant 0 : i32
    %c0_i32_1 = arith.constant 0 : i32
    return %c0_i32, %c0_i32_0 : i32, i32
  }
  func.func @transform_12(%arg0: i32) -> (i32, i32) {
    %c0_i32 = arith.constant 0 : i32
    %c0_i32_0 = arith.constant 0 : i32
    %c0_i32_1 = arith.constant 0 : i32
    return %c0_i32, %c0_i32_0 : i32, i32
  }
  func.func @transform_13(%arg0: i32) -> (i32, i32) {
    %c0_i32 = arith.constant 0 : i32
    %c0_i32_0 = arith.constant 0 : i32
    %c0_i32_1 = arith.constant 0 : i32
    return %c0_i32, %c0_i32_0 : i32, i32
  }
  func.func @transform_14(%arg0: i32) -> (i32, i32) {
    %c0_i32 = arith.constant 0 : i32
    %c0_i32_0 = arith.constant 0 : i32
    %c0_i32_1 = arith.constant 0 : i32
    return %c0_i32, %c0_i32_0 : i32, i32
  }
  func.func @transform_15(%arg0: i32) -> (i32, i32, i32) {
    %c0_i32 = arith.constant 0 : i32
    %c0_i32_0 = arith.constant 0 : i32
    %c0_i32_1 = arith.constant 0 : i32
    return %arg0, %c0_i32, %c0_i32_0 : i32, i32, i32
  }
}

</mosaic_0001>

<bundles_post_ra>
// kernel: dqn_forward.1
= control target key start
LH: loop header
LB: loop body
LE: loop exit
PB: predicated region body
PF: predicated region fallthrough
CT: control target
= control target key end

     0   :  { %s12288_s18 = smov 0   ;;  %s15308_s0 = inlined_call_operand.vmem [shape: bf16[2,64,256], index: 0, kind: input, shape index: {}]   ;;  %s15309_s1 = inlined_call_operand.vmem [shape: bf16[256,128], index: 1, kind: input, shape index: {}]   ;;  %s15310_s2 = inlined_call_operand.vmem [shape: f32[1,128], index: 2, kind: input, shape index: {}]   ;;  %s15311_s3 = inlined_call_operand.vmem [shape: bf16[2048,128], index: 3, kind: input, shape index: {}]   ;;  %s15312_s4 = inlined_call_operand.vmem [shape: f32[1,128], index: 4, kind: input, shape index: {}]   ;;  %s15313_s5 = inlined_call_operand.vmem [shape: bf16[1152,128], index: 5, kind: input, shape index: {}]   ;;  %s15314_s6 = inlined_call_operand.vmem [shape: f32[1,128], index: 6, kind: input, shape index: {}]   ;;  %s15315_s7 = inlined_call_operand.vmem [shape: bf16[128,512], index: 7, kind: input, shape index: {}]   ;;  %s15316_s8 = inlined_call_operand.vmem [shape: f32[1,512], index: 8, kind: input, shape index: {}]   ;;  %s15317_s9 = inlined_call_operand.vmem [shape: bf16[512,256], index: 9, kind: input, shape index: {}]   ;;  %s15318_s10 = inlined_call_operand.vmem [shape: f32[1,256], index: 10, kind: input, shape index: {}]   ;;  %s15319_s11 = inlined_call_operand.vmem [shape: bf16[256,512], index: 11, kind: input, shape index: {}]   ;;  %s15320_s12 = inlined_call_operand.vmem [shape: f32[1,512], index: 12, kind: input, shape index: {}]   ;;  %s15321_s13 = inlined_call_operand.vmem [shape: bf16[512,128], index: 13, kind: input, shape index: {}]   ;;  %s15322_s14 = inlined_call_operand.vmem [shape: f32[1,128], index: 14, kind: input, shape index: {}]   ;;  %s15323_s15 = inlined_call_operand.vmem [shape: f32[2,8,128], index: 15, kind: output, shape index: {}]  }
   0x1 LB: > { %s8782_s19 = sadd.s32 4294967295, %s12202_s18   ;;  %p8786_p0 = scmp.ge.s32.totalorder %s12202_s18, 1  ;;  %s12202_s18 = sphi %s12288_s18, %s25_s18  }
   0x2   : > { %p437_p1 = scmp.lt.s32.totalorder %s12202_s18, 3 }
   0x4   : > { %p438_p2 = pnand %p8786_p0, %p437_p1 }
   0x5   : > { %v11438_v0 = vld [vmem:[%s15309_s1 + $0x40] sm:$0xff] (!%p438_p2)   ;;  %v11440_v2 = vld [vmem:[%s15309_s1 + $0x48] sm:$0xff] (!%p438_p2)   ;;  %v12204_v3 = vmov (!%p438_p2), 0.0   ;;  %p484_p3 = scmp.lt.s32.totalorder (!%p438_p2), %s8782_s19, 1  ;;  %v11442_v5 = vld [vmem:[%s15309_s1 + $0x50] sm:$0xff] (!%p438_p2)   ;;  %vm12205_vm0 = vmmov (!%p438_p2), 0  }
   0x6   : > { %441 = sbr.rel (%p438_p2) target bundleno = 2759 (0xac7), region = 80  ;;  %v11439_v1 = vld [vmem:[%s15309_s1] sm:$0xff] (!%p438_p2)   ;;  %9467 = vmatprep.subr.bf16.mxu0 (!%p438_p2), %v11438_v0  ;;  %10064 = vmatprep.subr.bf16.mxu1 (!%p438_p2), %v12204_v3  ;;  %v11441_v4 = vld [vmem:[%s15309_s1 + $0x8] sm:$0xff] (!%p438_p2)   ;;  %v11443_v6 = vld [vmem:[%s15309_s1 + $0x10] sm:$0xff] (!%p438_p2)   ;;  %vm771_vm1 = vcmask (!%p438_p2), 1040384   ;;  %vm773_vm2 = vcmask (!%p438_p2), 1041408  }
   0x7   : > { %9468 = vmatpush3.bf16.msra.mxu0 (!%p438_p2), %v11439_v1  ;;  %v11444_v7 = vld [vmem:[%s15309_s1 + $0x58] sm:$0xff] (!%p438_p2)   ;;  %v11446_v9 = vld [vmem:[%s15309_s1 + $0x60] sm:$0xff] (!%p438_p2)   ;;  %v11448_v11 = vld [vmem:[%s15309_s1 + $0x68] sm:$0xff] (!%p438_p2)   ;;  %10080 = vmatprep.mubr.msk.bf16.mxu1 (!%p438_p2), %vm12205_vm0, %v12204_v3 }
   0x8   : > { %9469 = vmatprep.subr.bf16.mxu0 (!%p438_p2), %v11440_v2  ;;  %v11445_v8 = vld [vmem:[%s15309_s1 + $0x18] sm:$0xff] (!%p438_p2)   ;;  %v11447_v10 = vld [vmem:[%s15309_s1 + $0x20] sm:$0xff] (!%p438_p2)   ;;  %v11449_v13 = vld [vmem:[%s15309_s1 + $0x28] sm:$0xff] (!%p438_p2)  }
   0x9   : > { %v11460_v14 = vld [vmem:[%s15311_s3] sm:$0xff] (!%p438_p2)   ;;  %v11450_v15 = vld [vmem:[%s15309_s1 + $0x70] sm:$0xff] (!%p438_p2)   ;;  %v11461_v16 = vld [vmem:[%s15311_s3 + $0x8] sm:$0xff] (!%p438_p2)  }
   0xa   : > { %10065 = vmatpush3.bf16.msra.mxu1 (!%p438_p2), %v11460_v14  ;;  %v11451_v17 = vld [vmem:[%s15309_s1 + $0x30] sm:$0xff] (!%p438_p2)   ;;  %v11452_v18 = vld [vmem:[%s15309_s1 + $0x78] sm:$0xff] (!%p438_p2)   ;;  %v11463_v24 = vld [vmem:[%s15311_s3] sm:$0xff] (!%p438_p2)  }
   0xb   : > { %9470 = vmatpush3.bf16.msra.mxu0 (!%p438_p2), %v11441_v4  ;;  %10066 = vmatprep.subr.bf16.mxu1 (!%p438_p2), %v12204_v3  ;;  %v11462_v19 = vld [vmem:[%s15311_s3 + $0x10] sm:$0xff] (!%p438_p2)   ;;  %v11453_v20 = vld [vmem:[%s15309_s1 + $0x38] sm:$0xff] (!%p438_p2)   ;;  %v11466_v25 = vld [vmem:[%s15311_s3 + $0x20] sm:$0xff] (!%p438_p2)  }
   0xc   : > { %9471 = vmatprep.subr.bf16.mxu0 (!%p438_p2), %v11442_v5  ;;  %v11464_v21 = vld [vmem:[%s15311_s3 + $0x18] sm:$0xff] (!%p438_p2)   ;;  %v11465_v26 = vld [vmem:[%s15311_s3 + $0x8] sm:$0xff] (!%p438_p2)   ;;  %v11467_v28 = vld [vmem:[%s15311_s3 + $0x10] sm:$0xff] (!%p438_p2)  }
   0xd   : > { %s15325_s19 = smov (!%p484_p3, %s8782_s19), 1  ;;  %v11468_v29 = vld [vmem:[%s15311_s3 + $0x28] sm:$0xff]   ;;  %v11469_v30 = vld [vmem:[%s15311_s3 + $0x18] sm:$0xff]   ;;  %v11473_v33 = vld [vmem:[%s15311_s3 + $0x30] sm:$0xff]  }
   0xe   : > { %s9466_s23 = sshll.u32 %s15325_s19, 6  ;;  %10067 = vmatpush3.bf16.msra.mxu1 %v11461_v16  ;;  %v11474_v34 = vld [vmem:[%s15311_s3 + $0x20] sm:$0xff]   ;;  %v11475_v35 = vld [vmem:[%s15311_s3 + $0x38] sm:$0xff]   ;;  %v11476_v36 = vld [vmem:[%s15311_s3 + $0x28] sm:$0xff]   ;;  %s8789_s21 = sshll.u32 %s15325_s19, 3 }
   0xf   : > { %9472 = vmatpush3.bf16.msra.mxu0 %v11443_v6  ;;  %s12330_s28 = scalar_lea.vmem %s15308_s0, %s9466_s23  ;;  %10068 = vmatprep.subr.bf16.mxu1 %v12204_v3  ;;  %v11481_v39 = vld [vmem:[%s15311_s3 + $0x30] sm:$0xff]   ;;  %v11483_v40 = vld [vmem:[%s15311_s3 + $0x38] sm:$0xff]   ;;  %v8790_v41 = vld [vmem:[%s15310_s2] ss:$0 sm:$0xff]  ;;  %s492_s24 = scalar_lea.vmem %s15323_s15, %s8789_s21 }
  0x10   : > { %9473 = vmatprep.subr.bf16.mxu0 %v11444_v7  ;;  %v11456_v12 = vld [vmem:[%s12330_s28 + $0x4] ss:$8 sps:$4 sm:$0xff]   ;;  %v11454_v22 = vld [vmem:[%s12330_s28] ss:$8 sps:$4 sm:$0xff]   ;;  %v11457_v23 = vld [vmem:[%s12330_s28 + $0x14] ss:$8 sps:$4 sm:$0xff]  }
  0x11   : > { %709 = vmatprep.mubr.bf16.mxu0 %v11456_v12  ;;  %v11459_v27 = vld [vmem:[%s12330_s28 + $0x10] ss:$8 sps:$4 sm:$0xff]   ;;  %v11470_v31 = vld [vmem:[%s12330_s28 + $0x24] ss:$8 sps:$4 sm:$0xff]   ;;  %v11472_v32 = vld [vmem:[%s12330_s28 + $0x20] ss:$8 sps:$4 sm:$0xff]  }
  0x12   : > { %10069 = vmatpush3.bf16.msra.mxu1 %v11462_v19  ;;  %v11477_v37 = vld [vmem:[%s12330_s28 + $0x34] ss:$8 sps:$4 sm:$0xff]   ;;  %v11479_v38 = vld [vmem:[%s12330_s28 + $0x30] ss:$8 sps:$4 sm:$0xff]   ;;  %v11480_v56 = vld [vmem:[%s15311_s3 + $0x40] sm:$0xff]  }
  0x13   : > { %9474 = vmatpush3.bf16.msra.mxu0 %v11445_v8  ;;  %10070 = vmatprep.subr.bf16.mxu1 %v12204_v3 }
  0x14   : > { %9475 = vmatprep.subr.bf16.mxu0 %v11446_v9 }
  0x16   : > { %10071 = vmatpush3.bf16.msra.mxu1 %v11464_v21 }
  0x17   : > { %9476 = vmatpush3.bf16.msra.mxu0 %v11447_v10  ;;  %10072 = vmatprep.subr.bf16.mxu1 %v12204_v3  ;;  %v11482_v10 = vld [vmem:[%s15311_s3 + $0x48] sm:$0xff]  }
  0x18   : > { %9477 = vmatprep.subr.bf16.mxu0 %v11448_v11 }
  0x1a   : > { %10073 = vmatpush3.bf16.msra.mxu1 %v11466_v25  ;;  %v11485_v25 = vld [vmem:[%s15311_s3 + $0x40] sm:$0xff]  }
  0x1b   : > { %9478 = vmatpush3.bf16.msra.mxu0 %v11449_v13  ;;  %10074 = vmatprep.subr.bf16.mxu1 %v12204_v3 }
  0x1c   : > { %9479 = vmatprep.subr.bf16.mxu0 %v11450_v15 }
  0x1e   : > { %10075 = vmatpush3.bf16.msra.mxu1 %v11468_v29  ;;  %v11486_v29 = vld [vmem:[%s15311_s3 + $0x58] sm:$0xff]  }
  0x1f   : > { %9480 = vmatpush3.bf16.msra.mxu0 %v11451_v17  ;;  %10076 = vmatprep.subr.bf16.mxu1 %v12204_v3 }
  0x20   : > { %9481 = vmatprep.subr.bf16.mxu0 %v11452_v18  ;;  %v11484_v18 = vld [vmem:[%s15311_s3 + $0x50] sm:$0xff]  }
  0x22   : > { %10077 = vmatpush3.bf16.msra.mxu1 %v11473_v33 }
  0x23   : > { %9482 = vmatpush3.bf16.msra.mxu0 %v11453_v20  ;;  %10078 = vmatprep.subr.bf16.mxu1 %v12204_v3 }
  0x24   : > { %10384 = vmatprep.subr.bf16.mxu0 %v12204_v3 }
  0x26   : > { %710 = vmatmul.mubr.bf16.vlgmr.msra.gmra.mrb[0].mxu0 %v11454_v22  ;;  %10079 = vmatpush3.bf16.msra.mxu1 %v11475_v35  ;;  %v11488_v35 = vld [vmem:[%s15311_s3 + $0x60] sm:$0xff]  }
  0x27   : > { %717 = vmatprep.mubr.bf16.mxu0 %v11457_v23  ;;  %10385 = vmatpush3.bf16.msra.mxu0 %v11463_v24 }
  0x28   : > { %10386 = vmatprep.subr.bf16.mxu0 %v12204_v3  ;;  %10084 = vmatprep.subr.bf16.mxu1 %v12204_v3 }
  0x2b   : > { %10387 = vmatpush3.bf16.msra.mxu0 %v11465_v26 }
  0x2c   : > { %10388 = vmatprep.subr.bf16.mxu0 %v12204_v3 }
  0x2e   : > { %718 = vmatmul.mubr.bf16.gmra.mrb[4].mxu0 %v11459_v27 }
  0x2f   : > { %10389 = vmatpush3.bf16.msra.mxu0 %v11467_v28  ;;  %725 = vmatprep.mubr.bf16.mxu0 %v11470_v31 }
  0x30   : > { %10390 = vmatprep.subr.bf16.mxu0 %v12204_v3 }
  0x33   : > { %10391 = vmatpush3.bf16.msra.mxu0 %v11469_v30 }
  0x34   : > { %10392 = vmatprep.subr.bf16.mxu0 %v12204_v3 }
  0x36   : > { %726 = vmatmul.mubr.bf16.gmra.mrb[8].mxu0 %v11472_v32 }
  0x37   : > { %10393 = vmatpush3.bf16.msra.mxu0 %v11474_v34  ;;  %733 = vmatprep.mubr.bf16.mxu0 %v11477_v37  ;;  %v11487_v34 = vld [vmem:[%s15311_s3 + $0x48] sm:$0xff]  }
  0x38   : > { %10394 = vmatprep.subr.bf16.mxu0 %v12204_v3  ;;  %v11490_v37 = vld [vmem:[%s15311_s3 + $0x68] sm:$0xff]  }
  0x3b   : > { %10395 = vmatpush3.bf16.msra.mxu0 %v11476_v36  ;;  %v11489_v36 = vld [vmem:[%s15311_s3 + $0x50] sm:$0xff]  }
  0x3c   : > { %10396 = vmatprep.subr.bf16.mxu0 %v12204_v3 }
  0x3e   : > { %734 = vmatmul.mubr.bf16.gmra.mrb[12].mxu0 %v11479_v38  ;;  %v11491_v38 = vld [vmem:[%s15311_s3 + $0x58] sm:$0xff]  }
  0x3f   : > { %10397 = vmatpush3.bf16.msra.mxu0 %v11481_v39  ;;  %10400 = vmatprep.mubr.msk.bf16.mxu0 %vm12205_vm0, %v12204_v3  ;;  %v11492_v39 = vld [vmem:[%s15311_s3 + $0x70] sm:$0xff]  }
  0x40   : > { %10398 = vmatprep.subr.bf16.mxu0 %v12204_v3 }
  0x43   : > { %10399 = vmatpush3.bf16.msra.mxu0 %v11483_v40  ;;  %v11493_v40 = vld [vmem:[%s15311_s3 + $0x60] sm:$0xff]  }
  0x44   : > { %10404 = vmatprep.subr.bf16.mxu0 %v12204_v3 }
  0xf9   : > { %v9483_v42 = vpop.f32.mrb[0].mxu0 }
  0xfa   : > { %v9484_v43 = vpop.f32.mrb[1].mxu0 }
  0xfb   : > { %v9485_v44 = vadd.f32 %v9484_v43, %v9483_v42  ;;  %v9486_v45 = vpop.f32.mrb[2].mxu0  ;;  %v11495_v43 = vld [vmem:[%s15311_s3 + $0x68] sm:$0xff]  }
  0xfc   : > { %v9487_v46 = vpop.f32.mrb[3].mxu0 }
  0xfd   : > { %v712_v47 = vadd.f32 %v9485_v44, %v8790_v41  ;;  %v9488_v48 = vadd.f32 %v9487_v46, %v9486_v45  ;;  %v11496_v45 = vld [vmem:[%s15311_s3 + $0x80] sm:$0xff]   ;;  %v11497_v46 = vld [vmem:[%s15311_s3 + $0x70] sm:$0xff]  }
  0xff   : > { %v12433_v49 = vmax.f32 %v712_v47, 0.0  ;;  %v715_v50 = vadd.f32 %v9488_v48, %v8790_v41 }
 0x101   : > { %v9489_v51 = vpop.f32.mrb[4].mxu0  ;;  %v767_v52 = vrot.slane %v12433_v49, 1  ;;  %v12437_v53 = vrot.slane %v12433_v49, 2  ;;  %v12440_v54 = vrot.slane %v12433_v49, 3  ;;  %v991_v57 = vrot.slane %v12433_v49, 4 }
 0x102   : > { %v9490_v55 = vpop.f32.mrb[5].mxu0  ;;  %v1101_v58 = vrot.slane %v12433_v49, 5  ;;  %v12447_v59 = vmax.f32 %v715_v50, 0.0  ;;  %v11499_v50 = vld [vmem:[%s15311_s3 + $0x78] sm:$0xff]  }
 0x103   : > { %v9491_v60 = vadd.f32 %v9490_v55, %v9489_v51  ;;  %v772_v61 = vsel %vm771_vm1, %v12433_v49, %v767_v52  ;;  %v993_v62 = vsel %vm771_vm1, %v12437_v53, %v12440_v54  ;;  %v9492_v63 = vpop.f32.mrb[6].mxu0  ;;  %v1103_v2 = vsel %vm771_vm1, %v12440_v54, %v991_v57  ;;  %v11498_v49 = vld [vmem:[%s15311_s3 + $0x88] sm:$0xff]   ;;  %v11502_v55 = vld [vmem:[%s15311_s3 + $0x98] sm:$0xff]  }
 0x104   : > { %v774_v0 = vsel %vm773_vm2, %v772_v61, %v12437_v53  ;;  %v12459_v1 = vsel %vm773_vm2, %v993_v62, %v991_v57  ;;  %v9493_v4 = vpop.f32.mrb[7].mxu0  ;;  %v12464_v7 = vsel %vm773_vm2, %v1103_v2, %v1101_v58  ;;  %v12474_v11 = vrot.slane %v12447_v59, 2  ;;  %v11504_v57 = vld [vmem:[%s15311_s3 + $0xa0] sm:$0xff]   ;;  %v11505_v58 = vld [vmem:[%s15311_s3 + $0x90] sm:$0xff]   ;;  %v11507_v61 = vld [vmem:[%s15311_s3 + $0x98] sm:$0xff]  }
 0x105   : > { %v720_v5 = vadd.f32 %v9491_v60, %v8790_v41  ;;  %v791_v6 = vpack.c.bf16 %v774_v0, %v774_v0  ;;  %v12466_v8 = vadd.f32 %v9493_v4, %v9492_v63  ;;  %v12479_v12 = vrot.slane %v12447_v59, 3  ;;  %v11494_v41 = vld [vmem:[%s15311_s3 + $0x78] sm:$0xff]   ;;  %v11506_v60 = vld [vmem:[%s15311_s3 + $0xa8] sm:$0xff]   ;;  %v11508_v62 = vld [vmem:[%s15311_s3 + $0xb0] sm:$0xff]  }
 0x106   : > { %v1435_v13 = vrot.slane %v12447_v59, 4  ;;  %v1545_v20 = vrot.slane %v12447_v59, 5  ;;  %v883_v42 = vsel %vm771_vm1, %v767_v52, %v12437_v53  ;;  %v11500_v52 = vld [vmem:[%s15311_s3 + $0x90] sm:$0xff]   ;;  %v11509_v63 = vld [vmem:[%s15311_s3 + $0xa0] sm:$0xff]   ;;  %v11510_v0 = vld [vmem:[%s15311_s3 + $0xb8] sm:$0xff]  }
 0x107   : > { %v12468_v9 = vmax.f32 %v720_v5, 0.0  ;;  %10081 = vmatmul.mubr.bf16.vlgmr.msra.gmra.mrb[0].mxu1 %v791_v6  ;;  %v1437_v30 = vsel %vm771_vm1, %v12474_v11, %v12479_v12  ;;  %v884_v44 = vsel %vm773_vm2, %v883_v42, %v12440_v54  ;;  %v11501_v54 = vld [vmem:[%s15311_s3 + $0x80] sm:$0xff]   ;;  %v11511_v2 = vld [vmem:[%s15311_s3 + $0xa8] sm:$0xff]   ;;  %v11513_v5 = vld [vmem:[%s15311_s3 + $0xb0] sm:$0xff]   ;;  %v1011_v6 = vpack.c.bf16 %v12459_v1, %v12459_v1 }
 0x108   : > { %10085 = vmatpush3.bf16.msra.mxu1 %v11480_v56  ;;  %10100 = vmatprep.mubr.msk.bf16.mxu1 %vm12205_vm0, %v12204_v3  ;;  %v1547_v31 = vsel %vm771_vm1, %v12479_v12, %v1435_v13  ;;  %v12525_v32 = vsel %vm773_vm2, %v1437_v30, %v1435_v13  ;;  %v901_v47 = vpack.c.bf16 %v884_v44, %v884_v44  ;;  %v11503_v56 = vld [vmem:[%s15311_s3 + $0x88] sm:$0xff]   ;;  %v11512_v4 = vld [vmem:[%s15311_s3 + $0xc0] sm:$0xff]   ;;  %v11516_v1 = vld [vmem:[%s15311_s3 + $0xd0] sm:$0xff]  }
 0x109   : > { %10086 = vmatprep.subr.bf16.mxu1 %v12204_v3  ;;  %v1657_v14 = vrot.slane %v12468_v9, 1  ;;  %v1659_v15 = vrot.slane %v12468_v9, 2  ;;  %v12486_v16 = vrot.slane %v12468_v9, 3  ;;  %v1879_v17 = vrot.slane %v12468_v9, 4  ;;  %v11530_v30 = vld [vmem:[%s15311_s3 + $0x108] sm:$0xff]   ;;  %v11540_v44 = vld [vmem:[%s15311_s3 + $0x130] sm:$0xff]  }
 0x10a   : > { %v1989_v19 = vrot.slane %v12468_v9, 5  ;;  %v12528_v33 = vsel %vm773_vm2, %v1547_v31, %v1545_v20  ;;  %v11523_v20 = vld [vmem:[%s15311_s3 + $0xd8] sm:$0xff]  }
 0x10b   : > { %v1661_v21 = vsel %vm771_vm1, %v12468_v9, %v1657_v14  ;;  %v1881_v22 = vsel %vm771_vm1, %v1659_v15, %v12486_v16  ;;  %v1991_v23 = vsel %vm771_vm1, %v12486_v16, %v1879_v17  ;;  %v1771_v48 = vsel %vm771_vm1, %v1657_v14, %v1659_v15  ;;  %v11514_v9 = vld [vmem:[%s15311_s3 + $0xc8] sm:$0xff]   ;;  %v11517_v14 = vld [vmem:[%s15311_s3 + $0xc0] sm:$0xff]   ;;  %v11531_v31 = vld [vmem:[%s15311_s3 + $0xf8] sm:$0xff]  }
 0x10c   : > { %10087 = vmatpush3.bf16.msra.mxu1 %v11482_v10  ;;  %v1662_v24 = vsel %vm773_vm2, %v1661_v21, %v1659_v15  ;;  %v12507_v26 = vsel %vm773_vm2, %v1881_v22, %v1879_v17  ;;  %v12510_v27 = vsel %vm773_vm2, %v1991_v23, %v1989_v19  ;;  %v1772_v51 = vsel %vm773_vm2, %v1771_v48, %v12486_v16  ;;  %v11515_v10 = vld [vmem:[%s15311_s3 + $0xb8] sm:$0xff]   ;;  %v11519_v16 = vld [vmem:[%s15311_s3 + $0xc8] sm:$0xff]   ;;  %v11520_v17 = vld [vmem:[%s15311_s3 + $0xe0] sm:$0xff]  }
 0x10d   : > { %10088 = vmatprep.subr.bf16.mxu1 %v12204_v3  ;;  %v12513_v28 = vpack.c.bf16 %v1662_v24, %v1662_v24  ;;  %v12601_v53 = vpack.c.bf16 %v1772_v51, %v1772_v51  ;;  %v12676_v13 = vpack.c.bf16 %v12507_v26, %v12507_v26  ;;  %v11518_v15 = vld [vmem:[%s15311_s3 + $0xd8] sm:$0xff]   ;;  %v11522_v19 = vld [vmem:[%s15311_s3 + $0xe8] sm:$0xff]   ;;  %v11524_v21 = vld [vmem:[%s15311_s3 + $0xf0] sm:$0xff]  }
 0x10e   : > { %v11525_v22 = vld [vmem:[%s15311_s3 + $0xe0] sm:$0xff]   ;;  %v11526_v23 = vld [vmem:[%s15311_s3 + $0xf8] sm:$0xff]   ;;  %v11527_v24 = vld [vmem:[%s15311_s3 + $0xe8] sm:$0xff]  }
 0x10f   : > { %10401 = vmatmul.mubr.bf16.vlgmr.msra.gmra.mrb[16].mxu0 %v12513_v28  ;;  %v11529_v26 = vld [vmem:[%s15311_s3 + $0xf0] sm:$0xff]   ;;  %v11543_v48 = vld [vmem:[%s15311_s3 + $0x128] sm:$0xff]  }
 0x110   : > { %10089 = vmatpush3.bf16.msra.mxu1 %v11484_v18  ;;  %10405 = vmatpush3.bf16.msra.mxu0 %v11485_v25  ;;  %v11521_v18 = vld [vmem:[%s15311_s3 + $0xd0] sm:$0xff]   ;;  %v11528_v25 = vld [vmem:[%s15311_s3 + $0x100] sm:$0xff]  }
 0x111   : > { %10090 = vmatprep.subr.bf16.mxu1 %v12204_v3  ;;  %10406 = vmatprep.subr.bf16.mxu0 %v12204_v3 }
 0x112   : > { %10420 = vmatprep.mubr.msk.bf16.mxu0 %vm12205_vm0, %v12204_v3 }
 0x114   : > { %10091 = vmatpush3.bf16.msra.mxu1 %v11486_v29  ;;  %10407 = vmatpush3.bf16.msra.mxu0 %v11487_v34  ;;  %v1121_v29 = vpack.c.bf16 %v12464_v7, %v12464_v7  ;;  %v11532_v7 = vld [vmem:[%s15311_s3 + $0x110] sm:$0xff]   ;;  %v12751_v34 = vpack.c.bf16 %v12510_v27, %v12510_v27  ;;  %v11535_v27 = vld [vmem:[%s15311_s3 + $0x108] sm:$0xff]  }
 0x115   : > { %10092 = vmatprep.subr.bf16.mxu1 %v12204_v3  ;;  %10408 = vmatprep.subr.bf16.mxu0 %v12204_v3 }
 0x118   : > { %10093 = vmatpush3.bf16.msra.mxu1 %v11488_v35  ;;  %10409 = vmatpush3.bf16.msra.mxu0 %v11489_v36  ;;  %v11533_v35 = vld [vmem:[%s15311_s3 + $0x100] sm:$0xff]   ;;  %v11534_v36 = vld [vmem:[%s15311_s3 + $0x118] sm:$0xff]  }
 0x119   : > { %10094 = vmatprep.subr.bf16.mxu1 %v12204_v3  ;;  %10410 = vmatprep.subr.bf16.mxu0 %v12204_v3 }
 0x11c   : > { %10095 = vmatpush3.bf16.msra.mxu1 %v11490_v37  ;;  %10411 = vmatpush3.bf16.msra.mxu0 %v11491_v38  ;;  %v11536_v37 = vld [vmem:[%s15311_s3 + $0x120] sm:$0xff]   ;;  %v11537_v38 = vld [vmem:[%s15311_s3 + $0x110] sm:$0xff]  }
 0x11d   : > { %10096 = vmatprep.subr.bf16.mxu1 %v12204_v3  ;;  %10412 = vmatprep.subr.bf16.mxu0 %v12204_v3 }
 0x120   : > { %10097 = vmatpush3.bf16.msra.mxu1 %v11492_v39  ;;  %10413 = vmatpush3.bf16.msra.mxu0 %v11493_v40  ;;  %v11538_v39 = vld [vmem:[%s15311_s3 + $0x128] sm:$0xff]   ;;  %v11539_v40 = vld [vmem:[%s15311_s3 + $0x118] sm:$0xff]  }
 0x121   : > { %10098 = vmatprep.subr.bf16.mxu1 %v12204_v3  ;;  %10414 = vmatprep.subr.bf16.mxu0 %v12204_v3 }
 0x124   : > { %10099 = vmatpush3.bf16.msra.mxu1 %v11494_v41  ;;  %10415 = vmatpush3.bf16.msra.mxu0 %v11495_v43  ;;  %v12788_v41 = vld [vmem:[%s15310_s2] ss:$0 sm:$0xff]  ;;  %v1213_v43 = vrot.slane %v12447_v59, 1 }
 0x125   : > { %10104 = vmatprep.subr.bf16.mxu1 %v12204_v3  ;;  %10416 = vmatprep.subr.bf16.mxu0 %v12204_v3  ;;  %v723_v42 = vadd.f32 %v12788_v41, %v12466_v8  ;;  %v11542_v8 = vld [vmem:[%s15311_s3 + $0x138] sm:$0xff]  }
 0x127   : > { %10101 = vmatmul.mubr.bf16.vlgmr.msra.gmra.mrb[0].mxu1 %v901_v47  ;;  %v1217_v47 = vsel %vm771_vm1, %v12447_v59, %v1213_v43  ;;  %v11561_v59 = vld [vmem:[%s15311_s3 + $0x170] sm:$0xff]  }
 0x128   : > { %10105 = vmatpush3.bf16.msra.mxu1 %v11496_v45  ;;  %10417 = vmatpush3.bf16.msra.mxu0 %v11497_v46  ;;  %v11541_v45 = vld [vmem:[%s15311_s3 + $0x120] sm:$0xff]   ;;  %v12801_v46 = vmax.f32 %v723_v42, 0.0  ;;  %v11575_v42 = vld [vmem:[%s15311_s3 + $0x1a8] sm:$0xff]  }
 0x129   : > { %10106 = vmatprep.subr.bf16.mxu1 %v12204_v3  ;;  %10418 = vmatprep.subr.bf16.mxu0 %v12204_v3 }
 0x12a   : > { %10120 = vmatprep.mubr.msk.bf16.mxu1 %vm12205_vm0, %v12204_v3 }
 0x12c   : > { %10107 = vmatpush3.bf16.msra.mxu1 %v11498_v49  ;;  %10419 = vmatpush3.bf16.msra.mxu0 %v11499_v50  ;;  %v9495_v49 = vpop.f32.mrb[8].mxu0  ;;  %v2101_v50 = vrot.slane %v12801_v46, 1 }
 0x12d   : > { %10108 = vmatprep.subr.bf16.mxu1 %v12204_v3  ;;  %10424 = vmatprep.subr.bf16.mxu0 %v12204_v3  ;;  %v9496_v51 = vpop.f32.mrb[9].mxu0 }
 0x12f   : > { %10421 = vmatmul.mubr.bf16.vlgmr.msra.gmra.mrb[16].mxu0 %v12601_v53 }
 0x130   : > { %10109 = vmatpush3.bf16.msra.mxu1 %v11500_v52  ;;  %10425 = vmatpush3.bf16.msra.mxu0 %v11501_v54  ;;  %v1218_v52 = vsel %vm773_vm2, %v1217_v47, %v12474_v11  ;;  %v11544_v54 = vld [vmem:[%s15311_s3 + $0x140] sm:$0xff]  }
 0x131   : > { %10110 = vmatprep.subr.bf16.mxu1 %v12204_v3  ;;  %10426 = vmatprep.subr.bf16.mxu0 %v12204_v3 }
 0x132   : > { %10440 = vmatprep.mubr.msk.bf16.mxu0 %vm12205_vm0, %v12204_v3 }
 0x134   : > { %10111 = vmatpush3.bf16.msra.mxu1 %v11502_v55  ;;  %10427 = vmatpush3.bf16.msra.mxu0 %v11503_v56  ;;  %v12821_v55 = vadd.f32 %v9496_v51, %v9495_v49  ;;  %v11545_v56 = vld [vmem:[%s15311_s3 + $0x130] sm:$0xff]   ;;  %v11579_v49 = vld [vmem:[%s15311_s3 + $0x1b8] sm:$0xff]  }
 0x135   : > { %10112 = vmatprep.subr.bf16.mxu1 %v12204_v3  ;;  %10428 = vmatprep.subr.bf16.mxu0 %v12204_v3 }
 0x138   : > { %10113 = vmatpush3.bf16.msra.mxu1 %v11504_v57  ;;  %10429 = vmatpush3.bf16.msra.mxu0 %v11505_v58  ;;  %v12827_v57 = vrot.slane %v12801_v46, 2  ;;  %v1235_v58 = vpack.c.bf16 %v1218_v52, %v1218_v52  ;;  %v11581_v52 = vld [vmem:[%s15311_s3 + $0x1c0] sm:$0xff]  }
 0x139   : > { %10114 = vmatprep.subr.bf16.mxu1 %v12204_v3  ;;  %10430 = vmatprep.subr.bf16.mxu0 %v12204_v3 }
 0x13c   : > { %10115 = vmatpush3.bf16.msra.mxu1 %v11506_v60  ;;  %10431 = vmatpush3.bf16.msra.mxu0 %v11507_v61  ;;  %v2105_v60 = vsel %vm771_vm1, %v12801_v46, %v2101_v50  ;;  %v11546_v61 = vld [vmem:[%s15311_s3 + $0x148] sm:$0xff]  }
 0x13d   : > { %10116 = vmatprep.subr.bf16.mxu1 %v12204_v3  ;;  %10432 = vmatprep.subr.bf16.mxu0 %v12204_v3 }
 0x140   : > { %10117 = vmatpush3.bf16.msra.mxu1 %v11508_v62  ;;  %10433 = vmatpush3.bf16.msra.mxu0 %v11509_v63  ;;  %v11547_v62 = vld [vmem:[%s15311_s3 + $0x138] sm:$0xff]   ;;  %v2106_v63 = vsel %vm773_vm2, %v2105_v60, %v12827_v57  ;;  %v11586_v60 = vld [vmem:[%s15311_s3 + $0x1e8] sm:$0xff]  }
 0x141   : > { %10118 = vmatprep.subr.bf16.mxu1 %v12204_v3  ;;  %10434 = vmatprep.subr.bf16.mxu0 %v12204_v3 }
 0x144   : > { %10119 = vmatpush3.bf16.msra.mxu1 %v11510_v0  ;;  %10435 = vmatpush3.bf16.msra.mxu0 %v11511_v2  ;;  %v11548_v0 = vld [vmem:[%s15311_s3 + $0x150] sm:$0xff]   ;;  %v12850_v2 = vpack.c.bf16 %v2106_v63, %v2106_v63  ;;  %v11589_v63 = vld [vmem:[%s15311_s3 + $0x1e0] sm:$0xff]  }
 0x145   : > { %10124 = vmatprep.subr.bf16.mxu1 %v12204_v3  ;;  %10436 = vmatprep.subr.bf16.mxu0 %v12204_v3 }
 0x147   : > { %10121 = vmatmul.mubr.bf16.vlgmr.msra.gmra.mrb[0].mxu1 %v1011_v6  ;;  %v11551_v6 = vld [vmem:[%s15311_s3 + $0x148] sm:$0xff]  }
 0x148   : > { %10125 = vmatpush3.bf16.msra.mxu1 %v11512_v4  ;;  %10437 = vmatpush3.bf16.msra.mxu0 %v11513_v5  ;;  %v11549_v4 = vld [vmem:[%s15311_s3 + $0x140] sm:$0xff]   ;;  %v11550_v5 = vld [vmem:[%s15311_s3 + $0x158] sm:$0xff]  }
 0x149   : > { %10126 = vmatprep.subr.bf16.mxu1 %v12204_v3  ;;  %10438 = vmatprep.subr.bf16.mxu0 %v12204_v3 }
 0x14a   : > { %10140 = vmatprep.mubr.msk.bf16.mxu1 %vm12205_vm0, %v12204_v3 }
 0x14c   : > { %10127 = vmatpush3.bf16.msra.mxu1 %v11514_v9  ;;  %10439 = vmatpush3.bf16.msra.mxu0 %v11515_v10  ;;  %v11552_v9 = vld [vmem:[%s15311_s3 + $0x160] sm:$0xff]   ;;  %v11553_v10 = vld [vmem:[%s15311_s3 + $0x150] sm:$0xff]  }
 0x14d   : > { %10128 = vmatprep.subr.bf16.mxu1 %v12204_v3  ;;  %10444 = vmatprep.subr.bf16.mxu0 %v12204_v3 }
 0x14f   : > { %10441 = vmatmul.mubr.bf16.vlgmr.msra.gmra.mrb[16].mxu0 %v12676_v13 }
 0x150   : > { %10129 = vmatpush3.bf16.msra.mxu1 %v11516_v1  ;;  %10445 = vmatpush3.bf16.msra.mxu0 %v11517_v14  ;;  %v11554_v1 = vld [vmem:[%s15311_s3 + $0x168] sm:$0xff]   ;;  %v11555_v14 = vld [vmem:[%s15311_s3 + $0x158] sm:$0xff]  }
 0x151   : > { %10130 = vmatprep.subr.bf16.mxu1 %v12204_v3  ;;  %10446 = vmatprep.subr.bf16.mxu0 %v12204_v3 }
 0x152   : > { %10460 = vmatprep.mubr.msk.bf16.mxu0 %vm12205_vm0, %v12204_v3 }
 0x154   : > { %10131 = vmatpush3.bf16.msra.mxu1 %v11518_v15  ;;  %10447 = vmatpush3.bf16.msra.mxu0 %v11519_v16  ;;  %v11556_v15 = vld [vmem:[%s15311_s3 + $0x170] sm:$0xff]   ;;  %v11557_v16 = vld [vmem:[%s15311_s3 + $0x160] sm:$0xff]  }
 0x155   : > { %10132 = vmatprep.subr.bf16.mxu1 %v12204_v3  ;;  %10448 = vmatprep.subr.bf16.mxu0 %v12204_v3 }
 0x158   : > { %10133 = vmatpush3.bf16.msra.mxu1 %v11520_v17  ;;  %10449 = vmatpush3.bf16.msra.mxu0 %v11521_v18  ;;  %v11558_v17 = vld [vmem:[%s15311_s3 + $0x178] sm:$0xff]   ;;  %v1327_v18 = vsel %vm771_vm1, %v1213_v43, %v12474_v11  ;;  %v12913_v11 = vrot.slane %v12801_v46, 3  ;;  %v11576_v43 = vld [vmem:[%s15311_s3 + $0x1c0] sm:$0xff]  }
 0x159   : > { %10134 = vmatprep.subr.bf16.mxu1 %v12204_v3  ;;  %10450 = vmatprep.subr.bf16.mxu0 %v12204_v3 }
 0x15a   : > { %v2325_v47 = vsel %vm771_vm1, %v12827_v57, %v12913_v11 }
 0x15c   : > { %10135 = vmatpush3.bf16.msra.mxu1 %v11522_v19  ;;  %10451 = vmatpush3.bf16.msra.mxu0 %v11523_v20  ;;  %v11559_v19 = vld [vmem:[%s15311_s3 + $0x168] sm:$0xff]   ;;  %v1328_v20 = vsel %vm773_vm2, %v1327_v18, %v12479_v12  ;;  %v2215_v12 = vsel %vm771_vm1, %v2101_v50, %v12827_v57  ;;  %v11580_v50 = vld [vmem:[%s15311_s3 + $0x1d0] sm:$0xff]   ;;  %v11584_v57 = vld [vmem:[%s15311_s3 + $0x1e0] sm:$0xff]  }
 0x15d   : > { %10136 = vmatprep.subr.bf16.mxu1 %v12204_v3  ;;  %10452 = vmatprep.subr.bf16.mxu0 %v12204_v3  ;;  %v11598_v18 = vld [vmem:[%s15311_s3 + $0x218] sm:$0xff]  }
 0x160   : > { %10137 = vmatpush3.bf16.msra.mxu1 %v11524_v21  ;;  %10453 = vmatpush3.bf16.msra.mxu0 %v11525_v22  ;;  %v11560_v21 = vld [vmem:[%s15311_s3 + $0x180] sm:$0xff]   ;;  %v1345_v22 = vpack.c.bf16 %v1328_v20, %v1328_v20 }
 0x161   : > { %10138 = vmatprep.subr.bf16.mxu1 %v12204_v3  ;;  %10454 = vmatprep.subr.bf16.mxu0 %v12204_v3  ;;  %v11600_v20 = vld [vmem:[%s15311_s3 + $0x220] sm:$0xff]  }
 0x164   : > { %10139 = vmatpush3.bf16.msra.mxu1 %v11526_v23  ;;  %10455 = vmatpush3.bf16.msra.mxu0 %v11527_v24  ;;  %v11562_v23 = vld [vmem:[%s15311_s3 + $0x188] sm:$0xff]   ;;  %v11563_v24 = vld [vmem:[%s15311_s3 + $0x178] sm:$0xff]  }
 0x165   : > { %10144 = vmatprep.subr.bf16.mxu1 %v12204_v3  ;;  %10456 = vmatprep.subr.bf16.mxu0 %v12204_v3 }
 0x167   : > { %10141 = vmatmul.mubr.bf16.vlgmr.msra.gmra.mrb[0].mxu1 %v1121_v29 }
 0x168   : > { %10145 = vmatpush3.bf16.msra.mxu1 %v11528_v25  ;;  %10457 = vmatpush3.bf16.msra.mxu0 %v11529_v26  ;;  %v2216_v25 = vsel %vm773_vm2, %v2215_v12, %v12913_v11  ;;  %v11564_v26 = vld [vmem:[%s15311_s3 + $0x190] sm:$0xff]  }
 0x169   : > { %10146 = vmatprep.subr.bf16.mxu1 %v12204_v3  ;;  %10458 = vmatprep.subr.bf16.mxu0 %v12204_v3  ;;  %v12936_v29 = vpack.c.bf16 %v2216_v25, %v2216_v25  ;;  %v11604_v12 = vld [vmem:[%s15311_s3 + $0x230] sm:$0xff]   ;;  %v9498_v25 = vpop.f32.mrb[10].mxu0 }
 0x16a   : > { %10160 = vmatprep.mubr.msk.bf16.mxu1 %vm12205_vm0, %v12204_v3 }
 0x16c   : > { %10147 = vmatpush3.bf16.msra.mxu1 %v11530_v30  ;;  %10459 = vmatpush3.bf16.msra.mxu0 %v11531_v31  ;;  %v11565_v30 = vld [vmem:[%s15311_s3 + $0x180] sm:$0xff]   ;;  %v11566_v31 = vld [vmem:[%s15311_s3 + $0x198] sm:$0xff]  }
 0x16d   : > { %10148 = vmatprep.subr.bf16.mxu1 %v12204_v3  ;;  %10464 = vmatprep.subr.bf16.mxu0 %v12204_v3 }
 0x16f   : > { %10461 = vmatmul.mubr.bf16.vlgmr.msra.gmra.mrb[16].mxu0 %v12751_v34 }
 0x170   : > { %10149 = vmatpush3.bf16.msra.mxu1 %v11532_v7  ;;  %10465 = vmatpush3.bf16.msra.mxu0 %v11533_v35  ;;  %v11567_v7 = vld [vmem:[%s15311_s3 + $0x188] sm:$0xff]   ;;  %v11568_v35 = vld [vmem:[%s15311_s3 + $0x1a0] sm:$0xff]  }
 0x171   : > { %10150 = vmatprep.subr.bf16.mxu1 %v12204_v3  ;;  %10466 = vmatprep.subr.bf16.mxu0 %v12204_v3 }
 0x172   : > { %10480 = vmatprep.mubr.msk.bf16.mxu0 %vm12205_vm0, %v12204_v3 }
 0x174   : > { %10151 = vmatpush3.bf16.msra.mxu1 %v11534_v36  ;;  %10467 = vmatpush3.bf16.msra.mxu0 %v11535_v27  ;;  %v11569_v36 = vld [vmem:[%s15311_s3 + $0x190] sm:$0xff]   ;;  %v11570_v27 = vld [vmem:[%s15311_s3 + $0x1a8] sm:$0xff]  }
 0x175   : > { %10152 = vmatprep.subr.bf16.mxu1 %v12204_v3  ;;  %10468 = vmatprep.subr.bf16.mxu0 %v12204_v3 }
 0x178   : > { %10153 = vmatpush3.bf16.msra.mxu1 %v11536_v37  ;;  %10469 = vmatpush3.bf16.msra.mxu0 %v11537_v38  ;;  %v11571_v37 = vld [vmem:[%s15311_s3 + $0x198] sm:$0xff]   ;;  %v11572_v38 = vld [vmem:[%s15311_s3 + $0x1b0] sm:$0xff]  }
 0x179   : > { %10154 = vmatprep.subr.bf16.mxu1 %v12204_v3  ;;  %10470 = vmatprep.subr.bf16.mxu0 %v12204_v3 }
 0x17c   : > { %10155 = vmatpush3.bf16.msra.mxu1 %v11538_v39  ;;  %10471 = vmatpush3.bf16.msra.mxu0 %v11539_v40  ;;  %v11573_v39 = vld [vmem:[%s15311_s3 + $0x1a0] sm:$0xff]   ;;  %v11574_v40 = vld [vmem:[%s15311_s3 + $0x1b8] sm:$0xff]  }
 0x17d   : > { %10156 = vmatprep.subr.bf16.mxu1 %v12204_v3  ;;  %10472 = vmatprep.subr.bf16.mxu0 %v12204_v3 }
 0x180   : > { %10157 = vmatpush3.bf16.msra.mxu1 %v11540_v44  ;;  %10473 = vmatpush3.bf16.msra.mxu0 %v11541_v45  ;;  %v11577_v44 = vld [vmem:[%s15311_s3 + $0x1b0] sm:$0xff]   ;;  %v2323_v45 = vrot.slane %v12801_v46, 4 }
 0x181   : > { %10158 = vmatprep.subr.bf16.mxu1 %v12204_v3  ;;  %10474 = vmatprep.subr.bf16.mxu0 %v12204_v3 }
 0x184   : > { %10159 = vmatpush3.bf16.msra.mxu1 %v11542_v8  ;;  %10475 = vmatpush3.bf16.msra.mxu0 %v11543_v48  ;;  %v1455_v8 = vpack.c.bf16 %v12525_v32, %v12525_v32  ;;  %v11578_v48 = vld [vmem:[%s15311_s3 + $0x1c8] sm:$0xff]   ;;  %v2326_v32 = vsel %vm773_vm2, %v2325_v47, %v2323_v45 }
 0x185   : > { %10164 = vmatprep.subr.bf16.mxu1 %v12204_v3  ;;  %10476 = vmatprep.subr.bf16.mxu0 %v12204_v3  ;;  %v13014_v51 = vpack.c.bf16 %v2326_v32, %v2326_v32  ;;  %v11618_v47 = vld [vmem:[%s15311_s3 + $0x268] sm:$0xff]   ;;  %v11621_v32 = vld [vmem:[%s15311_s3 + $0x260] sm:$0xff]  }
 0x187   : > { %10161 = vmatmul.mubr.bf16.vlgmr.msra.gmra.mrb[0].mxu1 %v1235_v58  ;;  %v11585_v58 = vld [vmem:[%s15311_s3 + $0x1d0] sm:$0xff]  }
 0x188   : > { %10165 = vmatpush3.bf16.msra.mxu1 %v11544_v54  ;;  %10477 = vmatpush3.bf16.msra.mxu0 %v11545_v56  ;;  %v11582_v54 = vld [vmem:[%s15311_s3 + $0x1d8] sm:$0xff]   ;;  %v11583_v56 = vld [vmem:[%s15311_s3 + $0x1c8] sm:$0xff]  }
 0x189   : > { %10166 = vmatprep.subr.bf16.mxu1 %v12204_v3  ;;  %10478 = vmatprep.subr.bf16.mxu0 %v12204_v3 }
 0x18a   : > { %10180 = vmatprep.mubr.msk.bf16.mxu1 %vm12205_vm0, %v12204_v3 }
 0x18c   : > { %10167 = vmatpush3.bf16.msra.mxu1 %v11546_v61  ;;  %10479 = vmatpush3.bf16.msra.mxu0 %v11547_v62  ;;  %v11587_v61 = vld [vmem:[%s15311_s3 + $0x1d8] sm:$0xff]   ;;  %v11588_v62 = vld [vmem:[%s15311_s3 + $0x1f0] sm:$0xff]  }
 0x18d   : > { %10168 = vmatprep.subr.bf16.mxu1 %v12204_v3  ;;  %10484 = vmatprep.subr.bf16.mxu0 %v12204_v3 }
 0x18f   : > { %10481 = vmatmul.mubr.bf16.vlgmr.msra.gmra.mrb[16].mxu0 %v12850_v2 }
 0x190   : > { %10169 = vmatpush3.bf16.msra.mxu1 %v11548_v0  ;;  %10485 = vmatpush3.bf16.msra.mxu0 %v11549_v4  ;;  %v11590_v0 = vld [vmem:[%s15311_s3 + $0x1f8] sm:$0xff]   ;;  %v11591_v4 = vld [vmem:[%s15311_s3 + $0x1e8] sm:$0xff]  }
 0x191   : > { %10170 = vmatprep.subr.bf16.mxu1 %v12204_v3  ;;  %10486 = vmatprep.subr.bf16.mxu0 %v12204_v3 }
 0x192   : > { %10500 = vmatprep.mubr.msk.bf16.mxu0 %vm12205_vm0, %v12204_v3 }
 0x194   : > { %10171 = vmatpush3.bf16.msra.mxu1 %v11550_v5  ;;  %10487 = vmatpush3.bf16.msra.mxu0 %v11551_v6  ;;  %v11592_v5 = vld [vmem:[%s15311_s3 + $0x200] sm:$0xff]   ;;  %v11593_v6 = vld [vmem:[%s15311_s3 + $0x1f0] sm:$0xff]  }
 0x195   : > { %10172 = vmatprep.subr.bf16.mxu1 %v12204_v3  ;;  %10488 = vmatprep.subr.bf16.mxu0 %v12204_v3 }
 0x198   : > { %10173 = vmatpush3.bf16.msra.mxu1 %v11552_v9  ;;  %10489 = vmatpush3.bf16.msra.mxu0 %v11553_v10  ;;  %v2433_v9 = vrot.slane %v12801_v46, 5  ;;  %v1565_v10 = vpack.c.bf16 %v12528_v33, %v12528_v33  ;;  %v11595_v46 = vld [vmem:[%s15311_s3 + $0x1f8] sm:$0xff]  }
 0x199   : > { %10174 = vmatprep.subr.bf16.mxu1 %v12204_v3  ;;  %10490 = vmatprep.subr.bf16.mxu0 %v12204_v3 }
 0x19c   : > { %10175 = vmatpush3.bf16.msra.mxu1 %v11554_v1  ;;  %10491 = vmatpush3.bf16.msra.mxu0 %v11555_v14  ;;  %v2435_v1 = vsel %vm771_vm1, %v12913_v11, %v2323_v45  ;;  %v11594_v14 = vld [vmem:[%s15311_s3 + $0x208] sm:$0xff]   ;;  %v11603_v11 = vld [vmem:[%s15311_s3 + $0x218] sm:$0xff]   ;;  %v11616_v45 = vld [vmem:[%s15311_s3 + $0x260] sm:$0xff]  }
 0x19d   : > { %10176 = vmatprep.subr.bf16.mxu1 %v12204_v3  ;;  %10492 = vmatprep.subr.bf16.mxu0 %v12204_v3  ;;  %v2436_v33 = vsel %vm773_vm2, %v2435_v1, %v2433_v9  ;;  %v11633_v9 = vld [vmem:[%s15311_s3 + $0x290] sm:$0xff]   ;;  %v11635_v1 = vld [vmem:[%s15311_s3 + $0x298] sm:$0xff]  }
 0x1a0   : > { %10177 = vmatpush3.bf16.msra.mxu1 %v11556_v15  ;;  %10493 = vmatpush3.bf16.msra.mxu0 %v11557_v16  ;;  %v13088_v15 = vpack.c.bf16 %v2436_v33, %v2436_v33  ;;  %v11596_v16 = vld [vmem:[%s15311_s3 + $0x210] sm:$0xff]   ;;  %v11638_v33 = vld [vmem:[%s15311_s3 + $0x2b8] sm:$0xff]  }
 0x1a1   : > { %10178 = vmatprep.subr.bf16.mxu1 %v12204_v3  ;;  %10494 = vmatprep.subr.bf16.mxu0 %v12204_v3 }
 0x1a4   : > { %10179 = vmatpush3.bf16.msra.mxu1 %v11558_v17  ;;  %10495 = vmatpush3.bf16.msra.mxu0 %v11559_v19  ;;  %v11597_v17 = vld [vmem:[%s15311_s3 + $0x200] sm:$0xff]   ;;  %v11599_v19 = vld [vmem:[%s15311_s3 + $0x208] sm:$0xff]  }
 0x1a5   : > { %10184 = vmatprep.subr.bf16.mxu1 %v12204_v3  ;;  %10496 = vmatprep.subr.bf16.mxu0 %v12204_v3 }
 0x1a7   : > { %10181 = vmatmul.mubr.bf16.vlgmr.msra.gmra.mrb[0].mxu1 %v1345_v22  ;;  %v728_v22 = vadd.f32 %v12788_v41, %v12821_v55  ;;  %v11606_v41 = vld [vmem:[%s15311_s3 + $0x238] sm:$0xff]   ;;  %v11607_v55 = vld [vmem:[%s15311_s3 + $0x228] sm:$0xff]  }
 0x1a8   : > { %10185 = vmatpush3.bf16.msra.mxu1 %v11560_v21  ;;  %10497 = vmatpush3.bf16.msra.mxu0 %v11561_v59  ;;  %v11601_v21 = vld [vmem:[%s15311_s3 + $0x210] sm:$0xff]   ;;  %v11602_v59 = vld [vmem:[%s15311_s3 + $0x228] sm:$0xff]  }
 0x1a9   : > { %10186 = vmatprep.subr.bf16.mxu1 %v12204_v3  ;;  %10498 = vmatprep.subr.bf16.mxu0 %v12204_v3 }
 0x1aa   : > { %10200 = vmatprep.mubr.msk.bf16.mxu1 %vm12205_vm0, %v12204_v3 }
 0x1ac   : > { %10187 = vmatpush3.bf16.msra.mxu1 %v11562_v23  ;;  %10499 = vmatpush3.bf16.msra.mxu0 %v11563_v24  ;;  %v11605_v23 = vld [vmem:[%s15311_s3 + $0x220] sm:$0xff]   ;;  %v13135_v24 = vmax.f32 %v728_v22, 0.0  ;;  %v11644_v22 = vld [vmem:[%s15311_s3 + $0x2d0] sm:$0xff]  }
 0x1ad   : > { %10188 = vmatprep.subr.bf16.mxu1 %v12204_v3  ;;  %10504 = vmatprep.subr.bf16.mxu0 %v12204_v3 }
 0x1af   : > { %10501 = vmatmul.mubr.bf16.vlgmr.msra.gmra.mrb[16].mxu0 %v12936_v29 }
 0x1b0   : > { %10189 = vmatpush3.bf16.msra.mxu1 %v11564_v26  ;;  %10505 = vmatpush3.bf16.msra.mxu0 %v11565_v30  ;;  %v3435_v26 = vrot.slane %v13135_v24, 1  ;;  %v9499_v30 = vpop.f32.mrb[11].mxu0 }
 0x1b1   : > { %10190 = vmatprep.subr.bf16.mxu1 %v12204_v3  ;;  %10506 = vmatprep.subr.bf16.mxu0 %v12204_v3 }
 0x1b2   : > { %10520 = vmatprep.mubr.msk.bf16.mxu0 %vm12205_vm0, %v12204_v3 }
 0x1b4   : > { %10191 = vmatpush3.bf16.msra.mxu1 %v11566_v31  ;;  %10507 = vmatpush3.bf16.msra.mxu0 %v11567_v7  ;;  %v13146_v31 = vadd.f32 %v9499_v30, %v9498_v25  ;;  %v11608_v7 = vld [vmem:[%s15311_s3 + $0x240] sm:$0xff]   ;;  %v11649_v25 = vld [vmem:[%s15311_s3 + $0x2d0] sm:$0xff]   ;;  %v11651_v30 = vld [vmem:[%s15311_s3 + $0x2d8] sm:$0xff]  }
 0x1b5   : > { %10192 = vmatprep.subr.bf16.mxu1 %v12204_v3  ;;  %10508 = vmatprep.subr.bf16.mxu0 %v12204_v3 }
 0x1b8   : > { %10193 = vmatpush3.bf16.msra.mxu1 %v11568_v35  ;;  %10509 = vmatpush3.bf16.msra.mxu0 %v11569_v36  ;;  %v11609_v35 = vld [vmem:[%s15311_s3 + $0x230] sm:$0xff]   ;;  %v13155_v36 = vrot.slane %v13135_v24, 2 }
 0x1b9   : > { %10194 = vmatprep.subr.bf16.mxu1 %v12204_v3  ;;  %10510 = vmatprep.subr.bf16.mxu0 %v12204_v3 }
 0x1bc   : > { %10195 = vmatpush3.bf16.msra.mxu1 %v11570_v27  ;;  %10511 = vmatpush3.bf16.msra.mxu0 %v11571_v37  ;;  %v3439_v27 = vsel %vm771_vm1, %v13135_v24, %v3435_v26  ;;  %v11610_v37 = vld [vmem:[%s15311_s3 + $0x248] sm:$0xff]  }
 0x1bd   : > { %10196 = vmatprep.subr.bf16.mxu1 %v12204_v3  ;;  %10512 = vmatprep.subr.bf16.mxu0 %v12204_v3 }
 0x1c0   : > { %10197 = vmatpush3.bf16.msra.mxu1 %v11572_v38  ;;  %10513 = vmatpush3.bf16.msra.mxu0 %v11573_v39  ;;  %v11611_v38 = vld [vmem:[%s15311_s3 + $0x238] sm:$0xff]   ;;  %v3440_v39 = vsel %vm773_vm2, %v3439_v27, %v13155_v36  ;;  %v11655_v27 = vld [vmem:[%s15311_s3 + $0x2e8] sm:$0xff]  }
 0x1c1   : > { %10198 = vmatprep.subr.bf16.mxu1 %v12204_v3  ;;  %10514 = vmatprep.subr.bf16.mxu0 %v12204_v3 }
 0x1c4   : > { %10199 = vmatpush3.bf16.msra.mxu1 %v11574_v40  ;;  %10515 = vmatpush3.bf16.msra.mxu0 %v11575_v42  ;;  %v11612_v40 = vld [vmem:[%s15311_s3 + $0x250] sm:$0xff]   ;;  %v11613_v42 = vld [vmem:[%s15311_s3 + $0x240] sm:$0xff]  }
 0x1c5   : > { %10204 = vmatprep.subr.bf16.mxu1 %v12204_v3  ;;  %10516 = vmatprep.subr.bf16.mxu0 %v12204_v3 }
 0x1c7   : > { %10201 = vmatmul.mubr.bf16.vlgmr.msra.gmra.mrb[0].mxu1 %v1455_v8  ;;  %v11617_v8 = vld [vmem:[%s15311_s3 + $0x250] sm:$0xff]  }
 0x1c8   : > { %10205 = vmatpush3.bf16.msra.mxu1 %v11576_v43  ;;  %10517 = vmatpush3.bf16.msra.mxu0 %v11577_v44  ;;  %v11614_v43 = vld [vmem:[%s15311_s3 + $0x258] sm:$0xff]   ;;  %v11615_v44 = vld [vmem:[%s15311_s3 + $0x248] sm:$0xff]  }
 0x1c9   : > { %10206 = vmatprep.subr.bf16.mxu1 %v12204_v3  ;;  %10518 = vmatprep.subr.bf16.mxu0 %v12204_v3 }
 0x1ca   : > { %10220 = vmatprep.mubr.msk.bf16.mxu1 %vm12205_vm0, %v12204_v3 }
 0x1cc   : > { %10207 = vmatpush3.bf16.msra.mxu1 %v11578_v48  ;;  %10519 = vmatpush3.bf16.msra.mxu0 %v11579_v49  ;;  %v11619_v48 = vld [vmem:[%s15311_s3 + $0x258] sm:$0xff]   ;;  %v11620_v49 = vld [vmem:[%s15311_s3 + $0x270] sm:$0xff]  }
 0x1cd   : > { %10208 = vmatprep.subr.bf16.mxu1 %v12204_v3  ;;  %10524 = vmatprep.subr.bf16.mxu0 %v12204_v3 }
 0x1cf   : > { %10521 = vmatmul.mubr.bf16.vlgmr.msra.gmra.mrb[16].mxu0 %v13014_v51 }
 0x1d0   : > { %10209 = vmatpush3.bf16.msra.mxu1 %v11580_v50  ;;  %10525 = vmatpush3.bf16.msra.mxu0 %v11581_v52  ;;  %v11622_v50 = vld [vmem:[%s15311_s3 + $0x278] sm:$0xff]   ;;  %v11623_v52 = vld [vmem:[%s15311_s3 + $0x268] sm:$0xff]  }
 0x1d1   : > { %10210 = vmatprep.subr.bf16.mxu1 %v12204_v3  ;;  %10526 = vmatprep.subr.bf16.mxu0 %v12204_v3 }
 0x1d2   : > { %10540 = vmatprep.mubr.msk.bf16.mxu0 %vm12205_vm0, %v12204_v3 }
 0x1d4   : > { %10211 = vmatpush3.bf16.msra.mxu1 %v11582_v54  ;;  %10527 = vmatpush3.bf16.msra.mxu0 %v11583_v56  ;;  %v11624_v54 = vld [vmem:[%s15311_s3 + $0x280] sm:$0xff]   ;;  %v11625_v56 = vld [vmem:[%s15311_s3 + $0x270] sm:$0xff]  }
 0x1d5   : > { %10212 = vmatprep.subr.bf16.mxu1 %v12204_v3  ;;  %10528 = vmatprep.subr.bf16.mxu0 %v12204_v3 }
 0x1d8   : > { %10213 = vmatpush3.bf16.msra.mxu1 %v11584_v57  ;;  %10529 = vmatpush3.bf16.msra.mxu0 %v11585_v58  ;;  %v13236_v57 = vrot.slane %v13135_v24, 3  ;;  %v3549_v58 = vsel %vm771_vm1, %v3435_v26, %v13155_v36  ;;  %v11650_v26 = vld [vmem:[%s15311_s3 + $0x2e8] sm:$0xff]  }
 0x1d9   : > { %10214 = vmatprep.subr.bf16.mxu1 %v12204_v3  ;;  %10530 = vmatprep.subr.bf16.mxu0 %v12204_v3 }
 0x1dc   : > { %10215 = vmatpush3.bf16.msra.mxu1 %v11586_v60  ;;  %10531 = vmatpush3.bf16.msra.mxu0 %v11587_v61  ;;  %v11626_v60 = vld [vmem:[%s15311_s3 + $0x288] sm:$0xff]   ;;  %v11627_v61 = vld [vmem:[%s15311_s3 + $0x278] sm:$0xff]  }
 0x1dd   : > { %10216 = vmatprep.subr.bf16.mxu1 %v12204_v3  ;;  %10532 = vmatprep.subr.bf16.mxu0 %v12204_v3 }
 0x1e0   : > { %10217 = vmatpush3.bf16.msra.mxu1 %v11588_v62  ;;  %10533 = vmatpush3.bf16.msra.mxu0 %v11589_v63  ;;  %v3550_v62 = vsel %vm773_vm2, %v3549_v58, %v13236_v57  ;;  %v11628_v63 = vld [vmem:[%s15311_s3 + $0x290] sm:$0xff]  }
 0x1e1   : > { %10218 = vmatprep.subr.bf16.mxu1 %v12204_v3  ;;  %10534 = vmatprep.subr.bf16.mxu0 %v12204_v3 }
 0x1e4   : > { %10219 = vmatpush3.bf16.msra.mxu1 %v11590_v0  ;;  %10535 = vmatpush3.bf16.msra.mxu0 %v11591_v4  ;;  %v11629_v0 = vld [vmem:[%s15311_s3 + $0x280] sm:$0xff]   ;;  %v11630_v4 = vld [vmem:[%s15311_s3 + $0x298] sm:$0xff]  }
 0x1e5   : > { %10224 = vmatprep.subr.bf16.mxu1 %v12204_v3  ;;  %10536 = vmatprep.subr.bf16.mxu0 %v12204_v3 }
 0x1e7   : > { %10221 = vmatmul.mubr.bf16.vlgmr.msra.gmra.mrb[0].mxu1 %v1565_v10  ;;  %v11634_v10 = vld [vmem:[%s15311_s3 + $0x2a8] sm:$0xff]  }
 0x1e8   : > { %10225 = vmatpush3.bf16.msra.mxu1 %v11592_v5  ;;  %10537 = vmatpush3.bf16.msra.mxu0 %v11593_v6  ;;  %v11631_v5 = vld [vmem:[%s15311_s3 + $0x288] sm:$0xff]   ;;  %v11632_v6 = vld [vmem:[%s15311_s3 + $0x2a0] sm:$0xff]  }
 0x1e9   : > { %10226 = vmatprep.subr.bf16.mxu1 %v12204_v3  ;;  %10538 = vmatprep.subr.bf16.mxu0 %v12204_v3 }
 0x1ea   : > { %10240 = vmatprep.mubr.msk.bf16.mxu1 %vm12205_vm0, %v12204_v3 }
 0x1ec   : > { %10227 = vmatpush3.bf16.msra.mxu1 %v11594_v14  ;;  %10539 = vmatpush3.bf16.msra.mxu0 %v11595_v46  ;;  %v11636_v14 = vld [vmem:[%s15311_s3 + $0x2b0] sm:$0xff]   ;;  %v11637_v46 = vld [vmem:[%s15311_s3 + $0x2a0] sm:$0xff]  }
 0x1ed   : > { %10228 = vmatprep.subr.bf16.mxu1 %v12204_v3  ;;  %10544 = vmatprep.subr.bf16.mxu0 %v12204_v3 }
 0x1ef   : > { %10541 = vmatmul.mubr.bf16.vlgmr.msra.gmra.mrb[16].mxu0 %v13088_v15 }
 0x1f0   : > { %10229 = vmatpush3.bf16.msra.mxu1 %v11596_v16  ;;  %10545 = vmatpush3.bf16.msra.mxu0 %v11597_v17  ;;  %v11639_v16 = vld [vmem:[%s15311_s3 + $0x2a8] sm:$0xff]   ;;  %v11640_v17 = vld [vmem:[%s15311_s3 + $0x2c0] sm:$0xff]  }
 0x1f1   : > { %10230 = vmatprep.subr.bf16.mxu1 %v12204_v3  ;;  %10546 = vmatprep.subr.bf16.mxu0 %v12204_v3 }
 0x1f2   : > { %10560 = vmatprep.mubr.msk.bf16.mxu0 %vm12205_vm0, %v12204_v3 }
 0x1f4   : > { %10231 = vmatpush3.bf16.msra.mxu1 %v11598_v18  ;;  %10547 = vmatpush3.bf16.msra.mxu0 %v11599_v19  ;;  %v11641_v18 = vld [vmem:[%s15311_s3 + $0x2b0] sm:$0xff]   ;;  %v3657_v19 = vrot.slane %v13135_v24, 4 }
 0x1f5   : > { %10232 = vmatprep.subr.bf16.mxu1 %v12204_v3  ;;  %10548 = vmatprep.subr.bf16.mxu0 %v12204_v3 }
 0x1f8   : > { %10233 = vmatpush3.bf16.msra.mxu1 %v11600_v20  ;;  %10549 = vmatpush3.bf16.msra.mxu0 %v11601_v21  ;;  %v3659_v20 = vsel %vm771_vm1, %v13155_v36, %v13236_v57  ;;  %v11642_v21 = vld [vmem:[%s15311_s3 + $0x2c8] sm:$0xff]   ;;  %v11654_v36 = vld [vmem:[%s15311_s3 + $0x2f8] sm:$0xff]  }
 0x1f9   : > { %10234 = vmatprep.subr.bf16.mxu1 %v12204_v3  ;;  %10550 = vmatprep.subr.bf16.mxu0 %v12204_v3 }
 0x1fc   : > { %10235 = vmatpush3.bf16.msra.mxu1 %v11602_v59  ;;  %10551 = vmatpush3.bf16.msra.mxu0 %v11603_v11  ;;  %v11643_v59 = vld [vmem:[%s15311_s3 + $0x2b8] sm:$0xff]   ;;  %v3660_v11 = vsel %vm773_vm2, %v3659_v20, %v3657_v19  ;;  %v11685_v20 = vld [vmem:[%s15311_s3 + $0x360] sm:$0xff]  }
 0x1fd   : > { %10236 = vmatprep.subr.bf16.mxu1 %v12204_v3  ;;  %10552 = vmatprep.subr.bf16.mxu0 %v12204_v3 }
 0x200   : > { %10237 = vmatpush3.bf16.msra.mxu1 %v11604_v12  ;;  %10553 = vmatpush3.bf16.msra.mxu0 %v11605_v23  ;;  %v11645_v12 = vld [vmem:[%s15311_s3 + $0x2c0] sm:$0xff]   ;;  %v11646_v23 = vld [vmem:[%s15311_s3 + $0x2d8] sm:$0xff]  }
 0x201   : > { %10238 = vmatprep.subr.bf16.mxu1 %v12204_v3  ;;  %10554 = vmatprep.subr.bf16.mxu0 %v12204_v3 }
 0x204   : > { %10239 = vmatpush3.bf16.msra.mxu1 %v11606_v41  ;;  %10555 = vmatpush3.bf16.msra.mxu0 %v11607_v55  ;;  %v11647_v41 = vld [vmem:[%s15311_s3 + $0x2c8] sm:$0xff]   ;;  %v11648_v55 = vld [vmem:[%s15311_s3 + $0x2e0] sm:$0xff]  }
 0x205   : > { %10244 = vmatprep.subr.bf16.mxu1 %v12204_v3  ;;  %10556 = vmatprep.subr.bf16.mxu0 %v12204_v3 }
 0x207   : > { %10241 = vmatmul.mubr.bf16.vlgmr.msra.gmra.mrb[0].mxu1 %v12513_v28  ;;  %v13176_v28 = vpack.c.bf16 %v3440_v39, %v3440_v39  ;;  %v3767_v39 = vrot.slane %v13135_v24, 5 }
 0x208   : > { %10245 = vmatpush3.bf16.msra.mxu1 %v11608_v7  ;;  %10557 = vmatpush3.bf16.msra.mxu0 %v11609_v35  ;;  %v11652_v7 = vld [vmem:[%s15311_s3 + $0x2f0] sm:$0xff]   ;;  %v11653_v35 = vld [vmem:[%s15311_s3 + $0x2e0] sm:$0xff]  }
 0x209   : > { %10246 = vmatprep.subr.bf16.mxu1 %v12204_v3  ;;  %10558 = vmatprep.subr.bf16.mxu0 %v12204_v3 }
 0x20a   : > { %10260 = vmatprep.mubr.msk.bf16.mxu1 %vm12205_vm0, %v12204_v3 }
 0x20c   : > { %10247 = vmatpush3.bf16.msra.mxu1 %v11610_v37  ;;  %10559 = vmatpush3.bf16.msra.mxu0 %v11611_v38  ;;  %v11656_v37 = vld [vmem:[%s15311_s3 + $0x300] sm:$0xff]   ;;  %v11657_v38 = vld [vmem:[%s15311_s3 + $0x2f0] sm:$0xff]  }
 0x20d   : > { %10248 = vmatprep.subr.bf16.mxu1 %v12204_v3  ;;  %10564 = vmatprep.subr.bf16.mxu0 %v12204_v3 }
 0x20f   : > { %10561 = vmatmul.mubr.bf16.vlgmr.msra.gmra.mrb[16].mxu0 %v13176_v28 }
 0x210   : > { %10249 = vmatpush3.bf16.msra.mxu1 %v11612_v40  ;;  %10565 = vmatpush3.bf16.msra.mxu0 %v11613_v42  ;;  %v3769_v40 = vsel %vm771_vm1, %v13236_v57, %v3657_v19  ;;  %v11658_v42 = vld [vmem:[%s15311_s3 + $0x308] sm:$0xff]   ;;  %v11669_v57 = vld [vmem:[%s15311_s3 + $0x320] sm:$0xff]   ;;  %v11684_v19 = vld [vmem:[%s15311_s3 + $0x370] sm:$0xff]  }
 0x211   : > { %10250 = vmatprep.subr.bf16.mxu1 %v12204_v3  ;;  %10566 = vmatprep.subr.bf16.mxu0 %v12204_v3  ;;  %v3770_v24 = vsel %vm773_vm2, %v3769_v40, %v3767_v39  ;;  %v11700_v39 = vld [vmem:[%s15311_s3 + $0x3b0] sm:$0xff]   ;;  %v11701_v40 = vld [vmem:[%s15311_s3 + $0x3a0] sm:$0xff]  }
 0x212   : > { %10580 = vmatprep.mubr.msk.bf16.mxu0 %vm12205_vm0, %v12204_v3 }
 0x214   : > { %10251 = vmatpush3.bf16.msra.mxu1 %v11614_v43  ;;  %10567 = vmatpush3.bf16.msra.mxu0 %v11615_v44  ;;  %v11659_v43 = vld [vmem:[%s15311_s3 + $0x2f8] sm:$0xff]   ;;  %v11660_v44 = vld [vmem:[%s15311_s3 + $0x310] sm:$0xff]  }
 0x215   : > { %10252 = vmatprep.subr.bf16.mxu1 %v12204_v3  ;;  %10568 = vmatprep.subr.bf16.mxu0 %v12204_v3 }
 0x218   : > { %10253 = vmatpush3.bf16.msra.mxu1 %v11616_v45  ;;  %10569 = vmatpush3.bf16.msra.mxu0 %v11617_v8  ;;  %v11661_v45 = vld [vmem:[%s15311_s3 + $0x300] sm:$0xff]   ;;  %v11662_v8 = vld [vmem:[%s15311_s3 + $0x318] sm:$0xff]  }
 0x219   : > { %10254 = vmatprep.subr.bf16.mxu1 %v12204_v3  ;;  %10570 = vmatprep.subr.bf16.mxu0 %v12204_v3 }
 0x21c   : > { %10255 = vmatpush3.bf16.msra.mxu1 %v11618_v47  ;;  %10571 = vmatpush3.bf16.msra.mxu0 %v11619_v48  ;;  %v11663_v47 = vld [vmem:[%s15311_s3 + $0x308] sm:$0xff]   ;;  %v11664_v48 = vld [vmem:[%s15311_s3 + $0x320] sm:$0xff]  }
 0x21d   : > { %10256 = vmatprep.subr.bf16.mxu1 %v12204_v3  ;;  %10572 = vmatprep.subr.bf16.mxu0 %v12204_v3 }
 0x220   : > { %10257 = vmatpush3.bf16.msra.mxu1 %v11620_v49  ;;  %10573 = vmatpush3.bf16.msra.mxu0 %v11621_v32  ;;  %v11665_v49 = vld [vmem:[%s15311_s3 + $0x310] sm:$0xff]   ;;  %v11666_v32 = vld [vmem:[%s15311_s3 + $0x328] sm:$0xff]  }
 0x221   : > { %10258 = vmatprep.subr.bf16.mxu1 %v12204_v3  ;;  %10574 = vmatprep.subr.bf16.mxu0 %v12204_v3 }
 0x224   : > { %10259 = vmatpush3.bf16.msra.mxu1 %v11622_v50  ;;  %10575 = vmatpush3.bf16.msra.mxu0 %v11623_v52  ;;  %v11667_v50 = vld [vmem:[%s15311_s3 + $0x318] sm:$0xff]   ;;  %v13450_v52 = vld [vmem:[%s15310_s2] ss:$0 sm:$0xff] }
 0x225   : > { %10264 = vmatprep.subr.bf16.mxu1 %v12204_v3  ;;  %10576 = vmatprep.subr.bf16.mxu0 %v12204_v3 }
 0x227   : > { %10261 = vmatmul.mubr.bf16.vlgmr.msra.gmra.mrb[0].mxu1 %v12601_v53  ;;  %v13257_v53 = vpack.c.bf16 %v3550_v62, %v3550_v62  ;;  %v11672_v62 = vld [vmem:[%s15311_s3 + $0x340] sm:$0xff]  }
 0x228   : > { %10265 = vmatpush3.bf16.msra.mxu1 %v11624_v54  ;;  %10577 = vmatpush3.bf16.msra.mxu0 %v11625_v56  ;;  %v731_v54 = vadd.f32 %v13450_v52, %v13146_v31  ;;  %v11668_v56 = vld [vmem:[%s15311_s3 + $0x330] sm:$0xff]   ;;  %v11670_v31 = vld [vmem:[%s15311_s3 + $0x338] sm:$0xff]  }
 0x229   : > { %10266 = vmatprep.subr.bf16.mxu1 %v12204_v3  ;;  %10578 = vmatprep.subr.bf16.mxu0 %v12204_v3 }
 0x22a   : > { %10280 = vmatprep.mubr.msk.bf16.mxu1 %vm12205_vm0, %v12204_v3  ;;  %v13462_v58 = vmax.f32 %v731_v54, 0.0  ;;  %v11710_v54 = vld [vmem:[%s15311_s3 + $0x3d8] sm:$0xff]  }
 0x22c   : > { %10267 = vmatpush3.bf16.msra.mxu1 %v11626_v60  ;;  %10579 = vmatpush3.bf16.msra.mxu0 %v11627_v61  ;;  %v11671_v60 = vld [vmem:[%s15311_s3 + $0x328] sm:$0xff]   ;;  %v3879_v61 = vrot.slane %v13462_v58, 1 }
 0x22d   : > { %10268 = vmatprep.subr.bf16.mxu1 %v12204_v3  ;;  %10584 = vmatprep.subr.bf16.mxu0 %v12204_v3 }
 0x22f   : > { %10581 = vmatmul.mubr.bf16.vlgmr.msra.gmra.mrb[16].mxu0 %v13257_v53 }
 0x230   : > { %10269 = vmatpush3.bf16.msra.mxu1 %v11628_v63  ;;  %10585 = vmatpush3.bf16.msra.mxu0 %v11629_v0  ;;  %v11673_v63 = vld [vmem:[%s15311_s3 + $0x330] sm:$0xff]   ;;  %v13480_v0 = vrot.slane %v13462_v58, 2 }
 0x231   : > { %10270 = vmatprep.subr.bf16.mxu1 %v12204_v3  ;;  %10586 = vmatprep.subr.bf16.mxu0 %v12204_v3 }
 0x232   : > { %10600 = vmatprep.mubr.msk.bf16.mxu0 %vm12205_vm0, %v12204_v3 }
 0x234   : > { %10271 = vmatpush3.bf16.msra.mxu1 %v11630_v4  ;;  %10587 = vmatpush3.bf16.msra.mxu0 %v11631_v5  ;;  %v3883_v4 = vsel %vm771_vm1, %v13462_v58, %v3879_v61  ;;  %v11674_v5 = vld [vmem:[%s15311_s3 + $0x348] sm:$0xff]  }
 0x235   : > { %10272 = vmatprep.subr.bf16.mxu1 %v12204_v3  ;;  %10588 = vmatprep.subr.bf16.mxu0 %v12204_v3 }
 0x238   : > { %10273 = vmatpush3.bf16.msra.mxu1 %v11632_v6  ;;  %10589 = vmatpush3.bf16.msra.mxu0 %v11633_v9  ;;  %v11675_v6 = vld [vmem:[%s15311_s3 + $0x338] sm:$0xff]   ;;  %v3884_v9 = vsel %vm773_vm2, %v3883_v4, %v13480_v0  ;;  %v11719_v4 = vld [vmem:[%s15311_s3 + $0x3e8] sm:$0xff]  }
 0x239   : > { %10274 = vmatprep.subr.bf16.mxu1 %v12204_v3  ;;  %10590 = vmatprep.subr.bf16.mxu0 %v12204_v3 }
 0x23c   : > { %10275 = vmatpush3.bf16.msra.mxu1 %v11634_v10  ;;  %10591 = vmatpush3.bf16.msra.mxu0 %v11635_v1  ;;  %v11676_v10 = vld [vmem:[%s15311_s3 + $0x350] sm:$0xff]   ;;  %v11677_v1 = vld [vmem:[%s15311_s3 + $0x340] sm:$0xff]  }
 0x23d   : > { %10276 = vmatprep.subr.bf16.mxu1 %v12204_v3  ;;  %10592 = vmatprep.subr.bf16.mxu0 %v12204_v3 }
 0x240   : > { %10277 = vmatpush3.bf16.msra.mxu1 %v11636_v14  ;;  %10593 = vmatpush3.bf16.msra.mxu0 %v11637_v46  ;;  %v11678_v14 = vld [vmem:[%s15311_s3 + $0x358] sm:$0xff]   ;;  %v11679_v46 = vld [vmem:[%s15311_s3 + $0x348] sm:$0xff]  }
 0x241   : > { %10278 = vmatprep.subr.bf16.mxu1 %v12204_v3  ;;  %10594 = vmatprep.subr.bf16.mxu0 %v12204_v3 }
 0x244   : > { %10279 = vmatpush3.bf16.msra.mxu1 %v11638_v33  ;;  %10595 = vmatpush3.bf16.msra.mxu0 %v11639_v16  ;;  %v11680_v33 = vld [vmem:[%s15311_s3 + $0x360] sm:$0xff]   ;;  %v11681_v16 = vld [vmem:[%s15311_s3 + $0x350] sm:$0xff]  }
 0x245   : > { %10284 = vmatprep.subr.bf16.mxu1 %v12204_v3  ;;  %10596 = vmatprep.subr.bf16.mxu0 %v12204_v3 }
 0x247   : > { %10281 = vmatmul.mubr.bf16.vlgmr.msra.gmra.mrb[0].mxu1 %v12676_v13  ;;  %v13334_v13 = vpack.c.bf16 %v3660_v11, %v3660_v11  ;;  %v11688_v11 = vld [vmem:[%s15311_s3 + $0x380] sm:$0xff]  }
 0x248   : > { %10285 = vmatpush3.bf16.msra.mxu1 %v11640_v17  ;;  %10597 = vmatpush3.bf16.msra.mxu0 %v11641_v18  ;;  %v11682_v17 = vld [vmem:[%s15311_s3 + $0x368] sm:$0xff]   ;;  %v11683_v18 = vld [vmem:[%s15311_s3 + $0x358] sm:$0xff]  }
 0x249   : > { %10286 = vmatprep.subr.bf16.mxu1 %v12204_v3  ;;  %10598 = vmatprep.subr.bf16.mxu0 %v12204_v3 }
 0x24a   : > { %10300 = vmatprep.mubr.msk.bf16.mxu1 %vm12205_vm0, %v12204_v3 }
 0x24c   : > { %10287 = vmatpush3.bf16.msra.mxu1 %v11642_v21  ;;  %10599 = vmatpush3.bf16.msra.mxu0 %v11643_v59  ;;  %v11686_v21 = vld [vmem:[%s15311_s3 + $0x378] sm:$0xff]   ;;  %v11687_v59 = vld [vmem:[%s15311_s3 + $0x368] sm:$0xff]  }
 0x24d   : > { %10288 = vmatprep.subr.bf16.mxu1 %v12204_v3  ;;  %10604 = vmatprep.subr.bf16.mxu0 %v12204_v3 }
 0x24f   : > { %10601 = vmatmul.mubr.bf16.vlgmr.msra.gmra.mrb[16].mxu0 %v13334_v13 }
 0x250   : > { %10289 = vmatpush3.bf16.msra.mxu1 %v11644_v22  ;;  %10605 = vmatpush3.bf16.msra.mxu0 %v11645_v12  ;;  %v11689_v22 = vld [vmem:[%s15311_s3 + $0x370] sm:$0xff]   ;;  %v13561_v12 = vrot.slane %v13462_v58, 3 }
 0x251   : > { %10290 = vmatprep.subr.bf16.mxu1 %v12204_v3  ;;  %10606 = vmatprep.subr.bf16.mxu0 %v12204_v3 }
 0x252   : > { %10620 = vmatprep.mubr.msk.bf16.mxu0 %vm12205_vm0, %v12204_v3 }
 0x254   : > { %10291 = vmatpush3.bf16.msra.mxu1 %v11646_v23  ;;  %10607 = vmatpush3.bf16.msra.mxu0 %v11647_v41  ;;  %v3993_v23 = vsel %vm771_vm1, %v3879_v61, %v13480_v0  ;;  %v11690_v41 = vld [vmem:[%s15311_s3 + $0x388] sm:$0xff]   ;;  %v11715_v61 = vld [vmem:[%s15311_s3 + $0x3d8] sm:$0xff]  }
 0x255   : > { %10292 = vmatprep.subr.bf16.mxu1 %v12204_v3  ;;  %10608 = vmatprep.subr.bf16.mxu0 %v12204_v3 }
 0x258   : > { %10293 = vmatpush3.bf16.msra.mxu1 %v11648_v55  ;;  %10609 = vmatpush3.bf16.msra.mxu0 %v11649_v25  ;;  %v11691_v55 = vld [vmem:[%s15311_s3 + $0x378] sm:$0xff]   ;;  %v3994_v25 = vsel %vm773_vm2, %v3993_v23, %v13561_v12  ;;  %v11728_v23 = vld [vmem:[%s15311_s3 + $0x30] sm:$0xff]  }
 0x259   : > { %10294 = vmatprep.subr.bf16.mxu1 %v12204_v3  ;;  %10610 = vmatprep.subr.bf16.mxu0 %v12204_v3 }
 0x25c   : > { %10295 = vmatpush3.bf16.msra.mxu1 %v11650_v26  ;;  %10611 = vmatpush3.bf16.msra.mxu0 %v11651_v30  ;;  %v11692_v26 = vld [vmem:[%s15311_s3 + $0x390] sm:$0xff]   ;;  %v11693_v30 = vld [vmem:[%s15311_s3 + $0x380] sm:$0xff]  }
 0x25d   : > { %10296 = vmatprep.subr.bf16.mxu1 %v12204_v3  ;;  %10612 = vmatprep.subr.bf16.mxu0 %v12204_v3 }
 0x260   : > { %10297 = vmatpush3.bf16.msra.mxu1 %v11652_v7  ;;  %10613 = vmatpush3.bf16.msra.mxu0 %v11653_v35  ;;  %v11694_v7 = vld [vmem:[%s15311_s3 + $0x398] sm:$0xff]   ;;  %v11695_v35 = vld [vmem:[%s15311_s3 + $0x388] sm:$0xff]  }
 0x261   : > { %10298 = vmatprep.subr.bf16.mxu1 %v12204_v3  ;;  %10614 = vmatprep.subr.bf16.mxu0 %v12204_v3 }
 0x264   : > { %10299 = vmatpush3.bf16.msra.mxu1 %v11654_v36  ;;  %10615 = vmatpush3.bf16.msra.mxu0 %v11655_v27  ;;  %v11696_v36 = vld [vmem:[%s15311_s3 + $0x3a0] sm:$0xff]   ;;  %v11697_v27 = vld [vmem:[%s15311_s3 + $0x390] sm:$0xff]  }
 0x265   : > { %10304 = vmatprep.subr.bf16.mxu1 %v12204_v3  ;;  %10616 = vmatprep.subr.bf16.mxu0 %v12204_v3 }
 0x267   : > { %10301 = vmatmul.mubr.bf16.vlgmr.msra.gmra.mrb[0].mxu1 %v12751_v34  ;;  %v13410_v34 = vpack.c.bf16 %v3770_v24, %v3770_v24  ;;  %v11704_v24 = vld [vmem:[%s15311_s3 + $0x3c0] sm:$0xff]  }
 0x268   : > { %10305 = vmatpush3.bf16.msra.mxu1 %v11656_v37  ;;  %10617 = vmatpush3.bf16.msra.mxu0 %v11657_v38  ;;  %v11698_v37 = vld [vmem:[%s15311_s3 + $0x3a8] sm:$0xff]   ;;  %v11699_v38 = vld [vmem:[%s15311_s3 + $0x398] sm:$0xff]  }
 0x269   : > { %10306 = vmatprep.subr.bf16.mxu1 %v12204_v3  ;;  %10618 = vmatprep.subr.bf16.mxu0 %v12204_v3 }
 0x26a   : > { %10320 = vmatprep.mubr.msk.bf16.mxu1 %vm12205_vm0, %v12204_v3 }
 0x26c   : > { %10307 = vmatpush3.bf16.msra.mxu1 %v11658_v42  ;;  %10619 = vmatpush3.bf16.msra.mxu0 %v11659_v43  ;;  %v11702_v42 = vld [vmem:[%s15311_s3 + $0x3b8] sm:$0xff]   ;;  %v11703_v43 = vld [vmem:[%s15311_s3 + $0x3a8] sm:$0xff]  }
 0x26d   : > { %10308 = vmatprep.subr.bf16.mxu1 %v12204_v3  ;;  %10624 = vmatprep.subr.bf16.mxu0 %v12204_v3 }
 0x26f   : > { %10621 = vmatmul.mubr.bf16.vlgmr.msra.gmra.mrb[16].mxu0 %v13410_v34 }
 0x270   : > { %10309 = vmatpush3.bf16.msra.mxu1 %v11660_v44  ;;  %10625 = vmatpush3.bf16.msra.mxu0 %v11661_v45  ;;  %v11705_v44 = vld [vmem:[%s15311_s3 + $0x3b0] sm:$0xff]   ;;  %v4101_v45 = vrot.slane %v13462_v58, 4 }
 0x271   : > { %10310 = vmatprep.subr.bf16.mxu1 %v12204_v3  ;;  %10626 = vmatprep.subr.bf16.mxu0 %v12204_v3 }
 0x272   : > { %10640 = vmatprep.mubr.msk.bf16.mxu0 %vm12205_vm0, %v12204_v3 }
 0x274   : > { %10311 = vmatpush3.bf16.msra.mxu1 %v11662_v8  ;;  %10627 = vmatpush3.bf16.msra.mxu0 %v11663_v47  ;;  %v4103_v8 = vsel %vm771_vm1, %v13480_v0, %v13561_v12  ;;  %v11706_v47 = vld [vmem:[%s15311_s3 + $0x3c8] sm:$0xff]   ;;  %v11718_v0 = vld [vmem:[%s15311_s3 + $0x3f8] sm:$0xff]  }
 0x275   : > { %10312 = vmatprep.subr.bf16.mxu1 %v12204_v3  ;;  %10628 = vmatprep.subr.bf16.mxu0 %v12204_v3 }
 0x278   : > { %10313 = vmatpush3.bf16.msra.mxu1 %v11664_v48  ;;  %10629 = vmatpush3.bf16.msra.mxu0 %v11665_v49  ;;  %v11707_v48 = vld [vmem:[%s15311_s3 + $0x3b8] sm:$0xff]   ;;  %v4104_v49 = vsel %vm773_vm2, %v4103_v8, %v4101_v45 }
 0x279   : > { %10314 = vmatprep.subr.bf16.mxu1 %v12204_v3  ;;  %10630 = vmatprep.subr.bf16.mxu0 %v12204_v3 }
 0x27c   : > { %10315 = vmatpush3.bf16.msra.mxu1 %v11666_v32  ;;  %10631 = vmatpush3.bf16.msra.mxu0 %v11667_v50  ;;  %v11708_v32 = vld [vmem:[%s15311_s3 + $0x3d0] sm:$0xff]   ;;  %v11709_v50 = vld [vmem:[%s15311_s3 + $0x3c0] sm:$0xff]  }
 0x27d   : > { %10316 = vmatprep.subr.bf16.mxu1 %v12204_v3  ;;  %10632 = vmatprep.subr.bf16.mxu0 %v12204_v3 }
 0x280   : > { %10317 = vmatpush3.bf16.msra.mxu1 %v11668_v56  ;;  %10633 = vmatpush3.bf16.msra.mxu0 %v11669_v57  ;;  %v11711_v56 = vld [vmem:[%s15311_s3 + $0x3c8] sm:$0xff]   ;;  %v11712_v57 = vld [vmem:[%s15311_s3 + $0x3e0] sm:$0xff]  }
 0x281   : > { %10318 = vmatprep.subr.bf16.mxu1 %v12204_v3  ;;  %10634 = vmatprep.subr.bf16.mxu0 %v12204_v3 }
 0x284   : > { %10319 = vmatpush3.bf16.msra.mxu1 %v11670_v31  ;;  %10635 = vmatpush3.bf16.msra.mxu0 %v11671_v60  ;;  %v11713_v31 = vld [vmem:[%s15311_s3 + $0x3d0] sm:$0xff]   ;;  %v11714_v60 = vld [vmem:[%s15311_s3 + $0x3e8] sm:$0xff]  }
 0x285   : > { %10324 = vmatprep.subr.bf16.mxu1 %v12204_v3  ;;  %10636 = vmatprep.subr.bf16.mxu0 %v12204_v3 }
 0x287   : > { %10321 = vmatmul.mubr.bf16.vlgmr.msra.gmra.mrb[0].mxu1 %v12850_v2  ;;  %v13501_v2 = vpack.c.bf16 %v3884_v9, %v3884_v9  ;;  %v4211_v9 = vrot.slane %v13462_v58, 5 }
 0x288   : > { %10325 = vmatpush3.bf16.msra.mxu1 %v11672_v62  ;;  %10637 = vmatpush3.bf16.msra.mxu0 %v11673_v63  ;;  %v11716_v62 = vld [vmem:[%s15311_s3 + $0x3f0] sm:$0xff]   ;;  %v11717_v63 = vld [vmem:[%s15311_s3 + $0x3e0] sm:$0xff]  }
 0x289   : > { %10326 = vmatprep.subr.bf16.mxu1 %v12204_v3  ;;  %10638 = vmatprep.subr.bf16.mxu0 %v12204_v3 }
 0x28a   : > { %10340 = vmatprep.mubr.msk.bf16.mxu1 %vm12205_vm0, %v12204_v3 }
 0x28c   : > { %10327 = vmatpush3.bf16.msra.mxu1 %v11674_v5  ;;  %10639 = vmatpush3.bf16.msra.mxu0 %v11675_v6  ;;  %v11720_v5 = vld [vmem:[%s15311_s3 + $0x3f0] sm:$0xff]   ;;  %v11721_v6 = vld [vmem:[%s15311_s3] sm:$0xff]  }
 0x28d   : > { %10328 = vmatprep.subr.bf16.mxu1 %v12204_v3  ;;  %10644 = vmatprep.subr.bf16.mxu0 %v12204_v3 }
 0x28f   : > { %10641 = vmatmul.mubr.bf16.vlgmr.msra.gmra.mrb[16].mxu0 %v13501_v2 }
 0x290   : > { %10329 = vmatpush3.bf16.msra.mxu1 %v11676_v10  ;;  %10645 = vmatpush3.bf16.msra.mxu0 %v11677_v1  ;;  %v4213_v10 = vsel %vm771_vm1, %v13561_v12, %v4101_v45  ;;  %v11722_v1 = vld [vmem:[%s15311_s3 + $0x3f8] sm:$0xff]  }
 0x291   : > { %10330 = vmatprep.subr.bf16.mxu1 %v12204_v3  ;;  %10646 = vmatprep.subr.bf16.mxu0 %v12204_v3  ;;  %v4214_v58 = vsel %vm773_vm2, %v4213_v10, %v4211_v9  ;;  %v11781_v9 = vld [vmem:[%s15313_s5 + $0x28] sm:$0xff]   ;;  %v11745_v10 = vld [vmem:[%s15311_s3 + $0xb8] sm:$0xff]  }
 0x292   : > { %10660 = vmatprep.mubr.msk.bf16.mxu0 %vm12205_vm0, %v12204_v3 }
 0x294   : > { %10331 = vmatpush3.bf16.msra.mxu1 %v11678_v14  ;;  %10647 = vmatpush3.bf16.msra.mxu0 %v11679_v46  ;;  %v11723_v14 = vld [vmem:[%s15311_s3 + $0x8] sm:$0xff]   ;;  %v11724_v46 = vld [vmem:[%s15311_s3 + $0x10] sm:$0xff]  }
 0x295   : > { %10332 = vmatprep.subr.bf16.mxu1 %v12204_v3  ;;  %10648 = vmatprep.subr.bf16.mxu0 %v12204_v3 }
 0x298   : > { %10333 = vmatpush3.bf16.msra.mxu1 %v11680_v33  ;;  %10649 = vmatpush3.bf16.msra.mxu0 %v11681_v16  ;;  %v9501_v33 = vpop.f32.mrb[12].mxu0 }
 0x299   : > { %10334 = vmatprep.subr.bf16.mxu1 %v12204_v3  ;;  %10650 = vmatprep.subr.bf16.mxu0 %v12204_v3  ;;  %v9502_v16 = vpop.f32.mrb[13].mxu0 }
 0x29c   : > { %10335 = vmatpush3.bf16.msra.mxu1 %v11682_v17  ;;  %10651 = vmatpush3.bf16.msra.mxu0 %v11683_v18  ;;  %v9503_v17 = vadd.f32 %v9502_v16, %v9501_v33  ;;  %v9504_v18 = vpop.f32.mrb[14].mxu0  ;;  %v11749_v33 = vld [vmem:[%s15311_s3 + $0xd8] sm:$0xff]   ;;  %v11750_v16 = vld [vmem:[%s15311_s3 + $0xe0] sm:$0xff]  }
 0x29d   : > { %10336 = vmatprep.subr.bf16.mxu1 %v12204_v3  ;;  %10652 = vmatprep.subr.bf16.mxu0 %v12204_v3 }
 0x2a0   : > { %10337 = vmatpush3.bf16.msra.mxu1 %v11684_v19  ;;  %10653 = vmatpush3.bf16.msra.mxu0 %v11685_v20  ;;  %v11725_v19 = vld [vmem:[%s15311_s3 + $0x18] sm:$0xff]   ;;  %v9505_v20 = vpop.f32.mrb[15].mxu0 }
 0x2a1   : > { %10338 = vmatprep.subr.bf16.mxu1 %v12204_v3  ;;  %10654 = vmatprep.subr.bf16.mxu0 %v12204_v3 }
 0x2a4   : > { %10339 = vmatpush3.bf16.msra.mxu1 %v11686_v21  ;;  %10655 = vmatpush3.bf16.msra.mxu0 %v11687_v59  ;;  %v9506_v21 = vadd.f32 %v9505_v20, %v9504_v18  ;;  %v11726_v59 = vld [vmem:[%s15311_s3 + $0x20] sm:$0xff]   ;;  %v11752_v18 = vld [vmem:[%s15311_s3 + $0xf0] sm:$0xff]  }
 0x2a5   : > { %10344 = vmatprep.subr.bf16.mxu1 %v12204_v3  ;;  %10656 = vmatprep.subr.bf16.mxu0 %v12204_v3  ;;  %v11754_v20 = vld [vmem:[%s15311_s3 + $0x100] sm:$0xff]  }
 0x2a6   : > { %v739_v12 = vadd.f32 %v13450_v52, %v9506_v21  ;;  %v11755_v21 = vld [vmem:[%s15311_s3 + $0x108] sm:$0xff]  }
 0x2a7   : > { %10341 = vmatmul.mubr.bf16.vlgmr.msra.gmra.mrb[0].mxu1 %v12936_v29  ;;  %v13582_v29 = vpack.c.bf16 %v3994_v25, %v3994_v25  ;;  %v11729_v25 = vld [vmem:[%s15311_s3 + $0x38] sm:$0xff]  }
 0x2a8   : > { %10345 = vmatpush3.bf16.msra.mxu1 %v11688_v11  ;;  %10657 = vmatpush3.bf16.msra.mxu0 %v11689_v22  ;;  %v11727_v11 = vld [vmem:[%s15311_s3 + $0x28] sm:$0xff]   ;;  %v736_v22 = vadd.f32 %v13450_v52, %v9503_v17 }
 0x2a9   : > { %10346 = vmatprep.subr.bf16.mxu1 %v12204_v3  ;;  %10658 = vmatprep.subr.bf16.mxu0 %v12204_v3  ;;  %v11751_v17 = vld [vmem:[%s15311_s3 + $0xe8] sm:$0xff]  }
 0x2aa   : > { %10360 = vmatprep.mubr.msk.bf16.mxu1 %vm12205_vm0, %v12204_v3 }
 0x2ac   : > { %10347 = vmatpush3.bf16.msra.mxu1 %v11690_v41  ;;  %10659 = vmatpush3.bf16.msra.mxu0 %v11691_v55  ;;  %v13763_v41 = vmax.f32 %v736_v22, 0.0  ;;  %v13765_v55 = vmax.f32 %v739_v12, 0.0  ;;  %v11759_v22 = vld [vmem:[%s15311_s3 + $0x128] sm:$0xff]   ;;  %v11760_v12 = vld [vmem:[%s15311_s3 + $0x130] sm:$0xff]  }
 0x2ad   : > { %10348 = vmatprep.subr.bf16.mxu1 %v12204_v3  ;;  %10664 = vmatprep.subr.bf16.mxu0 %v12204_v3 }
 0x2ae   : > { %v13772_v52 = vrot.slane %v13763_v41, 2 }
 0x2af   : > { %10661 = vmatmul.mubr.bf16.vlgmr.msra.gmra.mrb[16].mxu0 %v13582_v29 }
 0x2b0   : > { %10349 = vmatpush3.bf16.msra.mxu1 %v11692_v26  ;;  %10665 = vmatpush3.bf16.msra.mxu0 %v11693_v30  ;;  %v13775_v26 = vrot.slane %v13763_v41, 3  ;;  %v5435_v30 = vrot.slane %v13763_v41, 4 }
 0x2b1   : > { %10350 = vmatprep.subr.bf16.mxu1 %v12204_v3  ;;  %10666 = vmatprep.subr.bf16.mxu0 %v12204_v3 }
 0x2b2   : > { %10680 = vmatprep.mubr.msk.bf16.mxu0 %vm12205_vm0, %v12204_v3 }
 0x2b4   : > { %10351 = vmatpush3.bf16.msra.mxu1 %v11694_v7  ;;  %10667 = vmatpush3.bf16.msra.mxu0 %v11695_v35  ;;  %v5545_v7 = vrot.slane %v13763_v41, 5  ;;  %v13780_v35 = vrot.slane %v13765_v55, 2 }
 0x2b5   : > { %10352 = vmatprep.subr.bf16.mxu1 %v12204_v3  ;;  %10668 = vmatprep.subr.bf16.mxu0 %v12204_v3 }
 0x2b8   : > { %10353 = vmatpush3.bf16.msra.mxu1 %v11696_v36  ;;  %10669 = vmatpush3.bf16.msra.mxu0 %v11697_v27  ;;  %v13783_v36 = vrot.slane %v13765_v55, 3  ;;  %v5437_v27 = vsel %vm771_vm1, %v13772_v52, %v13775_v26 }
 0x2b9   : > { %10354 = vmatprep.subr.bf16.mxu1 %v12204_v3  ;;  %10670 = vmatprep.subr.bf16.mxu0 %v12204_v3 }
 0x2bc   : > { %10355 = vmatpush3.bf16.msra.mxu1 %v11698_v37  ;;  %10671 = vmatpush3.bf16.msra.mxu0 %v11699_v38  ;;  %v5547_v37 = vsel %vm771_vm1, %v13775_v26, %v5435_v30  ;;  %v11730_v38 = vld [vmem:[%s15311_s3 + $0x40] sm:$0xff]  }
 0x2bd   : > { %10356 = vmatprep.subr.bf16.mxu1 %v12204_v3  ;;  %10672 = vmatprep.subr.bf16.mxu0 %v12204_v3 }
 0x2c0   : > { %10357 = vmatpush3.bf16.msra.mxu1 %v11700_v39  ;;  %10673 = vmatpush3.bf16.msra.mxu0 %v11701_v40  ;;  %v13794_v39 = vsel %vm773_vm2, %v5437_v27, %v5435_v30  ;;  %v13797_v40 = vsel %vm773_vm2, %v5547_v37, %v5545_v7  ;;  %v11763_v30 = vld [vmem:[%s15311_s3 + $0x148] sm:$0xff]   ;;  %v11764_v7 = vld [vmem:[%s15311_s3 + $0x150] sm:$0xff]   ;;  %v11766_v27 = vld [vmem:[%s15311_s3 + $0x160] sm:$0xff]  }
 0x2c1   : > { %10358 = vmatprep.subr.bf16.mxu1 %v12204_v3  ;;  %10674 = vmatprep.subr.bf16.mxu0 %v12204_v3  ;;  %v11767_v37 = vld [vmem:[%s15311_s3 + $0x168] sm:$0xff]  }
 0x2c4   : > { %10359 = vmatpush3.bf16.msra.mxu1 %v11702_v42  ;;  %10675 = vmatpush3.bf16.msra.mxu0 %v11703_v43  ;;  %v5879_v42 = vrot.slane %v13765_v55, 4  ;;  %v5881_v43 = vsel %vm771_vm1, %v13780_v35, %v13783_v36 }
 0x2c5   : > { %10364 = vmatprep.subr.bf16.mxu1 %v12204_v3  ;;  %10676 = vmatprep.subr.bf16.mxu0 %v12204_v3 }
 0x2c6   : > { %v13812_v45 = vsel %vm773_vm2, %v5881_v43, %v5879_v42  ;;  %v5991_v8 = vsel %vm771_vm1, %v13783_v36, %v5879_v42  ;;  %v11769_v42 = vld [vmem:[%s15311_s3 + $0x178] sm:$0xff]   ;;  %v11770_v43 = vld [vmem:[%s15311_s3 + $0x180] sm:$0xff]  }
 0x2c7   : > { %10361 = vmatmul.mubr.bf16.vlgmr.msra.gmra.mrb[0].mxu1 %v13014_v51  ;;  %v13659_v51 = vpack.c.bf16 %v4104_v49, %v4104_v49  ;;  %v11734_v49 = vld [vmem:[%s15311_s3 + $0x60] sm:$0xff]  }
 0x2c8   : > { %10365 = vmatpush3.bf16.msra.mxu1 %v11704_v24  ;;  %10677 = vmatpush3.bf16.msra.mxu0 %v11705_v44  ;;  %v5989_v24 = vrot.slane %v13765_v55, 5  ;;  %v11731_v44 = vld [vmem:[%s15311_s3 + $0x48] sm:$0xff]  }
 0x2c9   : > { %10366 = vmatprep.subr.bf16.mxu1 %v12204_v3  ;;  %10678 = vmatprep.subr.bf16.mxu0 %v12204_v3 }
 0x2ca   : > { %10380 = vmatprep.mubr.msk.bf16.mxu1 %vm12205_vm0, %v12204_v3 }
 0x2cc   : > { %10367 = vmatpush3.bf16.msra.mxu1 %v11706_v47  ;;  %10679 = vmatpush3.bf16.msra.mxu0 %v11707_v48  ;;  %v11732_v47 = vld [vmem:[%s15311_s3 + $0x50] sm:$0xff]   ;;  %v11733_v48 = vld [vmem:[%s15311_s3 + $0x58] sm:$0xff]  }
 0x2cd   : > { %10368 = vmatprep.subr.bf16.mxu1 %v12204_v3  ;;  %10684 = vmatprep.subr.bf16.mxu0 %v12204_v3 }
 0x2cf   : > { %10681 = vmatmul.mubr.bf16.vlgmr.msra.gmra.mrb[16].mxu0 %v13659_v51 }
 0x2d0   : > { %10369 = vmatpush3.bf16.msra.mxu1 %v11708_v32  ;;  %10685 = vmatpush3.bf16.msra.mxu0 %v11709_v50  ;;  %v11735_v32 = vld [vmem:[%s15311_s3 + $0x68] sm:$0xff]   ;;  %v11736_v50 = vld [vmem:[%s15311_s3 + $0x70] sm:$0xff]  }
 0x2d1   : > { %10370 = vmatprep.subr.bf16.mxu1 %v12204_v3  ;;  %10686 = vmatprep.subr.bf16.mxu0 %v12204_v3 }
 0x2d2   : > { %10700 = vmatprep.mubr.msk.bf16.mxu0 %vm12205_vm0, %v12204_v3 }
 0x2d4   : > { %10371 = vmatpush3.bf16.msra.mxu1 %v11710_v54  ;;  %10687 = vmatpush3.bf16.msra.mxu0 %v11711_v56  ;;  %v11737_v54 = vld [vmem:[%s15311_s3 + $0x78] sm:$0xff]   ;;  %v11738_v56 = vld [vmem:[%s15311_s3 + $0x80] sm:$0xff]  }
 0x2d5   : > { %10372 = vmatprep.subr.bf16.mxu1 %v12204_v3  ;;  %10688 = vmatprep.subr.bf16.mxu0 %v12204_v3 }
 0x2d8   : > { %10373 = vmatpush3.bf16.msra.mxu1 %v11712_v57  ;;  %10689 = vmatpush3.bf16.msra.mxu0 %v11713_v31  ;;  %v11739_v57 = vld [vmem:[%s15311_s3 + $0x88] sm:$0xff]   ;;  %v11771_v31 = vld [vmem:[%s15313_s5] sm:$0xff]  }
 0x2d9   : > { %10374 = vmatprep.subr.bf16.mxu1 %v12204_v3  ;;  %10690 = vmatprep.subr.bf16.mxu0 %v12204_v3 }
 0x2dc   : > { %10375 = vmatpush3.bf16.msra.mxu1 %v11714_v60  ;;  %10691 = vmatpush3.bf16.msra.mxu0 %v11715_v61  ;;  %v11773_v60 = vld [vmem:[%s15313_s5 + $0x8] sm:$0xff]   ;;  %v11741_v61 = vld [vmem:[%s15311_s3 + $0x98] sm:$0xff]  }
 0x2dd   : > { %10376 = vmatprep.subr.bf16.mxu1 %v12204_v3  ;;  %10692 = vmatprep.subr.bf16.mxu0 %v12204_v3 }
 0x2e0   : > { %10377 = vmatpush3.bf16.msra.mxu1 %v11716_v62  ;;  %10693 = vmatpush3.bf16.msra.mxu0 %v11717_v63  ;;  %v11775_v62 = vld [vmem:[%s15313_s5 + $0x10] sm:$0xff]   ;;  %v11742_v63 = vld [vmem:[%s15311_s3 + $0xa0] sm:$0xff]  }
 0x2e1   : > { %10378 = vmatprep.subr.bf16.mxu1 %v12204_v3  ;;  %10694 = vmatprep.subr.bf16.mxu0 %v12204_v3 }
 0x2e4   : > { %10379 = vmatpush3.bf16.msra.mxu1 %v11718_v0  ;;  %10695 = vmatpush3.bf16.msra.mxu0 %v11719_v4  ;;  %v11777_v0 = vld [vmem:[%s15313_s5 + $0x18] sm:$0xff]   ;;  %v11743_v4 = vld [vmem:[%s15311_s3 + $0xa8] sm:$0xff]  }
 0x2e5   : > { %10696 = vmatprep.subr.bf16.mxu0 %v12204_v3  ;;  %10704 = vmatprep.subr.bf16.mxu1 %v12204_v3 }
 0x2e7   : > { %10381 = vmatmul.mubr.bf16.vlgmr.msra.gmra.mrb[0].mxu1 %v13088_v15  ;;  %v13735_v15 = vpack.c.bf16 %v4214_v58, %v4214_v58  ;;  %v11785_v58 = vld [vmem:[%s15313_s5 + $0x38] sm:$0xff]  }
 0x2e8   : > { %10697 = vmatpush3.bf16.msra.mxu0 %v11720_v5  ;;  %10705 = vmatpush3.bf16.msra.mxu1 %v11721_v6  ;;  %v11779_v5 = vld [vmem:[%s15313_s5 + $0x20] sm:$0xff]   ;;  %v11744_v6 = vld [vmem:[%s15311_s3 + $0xb0] sm:$0xff]  }
 0x2e9   : > { %10698 = vmatprep.subr.bf16.mxu0 %v12204_v3  ;;  %10706 = vmatprep.subr.bf16.mxu1 %v12204_v3 }
 0x2ea   : > { %10720 = vmatprep.mubr.msk.bf16.mxu1 %vm12205_vm0, %v12204_v3 }
 0x2ec   : > { %10699 = vmatpush3.bf16.msra.mxu0 %v11722_v1  ;;  %10707 = vmatpush3.bf16.msra.mxu1 %v11723_v14  ;;  %v11783_v1 = vld [vmem:[%s15313_s5 + $0x30] sm:$0xff]   ;;  %v11746_v14 = vld [vmem:[%s15311_s3 + $0xc0] sm:$0xff]  }
 0x2ed   : > { %10708 = vmatprep.subr.bf16.mxu1 %v12204_v3  ;;  %11024 = vmatprep.subr.bf16.mxu0 %v12204_v3 }
 0x2ef   : > { %10701 = vmatmul.mubr.bf16.vlgmr.msra.gmra.mrb[16].mxu0 %v13735_v15 }
 0x2f0   : > { %10709 = vmatpush3.bf16.msra.mxu1 %v11724_v46  ;;  %11040 = vmatprep.mubr.msk.bf16.mxu0 %vm12205_vm0, %v12204_v3  ;;  %v11747_v46 = vld [vmem:[%s15311_s3 + $0xc8] sm:$0xff]  }
 0x2f1   : > { %10710 = vmatprep.subr.bf16.mxu1 %v12204_v3  ;;  %11025 = vmatpush3.bf16.msra.mxu0 %v11771_v31 }
 0x2f2   : > { %11026 = vmatprep.subr.bf16.mxu0 %v12204_v3 }
 0x2f4   : > { %10711 = vmatpush3.bf16.msra.mxu1 %v11725_v19  ;;  %v11753_v19 = vld [vmem:[%s15311_s3 + $0xf8] sm:$0xff]  }
 0x2f5   : > { %10712 = vmatprep.subr.bf16.mxu1 %v12204_v3  ;;  %11027 = vmatpush3.bf16.msra.mxu0 %v11773_v60 }
 0x2f6   : > { %11028 = vmatprep.subr.bf16.mxu0 %v12204_v3 }
 0x2f8   : > { %10713 = vmatpush3.bf16.msra.mxu1 %v11726_v59  ;;  %v11756_v59 = vld [vmem:[%s15311_s3 + $0x110] sm:$0xff]  }
 0x2f9   : > { %10714 = vmatprep.subr.bf16.mxu1 %v12204_v3  ;;  %11029 = vmatpush3.bf16.msra.mxu0 %v11775_v62 }
 0x2fa   : > { %11030 = vmatprep.subr.bf16.mxu0 %v12204_v3 }
 0x2fc   : > { %10715 = vmatpush3.bf16.msra.mxu1 %v11727_v11  ;;  %v11758_v11 = vld [vmem:[%s15311_s3 + $0x120] sm:$0xff]  }
 0x2fd   : > { %10716 = vmatprep.subr.bf16.mxu1 %v12204_v3  ;;  %11031 = vmatpush3.bf16.msra.mxu0 %v11777_v0  ;;  %v11786_v0 = vld [vmem:[%s15311_s3 + $0x1c0] sm:$0xff]  }
 0x2fe   : > { %11032 = vmatprep.subr.bf16.mxu0 %v12204_v3 }
 0x300   : > { %10717 = vmatpush3.bf16.msra.mxu1 %v11728_v23  ;;  %v11761_v23 = vld [vmem:[%s15311_s3 + $0x138] sm:$0xff]  }
 0x301   : > { %10718 = vmatprep.subr.bf16.mxu1 %v12204_v3  ;;  %11033 = vmatpush3.bf16.msra.mxu0 %v11779_v5 }
 0x302   : > { %11034 = vmatprep.subr.bf16.mxu0 %v12204_v3 }
 0x304   : > { %10719 = vmatpush3.bf16.msra.mxu1 %v11729_v25  ;;  %v11762_v25 = vld [vmem:[%s15311_s3 + $0x140] sm:$0xff]  }
 0x305   : > { %10724 = vmatprep.subr.bf16.mxu1 %v12204_v3  ;;  %11035 = vmatpush3.bf16.msra.mxu0 %v11781_v9  ;;  %v11787_v9 = vld [vmem:[%s15313_s5 + $0x40] sm:$0xff]  }
 0x306   : > { %11036 = vmatprep.subr.bf16.mxu0 %v12204_v3 }
 0x307   : > { %10721 = vmatmul.mubr.bf16.vlgmr.msra.gmra.mrb[4].mxu1 %v13176_v28  ;;  %v13818_v28 = vsel %vm773_vm2, %v5991_v8, %v5989_v24  ;;  %v11772_v24 = vld [vmem:[%s15311_s3 + $0x188] sm:$0xff]   ;;  %v11778_v8 = vld [vmem:[%s15311_s3 + $0x1a0] sm:$0xff]  }
 0x308   : > { %10725 = vmatpush3.bf16.msra.mxu1 %v11730_v38  ;;  %10740 = vmatprep.mubr.msk.bf16.mxu1 %vm12205_vm0, %v12204_v3  ;;  %v11768_v38 = vld [vmem:[%s15311_s3 + $0x170] sm:$0xff]  }
 0x309   : > { %10726 = vmatprep.subr.bf16.mxu1 %v12204_v3  ;;  %11037 = vmatpush3.bf16.msra.mxu0 %v11783_v1  ;;  %v11788_v1 = vld [vmem:[%s15311_s3 + $0x1c8] sm:$0xff]  }
 0x30a   : > { %11038 = vmatprep.subr.bf16.mxu0 %v12204_v3 }
 0x30c   : > { %10727 = vmatpush3.bf16.msra.mxu1 %v11731_v44  ;;  %v11774_v44 = vld [vmem:[%s15311_s3 + $0x190] sm:$0xff]  }
 0x30d   : > { %10728 = vmatprep.subr.bf16.mxu1 %v12204_v3  ;;  %11039 = vmatpush3.bf16.msra.mxu0 %v11785_v58  ;;  %v11791_v58 = vld [vmem:[%s15313_s5 + $0x50] sm:$0xff]  }
 0x30e   : > { %11044 = vmatprep.subr.bf16.mxu0 %v12204_v3 }
 0x310   : > { %10729 = vmatpush3.bf16.msra.mxu1 %v11732_v47  ;;  %v14042_v47 = vld [vmem:[%s15312_s4] ss:$0 sm:$0xff] }
 0x311   : > { %10730 = vmatprep.subr.bf16.mxu1 %v12204_v3 }
 0x314   : > { %10731 = vmatpush3.bf16.msra.mxu1 %v11733_v48  ;;  %v11780_v48 = vld [vmem:[%s15311_s3 + $0x1a8] sm:$0xff]  }
 0x315   : > { %10732 = vmatprep.subr.bf16.mxu1 %v12204_v3 }
 0x318   : > { %10733 = vmatpush3.bf16.msra.mxu1 %v11734_v49 }
 0x319   : > { %10734 = vmatprep.subr.bf16.mxu1 %v12204_v3 }
 0x31c   : > { %10735 = vmatpush3.bf16.msra.mxu1 %v11735_v32 }
 0x31d   : > { %10736 = vmatprep.subr.bf16.mxu1 %v12204_v3 }
 0x320   : > { %10737 = vmatpush3.bf16.msra.mxu1 %v11736_v50 }
 0x321   : > { %10738 = vmatprep.subr.bf16.mxu1 %v12204_v3 }
 0x324   : > { %10739 = vmatpush3.bf16.msra.mxu1 %v11737_v54 }
 0x325   : > { %10744 = vmatprep.subr.bf16.mxu1 %v12204_v3 }
 0x327   : > { %10741 = vmatmul.mubr.bf16.vlgmr.msra.gmra.mrb[4].mxu1 %v13257_v53  ;;  %v11740_v53 = vld [vmem:[%s15311_s3 + $0x90] sm:$0xff]  }
 0x328   : > { %10745 = vmatpush3.bf16.msra.mxu1 %v11738_v56  ;;  %10760 = vmatprep.mubr.msk.bf16.mxu1 %vm12205_vm0, %v12204_v3  ;;  %v11782_v56 = vld [vmem:[%s15311_s3 + $0x1b0] sm:$0xff]  }
 0x329   : > { %10746 = vmatprep.subr.bf16.mxu1 %v12204_v3 }
 0x32c   : > { %10747 = vmatpush3.bf16.msra.mxu1 %v11739_v57 }
 0x32d   : > { %10748 = vmatprep.subr.bf16.mxu1 %v12204_v3 }
 0x330   : > { %10749 = vmatpush3.bf16.msra.mxu1 %v11740_v53  ;;  %v11784_v53 = vld [vmem:[%s15311_s3 + $0x1b8] sm:$0xff]  }
 0x331   : > { %10750 = vmatprep.subr.bf16.mxu1 %v12204_v3 }
 0x334   : > { %10751 = vmatpush3.bf16.msra.mxu1 %v11741_v61 }
 0x335   : > { %10752 = vmatprep.subr.bf16.mxu1 %v12204_v3 }
 0x338   : > { %10753 = vmatpush3.bf16.msra.mxu1 %v11742_v63 }
 0x339   : > { %10754 = vmatprep.subr.bf16.mxu1 %v12204_v3 }
 0x33c   : > { %10755 = vmatpush3.bf16.msra.mxu1 %v11743_v4 }
 0x33d   : > { %10756 = vmatprep.subr.bf16.mxu1 %v12204_v3 }
 0x340   : > { %10757 = vmatpush3.bf16.msra.mxu1 %v11744_v6 }
 0x341   : > { %10758 = vmatprep.subr.bf16.mxu1 %v12204_v3 }
 0x344   : > { %10759 = vmatpush3.bf16.msra.mxu1 %v11745_v10 }
 0x345   : > { %10764 = vmatprep.subr.bf16.mxu1 %v12204_v3 }
 0x347   : > { %10761 = vmatmul.mubr.bf16.vlgmr.msra.gmra.mrb[4].mxu1 %v13334_v13  ;;  %v11748_v13 = vld [vmem:[%s15311_s3 + $0xd0] sm:$0xff]  }
 0x348   : > { %10765 = vmatpush3.bf16.msra.mxu1 %v11746_v14  ;;  %10780 = vmatprep.mubr.msk.bf16.mxu1 %vm12205_vm0, %v12204_v3  ;;  %v11789_v14 = vld [vmem:[%s15313_s5 + $0x48] sm:$0xff]  }
 0x349   : > { %10766 = vmatprep.subr.bf16.mxu1 %v12204_v3 }
 0x34c   : > { %10767 = vmatpush3.bf16.msra.mxu1 %v11747_v46  ;;  %v11792_v46 = vld [vmem:[%s15311_s3 + $0x1d8] sm:$0xff]  }
 0x34d   : > { %10768 = vmatprep.subr.bf16.mxu1 %v12204_v3 }
 0x350   : > { %10769 = vmatpush3.bf16.msra.mxu1 %v11748_v13  ;;  %v11793_v13 = vld [vmem:[%s15313_s5 + $0x58] sm:$0xff]  }
 0x351   : > { %10770 = vmatprep.subr.bf16.mxu1 %v12204_v3 }
 0x354   : > { %10771 = vmatpush3.bf16.msra.mxu1 %v11749_v33  ;;  %v11794_v33 = vld [vmem:[%s15311_s3 + $0x1e0] sm:$0xff]  }
 0x355   : > { %10772 = vmatprep.subr.bf16.mxu1 %v12204_v3 }
 0x358   : > { %10773 = vmatpush3.bf16.msra.mxu1 %v11750_v16  ;;  %v11795_v16 = vld [vmem:[%s15313_s5 + $0x60] sm:$0xff]  }
 0x359   : > { %10774 = vmatprep.subr.bf16.mxu1 %v12204_v3 }
 0x35c   : > { %10775 = vmatpush3.bf16.msra.mxu1 %v11751_v17  ;;  %v11796_v17 = vld [vmem:[%s15311_s3 + $0x1e8] sm:$0xff]  }
 0x35d   : > { %10776 = vmatprep.subr.bf16.mxu1 %v12204_v3 }
 0x360   : > { %10777 = vmatpush3.bf16.msra.mxu1 %v11752_v18  ;;  %v11797_v18 = vld [vmem:[%s15313_s5 + $0x68] sm:$0xff]  }
 0x361   : > { %10778 = vmatprep.subr.bf16.mxu1 %v12204_v3 }
 0x364   : > { %10779 = vmatpush3.bf16.msra.mxu1 %v11753_v19  ;;  %v11798_v19 = vld [vmem:[%s15311_s3 + $0x1f0] sm:$0xff]  }
 0x365   : > { %10784 = vmatprep.subr.bf16.mxu1 %v12204_v3 }
 0x367   : > { %10781 = vmatmul.mubr.bf16.vlgmr.msra.gmra.mrb[4].mxu1 %v13410_v34  ;;  %v11757_v34 = vld [vmem:[%s15311_s3 + $0x118] sm:$0xff]  }
 0x368   : > { %10785 = vmatpush3.bf16.msra.mxu1 %v11754_v20  ;;  %10800 = vmatprep.mubr.msk.bf16.mxu1 %vm12205_vm0, %v12204_v3  ;;  %v11799_v20 = vld [vmem:[%s15313_s5 + $0x70] sm:$0xff]  }
 0x369   : > { %10786 = vmatprep.subr.bf16.mxu1 %v12204_v3 }
 0x36c   : > { %10787 = vmatpush3.bf16.msra.mxu1 %v11755_v21  ;;  %v11800_v21 = vld [vmem:[%s15311_s3 + $0x1f8] sm:$0xff]  }
 0x36d   : > { %10788 = vmatprep.subr.bf16.mxu1 %v12204_v3 }
 0x370   : > { %10789 = vmatpush3.bf16.msra.mxu1 %v11756_v59  ;;  %v11801_v59 = vld [vmem:[%s15313_s5 + $0x78] sm:$0xff]  }
 0x371   : > { %10790 = vmatprep.subr.bf16.mxu1 %v12204_v3 }
 0x374   : > { %10791 = vmatpush3.bf16.msra.mxu1 %v11757_v34  ;;  %v11802_v34 = vld [vmem:[%s15311_s3 + $0x200] sm:$0xff]  }
 0x375   : > { %10792 = vmatprep.subr.bf16.mxu1 %v12204_v3 }
 0x378   : > { %10793 = vmatpush3.bf16.msra.mxu1 %v11758_v11  ;;  %v11803_v11 = vld [vmem:[%s15313_s5 + $0x80] sm:$0xff]  }
 0x379   : > { %10794 = vmatprep.subr.bf16.mxu1 %v12204_v3 }
 0x37c   : > { %10795 = vmatpush3.bf16.msra.mxu1 %v11759_v22 }
 0x37d   : > { %10796 = vmatprep.subr.bf16.mxu1 %v12204_v3 }
 0x380   : > { %10797 = vmatpush3.bf16.msra.mxu1 %v11760_v12  ;;  %v11804_v12 = vld [vmem:[%s15311_s3 + $0x208] sm:$0xff]  }
 0x381   : > { %10798 = vmatprep.subr.bf16.mxu1 %v12204_v3 }
 0x384   : > { %10799 = vmatpush3.bf16.msra.mxu1 %v11761_v23  ;;  %v11806_v23 = vld [vmem:[%s15311_s3 + $0x210] sm:$0xff]  }
 0x385   : > { %10804 = vmatprep.subr.bf16.mxu1 %v12204_v3 }
 0x387   : > { %10801 = vmatmul.mubr.bf16.vlgmr.msra.gmra.mrb[4].mxu1 %v13501_v2  ;;  %v11765_v2 = vld [vmem:[%s15311_s3 + $0x158] sm:$0xff]  }
 0x388   : > { %10805 = vmatpush3.bf16.msra.mxu1 %v11762_v25  ;;  %10820 = vmatprep.mubr.msk.bf16.mxu1 %vm12205_vm0, %v12204_v3  ;;  %v11807_v25 = vld [vmem:[%s15313_s5 + $0x90] sm:$0xff]  }
 0x389   : > { %10806 = vmatprep.subr.bf16.mxu1 %v12204_v3 }
 0x38c   : > { %10807 = vmatpush3.bf16.msra.mxu1 %v11763_v30  ;;  %v11808_v30 = vld [vmem:[%s15311_s3 + $0x218] sm:$0xff]  }
 0x38d   : > { %10808 = vmatprep.subr.bf16.mxu1 %v12204_v3 }
 0x390   : > { %10809 = vmatpush3.bf16.msra.mxu1 %v11764_v7  ;;  %v11809_v7 = vld [vmem:[%s15313_s5 + $0x98] sm:$0xff]  }
 0x391   : > { %10810 = vmatprep.subr.bf16.mxu1 %v12204_v3 }
 0x394   : > { %10811 = vmatpush3.bf16.msra.mxu1 %v11765_v2  ;;  %v11810_v2 = vld [vmem:[%s15311_s3 + $0x220] sm:$0xff]  }
 0x395   : > { %10812 = vmatprep.subr.bf16.mxu1 %v12204_v3 }
 0x398   : > { %10813 = vmatpush3.bf16.msra.mxu1 %v11766_v27  ;;  %v11811_v27 = vld [vmem:[%s15313_s5 + $0xa0] sm:$0xff]  }
 0x399   : > { %10814 = vmatprep.subr.bf16.mxu1 %v12204_v3 }
 0x39c   : > { %10815 = vmatpush3.bf16.msra.mxu1 %v11767_v37  ;;  %v11812_v37 = vld [vmem:[%s15311_s3 + $0x228] sm:$0xff]  }
 0x39d   : > { %10816 = vmatprep.subr.bf16.mxu1 %v12204_v3 }
 0x3a0   : > { %10817 = vmatpush3.bf16.msra.mxu1 %v11768_v38  ;;  %v11813_v38 = vld [vmem:[%s15313_s5 + $0xa8] sm:$0xff]  }
 0x3a1   : > { %10818 = vmatprep.subr.bf16.mxu1 %v12204_v3 }
 0x3a4   : > { %10819 = vmatpush3.bf16.msra.mxu1 %v11769_v42  ;;  %v5213_v42 = vrot.slane %v13763_v41, 1 }
 0x3a5   : > { %10824 = vmatprep.subr.bf16.mxu1 %v12204_v3 }
 0x3a7   : > { %10821 = vmatmul.mubr.bf16.vlgmr.msra.gmra.mrb[4].mxu1 %v13582_v29  ;;  %v11776_v29 = vld [vmem:[%s15311_s3 + $0x198] sm:$0xff]  }
 0x3a8   : > { %10825 = vmatpush3.bf16.msra.mxu1 %v11770_v43  ;;  %10840 = vmatprep.mubr.msk.bf16.mxu1 %vm12205_vm0, %v12204_v3  ;;  %v11814_v43 = vld [vmem:[%s15311_s3 + $0x230] sm:$0xff]  }
 0x3a9   : > { %10826 = vmatprep.subr.bf16.mxu1 %v12204_v3 }
 0x3ac   : > { %10827 = vmatpush3.bf16.msra.mxu1 %v11772_v24  ;;  %v11815_v24 = vld [vmem:[%s15313_s5 + $0xb0] sm:$0xff]  }
 0x3ad   : > { %10828 = vmatprep.subr.bf16.mxu1 %v12204_v3 }
 0x3b0   : > { %10829 = vmatpush3.bf16.msra.mxu1 %v11774_v44  ;;  %v5217_v44 = vsel %vm771_vm1, %v13763_v41, %v5213_v42  ;;  %v11834_v41 = vld [vmem:[%s15311_s3 + $0x280] sm:$0xff]  }
 0x3b1   : > { %10830 = vmatprep.subr.bf16.mxu1 %v12204_v3 }
 0x3b4   : > { %10831 = vmatpush3.bf16.msra.mxu1 %v11776_v29  ;;  %v11816_v29 = vld [vmem:[%s15311_s3 + $0x238] sm:$0xff]  }
 0x3b5   : > { %10832 = vmatprep.subr.bf16.mxu1 %v12204_v3 }
 0x3b8   : > { %10833 = vmatpush3.bf16.msra.mxu1 %v11778_v8  ;;  %v11817_v8 = vld [vmem:[%s15313_s5 + $0xb8] sm:$0xff]  }
 0x3b9   : > { %10834 = vmatprep.subr.bf16.mxu1 %v12204_v3 }
 0x3ba   : > { %v2536_v49 = vpop.f32.mrb[0].mxu1 }
 0x3bb   : > { %v11204_v32 = vadd.f32 %v14042_v47, %v2536_v49  ;;  %v10382_v50 = vpop.f32.mrb[1].mxu1  ;;  %v11818_v49 = vld [vmem:[%s15311_s3 + $0x240] sm:$0xff]  }
 0x3bc   : > { %v2539_v54 = vpop.f32.mrb[2].mxu1  ;;  %10835 = vmatpush3.bf16.msra.mxu1 %v11780_v48  ;;  %v5218_v48 = vsel %vm773_vm2, %v5217_v44, %v13772_v52  ;;  %v11819_v50 = vld [vmem:[%s15313_s5 + $0xc0] sm:$0xff]   ;;  %v11861_v44 = vld [vmem:[%s15313_s5 + $0x168] sm:$0xff]  }
 0x3bd   : > { %v2543_v57 = vmax.f32 %v11204_v32, 0.0  ;;  %v10383_v31 = vpop.f32.mrb[3].mxu1  ;;  %10836 = vmatprep.subr.bf16.mxu1 %v12204_v3  ;;  %v5235_v32 = vpack.c.bf16 %v5218_v48, %v5218_v48  ;;  %v11864_v48 = vld [vmem:[%s15311_s3 + $0x2f8] sm:$0xff]  }
 0x3be   : > { %v11822_v31 = vld [vmem:[%s15311_s3 + $0x250] sm:$0xff]  }
 0x3bf   : > { %2544 = vst [vmem:[#allocation3] sm:$0x7] %v2543_v57  ;;  %v11821_v57 = vld [vmem:[%s15313_s5 + $0xc8] sm:$0xff]  }
 0x3c0   : > { %10837 = vmatpush3.bf16.msra.mxu1 %v11782_v56  ;;  %v11820_v56 = vld [vmem:[%s15311_s3 + $0x248] sm:$0xff]  }
 0x3c1   : > { %10838 = vmatprep.subr.bf16.mxu1 %v12204_v3 }
 0x3c2   : > { %v4314_v60 = vpop.f32.mrb[16].mxu0 }
 0x3c3   : > { %v11205_v61 = vadd.f32 %v14042_v47, %v4314_v60  ;;  %v10702_v62 = vpop.f32.mrb[17].mxu0  ;;  %v11824_v60 = vld [vmem:[%s15311_s3 + $0x258] sm:$0xff]  }
 0x3c4   : > { %v4317_v63 = vpop.f32.mrb[18].mxu0  ;;  %10839 = vmatpush3.bf16.msra.mxu1 %v11784_v53  ;;  %v11823_v53 = vld [vmem:[%s15313_s5 + $0xd0] sm:$0xff]   ;;  %v11826_v62 = vld [vmem:[%s15311_s3 + $0x260] sm:$0xff]  }
 0x3c5   : > { %v4321_v4 = vmax.f32 %v11205_v61, 0.0  ;;  %v10703_v5 = vpop.f32.mrb[19].mxu0  ;;  %10844 = vmatprep.subr.bf16.mxu1 %v12204_v3  ;;  %v11825_v61 = vld [vmem:[%s15313_s5 + $0xd8] sm:$0xff]   ;;  %v11827_v63 = vld [vmem:[%s15313_s5 + $0xe0] sm:$0xff]  }
 0x3c6   : > { %v6102_v6 = vld [vmem:[#allocation3] sm:$0x7]  ;;  %v11830_v5 = vld [vmem:[%s15311_s3 + $0x270] sm:$0xff]  }
 0x3c7   : > { %4322 = vst [vmem:[#allocation3 + $0x3] sm:$0x7] %v4321_v4  ;;  %10841 = vmatmul.mubr.bf16.vlgmr.msra.gmra.mrb[4].mxu1 %v13659_v51  ;;  %v14066_v10 = vpack.c.bf16 %v6102_v6, %v6102_v6  ;;  %v11790_v51 = vld [vmem:[%s15311_s3 + $0x1d0] sm:$0xff]   ;;  %v11829_v4 = vld [vmem:[%s15313_s5 + $0xe8] sm:$0xff]  }
 0x3c8   : > { %10845 = vmatpush3.bf16.msra.mxu1 %v11786_v0  ;;  %10860 = vmatprep.mubr.msk.bf16.mxu1 %vm12205_vm0, %v12204_v3  ;;  %v11828_v0 = vld [vmem:[%s15311_s3 + $0x268] sm:$0xff]   ;;  %v11831_v6 = vld [vmem:[%s15313_s5 + $0xf0] sm:$0xff]  }
 0x3c9   : > { %11041 = vmatmul.mubr.bf16.vlgmr.msra.gmra.mrb[20].mxu0 %v14066_v10  ;;  %10846 = vmatprep.subr.bf16.mxu1 %v12204_v3  ;;  %v6226_v22 = vshrl.u32 %v14066_v10, 16  ;;  %v6335_v54 = vrot.slane %v14066_v10, 1  ;;  %v11832_v10 = vld [vmem:[%s15311_s3 + $0x278] sm:$0xff]  }
 0x3ca   : > { %11045 = vmatpush3.bf16.msra.mxu0 %v11787_v9  ;;  %11060 = vmatprep.mubr.msk.bf16.mxu0 %vm12205_vm0, %v12204_v3  ;;  %v5327_v9 = vsel %vm771_vm1, %v5213_v42, %v13772_v52  ;;  %v11858_v42 = vld [vmem:[%s15311_s3 + $0x2e0] sm:$0xff]  }
 0x3cb   : > { %11046 = vmatprep.subr.bf16.mxu0 %v12204_v3 }
 0x3cc   : > { %10847 = vmatpush3.bf16.msra.mxu1 %v11788_v1  ;;  %v11833_v1 = vld [vmem:[%s15313_s5 + $0xf8] sm:$0xff]  }
 0x3cd   : > { %10848 = vmatprep.subr.bf16.mxu1 %v12204_v3 }
 0x3ce   : > { %11047 = vmatpush3.bf16.msra.mxu0 %v11789_v14  ;;  %v5328_v14 = vsel %vm773_vm2, %v5327_v9, %v13775_v26  ;;  %v6426_v52 = vld [vmem:[#allocation3 + $0x3] sm:$0x7]  ;;  %v11836_v26 = vld [vmem:[%s15311_s3 + $0x288] sm:$0xff]   ;;  %v11873_v9 = vld [vmem:[%s15311_s3 + $0x338] sm:$0xff]  }
 0x3cf   : > { %11048 = vmatprep.subr.bf16.mxu0 %v12204_v3 }
 0x3d0   : > { %10849 = vmatpush3.bf16.msra.mxu1 %v11790_v51  ;;  %v5345_v51 = vpack.c.bf16 %v5328_v14, %v5328_v14 }
 0x3d1   : > { %10850 = vmatprep.subr.bf16.mxu1 %v12204_v3 }
 0x3d2   : > { %11049 = vmatpush3.bf16.msra.mxu0 %v11791_v58  ;;  %v11835_v58 = vld [vmem:[%s15313_s5 + $0x100] sm:$0xff]  }
 0x3d3   : > { %11050 = vmatprep.subr.bf16.mxu0 %v12204_v3 }
 0x3d4   : > { %10851 = vmatpush3.bf16.msra.mxu1 %v11792_v46  ;;  %v14288_v46 = vpack.c.bf16 %v6426_v52, %v6426_v52  ;;  %v11877_v52 = vld [vmem:[%s15311_s3 + $0x358] sm:$0xff]  }
 0x3d5   : > { %10852 = vmatprep.subr.bf16.mxu1 %v12204_v3 }
 0x3d6   : > { %11051 = vmatpush3.bf16.msra.mxu0 %v11793_v13  ;;  %v11837_v13 = vld [vmem:[%s15313_s5 + $0x108] sm:$0xff]  }
 0x3d7   : > { %11052 = vmatprep.subr.bf16.mxu0 %v12204_v3 }
 0x3d8   : > { %10853 = vmatpush3.bf16.msra.mxu1 %v11794_v33  ;;  %v11838_v33 = vld [vmem:[%s15311_s3 + $0x290] sm:$0xff]  }
 0x3d9   : > { %10854 = vmatprep.subr.bf16.mxu1 %v12204_v3 }
 0x3da   : > { %11053 = vmatpush3.bf16.msra.mxu0 %v11795_v16  ;;  %v11839_v16 = vld [vmem:[%s15313_s5 + $0x110] sm:$0xff]  }
 0x3db   : > { %11054 = vmatprep.subr.bf16.mxu0 %v12204_v3 }
 0x3dc   : > { %10855 = vmatpush3.bf16.msra.mxu1 %v11796_v17  ;;  %v11840_v17 = vld [vmem:[%s15311_s3 + $0x298] sm:$0xff]  }
 0x3dd   : > { %10856 = vmatprep.subr.bf16.mxu1 %v12204_v3 }
 0x3de   : > { %11055 = vmatpush3.bf16.msra.mxu0 %v11797_v18  ;;  %v11841_v18 = vld [vmem:[%s15313_s5 + $0x118] sm:$0xff]  }
 0x3df   : > { %11056 = vmatprep.subr.bf16.mxu0 %v12204_v3 }
 0x3e0   : > { %10857 = vmatpush3.bf16.msra.mxu1 %v11798_v19  ;;  %v11842_v19 = vld [vmem:[%s15311_s3 + $0x2a0] sm:$0xff]  }
 0x3e1   : > { %10858 = vmatprep.subr.bf16.mxu1 %v12204_v3 }
 0x3e2   : > { %11057 = vmatpush3.bf16.msra.mxu0 %v11799_v20  ;;  %v11843_v20 = vld [vmem:[%s15313_s5 + $0x120] sm:$0xff]  }
 0x3e3   : > { %11058 = vmatprep.subr.bf16.mxu0 %v12204_v3 }
 0x3e4   : > { %10859 = vmatpush3.bf16.msra.mxu1 %v11800_v21  ;;  %v11844_v21 = vld [vmem:[%s15311_s3 + $0x2a8] sm:$0xff]  }
 0x3e5   : > { %10864 = vmatprep.subr.bf16.mxu1 %v12204_v3 }
 0x3e6   : > { %11059 = vmatpush3.bf16.msra.mxu0 %v11801_v59  ;;  %v11845_v59 = vld [vmem:[%s15313_s5 + $0x128] sm:$0xff]  }
 0x3e7   : > { %10861 = vmatmul.mubr.bf16.vlgmr.msra.gmra.mrb[4].mxu1 %v13735_v15  ;;  %11064 = vmatprep.subr.bf16.mxu0 %v12204_v3  ;;  %v11805_v15 = vld [vmem:[%s15313_s5 + $0x88] sm:$0xff]  }
 0x3e8   : > { %10865 = vmatpush3.bf16.msra.mxu1 %v11802_v34  ;;  %10880 = vmatprep.mubr.msk.bf16.mxu1 %vm12205_vm0, %v12204_v3  ;;  %v11846_v34 = vld [vmem:[%s15311_s3 + $0x2b0] sm:$0xff]  }
 0x3e9   : > { %11061 = vmatmul.mubr.bf16.vlgmr.msra.gmra.mrb[20].mxu0 %v6226_v22  ;;  %10866 = vmatprep.subr.bf16.mxu1 %v12204_v3  ;;  %v11848_v22 = vld [vmem:[%s15311_s3 + $0x2b8] sm:$0xff]  }
 0x3ea   : > { %11065 = vmatpush3.bf16.msra.mxu0 %v11803_v11  ;;  %11080 = vmatprep.mubr.msk.bf16.mxu0 %vm12205_vm0, %v12204_v3  ;;  %v11847_v11 = vld [vmem:[%s15313_s5 + $0x130] sm:$0xff]  }
 0x3eb   : > { %11066 = vmatprep.subr.bf16.mxu0 %v12204_v3 }
 0x3ec   : > { %10867 = vmatpush3.bf16.msra.mxu1 %v11804_v12  ;;  %v11849_v12 = vld [vmem:[%s15313_s5 + $0x138] sm:$0xff]  }
 0x3ed   : > { %10868 = vmatprep.subr.bf16.mxu1 %v12204_v3 }
 0x3ee   : > { %11067 = vmatpush3.bf16.msra.mxu0 %v11805_v15  ;;  %v11850_v15 = vld [vmem:[%s15311_s3 + $0x2c0] sm:$0xff]  }
 0x3ef   : > { %11068 = vmatprep.subr.bf16.mxu0 %v12204_v3 }
 0x3f0   : > { %10869 = vmatpush3.bf16.msra.mxu1 %v11806_v23  ;;  %v5455_v23 = vpack.c.bf16 %v13794_v39, %v13794_v39  ;;  %v11853_v39 = vld [vmem:[%s15313_s5 + $0x148] sm:$0xff]  }
 0x3f1   : > { %10870 = vmatprep.subr.bf16.mxu1 %v12204_v3 }
 0x3f2   : > { %11069 = vmatpush3.bf16.msra.mxu0 %v11807_v25  ;;  %v11851_v25 = vld [vmem:[%s15313_s5 + $0x140] sm:$0xff]  }
 0x3f3   : > { %11070 = vmatprep.subr.bf16.mxu0 %v12204_v3 }
 0x3f4   : > { %10871 = vmatpush3.bf16.msra.mxu1 %v11808_v30  ;;  %v6550_v30 = vshrl.u32 %v14288_v46, 16 }
 0x3f5   : > { %10872 = vmatprep.subr.bf16.mxu1 %v12204_v3 }
 0x3f6   : > { %11071 = vmatpush3.bf16.msra.mxu0 %v11809_v7  ;;  %v11852_v7 = vld [vmem:[%s15311_s3 + $0x2c8] sm:$0xff]  }
 0x3f7   : > { %11072 = vmatprep.subr.bf16.mxu0 %v12204_v3 }
 0x3f8   : > { %10873 = vmatpush3.bf16.msra.mxu1 %v11810_v2  ;;  %v11854_v2 = vld [vmem:[%s15311_s3 + $0x2d0] sm:$0xff]  }
 0x3f9   : > { %10874 = vmatprep.subr.bf16.mxu1 %v12204_v3 }
 0x3fa   : > { %11073 = vmatpush3.bf16.msra.mxu0 %v11811_v27  ;;  %v11855_v27 = vld [vmem:[%s15313_s5 + $0x150] sm:$0xff]  }
 0x3fb   : > { %11074 = vmatprep.subr.bf16.mxu0 %v12204_v3 }
 0x3fc   : > { %10875 = vmatpush3.bf16.msra.mxu1 %v11812_v37  ;;  %v11856_v37 = vld [vmem:[%s15311_s3 + $0x2d8] sm:$0xff]  }
 0x3fd   : > { %10876 = vmatprep.subr.bf16.mxu1 %v12204_v3 }
 0x3fe   : > { %11075 = vmatpush3.bf16.msra.mxu0 %v11813_v38  ;;  %v11857_v38 = vld [vmem:[%s15313_s5 + $0x158] sm:$0xff]  }
 0x3ff   : > { %11076 = vmatprep.subr.bf16.mxu0 %v12204_v3 }
 0x400   : > { %10877 = vmatpush3.bf16.msra.mxu1 %v11814_v43  ;;  %v11859_v43 = vld [vmem:[%s15313_s5 + $0x160] sm:$0xff]  }
 0x401   : > { %10878 = vmatprep.subr.bf16.mxu1 %v12204_v3 }
 0x402   : > { %11077 = vmatpush3.bf16.msra.mxu0 %v11815_v24  ;;  %v11860_v24 = vld [vmem:[%s15311_s3 + $0x2e8] sm:$0xff]  }
 0x403   : > { %11078 = vmatprep.subr.bf16.mxu0 %v12204_v3 }
 0x404   : > { %10879 = vmatpush3.bf16.msra.mxu1 %v11816_v29  ;;  %v11862_v29 = vld [vmem:[%s15311_s3 + $0x2f0] sm:$0xff]  }
 0x405   : > { %10884 = vmatprep.subr.bf16.mxu1 %v12204_v3 }
 0x406   : > { %11079 = vmatpush3.bf16.msra.mxu0 %v11817_v8  ;;  %v11863_v8 = vld [vmem:[%s15313_s5 + $0x170] sm:$0xff]  }
 0x407   : > { %10881 = vmatmul.mubr.bf16.vlgmr.msra.gmra.mrb[4].mxu1 %v5235_v32  ;;  %11084 = vmatprep.subr.bf16.mxu0 %v12204_v3  ;;  %v11866_v32 = vld [vmem:[%s15311_s3 + $0x300] sm:$0xff]  }
 0x408   : > { %10885 = vmatpush3.bf16.msra.mxu1 %v11818_v49  ;;  %10900 = vmatprep.mubr.msk.bf16.mxu1 %vm12205_vm0, %v12204_v3  ;;  %v11865_v49 = vld [vmem:[%s15313_s5 + $0x178] sm:$0xff]  }
 0x409   : > { %11081 = vmatmul.mubr.bf16.vlgmr.msra.gmra.mrb[20].mxu0 %v6335_v54  ;;  %10886 = vmatprep.subr.bf16.mxu1 %v12204_v3  ;;  %v6659_v54 = vrot.slane %v14288_v46, 1 }
 0x40a   : > { %11085 = vmatpush3.bf16.msra.mxu0 %v11819_v50  ;;  %11100 = vmatprep.mubr.msk.bf16.mxu0 %vm12205_vm0, %v12204_v3  ;;  %v5565_v50 = vpack.c.bf16 %v13797_v40, %v13797_v40  ;;  %v11899_v40 = vld [vmem:[%s15313_s5 + $0x188] sm:$0xff]  }
 0x40b   : > { %11086 = vmatprep.subr.bf16.mxu0 %v12204_v3 }
 0x40c   : > { %10887 = vmatpush3.bf16.msra.mxu1 %v11820_v56  ;;  %v11898_v56 = vld [vmem:[%s15313_s5 + $0x180] sm:$0xff]  }
 0x40d   : > { %10888 = vmatprep.subr.bf16.mxu1 %v12204_v3 }
 0x40e   : > { %11087 = vmatpush3.bf16.msra.mxu0 %v11821_v57  ;;  %v11867_v57 = vld [vmem:[%s15311_s3 + $0x308] sm:$0xff]  }
 0x40f   : > { %11088 = vmatprep.subr.bf16.mxu0 %v12204_v3 }
 0x410   : > { %10889 = vmatpush3.bf16.msra.mxu1 %v11822_v31  ;;  %v11868_v31 = vld [vmem:[%s15311_s3 + $0x310] sm:$0xff]  }
 0x411   : > { %10890 = vmatprep.subr.bf16.mxu1 %v12204_v3 }
 0x412   : > { %11089 = vmatpush3.bf16.msra.mxu0 %v11823_v53  ;;  %v11900_v53 = vld [vmem:[%s15313_s5 + $0x190] sm:$0xff]  }
 0x413   : > { %11090 = vmatprep.subr.bf16.mxu0 %v12204_v3 }
 0x414   : > { %10891 = vmatpush3.bf16.msra.mxu1 %v11824_v60  ;;  %v11869_v60 = vld [vmem:[%s15311_s3 + $0x318] sm:$0xff]  }
 0x415   : > { %10892 = vmatprep.subr.bf16.mxu1 %v12204_v3 }
 0x416   : > { %11091 = vmatpush3.bf16.msra.mxu0 %v11825_v61  ;;  %v11901_v61 = vld [vmem:[%s15313_s5 + $0x198] sm:$0xff]  }
 0x417   : > { %11092 = vmatprep.subr.bf16.mxu0 %v12204_v3 }
 0x418   : > { %10893 = vmatpush3.bf16.msra.mxu1 %v11826_v62  ;;  %v11870_v62 = vld [vmem:[%s15311_s3 + $0x320] sm:$0xff]  }
 0x419   : > { %10894 = vmatprep.subr.bf16.mxu1 %v12204_v3 }
 0x41a   : > { %11093 = vmatpush3.bf16.msra.mxu0 %v11827_v63  ;;  %v11902_v63 = vld [vmem:[%s15313_s5 + $0x1a0] sm:$0xff]  }
 0x41b   : > { %11094 = vmatprep.subr.bf16.mxu0 %v12204_v3 }
 0x41c   : > { %10895 = vmatpush3.bf16.msra.mxu1 %v11828_v0  ;;  %v11871_v0 = vld [vmem:[%s15311_s3 + $0x328] sm:$0xff]  }
 0x41d   : > { %10896 = vmatprep.subr.bf16.mxu1 %v12204_v3 }
 0x41e   : > { %11095 = vmatpush3.bf16.msra.mxu0 %v11829_v4  ;;  %v5657_v4 = vrot.slane %v13765_v55, 1 }
 0x41f   : > { %11096 = vmatprep.subr.bf16.mxu0 %v12204_v3 }
 0x420   : > { %10897 = vmatpush3.bf16.msra.mxu1 %v11830_v5  ;;  %v11872_v5 = vld [vmem:[%s15311_s3 + $0x330] sm:$0xff]  }
 0x421   : > { %10898 = vmatprep.subr.bf16.mxu1 %v12204_v3 }
 0x422   : > { %11097 = vmatpush3.bf16.msra.mxu0 %v11831_v6  ;;  %v5661_v6 = vsel %vm771_vm1, %v13765_v55, %v5657_v4  ;;  %v11875_v55 = vld [vmem:[%s15311_s3 + $0x348] sm:$0xff]  }
 0x423   : > { %11098 = vmatprep.subr.bf16.mxu0 %v12204_v3 }
 0x424   : > { %10899 = vmatpush3.bf16.msra.mxu1 %v11832_v10  ;;  %v5662_v10 = vsel %vm773_vm2, %v5661_v6, %v13780_v35 }
 0x425   : > { %10904 = vmatprep.subr.bf16.mxu1 %v12204_v3  ;;  %v5679_v14 = vpack.c.bf16 %v5662_v10, %v5662_v10  ;;  %v11930_v10 = vld [vmem:[%s15315_s7 + $0x44] ss:$16 sps:$4 sm:$0xff]  }
 0x426   : > { %11099 = vmatpush3.bf16.msra.mxu0 %v11833_v1  ;;  %v11874_v1 = vld [vmem:[%s15311_s3 + $0x340] sm:$0xff]  }
 0x427   : > { %10901 = vmatmul.mubr.bf16.vlgmr.msra.gmra.mrb[4].mxu1 %v5345_v51  ;;  %11104 = vmatprep.subr.bf16.mxu0 %v12204_v3  ;;  %v11878_v51 = vld [vmem:[%s15311_s3 + $0x360] sm:$0xff]  }
 0x428   : > { %10905 = vmatpush3.bf16.msra.mxu1 %v11834_v41  ;;  %10920 = vmatprep.mubr.msk.bf16.mxu1 %vm12205_vm0, %v12204_v3  ;;  %v11876_v41 = vld [vmem:[%s15311_s3 + $0x350] sm:$0xff]  }
 0x429   : > { %11101 = vmatmul.mubr.bf16.vlgmr.msra.gmra.mrb[20].mxu0 %v14288_v46  ;;  %10906 = vmatprep.subr.bf16.mxu1 %v12204_v3  ;;  %v11880_v46 = vld [vmem:[%s15311_s3 + $0x370] sm:$0xff]  }
 0x42a   : > { %11105 = vmatpush3.bf16.msra.mxu0 %v11835_v58  ;;  %11120 = vmatprep.mubr.msk.bf16.mxu0 %vm12205_vm0, %v12204_v3  ;;  %v11879_v58 = vld [vmem:[%s15311_s3 + $0x368] sm:$0xff]  }
 0x42b   : > { %11106 = vmatprep.subr.bf16.mxu0 %v12204_v3 }
 0x42c   : > { %10907 = vmatpush3.bf16.msra.mxu1 %v11836_v26  ;;  %v5771_v26 = vsel %vm771_vm1, %v5657_v4, %v13780_v35  ;;  %v11883_v35 = vld [vmem:[%s15311_s3 + $0x388] sm:$0xff]   ;;  %v11924_v4 = vld [vmem:[%s15315_s7 + $0x4] ss:$16 sps:$4 sm:$0xff]  }
 0x42d   : > { %10908 = vmatprep.subr.bf16.mxu1 %v12204_v3 }
 0x42e   : > { %11107 = vmatpush3.bf16.msra.mxu0 %v11837_v13  ;;  %v11881_v13 = vld [vmem:[%s15311_s3 + $0x378] sm:$0xff]  }
 0x42f   : > { %11108 = vmatprep.subr.bf16.mxu0 %v12204_v3 }
 0x430   : > { %10909 = vmatpush3.bf16.msra.mxu1 %v11838_v33  ;;  %v5772_v33 = vsel %vm773_vm2, %v5771_v26, %v13783_v36  ;;  %v11884_v36 = vld [vmem:[%s15311_s3 + $0x390] sm:$0xff]  }
 0x431   : > { %10910 = vmatprep.subr.bf16.mxu1 %v12204_v3  ;;  %v11940_v26 = vld [vmem:[%s15315_s7 + $0xc0] ss:$16 sps:$4 sm:$0xff]  }
 0x432   : > { %11109 = vmatpush3.bf16.msra.mxu0 %v11839_v16  ;;  %v11882_v16 = vld [vmem:[%s15311_s3 + $0x380] sm:$0xff]  }
 0x433   : > { %11110 = vmatprep.subr.bf16.mxu0 %v12204_v3 }
 0x434   : > { %10911 = vmatpush3.bf16.msra.mxu1 %v11840_v17  ;;  %v5789_v17 = vpack.c.bf16 %v5772_v33, %v5772_v33  ;;  %v11945_v33 = vld [vmem:[%s15315_s7 + $0xe4] ss:$16 sps:$4 sm:$0xff]  }
 0x435   : > { %10912 = vmatprep.subr.bf16.mxu1 %v12204_v3 }
 0x436   : > { %11111 = vmatpush3.bf16.msra.mxu0 %v11841_v18  ;;  %v11885_v18 = vld [vmem:[%s15311_s3 + $0x398] sm:$0xff]  }
 0x437   : > { %11112 = vmatprep.subr.bf16.mxu0 %v12204_v3 }
 0x438   : > { %10913 = vmatpush3.bf16.msra.mxu1 %v11842_v19  ;;  %v11886_v19 = vld [vmem:[%s15311_s3 + $0x3a0] sm:$0xff]  }
 0x439   : > { %10914 = vmatprep.subr.bf16.mxu1 %v12204_v3 }
 0x43a   : > { %11113 = vmatpush3.bf16.msra.mxu0 %v11843_v20  ;;  %v11887_v20 = vld [vmem:[%s15311_s3 + $0x3a8] sm:$0xff]  }
 0x43b   : > { %11114 = vmatprep.subr.bf16.mxu0 %v12204_v3 }
 0x43c   : > { %10915 = vmatpush3.bf16.msra.mxu1 %v11844_v21  ;;  %v11888_v21 = vld [vmem:[%s15311_s3 + $0x3b0] sm:$0xff]  }
 0x43d   : > { %10916 = vmatprep.subr.bf16.mxu1 %v12204_v3 }
 0x43e   : > { %11115 = vmatpush3.bf16.msra.mxu0 %v11845_v59  ;;  %v11889_v59 = vld [vmem:[%s15311_s3 + $0x3b8] sm:$0xff]  }
 0x43f   : > { %11116 = vmatprep.subr.bf16.mxu0 %v12204_v3 }
 0x440   : > { %10917 = vmatpush3.bf16.msra.mxu1 %v11846_v34  ;;  %v11890_v34 = vld [vmem:[%s15311_s3 + $0x3c0] sm:$0xff]  }
 0x441   : > { %10918 = vmatprep.subr.bf16.mxu1 %v12204_v3 }
 0x442   : > { %11117 = vmatpush3.bf16.msra.mxu0 %v11847_v11  ;;  %v5899_v11 = vpack.c.bf16 %v13812_v45, %v13812_v45  ;;  %v11893_v45 = vld [vmem:[%s15311_s3 + $0x3d8] sm:$0xff]  }
 0x443   : > { %11118 = vmatprep.subr.bf16.mxu0 %v12204_v3 }
 0x444   : > { %10919 = vmatpush3.bf16.msra.mxu1 %v11848_v22  ;;  %v11891_v22 = vld [vmem:[%s15311_s3 + $0x3c8] sm:$0xff]  }
 0x445   : > { %10924 = vmatprep.subr.bf16.mxu1 %v12204_v3 }
 0x446   : > { %11119 = vmatpush3.bf16.msra.mxu0 %v11849_v12  ;;  %v11892_v12 = vld [vmem:[%s15311_s3 + $0x3d0] sm:$0xff]  }
 0x447   : > { %10921 = vmatmul.mubr.bf16.vlgmr.msra.gmra.mrb[4].mxu1 %v5455_v23  ;;  %11124 = vmatprep.subr.bf16.mxu0 %v12204_v3  ;;  %v11895_v23 = vld [vmem:[%s15311_s3 + $0x3e8] sm:$0xff]  }
 0x448   : > { %10925 = vmatpush3.bf16.msra.mxu1 %v11850_v15  ;;  %10940 = vmatprep.mubr.msk.bf16.mxu1 %vm12205_vm0, %v12204_v3  ;;  %v11894_v15 = vld [vmem:[%s15311_s3 + $0x3e0] sm:$0xff]  }
 0x449   : > { %11121 = vmatmul.mubr.bf16.vlgmr.msra.gmra.mrb[20].mxu0 %v6550_v30  ;;  %10926 = vmatprep.subr.bf16.mxu1 %v12204_v3  ;;  %v11897_v30 = vld [vmem:[%s15311_s3 + $0x3f8] sm:$0xff]  }
 0x44a   : > { %11125 = vmatpush3.bf16.msra.mxu0 %v11851_v25  ;;  %11140 = vmatprep.mubr.msk.bf16.mxu0 %vm12205_vm0, %v12204_v3  ;;  %v11896_v25 = vld [vmem:[%s15311_s3 + $0x3f0] sm:$0xff]  }
 0x44b   : > { %11126 = vmatprep.subr.bf16.mxu0 %v12204_v3 }
 0x44c   : > { %10927 = vmatpush3.bf16.msra.mxu1 %v11852_v7  ;;  %v6009_v7 = vpack.c.bf16 %v13818_v28, %v13818_v28 }
 0x44d   : > { %10928 = vmatprep.subr.bf16.mxu1 %v12204_v3 }
 0x44e   : > { %11127 = vmatpush3.bf16.msra.mxu0 %v11853_v39  ;;  %v11903_v39 = vld [vmem:[%s15313_s5 + $0x1a8] sm:$0xff]  }
 0x44f   : > { %11128 = vmatprep.subr.bf16.mxu0 %v12204_v3 }
 0x450   : > { %10929 = vmatpush3.bf16.msra.mxu1 %v11854_v2  ;;  %v11904_v2 = vld [vmem:[%s15313_s5 + $0x1b0] sm:$0xff]  }
 0x451   : > { %10930 = vmatprep.subr.bf16.mxu1 %v12204_v3 }
 0x452   : > { %11129 = vmatpush3.bf16.msra.mxu0 %v11855_v27  ;;  %v11905_v27 = vld [vmem:[%s15313_s5 + $0x1b8] sm:$0xff]  }
 0x453   : > { %11130 = vmatprep.subr.bf16.mxu0 %v12204_v3 }
 0x454   : > { %10931 = vmatpush3.bf16.msra.mxu1 %v11856_v37 }
 0x455   : > { %10932 = vmatprep.subr.bf16.mxu1 %v12204_v3 }
 0x456   : > { %11131 = vmatpush3.bf16.msra.mxu0 %v11857_v38 }
 0x457   : > { %11132 = vmatprep.subr.bf16.mxu0 %v12204_v3 }
 0x458   : > { %10933 = vmatpush3.bf16.msra.mxu1 %v11858_v42 }
 0x459   : > { %10934 = vmatprep.subr.bf16.mxu1 %v12204_v3 }
 0x45a   : > { %11133 = vmatpush3.bf16.msra.mxu0 %v11859_v43 }
 0x45b   : > { %11134 = vmatprep.subr.bf16.mxu0 %v12204_v3 }
 0x45c   : > { %10935 = vmatpush3.bf16.msra.mxu1 %v11860_v24 }
 0x45d   : > { %10936 = vmatprep.subr.bf16.mxu1 %v12204_v3 }
 0x45e   : > { %11135 = vmatpush3.bf16.msra.mxu0 %v11861_v44 }
 0x45f   : > { %11136 = vmatprep.subr.bf16.mxu0 %v12204_v3 }
 0x460   : > { %10937 = vmatpush3.bf16.msra.mxu1 %v11862_v29  ;;  %v11906_v29 = vld [vmem:[%s15313_s5 + $0x1c0] sm:$0xff]  }
 0x461   : > { %10938 = vmatprep.subr.bf16.mxu1 %v12204_v3 }
 0x462   : > { %11137 = vmatpush3.bf16.msra.mxu0 %v11863_v8 }
 0x463   : > { %11138 = vmatprep.subr.bf16.mxu0 %v12204_v3 }
 0x464   : > { %10939 = vmatpush3.bf16.msra.mxu1 %v11864_v48  ;;  %v11907_v48 = vld [vmem:[%s15313_s5 + $0x1c8] sm:$0xff]  }
 0x465   : > { %10944 = vmatprep.subr.bf16.mxu1 %v12204_v3 }
 0x466   : > { %11139 = vmatpush3.bf16.msra.mxu0 %v11865_v49  ;;  %v11909_v49 = vld [vmem:[%s15313_s5 + $0x1d8] sm:$0xff]  }
 0x467   : > { %10941 = vmatmul.mubr.bf16.vlgmr.msra.gmra.mrb[4].mxu1 %v5565_v50  ;;  %11144 = vmatprep.subr.bf16.mxu0 %v12204_v3  ;;  %v11911_v50 = vld [vmem:[%s15313_s5 + $0x1e8] sm:$0xff]  }
 0x468   : > { %10945 = vmatpush3.bf16.msra.mxu1 %v11866_v32  ;;  %10960 = vmatprep.mubr.msk.bf16.mxu1 %vm12205_vm0, %v12204_v3  ;;  %v11910_v32 = vld [vmem:[%s15313_s5 + $0x1e0] sm:$0xff]  }
 0x469   : > { %11141 = vmatmul.mubr.bf16.vlgmr.msra.gmra.mrb[20].mxu0 %v6659_v54  ;;  %10946 = vmatprep.subr.bf16.mxu1 %v12204_v3  ;;  %v11912_v54 = vld [vmem:[%s15313_s5 + $0x1f0] sm:$0xff]  }
 0x46a   : > { %11145 = vmatpush3.bf16.msra.mxu0 %v11898_v56  ;;  %11160 = vmatprep.mubr.msk.bf16.mxu0 %vm12205_vm0, %v12204_v3  ;;  %v11913_v56 = vld [vmem:[%s15313_s5 + $0x1f8] sm:$0xff]  }
 0x46b   : > { %11146 = vmatprep.subr.bf16.mxu0 %v12204_v3 }
 0x46c   : > { %10947 = vmatpush3.bf16.msra.mxu1 %v11867_v57  ;;  %v11914_v57 = vld [vmem:[%s15313_s5 + $0x200] sm:$0xff]  }
 0x46d   : > { %10948 = vmatprep.subr.bf16.mxu1 %v12204_v3 }
 0x46e   : > { %11147 = vmatpush3.bf16.msra.mxu0 %v11899_v40 }
 0x46f   : > { %11148 = vmatprep.subr.bf16.mxu0 %v12204_v3 }
 0x470   : > { %10949 = vmatpush3.bf16.msra.mxu1 %v11868_v31  ;;  %v11915_v31 = vld [vmem:[%s15313_s5 + $0x208] sm:$0xff]  }
 0x471   : > { %10950 = vmatprep.subr.bf16.mxu1 %v12204_v3 }
 0x472   : > { %11149 = vmatpush3.bf16.msra.mxu0 %v11900_v53  ;;  %v11916_v53 = vld [vmem:[%s15313_s5 + $0x210] sm:$0xff]  }
 0x473   : > { %11150 = vmatprep.subr.bf16.mxu0 %v12204_v3 }
 0x474   : > { %10951 = vmatpush3.bf16.msra.mxu1 %v11869_v60  ;;  %v11917_v60 = vld [vmem:[%s15313_s5 + $0x218] sm:$0xff]  }
 0x475   : > { %10952 = vmatprep.subr.bf16.mxu1 %v12204_v3 }
 0x476   : > { %11151 = vmatpush3.bf16.msra.mxu0 %v11901_v61  ;;  %v11918_v61 = vld [vmem:[%s15313_s5 + $0x220] sm:$0xff]  }
 0x477   : > { %11152 = vmatprep.subr.bf16.mxu0 %v12204_v3 }
 0x478   : > { %10953 = vmatpush3.bf16.msra.mxu1 %v11870_v62  ;;  %v11919_v62 = vld [vmem:[%s15313_s5 + $0x228] sm:$0xff]  }
 0x479   : > { %10954 = vmatprep.subr.bf16.mxu1 %v12204_v3 }
 0x47a   : > { %11153 = vmatpush3.bf16.msra.mxu0 %v11902_v63  ;;  %v11920_v63 = vld [vmem:[%s15313_s5 + $0x230] sm:$0xff]  }
 0x47b   : > { %11154 = vmatprep.subr.bf16.mxu0 %v12204_v3 }
 0x47c   : > { %10955 = vmatpush3.bf16.msra.mxu1 %v11871_v0  ;;  %v11921_v0 = vld [vmem:[%s15313_s5 + $0x238] sm:$0xff]  }
 0x47d   : > { %10956 = vmatprep.subr.bf16.mxu1 %v12204_v3 }
 0x47e   : > { %11155 = vmatpush3.bf16.msra.mxu0 %v11903_v39  ;;  %v11958_v39 = vld [vmem:[%s15315_s7 + $0x88] ss:$16 sps:$4 sm:$0xff]  }
 0x47f   : > { %11156 = vmatprep.subr.bf16.mxu0 %v12204_v3 }
 0x480   : > { %10957 = vmatpush3.bf16.msra.mxu1 %v11872_v5  ;;  %v11922_v5 = vld [vmem:[%s15315_s7] ss:$16 sps:$4 sm:$0xff]  }
 0x481   : > { %10958 = vmatprep.subr.bf16.mxu1 %v12204_v3 }
 0x482   : > { %11157 = vmatpush3.bf16.msra.mxu0 %v11904_v2  ;;  %v11963_v2 = vld [vmem:[%s15315_s7 + $0xac] ss:$16 sps:$4 sm:$0xff]  }
 0x483   : > { %11158 = vmatprep.subr.bf16.mxu0 %v12204_v3 }
 0x484   : > { %10959 = vmatpush3.bf16.msra.mxu1 %v11873_v9  ;;  %v11927_v9 = vld [vmem:[%s15315_s7 + $0x24] ss:$16 sps:$4 sm:$0xff]  }
 0x485   : > { %10964 = vmatprep.subr.bf16.mxu1 %v12204_v3 }
 0x486   : > { %11159 = vmatpush3.bf16.msra.mxu0 %v11905_v27  ;;  %v11961_v27 = vld [vmem:[%s15315_s7 + $0xa8] ss:$16 sps:$4 sm:$0xff]  }
 0x487   : > { %10961 = vmatmul.mubr.bf16.vlgmr.msra.gmra.mrb[4].mxu1 %v5679_v14  ;;  %11164 = vmatprep.subr.bf16.mxu0 %v12204_v3  ;;  %v11933_v14 = vld [vmem:[%s15315_s7 + $0x64] ss:$16 sps:$4 sm:$0xff]  }
 0x488   : > { %10965 = vmatpush3.bf16.msra.mxu1 %v11874_v1  ;;  %10980 = vmatprep.mubr.msk.bf16.mxu1 %vm12205_vm0, %v12204_v3  ;;  %v11928_v1 = vld [vmem:[%s15315_s7 + $0x40] ss:$16 sps:$4 sm:$0xff]  }
 0x489   : > { %10966 = vmatprep.subr.bf16.mxu1 %v12204_v3 }
 0x48c   : > { %10967 = vmatpush3.bf16.msra.mxu1 %v11875_v55  ;;  %v11931_v55 = vld [vmem:[%s15315_s7 + $0x60] ss:$16 sps:$4 sm:$0xff]  }
 0x48d   : > { %10968 = vmatprep.subr.bf16.mxu1 %v12204_v3 }
 0x490   : > { %10969 = vmatpush3.bf16.msra.mxu1 %v11876_v41  ;;  %v11936_v41 = vld [vmem:[%s15315_s7 + $0x84] ss:$16 sps:$4 sm:$0xff]  }
 0x491   : > { %10970 = vmatprep.subr.bf16.mxu1 %v12204_v3 }
 0x494   : > { %10971 = vmatpush3.bf16.msra.mxu1 %v11877_v52  ;;  %v11934_v52 = vld [vmem:[%s15315_s7 + $0x80] ss:$16 sps:$4 sm:$0xff]  }
 0x495   : > { %10972 = vmatprep.subr.bf16.mxu1 %v12204_v3 }
 0x498   : > { %10973 = vmatpush3.bf16.msra.mxu1 %v11878_v51  ;;  %v11937_v51 = vld [vmem:[%s15315_s7 + $0xa0] ss:$16 sps:$4 sm:$0xff]  }
 0x499   : > { %10974 = vmatprep.subr.bf16.mxu1 %v12204_v3 }
 0x49c   : > { %10975 = vmatpush3.bf16.msra.mxu1 %v11879_v58  ;;  %v11939_v58 = vld [vmem:[%s15315_s7 + $0xa4] ss:$16 sps:$4 sm:$0xff]  }
 0x49d   : > { %10976 = vmatprep.subr.bf16.mxu1 %v12204_v3 }
 0x4a0   : > { %10977 = vmatpush3.bf16.msra.mxu1 %v11880_v46  ;;  %v11942_v46 = vld [vmem:[%s15315_s7 + $0xc4] ss:$16 sps:$4 sm:$0xff]  }
 0x4a1   : > { %10978 = vmatprep.subr.bf16.mxu1 %v12204_v3 }
 0x4a4   : > { %10979 = vmatpush3.bf16.msra.mxu1 %v11881_v13  ;;  %v12206_v13 = vmov 0  }
 0x4a5   : > { %10984 = vmatprep.subr.bf16.mxu1 %v12204_v3 }
 0x4a7   : > { %10981 = vmatmul.mubr.bf16.vlgmr.msra.gmra.mrb[4].mxu1 %v5789_v17  ;;  %v11948_v17 = vld [vmem:[%s15315_s7 + $0xc] ss:$16 sps:$4 sm:$0xff]  }
 0x4a8   : > { %10985 = vmatpush3.bf16.msra.mxu1 %v11882_v16  ;;  %11000 = vmatprep.mubr.msk.bf16.mxu1 %vm12205_vm0, %v12204_v3  ;;  %v11943_v16 = vld [vmem:[%s15315_s7 + $0xe0] ss:$16 sps:$4 sm:$0xff]  }
 0x4a9   : > { %10986 = vmatprep.subr.bf16.mxu1 %v12204_v3 }
 0x4ac   : > { %10987 = vmatpush3.bf16.msra.mxu1 %v11883_v35  ;;  %v6101_v35 = vld [vmem:[%s15314_s6] sm:$0x1] }
 0x4ad   : > { %10988 = vmatprep.subr.bf16.mxu1 %v12204_v3 }
 0x4b0   : > { %10989 = vmatpush3.bf16.msra.mxu1 %v11884_v36 }
 0x4b1   : > { %10990 = vmatprep.subr.bf16.mxu1 %v12204_v3 }
 0x4b4   : > { %10991 = vmatpush3.bf16.msra.mxu1 %v11885_v18 }
 0x4b5   : > { %10992 = vmatprep.subr.bf16.mxu1 %v12204_v3 }
 0x4b8   : > { %10993 = vmatpush3.bf16.msra.mxu1 %v11886_v19 }
 0x4b9   : > { %10994 = vmatprep.subr.bf16.mxu1 %v12204_v3 }
 0x4bc   : > { %10995 = vmatpush3.bf16.msra.mxu1 %v11887_v20 }
 0x4bd   : > { %10996 = vmatprep.subr.bf16.mxu1 %v12204_v3 }
 0x4c0   : > { %10997 = vmatpush3.bf16.msra.mxu1 %v11888_v21 }
 0x4c1   : > { %10998 = vmatprep.subr.bf16.mxu1 %v12204_v3 }
 0x4c4   : > { %10999 = vmatpush3.bf16.msra.mxu1 %v11889_v59 }
 0x4c5   : > { %11004 = vmatprep.subr.bf16.mxu1 %v12204_v3 }
 0x4c7   : > { %11001 = vmatmul.mubr.bf16.vlgmr.msra.gmra.mrb[4].mxu1 %v5899_v11 }
 0x4c8   : > { %11005 = vmatpush3.bf16.msra.mxu1 %v11890_v34  ;;  %11020 = vmatprep.mubr.msk.bf16.mxu1 %vm12205_vm0, %v12204_v3  ;;  %v11946_v34 = vld [vmem:[%s15315_s7 + $0x8] ss:$16 sps:$4 sm:$0xff]  }
 0x4c9   : > { %11006 = vmatprep.subr.bf16.mxu1 %v12204_v3 }
 0x4cc   : > { %11007 = vmatpush3.bf16.msra.mxu1 %v11891_v22 }
 0x4cd   : > { %11008 = vmatprep.subr.bf16.mxu1 %v12204_v3 }
 0x4d0   : > { %11009 = vmatpush3.bf16.msra.mxu1 %v11892_v12  ;;  %v11951_v12 = vld [vmem:[%s15315_s7 + $0x2c] ss:$16 sps:$4 sm:$0xff]  }
 0x4d1   : > { %11010 = vmatprep.subr.bf16.mxu1 %v12204_v3 }
 0x4d4   : > { %11011 = vmatpush3.bf16.msra.mxu1 %v11893_v45  ;;  %v11949_v45 = vld [vmem:[%s15315_s7 + $0x28] ss:$16 sps:$4 sm:$0xff]  }
 0x4d5   : > { %11012 = vmatprep.subr.bf16.mxu1 %v12204_v3 }
 0x4d8   : > { %11013 = vmatpush3.bf16.msra.mxu1 %v11894_v15  ;;  %v11954_v15 = vld [vmem:[%s15315_s7 + $0x4c] ss:$16 sps:$4 sm:$0xff]  }
 0x4d9   : > { %11014 = vmatprep.subr.bf16.mxu1 %v12204_v3 }
 0x4dc   : > { %11015 = vmatpush3.bf16.msra.mxu1 %v11895_v23  ;;  %v11952_v23 = vld [vmem:[%s15315_s7 + $0x48] ss:$16 sps:$4 sm:$0xff]  }
 0x4dd   : > { %11016 = vmatprep.subr.bf16.mxu1 %v12204_v3 }
 0x4e0   : > { %11017 = vmatpush3.bf16.msra.mxu1 %v11896_v25  ;;  %v11957_v25 = vld [vmem:[%s15315_s7 + $0x6c] ss:$16 sps:$4 sm:$0xff]  }
 0x4e1   : > { %11018 = vmatprep.subr.bf16.mxu1 %v12204_v3 }
 0x4e4   : > { %11019 = vmatpush3.bf16.msra.mxu1 %v11897_v30  ;;  %v11955_v30 = vld [vmem:[%s15315_s7 + $0x68] ss:$16 sps:$4 sm:$0xff]  }
 0x4e7   : > { %11021 = vmatmul.mubr.bf16.vlgmr.msra.gmra.mrb[4].mxu1 %v6009_v7  ;;  %v11960_v7 = vld [vmem:[%s15315_s7 + $0x8c] ss:$16 sps:$4 sm:$0xff]  }
 0x5ba   : > { %v6092_v28 = vpop.f32.mrb[4].mxu1 }
 0x5bb   : > { %v11206_v37 = vadd.f32 %v14042_v47, %v6092_v28  ;;  %v11022_v38 = vpop.f32.mrb[5].mxu1  ;;  %v11908_v47 = vld [vmem:[%s15313_s5 + $0x1d0] sm:$0xff]   ;;  %v11966_v28 = vld [vmem:[%s15315_s7 + $0xcc] ss:$16 sps:$4 sm:$0xff]  }
 0x5bc   : > { %v6095_v42 = vpop.f32.mrb[6].mxu1  ;;  %v11969_v38 = vld [vmem:[%s15315_s7 + $0xec] ss:$16 sps:$4 sm:$0xff]  }
 0x5bd   : > { %v6099_v43 = vmax.f32 %v11206_v37, 0.0  ;;  %v11023_v24 = vpop.f32.mrb[7].mxu1  ;;  %v11964_v37 = vld [vmem:[%s15315_s7 + $0xc8] ss:$16 sps:$4 sm:$0xff]  }
 0x5be   : > { %v11967_v42 = vld [vmem:[%s15315_s7 + $0xe8] ss:$16 sps:$4 sm:$0xff]  }
 0x5bf   : > { %6100 = vst [vmem:[#allocation3 + $0x6] sm:$0x7] %v6099_v43  ;;  %v11972_v43 = vld [vmem:[%s15317_s9 + $0x4] ss:$8 sps:$4 sm:$0xff]   ;;  %v11970_v24 = vld [vmem:[%s15317_s9] ss:$8 sps:$4 sm:$0xff]  }
 0x5c6   : > { %v6750_v44 = vld [vmem:[#allocation3 + $0x6] sm:$0x7] }
 0x5c7   : > { %v6767_v8 = vpack.c.bf16 %v6750_v44, %v6750_v44  ;;  %v11975_v44 = vld [vmem:[%s15317_s9 + $0x14] ss:$8 sps:$4 sm:$0xff]  }
 0x5c9   : > { %11161 = vmatmul.mubr.bf16.vlgmr.msra.gmra.mrb[20].mxu0 %v6767_v8  ;;  %v6874_v40 = vshrl.u32 %v6767_v8, 16  ;;  %v6983_v6 = vrot.slane %v6767_v8, 1  ;;  %v11978_v8 = vld [vmem:[%s15317_s9 + $0x24] ss:$8 sps:$4 sm:$0xff]  }
 0x5ca   : > { %11165 = vmatpush3.bf16.msra.mxu0 %v11906_v29  ;;  %11180 = vmatprep.mubr.msk.bf16.mxu0 %vm12205_vm0, %v12204_v3  ;;  %v11973_v29 = vld [vmem:[%s15317_s9 + $0x10] ss:$8 sps:$4 sm:$0xff]  }
 0x5cb   : > { %11166 = vmatprep.subr.bf16.mxu0 %v12204_v3 }
 0x5ce   : > { %11167 = vmatpush3.bf16.msra.mxu0 %v11907_v48  ;;  %v11976_v48 = vld [vmem:[%s15317_s9 + $0x20] ss:$8 sps:$4 sm:$0xff]  }
 0x5cf   : > { %11168 = vmatprep.subr.bf16.mxu0 %v12204_v3 }
 0x5d2   : > { %11169 = vmatpush3.bf16.msra.mxu0 %v11908_v47  ;;  %v11981_v47 = vld [vmem:[%s15317_s9 + $0x34] ss:$8 sps:$4 sm:$0xff]  }
 0x5d3   : > { %11170 = vmatprep.subr.bf16.mxu0 %v12204_v3 }
 0x5d6   : > { %11171 = vmatpush3.bf16.msra.mxu0 %v11909_v49  ;;  %v11979_v49 = vld [vmem:[%s15317_s9 + $0x30] ss:$8 sps:$4 sm:$0xff]  }
 0x5d7   : > { %11172 = vmatprep.subr.bf16.mxu0 %v12204_v3 }
 0x5da   : > { %11173 = vmatpush3.bf16.msra.mxu0 %v11910_v32  ;;  %v11982_v32 = vld [vmem:[%s15317_s9 + $0x40] ss:$8 sps:$4 sm:$0xff]  }
 0x5db   : > { %11174 = vmatprep.subr.bf16.mxu0 %v12204_v3 }
 0x5de   : > { %11175 = vmatpush3.bf16.msra.mxu0 %v11911_v50  ;;  %v11984_v50 = vld [vmem:[%s15317_s9 + $0x44] ss:$8 sps:$4 sm:$0xff]  }
 0x5df   : > { %11176 = vmatprep.subr.bf16.mxu0 %v12204_v3 }
 0x5e2   : > { %11177 = vmatpush3.bf16.msra.mxu0 %v11912_v54  ;;  %v11987_v54 = vld [vmem:[%s15317_s9 + $0x54] ss:$8 sps:$4 sm:$0xff]  }
 0x5e3   : > { %11178 = vmatprep.subr.bf16.mxu0 %v12204_v3 }
 0x5e6   : > { %11179 = vmatpush3.bf16.msra.mxu0 %v11913_v56  ;;  %v11985_v56 = vld [vmem:[%s15317_s9 + $0x50] ss:$8 sps:$4 sm:$0xff]  }
 0x5e7   : > { %11184 = vmatprep.subr.bf16.mxu0 %v12204_v3 }
 0x5e9   : > { %11181 = vmatmul.mubr.bf16.vlgmr.msra.gmra.mrb[20].mxu0 %v6874_v40  ;;  %v11988_v40 = vld [vmem:[%s15317_s9 + $0x60] ss:$8 sps:$4 sm:$0xff]  }
 0x5ea   : > { %11185 = vmatpush3.bf16.msra.mxu0 %v11914_v57  ;;  %11200 = vmatprep.mubr.msk.bf16.mxu0 %vm12205_vm0, %v12204_v3  ;;  %v11990_v57 = vld [vmem:[%s15317_s9 + $0x64] ss:$8 sps:$4 sm:$0xff]  }
 0x5eb   : > { %11186 = vmatprep.subr.bf16.mxu0 %v12204_v3 }
 0x5ee   : > { %11187 = vmatpush3.bf16.msra.mxu0 %v11915_v31  ;;  %v11993_v31 = vld [vmem:[%s15317_s9 + $0x74] ss:$8 sps:$4 sm:$0xff]  }
 0x5ef   : > { %11188 = vmatprep.subr.bf16.mxu0 %v12204_v3 }
 0x5f2   : > { %11189 = vmatpush3.bf16.msra.mxu0 %v11916_v53  ;;  %v11991_v53 = vld [vmem:[%s15317_s9 + $0x70] ss:$8 sps:$4 sm:$0xff]  }
 0x5f3   : > { %11190 = vmatprep.subr.bf16.mxu0 %v12204_v3 }
 0x5f6   : > { %11191 = vmatpush3.bf16.msra.mxu0 %v11917_v60  ;;  %v11996_v60 = vld [vmem:[%s15317_s9 + $0x84] ss:$8 sps:$4 sm:$0xff]  }
 0x5f7   : > { %11192 = vmatprep.subr.bf16.mxu0 %v12204_v3 }
 0x5fa   : > { %11193 = vmatpush3.bf16.msra.mxu0 %v11918_v61  ;;  %v11994_v61 = vld [vmem:[%s15317_s9 + $0x80] ss:$8 sps:$4 sm:$0xff]  }
 0x5fb   : > { %11194 = vmatprep.subr.bf16.mxu0 %v12204_v3 }
 0x5fe   : > { %11195 = vmatpush3.bf16.msra.mxu0 %v11919_v62  ;;  %v11999_v62 = vld [vmem:[%s15317_s9 + $0x94] ss:$8 sps:$4 sm:$0xff]  }
 0x5ff   : > { %11196 = vmatprep.subr.bf16.mxu0 %v12204_v3 }
 0x602   : > { %11197 = vmatpush3.bf16.msra.mxu0 %v11920_v63  ;;  %v11997_v63 = vld [vmem:[%s15317_s9 + $0x90] ss:$8 sps:$4 sm:$0xff]  }
 0x603   : > { %11198 = vmatprep.subr.bf16.mxu0 %v12204_v3  ;;  %v11925_v3 = vld [vmem:[%s15315_s7 + $0x20] ss:$16 sps:$4 sm:$0xff]  }
 0x606   : > { %11199 = vmatpush3.bf16.msra.mxu0 %v11921_v0  ;;  %v12002_v0 = vld [vmem:[%s15317_s9 + $0xa4] ss:$8 sps:$4 sm:$0xff]  }
 0x607   : > { %7271 = vmatprep.subr.bf16.mxu0 %v11924_v4  ;;  %v12000_v4 = vld [vmem:[%s15317_s9 + $0xa0] ss:$8 sps:$4 sm:$0xff]  }
 0x609   : > { %11201 = vmatmul.mubr.bf16.vlgmr.msra.gmra.mrb[20].mxu0 %v6983_v6  ;;  %v12003_v6 = vld [vmem:[%s15317_s9 + $0xb0] ss:$8 sps:$4 sm:$0xff]  }
 0x60a   : > { %7272 = vmatpush1.bf16.msra.mxu0 %v11922_v5  ;;  %7303 = vmatprep.mubr.bf16.mxu0 %v12206_v13  ;;  %v12005_v5 = vld [vmem:[%s15317_s9 + $0xb4] ss:$8 sps:$4 sm:$0xff]  }
 0x60b   : > { %7273 = vmatprep.subr.bf16.mxu0 %v11927_v9  ;;  %v12008_v9 = vld [vmem:[%s15317_s9 + $0xc4] ss:$8 sps:$4 sm:$0xff]  }
 0x60e   : > { %7274 = vmatpush1.bf16.msra.mxu0 %v11925_v3  ;;  %v12006_v3 = vld [vmem:[%s15317_s9 + $0xc0] ss:$8 sps:$4 sm:$0xff]  }
 0x60f   : > { %7275 = vmatprep.subr.bf16.mxu0 %v11930_v10  ;;  %v12011_v10 = vld [vmem:[%s15317_s9 + $0xd4] ss:$8 sps:$4 sm:$0xff]  }
 0x612   : > { %7276 = vmatpush1.bf16.msra.mxu0 %v11928_v1  ;;  %v12009_v1 = vld [vmem:[%s15317_s9 + $0xd0] ss:$8 sps:$4 sm:$0xff]  }
 0x613   : > { %7277 = vmatprep.subr.bf16.mxu0 %v11933_v14  ;;  %v12014_v14 = vld [vmem:[%s15317_s9 + $0xe4] ss:$8 sps:$4 sm:$0xff]  }
 0x616   : > { %7278 = vmatpush1.bf16.msra.mxu0 %v11931_v55  ;;  %v12012_v55 = vld [vmem:[%s15317_s9 + $0xe0] ss:$8 sps:$4 sm:$0xff]  }
 0x617   : > { %7279 = vmatprep.subr.bf16.mxu0 %v11936_v41  ;;  %v12017_v41 = vld [vmem:[%s15317_s9 + $0xf4] ss:$8 sps:$4 sm:$0xff]  }
 0x61a   : > { %7280 = vmatpush1.bf16.msra.mxu0 %v11934_v52  ;;  %v12015_v52 = vld [vmem:[%s15317_s9 + $0xf0] ss:$8 sps:$4 sm:$0xff]  }
 0x61b   : > { %7281 = vmatprep.subr.bf16.mxu0 %v11939_v58  ;;  %v12069_v58 = vld [vmem:[%s15319_s11 + $0x8] ss:$16 sps:$4 sm:$0xff]  }
 0x61e   : > { %7282 = vmatpush1.bf16.msra.mxu0 %v11937_v51  ;;  %v12020_v51 = vld [vmem:[%s15317_s9 + $0x104] ss:$8 sps:$4 sm:$0xff]  }
 0x61f   : > { %7283 = vmatprep.subr.bf16.mxu0 %v11942_v46  ;;  %v12071_v46 = vld [vmem:[%s15319_s11 + $0xc] ss:$16 sps:$4 sm:$0xff]  }
 0x620   : > { %8338 = vmatprep.subr.bf16.mxu1 %v12071_v46  ;;  %v12029_v46 = vld [vmem:[%s15317_s9 + $0x134] ss:$8 sps:$4 sm:$0xff]  }
 0x621   : > { %8339 = vmatpush1.bf16.msra.mxu1 %v12069_v58  ;;  %v12024_v58 = vld [vmem:[%s15317_s9 + $0x120] ss:$8 sps:$4 sm:$0xff]  }
 0x622   : > { %7284 = vmatpush1.bf16.msra.mxu0 %v11940_v26  ;;  %v12077_v26 = vld [vmem:[%s15319_s11 + $0x2c] ss:$16 sps:$4 sm:$0xff]  }
 0x623   : > { %7285 = vmatprep.subr.bf16.mxu0 %v11945_v33  ;;  %8340 = vmatprep.subr.bf16.mxu1 %v12077_v26  ;;  %v12083_v33 = vld [vmem:[%s15319_s11 + $0x4c] ss:$16 sps:$4 sm:$0xff]   ;;  %v12027_v26 = vld [vmem:[%s15317_s9 + $0x130] ss:$8 sps:$4 sm:$0xff]  }
 0x626   : > { %7286 = vmatpush1.bf16.msra.mxu0 %v11943_v16  ;;  %v12081_v16 = vld [vmem:[%s15319_s11 + $0x48] ss:$16 sps:$4 sm:$0xff]  }
 0x627   : > { %7312 = vmatprep.subr.bf16.mxu0 %v11948_v17  ;;  %v12089_v17 = vld [vmem:[%s15319_s11 + $0x6c] ss:$16 sps:$4 sm:$0xff]  }
 0x6dc   : > { %v7067_v36 = vpop.f32.mrb[20].mxu0 }
 0x6dd   : > { %v11207_v18 = vadd.f32 %v7067_v36, %v6101_v35  ;;  %v11202_v19 = vpop.f32.mrb[21].mxu0  ;;  %v12087_v35 = vld [vmem:[%s15319_s11 + $0x68] ss:$16 sps:$4 sm:$0xff]  }
 0x6de   : > { %v7070_v20 = vpop.f32.mrb[22].mxu0  ;;  %v12095_v19 = vld [vmem:[%s15319_s11 + $0x8c] ss:$16 sps:$4 sm:$0xff]  }
 0x6df   : > { %v7074_v21 = vmax.f32 %v11207_v18, 0.0  ;;  %v11203_v59 = vpop.f32.mrb[23].mxu0 }
 0x6e1   : > { %7075 = vst [vmem:[#allocation4] sm:$0x1] %v7074_v21 }
 0x6e8   : > { %v7077_v11 = vld [vmem:[#allocation4] sm:$0x1] }
 0x6e9   : > { %v7078_v22 = vpack.c.bf16 %v7077_v11, %v7077_v11  ;;  %v12101_v11 = vld [vmem:[%s15319_s11 + $0xac] ss:$16 sps:$4 sm:$0xff]  }
 0x6eb   : > { %7304 = vmatmul.mubr.bf16.vlgmr.msra.gmra.mrb[24].mxu0 %v7078_v22 }
 0x6ec   : > { %7313 = vmatpush1.bf16.msra.mxu0 %v11946_v34  ;;  %7344 = vmatprep.mubr.bf16.mxu0 %v12206_v13  ;;  %v12075_v13 = vld [vmem:[%s15319_s11 + $0x28] ss:$16 sps:$4 sm:$0xff]  }
 0x6ed   : > { %7314 = vmatprep.subr.bf16.mxu0 %v11951_v12  ;;  %8341 = vmatpush1.bf16.msra.mxu1 %v12075_v13  ;;  %v12093_v34 = vld [vmem:[%s15319_s11 + $0x88] ss:$16 sps:$4 sm:$0xff]   ;;  %v12107_v12 = vld [vmem:[%s15319_s11 + $0xcc] ss:$16 sps:$4 sm:$0xff]  }
 0x6ee   : > { %8342 = vmatprep.subr.bf16.mxu1 %v12083_v33  ;;  %v12032_v13 = vld [vmem:[%s15317_s9 + $0x144] ss:$8 sps:$4 sm:$0xff]   ;;  %v12030_v33 = vld [vmem:[%s15317_s9 + $0x140] ss:$8 sps:$4 sm:$0xff]  }
 0x6f0   : > { %7315 = vmatpush1.bf16.msra.mxu0 %v11949_v45  ;;  %v12105_v45 = vld [vmem:[%s15319_s11 + $0xc8] ss:$16 sps:$4 sm:$0xff]  }
 0x6f1   : > { %7316 = vmatprep.subr.bf16.mxu0 %v11954_v15  ;;  %8343 = vmatpush1.bf16.msra.mxu1 %v12081_v16  ;;  %v12113_v15 = vld [vmem:[%s15319_s11 + $0xec] ss:$16 sps:$4 sm:$0xff]  }
 0x6f2   : > { %8344 = vmatprep.subr.bf16.mxu1 %v12089_v17  ;;  %v12035_v16 = vld [vmem:[%s15317_s9 + $0x154] ss:$8 sps:$4 sm:$0xff]   ;;  %v12033_v17 = vld [vmem:[%s15317_s9 + $0x150] ss:$8 sps:$4 sm:$0xff]  }
 0x6f4   : > { %7317 = vmatpush1.bf16.msra.mxu0 %v11952_v23  ;;  %v12111_v23 = vld [vmem:[%s15319_s11 + $0xe8] ss:$16 sps:$4 sm:$0xff]  }
 0x6f5   : > { %7318 = vmatprep.subr.bf16.mxu0 %v11957_v25  ;;  %8345 = vmatpush1.bf16.msra.mxu1 %v12087_v35  ;;  %v12119_v25 = vld [vmem:[%s15319_s11 + $0x10c] ss:$16 sps:$4 sm:$0xff]  }
 0x6f6   : > { %8346 = vmatprep.subr.bf16.mxu1 %v12095_v19  ;;  %v12038_v35 = vld [vmem:[%s15317_s9 + $0x164] ss:$8 sps:$4 sm:$0xff]   ;;  %v12039_v19 = vld [vmem:[%s15317_s9 + $0x170] ss:$8 sps:$4 sm:$0xff]  }
 0x6f8   : > { %7319 = vmatpush1.bf16.msra.mxu0 %v11955_v30  ;;  %v12117_v30 = vld [vmem:[%s15319_s11 + $0x108] ss:$16 sps:$4 sm:$0xff]  }
 0x6f9   : > { %7320 = vmatprep.subr.bf16.mxu0 %v11960_v7  ;;  %8347 = vmatpush1.bf16.msra.mxu1 %v12093_v34  ;;  %v12125_v7 = vld [vmem:[%s15319_s11 + $0x12c] ss:$16 sps:$4 sm:$0xff]   ;;  %v12045_v34 = vld [vmem:[%s15317_s9 + $0x190] ss:$8 sps:$4 sm:$0xff]  }
 0x6fa   : > { %8348 = vmatprep.subr.bf16.mxu1 %v12101_v11  ;;  %v12050_v11 = vld [vmem:[%s15317_s9 + $0x1a4] ss:$8 sps:$4 sm:$0xff]  }
 0x6fc   : > { %7321 = vmatpush1.bf16.msra.mxu0 %v11958_v39  ;;  %v12123_v39 = vld [vmem:[%s15319_s11 + $0x128] ss:$16 sps:$4 sm:$0xff]  }
 0x6fd   : > { %7322 = vmatprep.subr.bf16.mxu0 %v11963_v2  ;;  %v12207_v2 = vmov 1966171168  }
 0x700   : > { %7323 = vmatpush1.bf16.msra.mxu0 %v11961_v27  ;;  %v7360_v27 = vunpack.c.l.s4 %v12207_v2  ;;  %v12065_v2 = vld [vmem:[%s15317_s9 + $0x1f4] ss:$8 sps:$4 sm:$0xff]  }
 0x701   : > { %7324 = vmatprep.subr.bf16.mxu0 %v11966_v28  ;;  %v7362_v28 = vlaneseq }
 0x704   : > { %7325 = vmatpush1.bf16.msra.mxu0 %v11964_v37  ;;  %v12131_v37 = vld [vmem:[%s15319_s11 + $0x14c] ss:$16 sps:$4 sm:$0xff]  }
 0x705   : > { %7326 = vmatprep.subr.bf16.mxu0 %v11969_v38  ;;  %v12129_v38 = vld [vmem:[%s15319_s11 + $0x148] ss:$16 sps:$4 sm:$0xff]  }
 0x708   : > { %7327 = vmatpush1.bf16.msra.mxu0 %v11967_v42  ;;  %v7361_v42 = vunpack.c.0.s8 %v7360_v27 }
 0x709   : > { %7805 = vmatprep.subr.bf16.mxu0 %v11972_v43  ;;  %v14942_v43 = vshrl.u32 %v7362_v28, 7  ;;  %v12063_v28 = vld [vmem:[%s15317_s9 + $0x1f0] ss:$8 sps:$4 sm:$0xff]  }
 0x70b   : > { %7345 = vmatmul.mubr.bf16.vlgmr.msra.gmra.mrb[28].mxu0 %v7078_v22  ;;  %v12099_v22 = vld [vmem:[%s15319_s11 + $0xa8] ss:$16 sps:$4 sm:$0xff]   ;;  %v7395_v27 = vsub.s32 2, %v14942_v43 }
 0x70c   : > { %7806 = vmatpush1.bf16.msra.mxu0 %v11970_v24  ;;  %8349 = vmatpush1.bf16.msra.mxu1 %v12099_v22  ;;  %v12137_v24 = vld [vmem:[%s15319_s11 + $0x16c] ss:$16 sps:$4 sm:$0xff]   ;;  %v12048_v22 = vld [vmem:[%s15317_s9 + $0x1a0] ss:$8 sps:$4 sm:$0xff]  }
 0x70d   : > { %7807 = vmatprep.subr.bf16.mxu0 %v11975_v44  ;;  %8350 = vmatprep.subr.bf16.mxu1 %v12107_v12  ;;  %v12135_v44 = vld [vmem:[%s15319_s11 + $0x168] ss:$16 sps:$4 sm:$0xff]   ;;  %v12053_v12 = vld [vmem:[%s15317_s9 + $0x1b4] ss:$8 sps:$4 sm:$0xff]  }
 0x710   : > { %7808 = vmatpush1.bf16.msra.mxu0 %v11973_v29  ;;  %8351 = vmatpush1.bf16.msra.mxu1 %v12105_v45  ;;  %v7364_v29 = vsub.s32 %v7361_v42, %v14942_v43  ;;  %v12051_v45 = vld [vmem:[%s15317_s9 + $0x1b0] ss:$8 sps:$4 sm:$0xff]  }
 0x711   : > { %7809 = vmatprep.subr.bf16.mxu0 %v11978_v8  ;;  %8352 = vmatprep.subr.bf16.mxu1 %v12113_v15  ;;  %v12056_v15 = vld [vmem:[%s15317_s9 + $0x1c4] ss:$8 sps:$4 sm:$0xff]   ;;  %v12066_v42 = vld [vmem:[%s15319_s11] ss:$16 sps:$4 sm:$0xff]  }
 0x714   : > { %7810 = vmatpush1.bf16.msra.mxu0 %v11976_v48  ;;  %8353 = vmatpush1.bf16.msra.mxu1 %v12111_v23  ;;  %v12054_v23 = vld [vmem:[%s15317_s9 + $0x1c0] ss:$8 sps:$4 sm:$0xff]  }
 0x715   : > { %7811 = vmatprep.subr.bf16.mxu0 %v11981_v47  ;;  %8354 = vmatprep.subr.bf16.mxu1 %v12119_v25  ;;  %v12143_v47 = vld [vmem:[%s15319_s11 + $0x18c] ss:$16 sps:$4 sm:$0xff]  }
 0x716   : > { %v12059_v25 = vld [vmem:[%s15317_s9 + $0x1d4] ss:$8 sps:$4 sm:$0xff]  }
 0x718   : > { %7812 = vmatpush1.bf16.msra.mxu0 %v11979_v49  ;;  %8355 = vmatpush1.bf16.msra.mxu1 %v12117_v30  ;;  %v12057_v30 = vld [vmem:[%s15317_s9 + $0x1d0] ss:$8 sps:$4 sm:$0xff]  }
 0x719   : > { %7813 = vmatprep.subr.bf16.mxu0 %v11984_v50  ;;  %8356 = vmatprep.subr.bf16.mxu1 %v12125_v7  ;;  %v12062_v7 = vld [vmem:[%s15317_s9 + $0x1e4] ss:$8 sps:$4 sm:$0xff]  }
 0x71c   : > { %7814 = vmatpush1.bf16.msra.mxu0 %v11982_v32  ;;  %8357 = vmatpush1.bf16.msra.mxu1 %v12123_v39  ;;  %v12060_v39 = vld [vmem:[%s15317_s9 + $0x1e0] ss:$8 sps:$4 sm:$0xff]  }
 0x71d   : > { %7815 = vmatprep.subr.bf16.mxu0 %v11987_v54  ;;  %8358 = vmatprep.subr.bf16.mxu1 %v12131_v37  ;;  %v12141_v54 = vld [vmem:[%s15319_s11 + $0x188] ss:$16 sps:$4 sm:$0xff]  }
 0x720   : > { %7816 = vmatpush1.bf16.msra.mxu0 %v11985_v56  ;;  %8359 = vmatpush1.bf16.msra.mxu1 %v12129_v38  ;;  %v12068_v38 = vld [vmem:[%s15319_s11 + $0x4] ss:$16 sps:$4 sm:$0xff]  }
 0x721   : > { %7817 = vmatprep.subr.bf16.mxu0 %v11990_v57  ;;  %8360 = vmatprep.subr.bf16.mxu1 %v12137_v24 }
 0x724   : > { %7818 = vmatpush1.bf16.msra.mxu0 %v11988_v40  ;;  %8361 = vmatpush1.bf16.msra.mxu1 %v12135_v44  ;;  %v12149_v40 = vld [vmem:[%s15319_s11 + $0x1ac] ss:$16 sps:$4 sm:$0xff]   ;;  %v12074_v44 = vld [vmem:[%s15319_s11 + $0x24] ss:$16 sps:$4 sm:$0xff]  }
 0x725   : > { %7819 = vmatprep.subr.bf16.mxu0 %v11993_v31  ;;  %8362 = vmatprep.subr.bf16.mxu1 %v12143_v47  ;;  %v12086_v47 = vld [vmem:[%s15319_s11 + $0x64] ss:$16 sps:$4 sm:$0xff]  }
 0x728   : > { %7820 = vmatpush1.bf16.msra.mxu0 %v11991_v53  ;;  %v7076_v53 = vld [vmem:[%s15316_s8] sm:$0xf]  ;;  %8363 = vmatpush1.bf16.msra.mxu1 %v12141_v54  ;;  %v12098_v54 = vld [vmem:[%s15319_s11 + $0xa4] ss:$16 sps:$4 sm:$0xff]  }
 0x729   : > { %7821 = vmatprep.subr.bf16.mxu0 %v11996_v60  ;;  %v12147_v60 = vld [vmem:[%s15319_s11 + $0x1a8] ss:$16 sps:$4 sm:$0xff]   ;;  %8364 = vmatprep.subr.bf16.mxu1 %v12149_v40  ;;  %v12102_v40 = vld [vmem:[%s15319_s11 + $0xc0] ss:$16 sps:$4 sm:$0xff]  }
 0x72c   : > { %7822 = vmatpush1.bf16.msra.mxu0 %v11994_v61  ;;  %8365 = vmatpush1.bf16.msra.mxu1 %v12147_v60  ;;  %v12116_v60 = vld [vmem:[%s15319_s11 + $0x104] ss:$16 sps:$4 sm:$0xff]  }
 0x72d   : > { %7823 = vmatprep.subr.bf16.mxu0 %v11999_v62 }
 0x730   : > { %7824 = vmatpush1.bf16.msra.mxu0 %v11997_v63  ;;  %v14967_v63 = vsub.s32 1, %v14942_v43 }
 0x731   : > { %7825 = vmatprep.subr.bf16.mxu0 %v12002_v0  ;;  %v14970_v0 = vsub.s32 0, %v14942_v43 }
 0x734   : > { %7826 = vmatpush1.bf16.msra.mxu0 %v12000_v4  ;;  %v7399_v4 = vsub.s32 3, %v14942_v43 }
 0x735   : > { %7827 = vmatprep.subr.bf16.mxu0 %v12005_v5 }
 0x738   : > { %7828 = vmatpush1.bf16.msra.mxu0 %v12003_v6 }
 0x739   : > { %7829 = vmatprep.subr.bf16.mxu0 %v12008_v9 }
 0x73c   : > { %7830 = vmatpush1.bf16.msra.mxu0 %v12006_v3 }
 0x73d   : > { %7831 = vmatprep.subr.bf16.mxu0 %v12011_v10 }
 0x740   : > { %7832 = vmatpush1.bf16.msra.mxu0 %v12009_v1  ;;  %v12018_v1 = vld [vmem:[%s15317_s9 + $0x100] ss:$8 sps:$4 sm:$0xff]  }
 0x741   : > { %7833 = vmatprep.subr.bf16.mxu0 %v12014_v14 }
 0x744   : > { %7834 = vmatpush1.bf16.msra.mxu0 %v12012_v55  ;;  %v12023_v55 = vld [vmem:[%s15317_s9 + $0x114] ss:$8 sps:$4 sm:$0xff]  }
 0x745   : > { %7835 = vmatprep.subr.bf16.mxu0 %v12017_v41 }
 0x748   : > { %7836 = vmatpush1.bf16.msra.mxu0 %v12015_v52  ;;  %v12021_v52 = vld [vmem:[%s15317_s9 + $0x110] ss:$8 sps:$4 sm:$0xff]  }
 0x749   : > { %7846 = vmatprep.subr.bf16.mxu0 %v12020_v51  ;;  %v12026_v51 = vld [vmem:[%s15317_s9 + $0x124] ss:$8 sps:$4 sm:$0xff]  }
 0x7be   : > { %v7305_v36 = vpop.f32.mrb[24].mxu0 }
 0x7bf   : > { %v7307_v18 = vpop.f32.mrb[25].mxu0 }
 0x7c0   : > { %v7357_v20 = vcombine.low %v7305_v36, %v7307_v18  ;;  %v7309_v21 = vpop.f32.mrb[26].mxu0  ;;  %v12036_v36 = vld [vmem:[%s15317_s9 + $0x160] ss:$8 sps:$4 sm:$0xff]   ;;  %v12041_v18 = vld [vmem:[%s15317_s9 + $0x174] ss:$8 sps:$4 sm:$0xff]  }
 0x7c1   : > { %v7310_v59 = vpop.f32.mrb[27].mxu0  ;;  %v12042_v21 = vld [vmem:[%s15317_s9 + $0x180] ss:$8 sps:$4 sm:$0xff]  }
 0x7c2   : > { %v7365_v56 = vrot.slane %v7357_v20, %v7364_v29  ;;  %v12044_v20 = vld [vmem:[%s15317_s9 + $0x184] ss:$8 sps:$4 sm:$0xff]   ;;  %v12047_v59 = vld [vmem:[%s15317_s9 + $0x194] ss:$8 sps:$4 sm:$0xff]  }
 0x7de   : > { %v7346_v8 = vpop.f32.mrb[28].mxu0 }
 0x7df   : > { %v7348_v48 = vpop.f32.mrb[29].mxu0 }
 0x7e0   : > { %v7358_v49 = vcombine.low %v7346_v8, %v7348_v48  ;;  %v7350_v32 = vpop.f32.mrb[30].mxu0  ;;  %v12080_v8 = vld [vmem:[%s15319_s11 + $0x44] ss:$16 sps:$4 sm:$0xff]   ;;  %v12078_v48 = vld [vmem:[%s15319_s11 + $0x40] ss:$16 sps:$4 sm:$0xff]  }
 0x7e1   : > { %v7351_v50 = vpop.f32.mrb[31].mxu0  ;;  %v12092_v32 = vld [vmem:[%s15319_s11 + $0x84] ss:$16 sps:$4 sm:$0xff]  }
 0x7e2   : > { %v7372_v57 = vrot.slane %v7358_v49, %v7364_v29  ;;  %v12084_v49 = vld [vmem:[%s15319_s11 + $0x60] ss:$16 sps:$4 sm:$0xff]  }
 0x7e3   : > { %v12090_v50 = vld [vmem:[%s15319_s11 + $0x80] ss:$16 sps:$4 sm:$0xff]  }
 0x7e4   : > { %v7373_v31 = vcombine.low %v7365_v56, %v7372_v57  ;;  %v12096_v56 = vld [vmem:[%s15319_s11 + $0xa0] ss:$16 sps:$4 sm:$0xff]   ;;  %v12104_v57 = vld [vmem:[%s15319_s11 + $0xc4] ss:$16 sps:$4 sm:$0xff]  }
 0x7e6   : > { %v7380_v61 = vrot.slane %v7373_v31, %v7364_v29  ;;  %v12072_v29 = vld [vmem:[%s15319_s11 + $0x20] ss:$16 sps:$4 sm:$0xff]   ;;  %v12110_v31 = vld [vmem:[%s15319_s11 + $0xe4] ss:$16 sps:$4 sm:$0xff]  }
 0x7e8   : > { %v7382_v62 = vadd.f32 %v7380_v61, %v7076_v53  ;;  %v12108_v53 = vld [vmem:[%s15319_s11 + $0xe0] ss:$16 sps:$4 sm:$0xff]  }
 0x7e9   : > { %v12114_v61 = vld [vmem:[%s15319_s11 + $0x100] ss:$16 sps:$4 sm:$0xff]  }
 0x7ea   : > { %v14973_v5 = vmax.f32 %v7382_v62, 0.0  ;;  %v12122_v62 = vld [vmem:[%s15319_s11 + $0x124] ss:$16 sps:$4 sm:$0xff]  }
 0x7ec   : > { %v7392_v6 = vrot.slane %v14973_v5, %v14967_v63  ;;  %v7388_v9 = vrot.slane %v14973_v5, %v14970_v0  ;;  %v7400_v3 = vrot.slane %v14973_v5, %v7399_v4  ;;  %v7396_v37 = vrot.slane %v14973_v5, %v7395_v27  ;;  %v12120_v5 = vld [vmem:[%s15319_s11 + $0x120] ss:$16 sps:$4 sm:$0xff]  }
 0x7ee   : > { %v7406_v10 = vpack.c.bf16 %v7392_v6, %v7392_v6  ;;  %v7405_v14 = vpack.c.bf16 %v7388_v9, %v7388_v9  ;;  %v7408_v41 = vpack.c.bf16 %v7400_v3, %v7400_v3  ;;  %v7407_v24 = vpack.c.bf16 %v7396_v37, %v7396_v37  ;;  %v12128_v6 = vld [vmem:[%s15319_s11 + $0x144] ss:$16 sps:$4 sm:$0xff]   ;;  %v12126_v9 = vld [vmem:[%s15319_s11 + $0x140] ss:$16 sps:$4 sm:$0xff]  }
 0x7ef   : > { %v12134_v3 = vld [vmem:[%s15319_s11 + $0x164] ss:$16 sps:$4 sm:$0xff]  }
 0x7f0   : > { %7837 = vmatprep.mubr.bf16.mxu0 %v7406_v10  ;;  %v12132_v10 = vld [vmem:[%s15319_s11 + $0x160] ss:$16 sps:$4 sm:$0xff]  }
 0x7f1   : > { %7838 = vmatmul.mubr.bf16.vlgmr.msra.gmra.mrb[32].mxu0 %v7405_v14  ;;  %v12138_v14 = vld [vmem:[%s15319_s11 + $0x180] ss:$16 sps:$4 sm:$0xff]  }
 0x7f2   : > { %7847 = vmatpush1.bf16.msra.mxu0 %v12018_v1  ;;  %7878 = vmatprep.mubr.bf16.mxu0 %v7408_v41  ;;  %v12140_v1 = vld [vmem:[%s15319_s11 + $0x184] ss:$16 sps:$4 sm:$0xff]   ;;  %v12144_v41 = vld [vmem:[%s15319_s11 + $0x1a0] ss:$16 sps:$4 sm:$0xff]  }
 0x7f3   : > { %7848 = vmatprep.subr.bf16.mxu0 %v12023_v55  ;;  %v12146_v55 = vld [vmem:[%s15319_s11 + $0x1a4] ss:$16 sps:$4 sm:$0xff]  }
 0x7f4   : > { %v12170_v37 = vld [vmem:[%s15321_s13 + $0x50] sm:$0xff]  }
 0x7f6   : > { %7849 = vmatpush1.bf16.msra.mxu0 %v12021_v52  ;;  %v12152_v52 = vld [vmem:[%s15319_s11 + $0x1c4] ss:$16 sps:$4 sm:$0xff]  }
 0x7f7   : > { %7850 = vmatprep.subr.bf16.mxu0 %v12026_v51  ;;  %v12155_v51 = vld [vmem:[%s15319_s11 + $0x1cc] ss:$16 sps:$4 sm:$0xff]  }
 0x7f8   : > { %8366 = vmatprep.subr.bf16.mxu1 %v12155_v51 }
 0x7fa   : > { %7851 = vmatpush1.bf16.msra.mxu0 %v12024_v58  ;;  %v12150_v58 = vld [vmem:[%s15319_s11 + $0x1c0] ss:$16 sps:$4 sm:$0xff]  }
 0x7fb   : > { %7852 = vmatprep.subr.bf16.mxu0 %v12029_v46  ;;  %v12153_v46 = vld [vmem:[%s15319_s11 + $0x1c8] ss:$16 sps:$4 sm:$0xff]  }
 0x7fc   : > { %8367 = vmatpush1.bf16.msra.mxu1 %v12153_v46 }
 0x7fe   : > { %7853 = vmatpush1.bf16.msra.mxu0 %v12027_v26  ;;  %v12158_v26 = vld [vmem:[%s15319_s11 + $0x1e4] ss:$16 sps:$4 sm:$0xff]  }
 0x7ff   : > { %7854 = vmatprep.subr.bf16.mxu0 %v12032_v13  ;;  %v12156_v13 = vld [vmem:[%s15319_s11 + $0x1e0] ss:$16 sps:$4 sm:$0xff]  }
 0x802   : > { %7855 = vmatpush1.bf16.msra.mxu0 %v12030_v33  ;;  %v12159_v33 = vld [vmem:[%s15319_s11 + $0x1e8] ss:$16 sps:$4 sm:$0xff]  }
 0x803   : > { %7856 = vmatprep.subr.bf16.mxu0 %v12035_v16  ;;  %v12161_v16 = vld [vmem:[%s15319_s11 + $0x1ec] ss:$16 sps:$4 sm:$0xff]  }
 0x804   : > { %8368 = vmatprep.subr.bf16.mxu1 %v12161_v16 }
 0x805   : > { %8369 = vmatpush1.bf16.msra.mxu1 %v12159_v33 }
 0x806   : > { %7857 = vmatpush1.bf16.msra.mxu0 %v12033_v17  ;;  %v12162_v17 = vld [vmem:[%s15321_s13 + $0x40] sm:$0xff]  }
 0x807   : > { %7858 = vmatprep.subr.bf16.mxu0 %v12038_v35  ;;  %v12163_v35 = vld [vmem:[%s15321_s13 + $0xc0] sm:$0xff]  }
 0x808   : > { %10042 = vmatprep.subr.bf16.mxu1 %v12163_v35 }
 0x80a   : > { %7859 = vmatpush1.bf16.msra.mxu0 %v12036_v36  ;;  %v7473_v36 = vld [vmem:[%s15318_s10] sm:$0x3] }
 0x80b   : > { %7860 = vmatprep.subr.bf16.mxu0 %v12041_v18  ;;  %v7798_v18 = vrot.slane %v7473_v36, %v14970_v0 }
 0x80e   : > { %7861 = vmatpush1.bf16.msra.mxu0 %v12039_v19  ;;  %v7802_v19 = vrot.slane %v7473_v36, %v14967_v63 }
 0x80f   : > { %7862 = vmatprep.subr.bf16.mxu0 %v12044_v20 }
 0x812   : > { %7863 = vmatpush1.bf16.msra.mxu0 %v12042_v21 }
 0x813   : > { %7864 = vmatprep.subr.bf16.mxu0 %v12047_v59 }
 0x816   : > { %7865 = vmatpush1.bf16.msra.mxu0 %v12045_v34 }
 0x817   : > { %7866 = vmatprep.subr.bf16.mxu0 %v12050_v11 }
 0x81a   : > { %7867 = vmatpush1.bf16.msra.mxu0 %v12048_v22 }
 0x81b   : > { %7868 = vmatprep.subr.bf16.mxu0 %v12053_v12 }
 0x81e   : > { %7869 = vmatpush1.bf16.msra.mxu0 %v12051_v45 }
 0x81f   : > { %7870 = vmatprep.subr.bf16.mxu0 %v12056_v15 }
 0x822   : > { %7871 = vmatpush1.bf16.msra.mxu0 %v12054_v23  ;;  %v12164_v23 = vld [vmem:[%s15321_s13] sm:$0xff]  }
 0x823   : > { %7872 = vmatprep.subr.bf16.mxu0 %v12059_v25  ;;  %v12165_v25 = vld [vmem:[%s15321_s13 + $0x80] sm:$0xff]  }
 0x826   : > { %7873 = vmatpush1.bf16.msra.mxu0 %v12057_v30 }
 0x827   : > { %7874 = vmatprep.subr.bf16.mxu0 %v12062_v7  ;;  %v12166_v7 = vld [vmem:[%s15321_s13 + $0x48] sm:$0xff]  }
 0x82a   : > { %7875 = vmatpush1.bf16.msra.mxu0 %v12060_v39  ;;  %v12167_v39 = vld [vmem:[%s15321_s13 + $0xc8] sm:$0xff]  }
 0x82b   : > { %7876 = vmatprep.subr.bf16.mxu0 %v12065_v2  ;;  %v12168_v2 = vld [vmem:[%s15321_s13 + $0x8] sm:$0xff]  }
 0x82e   : > { %7877 = vmatpush1.bf16.msra.mxu0 %v12063_v28  ;;  %v12169_v28 = vld [vmem:[%s15321_s13 + $0x88] sm:$0xff]  }
 0x82f   : > { %8297 = vmatprep.subr.bf16.mxu0 %v12068_v38  ;;  %v12171_v38 = vld [vmem:[%s15321_s13 + $0xd0] sm:$0xff]  }
 0x831   : > { %7879 = vmatmul.mubr.bf16.vlgmr.msra.gmra.mrb[32].mxu0 %v7407_v24  ;;  %v12173_v24 = vld [vmem:[%s15321_s13 + $0x90] sm:$0xff]  }
 0x832   : > { %8298 = vmatpush1.bf16.msra.mxu0 %v12066_v42  ;;  %v12172_v42 = vld [vmem:[%s15321_s13 + $0x10] sm:$0xff]  }
 0x833   : > { %8299 = vmatprep.subr.bf16.mxu0 %v12074_v44  ;;  %v12174_v44 = vld [vmem:[%s15321_s13 + $0x58] sm:$0xff]  }
 0x836   : > { %8300 = vmatpush1.bf16.msra.mxu0 %v12072_v29  ;;  %v12175_v29 = vld [vmem:[%s15321_s13 + $0xd8] sm:$0xff]  }
 0x837   : > { %8301 = vmatprep.subr.bf16.mxu0 %v12080_v8  ;;  %v12176_v8 = vld [vmem:[%s15321_s13 + $0x18] sm:$0xff]  }
 0x83a   : > { %8302 = vmatpush1.bf16.msra.mxu0 %v12078_v48  ;;  %v12177_v48 = vld [vmem:[%s15321_s13 + $0x98] sm:$0xff]  }
 0x83b   : > { %8303 = vmatprep.subr.bf16.mxu0 %v12086_v47  ;;  %v12178_v47 = vld [vmem:[%s15321_s13 + $0x60] sm:$0xff]  }
 0x83e   : > { %8304 = vmatpush1.bf16.msra.mxu0 %v12084_v49  ;;  %v12179_v49 = vld [vmem:[%s15321_s13 + $0xe0] sm:$0xff]  }
 0x83f   : > { %8305 = vmatprep.subr.bf16.mxu0 %v12092_v32  ;;  %v12180_v32 = vld [vmem:[%s15321_s13 + $0x20] sm:$0xff]  }
 0x842   : > { %8306 = vmatpush1.bf16.msra.mxu0 %v12090_v50  ;;  %v12181_v50 = vld [vmem:[%s15321_s13 + $0xa0] sm:$0xff]  }
 0x843   : > { %8307 = vmatprep.subr.bf16.mxu0 %v12098_v54  ;;  %v12182_v54 = vld [vmem:[%s15321_s13 + $0x68] sm:$0xff]  }
 0x846   : > { %8308 = vmatpush1.bf16.msra.mxu0 %v12096_v56  ;;  %v12183_v56 = vld [vmem:[%s15321_s13 + $0xe8] sm:$0xff]  }
 0x847   : > { %8309 = vmatprep.subr.bf16.mxu0 %v12104_v57  ;;  %v12184_v57 = vld [vmem:[%s15321_s13 + $0x28] sm:$0xff]  }
 0x84a   : > { %8310 = vmatpush1.bf16.msra.mxu0 %v12102_v40  ;;  %v12185_v40 = vld [vmem:[%s15321_s13 + $0xa8] sm:$0xff]  }
 0x84b   : > { %8311 = vmatprep.subr.bf16.mxu0 %v12110_v31  ;;  %v12186_v31 = vld [vmem:[%s15321_s13 + $0x70] sm:$0xff]  }
 0x84e   : > { %8312 = vmatpush1.bf16.msra.mxu0 %v12108_v53  ;;  %v12187_v53 = vld [vmem:[%s15321_s13 + $0xf0] sm:$0xff]  }
 0x84f   : > { %8313 = vmatprep.subr.bf16.mxu0 %v12116_v60  ;;  %v12188_v60 = vld [vmem:[%s15321_s13 + $0x30] sm:$0xff]  }
 0x852   : > { %8314 = vmatpush1.bf16.msra.mxu0 %v12114_v61  ;;  %v12189_v61 = vld [vmem:[%s15321_s13 + $0xb0] sm:$0xff]  }
 0x853   : > { %8315 = vmatprep.subr.bf16.mxu0 %v12122_v62  ;;  %v12190_v62 = vld [vmem:[%s15321_s13 + $0x78] sm:$0xff]  }
 0x856   : > { %8316 = vmatpush1.bf16.msra.mxu0 %v12120_v5  ;;  %v12191_v5 = vld [vmem:[%s15321_s13 + $0xf8] sm:$0xff]  }
 0x857   : > { %8317 = vmatprep.subr.bf16.mxu0 %v12128_v6  ;;  %v12192_v6 = vld [vmem:[%s15321_s13 + $0x38] sm:$0xff]  }
 0x85a   : > { %8318 = vmatpush1.bf16.msra.mxu0 %v12126_v9  ;;  %v12193_v9 = vld [vmem:[%s15321_s13 + $0xb8] sm:$0xff]  }
 0x85b   : > { %8319 = vmatprep.subr.bf16.mxu0 %v12134_v3  ;;  %v7955_v3 = vld [vmem:[%s15320_s12] sm:$0xf] }
 0x85e   : > { %8320 = vmatpush1.bf16.msra.mxu0 %v12132_v10  ;;  %v8280_v10 = vrot.slane %v7955_v3, %v14970_v0 }
 0x85f   : > { %8321 = vmatprep.subr.bf16.mxu0 %v12140_v1  ;;  %v8288_v1 = vrot.slane %v7955_v3, %v7395_v27 }
 0x862   : > { %8322 = vmatpush1.bf16.msra.mxu0 %v12138_v14  ;;  %v8284_v14 = vrot.slane %v7955_v3, %v14967_v63 }
 0x863   : > { %8323 = vmatprep.subr.bf16.mxu0 %v12146_v55  ;;  %v8292_v55 = vrot.slane %v7955_v3, %v7399_v4 }
 0x866   : > { %8324 = vmatpush1.bf16.msra.mxu0 %v12144_v41 }
 0x867   : > { %8325 = vmatprep.subr.bf16.mxu0 %v12152_v52 }
 0x86a   : > { %8326 = vmatpush1.bf16.msra.mxu0 %v12150_v58 }
 0x86b   : > { %8327 = vmatprep.subr.bf16.mxu0 %v12158_v26 }
 0x86e   : > { %8328 = vmatpush1.bf16.msra.mxu0 %v12156_v13 }
 0x86f   : > { %10020 = vmatprep.subr.bf16.mxu0 %v12162_v17 }
 0x904   : > { %v7880_v20 = vpop.f32.mrb[32].mxu0 }
 0x905   : > { %v11208_v21 = vadd.f32 %v7880_v20, %v7798_v18  ;;  %v7882_v59 = vpop.f32.mrb[33].mxu0 }
 0x906   : > { %v11209_v34 = vadd.f32 %v7882_v59, %v7802_v19  ;;  %v7884_v11 = vpop.f32.mrb[34].mxu0 }
 0x907   : > { %v7887_v22 = vmax.f32 %v11208_v21, 0.0  ;;  %v7885_v12 = vpop.f32.mrb[35].mxu0  ;;  %v8451_v11 = vld [vmem:[%s15322_s14] sm:$0x1] }
 0x908   : > { %v7888_v45 = vmax.f32 %v11209_v34, 0.0 }
 0x909   : > { %v7889_v30 = vpack.c.bf16 %v7887_v22, %v7887_v22 }
 0x90a   : > { %v7890_v15 = vpack.c.bf16 %v7888_v45, %v7888_v45 }
 0x90c   : > { %8329 = vmatprep.mubr.bf16.mxu0 %v7890_v15  ;;  %8370 = vmatprep.mubr.bf16.mxu1 %v7890_v15 }
 0x90d   : > { %8330 = vmatmul.mubr.bf16.vlgmr.msra.gmra.mrb[36].mxu0 %v7889_v30  ;;  %8371 = vmatmul.mubr.bf16.vlgmr.msra.gmra.mrb[8].mxu1 %v7889_v30 }
 0x90e   : > { %10021 = vmatpush3.bf16.msra.mxu0 %v12164_v23  ;;  %10043 = vmatpush3.bf16.msra.mxu1 %v12165_v25 }
 0x90f   : > { %10022 = vmatprep.subr.bf16.mxu0 %v12166_v7  ;;  %10044 = vmatprep.subr.bf16.mxu1 %v12167_v39 }
 0x912   : > { %10023 = vmatpush3.bf16.msra.mxu0 %v12168_v2  ;;  %10045 = vmatpush3.bf16.msra.mxu1 %v12169_v28 }
 0x913   : > { %10024 = vmatprep.subr.bf16.mxu0 %v12170_v37  ;;  %10046 = vmatprep.subr.bf16.mxu1 %v12171_v38 }
 0x916   : > { %10025 = vmatpush3.bf16.msra.mxu0 %v12172_v42  ;;  %10047 = vmatpush3.bf16.msra.mxu1 %v12173_v24 }
 0x917   : > { %10026 = vmatprep.subr.bf16.mxu0 %v12174_v44  ;;  %10048 = vmatprep.subr.bf16.mxu1 %v12175_v29 }
 0x91a   : > { %10027 = vmatpush3.bf16.msra.mxu0 %v12176_v8  ;;  %10049 = vmatpush3.bf16.msra.mxu1 %v12177_v48 }
 0x91b   : > { %10028 = vmatprep.subr.bf16.mxu0 %v12178_v47  ;;  %10050 = vmatprep.subr.bf16.mxu1 %v12179_v49 }
 0x91e   : > { %10029 = vmatpush3.bf16.msra.mxu0 %v12180_v32  ;;  %10051 = vmatpush3.bf16.msra.mxu1 %v12181_v50 }
 0x91f   : > { %10030 = vmatprep.subr.bf16.mxu0 %v12182_v54  ;;  %10052 = vmatprep.subr.bf16.mxu1 %v12183_v56 }
 0x922   : > { %10031 = vmatpush3.bf16.msra.mxu0 %v12184_v57  ;;  %10053 = vmatpush3.bf16.msra.mxu1 %v12185_v40 }
 0x923   : > { %10032 = vmatprep.subr.bf16.mxu0 %v12186_v31  ;;  %10054 = vmatprep.subr.bf16.mxu1 %v12187_v53 }
 0x926   : > { %10033 = vmatpush3.bf16.msra.mxu0 %v12188_v60  ;;  %10055 = vmatpush3.bf16.msra.mxu1 %v12189_v61 }
 0x927   : > { %10034 = vmatprep.subr.bf16.mxu0 %v12190_v62  ;;  %10056 = vmatprep.subr.bf16.mxu1 %v12191_v5 }
 0x92a   : > { %10035 = vmatpush3.bf16.msra.mxu0 %v12192_v6  ;;  %10057 = vmatpush3.bf16.msra.mxu1 %v12193_v9 }
 0x9e0   : > { %v8331_v41 = vpop.f32.mrb[36].mxu0  ;;  %v8372_v52 = vpop.f32.mrb[8].mxu1 }
 0x9e1   : > { %v8332_v51 = vadd.f32 %v8331_v41, %v8280_v10  ;;  %v8373_v58 = vadd.f32 %v8372_v52, %v8288_v1  ;;  %v8333_v46 = vpop.f32.mrb[37].mxu0  ;;  %v8374_v26 = vpop.f32.mrb[9].mxu1 }
 0x9e2   : > { %v8334_v13 = vadd.f32 %v8333_v46, %v8284_v14  ;;  %v8375_v33 = vadd.f32 %v8374_v26, %v8292_v55  ;;  %v8335_v16 = vpop.f32.mrb[38].mxu0  ;;  %v8376_v17 = vpop.f32.mrb[10].mxu1 }
 0x9e3   : > { %v8379_v35 = vmax.f32 %v8332_v51, 0.0  ;;  %v8381_v36 = vmax.f32 %v8373_v58, 0.0  ;;  %v8336_v18 = vpop.f32.mrb[39].mxu0  ;;  %v8377_v19 = vpop.f32.mrb[11].mxu1 }
 0x9e4   : > { %v8380_v27 = vmax.f32 %v8334_v13, 0.0  ;;  %v8382_v20 = vmax.f32 %v8375_v33, 0.0 }
 0x9e5   : > { %v8383_v43 = vpack.c.bf16 %v8379_v35, %v8379_v35  ;;  %v8385_v4 = vpack.c.bf16 %v8381_v36, %v8381_v36 }
 0x9e6   : > { %v8384_v63 = vpack.c.bf16 %v8380_v27, %v8380_v27  ;;  %v8386_v21 = vpack.c.bf16 %v8382_v20, %v8382_v20 }
 0x9e8   : > { %8676 = vmatprep.mubr.bf16.mxu0 %v8384_v63  ;;  %8716 = vmatprep.mubr.bf16.mxu1 %v8386_v21 }
 0x9e9   : > { %8677 = vmatmul.mubr.bf16.vlgmr.msra.gmra.mrb[40].mxu0 %v8383_v43  ;;  %8717 = vmatmul.mubr.bf16.vlgmr.msra.gmra.mrb[12].mxu1 %v8385_v4 }
 0xabc   : > { %v10036_v59 = vpop.f32.mrb[40].mxu0  ;;  %v10058_v34 = vpop.f32.mrb[12].mxu1 }
 0xabd   : > { %v10037_v22 = vpop.f32.mrb[41].mxu0  ;;  %v10059_v12 = vpop.f32.mrb[13].mxu1 }
 0xabe   : > { %v10038_v45 = vadd.f32 %v10037_v22, %v10036_v59  ;;  %v10060_v15 = vadd.f32 %v10059_v12, %v10058_v34  ;;  %v10039_v23 = vpop.f32.mrb[42].mxu0  ;;  %v10061_v25 = vpop.f32.mrb[14].mxu1 }
 0xabf   : > { %v10040_v30 = vpop.f32.mrb[43].mxu0  ;;  %v10062_v7 = vpop.f32.mrb[15].mxu1 }
 0xac0   : > { %v8679_v39 = vadd.f32 %v10038_v45, %v8451_v11 }
 0xac2   : > { %v8719_v2 = vadd.f32 %v10060_v15, %v8679_v39 }
 0xac4   : > { %v8727_v28 = vrot.slane %v8719_v2, %v14970_v0 }
 0xac6   : > { %8728 = vst [vmem:[%s492_s24] sm:$0xff] %v8727_v28 }
 0xac7 PF: > { %s25_s18 = sadd.s32 1, %s12202_s18  }
 0xac8   : > { %p22_p4 = scmp.ge.s32.totalorder %s25_s18, 4  }
 0xaca   :  { %24 = sbr.rel (!%p22_p4) target bundleno = 1 (0x1), region = 110 }

// kernel: dqn_forward.1
= control target key start
LH: loop header
LB: loop body
LE: loop exit
PB: predicated region body
PF: predicated region fallthrough
CT: control target
= control target key end

     0   :  { %s12288_s18 = smov 0   ;;  %s15308_s0 = inlined_call_operand.vmem [shape: bf16[2,64,256], index: 0, kind: input, shape index: {}]   ;;  %s15309_s1 = inlined_call_operand.vmem [shape: bf16[256,128], index: 1, kind: input, shape index: {}]   ;;  %s15310_s2 = inlined_call_operand.vmem [shape: f32[1,128], index: 2, kind: input, shape index: {}]   ;;  %s15311_s3 = inlined_call_operand.vmem [shape: bf16[2048,128], index: 3, kind: input, shape index: {}]   ;;  %s15312_s4 = inlined_call_operand.vmem [shape: f32[1,128], index: 4, kind: input, shape index: {}]   ;;  %s15313_s5 = inlined_call_operand.vmem [shape: bf16[1152,128], index: 5, kind: input, shape index: {}]   ;;  %s15314_s6 = inlined_call_operand.vmem [shape: f32[1,128], index: 6, kind: input, shape index: {}]   ;;  %s15315_s7 = inlined_call_operand.vmem [shape: bf16[128,512], index: 7, kind: input, shape index: {}]   ;;  %s15316_s8 = inlined_call_operand.vmem [shape: f32[1,512], index: 8, kind: input, shape index: {}]   ;;  %s15317_s9 = inlined_call_operand.vmem [shape: bf16[512,256], index: 9, kind: input, shape index: {}]   ;;  %s15318_s10 = inlined_call_operand.vmem [shape: f32[1,256], index: 10, kind: input, shape index: {}]   ;;  %s15319_s11 = inlined_call_operand.vmem [shape: bf16[256,512], index: 11, kind: input, shape index: {}]   ;;  %s15320_s12 = inlined_call_operand.vmem [shape: f32[1,512], index: 12, kind: input, shape index: {}]   ;;  %s15321_s13 = inlined_call_operand.vmem [shape: bf16[512,128], index: 13, kind: input, shape index: {}]   ;;  %s15322_s14 = inlined_call_operand.vmem [shape: f32[1,128], index: 14, kind: input, shape index: {}]   ;;  %s15323_s15 = inlined_call_operand.vmem [shape: f32[2,8,128], index: 15, kind: output, shape index: {}]  }
   0x1 LB: > { %s8782_s19 = sadd.s32 4294967295, %s12202_s18   ;;  %p8786_p0 = scmp.ge.s32.totalorder %s12202_s18, 1  ;;  %s12202_s18 = sphi %s12288_s18, %s25_s18  }
   0x2   : > { %p437_p1 = scmp.lt.s32.totalorder %s12202_s18, 3 }
   0x4   : > { %p438_p2 = pnand %p8786_p0, %p437_p1 }
   0x5   : > { %v11438_v0 = vld [vmem:[%s15309_s1 + $0x40] sm:$0xff] (!%p438_p2)   ;;  %v11440_v2 = vld [vmem:[%s15309_s1 + $0x48] sm:$0xff] (!%p438_p2)   ;;  %v12204_v3 = vmov (!%p438_p2), 0.0   ;;  %p484_p3 = scmp.lt.s32.totalorder (!%p438_p2), %s8782_s19, 1  ;;  %v11442_v5 = vld [vmem:[%s15309_s1 + $0x50] sm:$0xff] (!%p438_p2)   ;;  %vm12205_vm0 = vmmov (!%p438_p2), 0  }
   0x6   : > { %441 = sbr.rel (%p438_p2) target bundleno = 2759 (0xac7), region = 80  ;;  %v11439_v1 = vld [vmem:[%s15309_s1] sm:$0xff] (!%p438_p2)   ;;  %9467 = vmatprep.subr.bf16.mxu0 (!%p438_p2), %v11438_v0  ;;  %10064 = vmatprep.subr.bf16.mxu1 (!%p438_p2), %v12204_v3  ;;  %v11441_v4 = vld [vmem:[%s15309_s1 + $0x8] sm:$0xff] (!%p438_p2)   ;;  %v11443_v6 = vld [vmem:[%s15309_s1 + $0x10] sm:$0xff] (!%p438_p2)   ;;  %vm771_vm1 = vcmask (!%p438_p2), 1040384   ;;  %vm773_vm2 = vcmask (!%p438_p2), 1041408  }
   0x7   : > { %9468 = vmatpush3.bf16.msra.mxu0 (!%p438_p2), %v11439_v1  ;;  %v11444_v7 = vld [vmem:[%s15309_s1 + $0x58] sm:$0xff] (!%p438_p2)   ;;  %v11446_v9 = vld [vmem:[%s15309_s1 + $0x60] sm:$0xff] (!%p438_p2)   ;;  %v11448_v11 = vld [vmem:[%s15309_s1 + $0x68] sm:$0xff] (!%p438_p2)   ;;  %10080 = vmatprep.mubr.msk.bf16.mxu1 (!%p438_p2), %vm12205_vm0, %v12204_v3 }
   0x8   : > { %9469 = vmatprep.subr.bf16.mxu0 (!%p438_p2), %v11440_v2  ;;  %v11445_v8 = vld [vmem:[%s15309_s1 + $0x18] sm:$0xff] (!%p438_p2)   ;;  %v11447_v10 = vld [vmem:[%s15309_s1 + $0x20] sm:$0xff] (!%p438_p2)   ;;  %v11449_v13 = vld [vmem:[%s15309_s1 + $0x28] sm:$0xff] (!%p438_p2)  }
   0x9   : > { %v11460_v14 = vld [vmem:[%s15311_s3] sm:$0xff] (!%p438_p2)   ;;  %v11450_v15 = vld [vmem:[%s15309_s1 + $0x70] sm:$0xff] (!%p438_p2)   ;;  %v11461_v16 = vld [vmem:[%s15311_s3 + $0x8] sm:$0xff] (!%p438_p2)  }
   0xa   : > { %10065 = vmatpush3.bf16.msra.mxu1 (!%p438_p2), %v11460_v14  ;;  %v11451_v17 = vld [vmem:[%s15309_s1 + $0x30] sm:$0xff] (!%p438_p2)   ;;  %v11452_v18 = vld [vmem:[%s15309_s1 + $0x78] sm:$0xff] (!%p438_p2)   ;;  %v11463_v24 = vld [vmem:[%s15311_s3] sm:$0xff] (!%p438_p2)  }
   0xb   : > { %9470 = vmatpush3.bf16.msra.mxu0 (!%p438_p2), %v11441_v4  ;;  %10066 = vmatprep.subr.bf16.mxu1 (!%p438_p2), %v12204_v3  ;;  %v11462_v19 = vld [vmem:[%s15311_s3 + $0x10] sm:$0xff] (!%p438_p2)   ;;  %v11453_v20 = vld [vmem:[%s15309_s1 + $0x38] sm:$0xff] (!%p438_p2)   ;;  %v11466_v25 = vld [vmem:[%s15311_s3 + $0x20] sm:$0xff] (!%p438_p2)  }
   0xc   : > { %9471 = vmatprep.subr.bf16.mxu0 (!%p438_p2), %v11442_v5  ;;  %v11464_v21 = vld [vmem:[%s15311_s3 + $0x18] sm:$0xff] (!%p438_p2)   ;;  %v11465_v26 = vld [vmem:[%s15311_s3 + $0x8] sm:$0xff] (!%p438_p2)   ;;  %v11467_v28 = vld [vmem:[%s15311_s3 + $0x10] sm:$0xff] (!%p438_p2)  }
   0xd   : > { %s15325_s19 = smov (!%p484_p3, %s8782_s19), 1  ;;  %v11468_v29 = vld [vmem:[%s15311_s3 + $0x28] sm:$0xff]   ;;  %v11469_v30 = vld [vmem:[%s15311_s3 + $0x18] sm:$0xff]   ;;  %v11473_v33 = vld [vmem:[%s15311_s3 + $0x30] sm:$0xff]  }
   0xe   : > { %s9466_s23 = sshll.u32 %s15325_s19, 6  ;;  %10067 = vmatpush3.bf16.msra.mxu1 %v11461_v16  ;;  %v11474_v34 = vld [vmem:[%s15311_s3 + $0x20] sm:$0xff]   ;;  %v11475_v35 = vld [vmem:[%s15311_s3 + $0x38] sm:$0xff]   ;;  %v11476_v36 = vld [vmem:[%s15311_s3 + $0x28] sm:$0xff]   ;;  %s8789_s21 = sshll.u32 %s15325_s19, 3 }
   0xf   : > { %9472 = vmatpush3.bf16.msra.mxu0 %v11443_v6  ;;  %s12330_s28 = scalar_lea.vmem %s15308_s0, %s9466_s23  ;;  %10068 = vmatprep.subr.bf16.mxu1 %v12204_v3  ;;  %v11481_v39 = vld [vmem:[%s15311_s3 + $0x30] sm:$0xff]   ;;  %v11483_v40 = vld [vmem:[%s15311_s3 + $0x38] sm:$0xff]   ;;  %v8790_v41 = vld [vmem:[%s15310_s2] ss:$0 sm:$0xff]  ;;  %s492_s24 = scalar_lea.vmem %s15323_s15, %s8789_s21 }
  0x10   : > { %9473 = vmatprep.subr.bf16.mxu0 %v11444_v7  ;;  %v11456_v12 = vld [vmem:[%s12330_s28 + $0x4] ss:$8 sps:$4 sm:$0xff]   ;;  %v11454_v22 = vld [vmem:[%s12330_s28] ss:$8 sps:$4 sm:$0xff]   ;;  %v11457_v23 = vld [vmem:[%s12330_s28 + $0x14] ss:$8 sps:$4 sm:$0xff]  }
  0x11   : > { %709 = vmatprep.mubr.bf16.mxu0 %v11456_v12  ;;  %v11459_v27 = vld [vmem:[%s12330_s28 + $0x10] ss:$8 sps:$4 sm:$0xff]   ;;  %v11470_v31 = vld [vmem:[%s12330_s28 + $0x24] ss:$8 sps:$4 sm:$0xff]   ;;  %v11472_v32 = vld [vmem:[%s12330_s28 + $0x20] ss:$8 sps:$4 sm:$0xff]  }
  0x12   : > { %10069 = vmatpush3.bf16.msra.mxu1 %v11462_v19  ;;  %v11477_v37 = vld [vmem:[%s12330_s28 + $0x34] ss:$8 sps:$4 sm:$0xff]   ;;  %v11479_v38 = vld [vmem:[%s12330_s28 + $0x30] ss:$8 sps:$4 sm:$0xff]   ;;  %v11480_v56 = vld [vmem:[%s15311_s3 + $0x40] sm:$0xff]  }
  0x13   : > { %9474 = vmatpush3.bf16.msra.mxu0 %v11445_v8  ;;  %10070 = vmatprep.subr.bf16.mxu1 %v12204_v3 }
  0x14   : > { %9475 = vmatprep.subr.bf16.mxu0 %v11446_v9 }
  0x16   : > { %10071 = vmatpush3.bf16.msra.mxu1 %v11464_v21 }
  0x17   : > { %9476 = vmatpush3.bf16.msra.mxu0 %v11447_v10  ;;  %10072 = vmatprep.subr.bf16.mxu1 %v12204_v3  ;;  %v11482_v10 = vld [vmem:[%s15311_s3 + $0x48] sm:$0xff]  }
  0x18   : > { %9477 = vmatprep.subr.bf16.mxu0 %v11448_v11 }
  0x1a   : > { %10073 = vmatpush3.bf16.msra.mxu1 %v11466_v25  ;;  %v11485_v25 = vld [vmem:[%s15311_s3 + $0x40] sm:$0xff]  }
  0x1b   : > { %9478 = vmatpush3.bf16.msra.mxu0 %v11449_v13  ;;  %10074 = vmatprep.subr.bf16.mxu1 %v12204_v3 }
  0x1c   : > { %9479 = vmatprep.subr.bf16.mxu0 %v11450_v15 }
  0x1e   : > { %10075 = vmatpush3.bf16.msra.mxu1 %v11468_v29  ;;  %v11486_v29 = vld [vmem:[%s15311_s3 + $0x58] sm:$0xff]  }
  0x1f   : > { %9480 = vmatpush3.bf16.msra.mxu0 %v11451_v17  ;;  %10076 = vmatprep.subr.bf16.mxu1 %v12204_v3 }
  0x20   : > { %9481 = vmatprep.subr.bf16.mxu0 %v11452_v18  ;;  %v11484_v18 = vld [vmem:[%s15311_s3 + $0x50] sm:$0xff]  }
  0x22   : > { %10077 = vmatpush3.bf16.msra.mxu1 %v11473_v33 }
  0x23   : > { %9482 = vmatpush3.bf16.msra.mxu0 %v11453_v20  ;;  %10078 = vmatprep.subr.bf16.mxu1 %v12204_v3 }
  0x24   : > { %10384 = vmatprep.subr.bf16.mxu0 %v12204_v3 }
  0x26   : > { %710 = vmatmul.mubr.bf16.vlgmr.msra.gmra.mrb[0].mxu0 %v11454_v22  ;;  %10079 = vmatpush3.bf16.msra.mxu1 %v11475_v35  ;;  %v11488_v35 = vld [vmem:[%s15311_s3 + $0x60] sm:$0xff]  }
  0x27   : > { %717 = vmatprep.mubr.bf16.mxu0 %v11457_v23  ;;  %10385 = vmatpush3.bf16.msra.mxu0 %v11463_v24 }
  0x28   : > { %10386 = vmatprep.subr.bf16.mxu0 %v12204_v3  ;;  %10084 = vmatprep.subr.bf16.mxu1 %v12204_v3 }
  0x2b   : > { %10387 = vmatpush3.bf16.msra.mxu0 %v11465_v26 }
  0x2c   : > { %10388 = vmatprep.subr.bf16.mxu0 %v12204_v3 }
  0x2e   : > { %718 = vmatmul.mubr.bf16.gmra.mrb[4].mxu0 %v11459_v27 }
  0x2f   : > { %10389 = vmatpush3.bf16.msra.mxu0 %v11467_v28  ;;  %725 = vmatprep.mubr.bf16.mxu0 %v11470_v31 }
  0x30   : > { %10390 = vmatprep.subr.bf16.mxu0 %v12204_v3 }
  0x33   : > { %10391 = vmatpush3.bf16.msra.mxu0 %v11469_v30 }
  0x34   : > { %10392 = vmatprep.subr.bf16.mxu0 %v12204_v3 }
  0x36   : > { %726 = vmatmul.mubr.bf16.gmra.mrb[8].mxu0 %v11472_v32 }
  0x37   : > { %10393 = vmatpush3.bf16.msra.mxu0 %v11474_v34  ;;  %733 = vmatprep.mubr.bf16.mxu0 %v11477_v37  ;;  %v11487_v34 = vld [vmem:[%s15311_s3 + $0x48] sm:$0xff]  }
  0x38   : > { %10394 = vmatprep.subr.bf16.mxu0 %v12204_v3  ;;  %v11490_v37 = vld [vmem:[%s15311_s3 + $0x68] sm:$0xff]  }
  0x3b   : > { %10395 = vmatpush3.bf16.msra.mxu0 %v11476_v36  ;;  %v11489_v36 = vld [vmem:[%s15311_s3 + $0x50] sm:$0xff]  }
  0x3c   : > { %10396 = vmatprep.subr.bf16.mxu0 %v12204_v3 }
  0x3e   : > { %734 = vmatmul.mubr.bf16.gmra.mrb[12].mxu0 %v11479_v38  ;;  %v11491_v38 = vld [vmem:[%s15311_s3 + $0x58] sm:$0xff]  }
  0x3f   : > { %10397 = vmatpush3.bf16.msra.mxu0 %v11481_v39  ;;  %10400 = vmatprep.mubr.msk.bf16.mxu0 %vm12205_vm0, %v12204_v3  ;;  %v11492_v39 = vld [vmem:[%s15311_s3 + $0x70] sm:$0xff]  }
  0x40   : > { %10398 = vmatprep.subr.bf16.mxu0 %v12204_v3 }
  0x43   : > { %10399 = vmatpush3.bf16.msra.mxu0 %v11483_v40  ;;  %v11493_v40 = vld [vmem:[%s15311_s3 + $0x60] sm:$0xff]  }
  0x44   : > { %10404 = vmatprep.subr.bf16.mxu0 %v12204_v3 }
  0xf9   : > { %v9483_v42 = vpop.f32.mrb[0].mxu0 }
  0xfa   : > { %v9484_v43 = vpop.f32.mrb[1].mxu0 }
  0xfb   : > { %v9485_v44 = vadd.f32 %v9484_v43, %v9483_v42  ;;  %v9486_v45 = vpop.f32.mrb[2].mxu0  ;;  %v11495_v43 = vld [vmem:[%s15311_s3 + $0x68] sm:$0xff]  }
  0xfc   : > { %v9487_v46 = vpop.f32.mrb[3].mxu0 }
  0xfd   : > { %v712_v47 = vadd.f32 %v9485_v44, %v8790_v41  ;;  %v9488_v48 = vadd.f32 %v9487_v46, %v9486_v45  ;;  %v11496_v45 = vld [vmem:[%s15311_s3 + $0x80] sm:$0xff]   ;;  %v11497_v46 = vld [vmem:[%s15311_s3 + $0x70] sm:$0xff]  }
  0xff   : > { %v12433_v49 = vmax.f32 %v712_v47, 0.0  ;;  %v715_v50 = vadd.f32 %v9488_v48, %v8790_v41 }
 0x101   : > { %v9489_v51 = vpop.f32.mrb[4].mxu0  ;;  %v767_v52 = vrot.slane %v12433_v49, 1  ;;  %v12437_v53 = vrot.slane %v12433_v49, 2  ;;  %v12440_v54 = vrot.slane %v12433_v49, 3  ;;  %v991_v57 = vrot.slane %v12433_v49, 4 }
 0x102   : > { %v9490_v55 = vpop.f32.mrb[5].mxu0  ;;  %v1101_v58 = vrot.slane %v12433_v49, 5  ;;  %v12447_v59 = vmax.f32 %v715_v50, 0.0  ;;  %v11499_v50 = vld [vmem:[%s15311_s3 + $0x78] sm:$0xff]  }
 0x103   : > { %v9491_v60 = vadd.f32 %v9490_v55, %v9489_v51  ;;  %v772_v61 = vsel %vm771_vm1, %v12433_v49, %v767_v52  ;;  %v993_v62 = vsel %vm771_vm1, %v12437_v53, %v12440_v54  ;;  %v9492_v63 = vpop.f32.mrb[6].mxu0  ;;  %v1103_v2 = vsel %vm771_vm1, %v12440_v54, %v991_v57  ;;  %v11498_v49 = vld [vmem:[%s15311_s3 + $0x88] sm:$0xff]   ;;  %v11502_v55 = vld [vmem:[%s15311_s3 + $0x98] sm:$0xff]  }
 0x104   : > { %v774_v0 = vsel %vm773_vm2, %v772_v61, %v12437_v53  ;;  %v12459_v1 = vsel %vm773_vm2, %v993_v62, %v991_v57  ;;  %v9493_v4 = vpop.f32.mrb[7].mxu0  ;;  %v12464_v7 = vsel %vm773_vm2, %v1103_v2, %v1101_v58  ;;  %v12474_v11 = vrot.slane %v12447_v59, 2  ;;  %v11504_v57 = vld [vmem:[%s15311_s3 + $0xa0] sm:$0xff]   ;;  %v11505_v58 = vld [vmem:[%s15311_s3 + $0x90] sm:$0xff]   ;;  %v11507_v61 = vld [vmem:[%s15311_s3 + $0x98] sm:$0xff]  }
 0x105   : > { %v720_v5 = vadd.f32 %v9491_v60, %v8790_v41  ;;  %v791_v6 = vpack.c.bf16 %v774_v0, %v774_v0  ;;  %v12466_v8 = vadd.f32 %v9493_v4, %v9492_v63  ;;  %v12479_v12 = vrot.slane %v12447_v59, 3  ;;  %v11494_v41 = vld [vmem:[%s15311_s3 + $0x78] sm:$0xff]   ;;  %v11506_v60 = vld [vmem:[%s15311_s3 + $0xa8] sm:$0xff]   ;;  %v11508_v62 = vld [vmem:[%s15311_s3 + $0xb0] sm:$0xff]  }
 0x106   : > { %v1435_v13 = vrot.slane %v12447_v59, 4  ;;  %v1545_v20 = vrot.slane %v12447_v59, 5  ;;  %v883_v42 = vsel %vm771_vm1, %v767_v52, %v12437_v53  ;;  %v11500_v52 = vld [vmem:[%s15311_s3 + $0x90] sm:$0xff]   ;;  %v11509_v63 = vld [vmem:[%s15311_s3 + $0xa0] sm:$0xff]   ;;  %v11510_v0 = vld [vmem:[%s15311_s3 + $0xb8] sm:$0xff]  }
 0x107   : > { %v12468_v9 = vmax.f32 %v720_v5, 0.0  ;;  %10081 = vmatmul.mubr.bf16.vlgmr.msra.gmra.mrb[0].mxu1 %v791_v6  ;;  %v1437_v30 = vsel %vm771_vm1, %v12474_v11, %v12479_v12  ;;  %v884_v44 = vsel %vm773_vm2, %v883_v42, %v12440_v54  ;;  %v11501_v54 = vld [vmem:[%s15311_s3 + $0x80] sm:$0xff]   ;;  %v11511_v2 = vld [vmem:[%s15311_s3 + $0xa8] sm:$0xff]   ;;  %v11513_v5 = vld [vmem:[%s15311_s3 + $0xb0] sm:$0xff]   ;;  %v1011_v6 = vpack.c.bf16 %v12459_v1, %v12459_v1 }
 0x108   : > { %10085 = vmatpush3.bf16.msra.mxu1 %v11480_v56  ;;  %10100 = vmatprep.mubr.msk.bf16.mxu1 %vm12205_vm0, %v12204_v3  ;;  %v1547_v31 = vsel %vm771_vm1, %v12479_v12, %v1435_v13  ;;  %v12525_v32 = vsel %vm773_vm2, %v1437_v30, %v1435_v13  ;;  %v901_v47 = vpack.c.bf16 %v884_v44, %v884_v44  ;;  %v11503_v56 = vld [vmem:[%s15311_s3 + $0x88] sm:$0xff]   ;;  %v11512_v4 = vld [vmem:[%s15311_s3 + $0xc0] sm:$0xff]   ;;  %v11516_v1 = vld [vmem:[%s15311_s3 + $0xd0] sm:$0xff]  }
 0x109   : > { %10086 = vmatprep.subr.bf16.mxu1 %v12204_v3  ;;  %v1657_v14 = vrot.slane %v12468_v9, 1  ;;  %v1659_v15 = vrot.slane %v12468_v9, 2  ;;  %v12486_v16 = vrot.slane %v12468_v9, 3  ;;  %v1879_v17 = vrot.slane %v12468_v9, 4  ;;  %v11530_v30 = vld [vmem:[%s15311_s3 + $0x108] sm:$0xff]   ;;  %v11540_v44 = vld [vmem:[%s15311_s3 + $0x130] sm:$0xff]  }
 0x10a   : > { %v1989_v19 = vrot.slane %v12468_v9, 5  ;;  %v12528_v33 = vsel %vm773_vm2, %v1547_v31, %v1545_v20  ;;  %v11523_v20 = vld [vmem:[%s15311_s3 + $0xd8] sm:$0xff]  }
 0x10b   : > { %v1661_v21 = vsel %vm771_vm1, %v12468_v9, %v1657_v14  ;;  %v1881_v22 = vsel %vm771_vm1, %v1659_v15, %v12486_v16  ;;  %v1991_v23 = vsel %vm771_vm1, %v12486_v16, %v1879_v17  ;;  %v1771_v48 = vsel %vm771_vm1, %v1657_v14, %v1659_v15  ;;  %v11514_v9 = vld [vmem:[%s15311_s3 + $0xc8] sm:$0xff]   ;;  %v11517_v14 = vld [vmem:[%s15311_s3 + $0xc0] sm:$0xff]   ;;  %v11531_v31 = vld [vmem:[%s15311_s3 + $0xf8] sm:$0xff]  }
 0x10c   : > { %10087 = vmatpush3.bf16.msra.mxu1 %v11482_v10  ;;  %v1662_v24 = vsel %vm773_vm2, %v1661_v21, %v1659_v15  ;;  %v12507_v26 = vsel %vm773_vm2, %v1881_v22, %v1879_v17  ;;  %v12510_v27 = vsel %vm773_vm2, %v1991_v23, %v1989_v19  ;;  %v1772_v51 = vsel %vm773_vm2, %v1771_v48, %v12486_v16  ;;  %v11515_v10 = vld [vmem:[%s15311_s3 + $0xb8] sm:$0xff]   ;;  %v11519_v16 = vld [vmem:[%s15311_s3 + $0xc8] sm:$0xff]   ;;  %v11520_v17 = vld [vmem:[%s15311_s3 + $0xe0] sm:$0xff]  }
 0x10d   : > { %10088 = vmatprep.subr.bf16.mxu1 %v12204_v3  ;;  %v12513_v28 = vpack.c.bf16 %v1662_v24, %v1662_v24  ;;  %v12601_v53 = vpack.c.bf16 %v1772_v51, %v1772_v51  ;;  %v12676_v13 = vpack.c.bf16 %v12507_v26, %v12507_v26  ;;  %v11518_v15 = vld [vmem:[%s15311_s3 + $0xd8] sm:$0xff]   ;;  %v11522_v19 = vld [vmem:[%s15311_s3 + $0xe8] sm:$0xff]   ;;  %v11524_v21 = vld [vmem:[%s15311_s3 + $0xf0] sm:$0xff]  }
 0x10e   : > { %v11525_v22 = vld [vmem:[%s15311_s3 + $0xe0] sm:$0xff]   ;;  %v11526_v23 = vld [vmem:[%s15311_s3 + $0xf8] sm:$0xff]   ;;  %v11527_v24 = vld [vmem:[%s15311_s3 + $0xe8] sm:$0xff]  }
 0x10f   : > { %10401 = vmatmul.mubr.bf16.vlgmr.msra.gmra.mrb[16].mxu0 %v12513_v28  ;;  %v11529_v26 = vld [vmem:[%s15311_s3 + $0xf0] sm:$0xff]   ;;  %v11543_v48 = vld [vmem:[%s15311_s3 + $0x128] sm:$0xff]  }
 0x110   : > { %10089 = vmatpush3.bf16.msra.mxu1 %v11484_v18  ;;  %10405 = vmatpush3.bf16.msra.mxu0 %v11485_v25  ;;  %v11521_v18 = vld [vmem:[%s15311_s3 + $0xd0] sm:$0xff]   ;;  %v11528_v25 = vld [vmem:[%s15311_s3 + $0x100] sm:$0xff]  }
 0x111   : > { %10090 = vmatprep.subr.bf16.mxu1 %v12204_v3  ;;  %10406 = vmatprep.subr.bf16.mxu0 %v12204_v3 }
 0x112   : > { %10420 = vmatprep.mubr.msk.bf16.mxu0 %vm12205_vm0, %v12204_v3 }
 0x114   : > { %10091 = vmatpush3.bf16.msra.mxu1 %v11486_v29  ;;  %10407 = vmatpush3.bf16.msra.mxu0 %v11487_v34  ;;  %v1121_v29 = vpack.c.bf16 %v12464_v7, %v12464_v7  ;;  %v11532_v7 = vld [vmem:[%s15311_s3 + $0x110] sm:$0xff]   ;;  %v12751_v34 = vpack.c.bf16 %v12510_v27, %v12510_v27  ;;  %v11535_v27 = vld [vmem:[%s15311_s3 + $0x108] sm:$0xff]  }
 0x115   : > { %10092 = vmatprep.subr.bf16.mxu1 %v12204_v3  ;;  %10408 = vmatprep.subr.bf16.mxu0 %v12204_v3 }
 0x118   : > { %10093 = vmatpush3.bf16.msra.mxu1 %v11488_v35  ;;  %10409 = vmatpush3.bf16.msra.mxu0 %v11489_v36  ;;  %v11533_v35 = vld [vmem:[%s15311_s3 + $0x100] sm:$0xff]   ;;  %v11534_v36 = vld [vmem:[%s15311_s3 + $0x118] sm:$0xff]  }
 0x119   : > { %10094 = vmatprep.subr.bf16.mxu1 %v12204_v3  ;;  %10410 = vmatprep.subr.bf16.mxu0 %v12204_v3 }
 0x11c   : > { %10095 = vmatpush3.bf16.msra.mxu1 %v11490_v37  ;;  %10411 = vmatpush3.bf16.msra.mxu0 %v11491_v38  ;;  %v11536_v37 = vld [vmem:[%s15311_s3 + $0x120] sm:$0xff]   ;;  %v11537_v38 = vld [vmem:[%s15311_s3 + $0x110] sm:$0xff]  }
 0x11d   : > { %10096 = vmatprep.subr.bf16.mxu1 %v12204_v3  ;;  %10412 = vmatprep.subr.bf16.mxu0 %v12204_v3 }
 0x120   : > { %10097 = vmatpush3.bf16.msra.mxu1 %v11492_v39  ;;  %10413 = vmatpush3.bf16.msra.mxu0 %v11493_v40  ;;  %v11538_v39 = vld [vmem:[%s15311_s3 + $0x128] sm:$0xff]   ;;  %v11539_v40 = vld [vmem:[%s15311_s3 + $0x118] sm:$0xff]  }
 0x121   : > { %10098 = vmatprep.subr.bf16.mxu1 %v12204_v3  ;;  %10414 = vmatprep.subr.bf16.mxu0 %v12204_v3 }
 0x124   : > { %10099 = vmatpush3.bf16.msra.mxu1 %v11494_v41  ;;  %10415 = vmatpush3.bf16.msra.mxu0 %v11495_v43  ;;  %v12788_v41 = vld [vmem:[%s15310_s2] ss:$0 sm:$0xff]  ;;  %v1213_v43 = vrot.slane %v12447_v59, 1 }
 0x125   : > { %10104 = vmatprep.subr.bf16.mxu1 %v12204_v3  ;;  %10416 = vmatprep.subr.bf16.mxu0 %v12204_v3  ;;  %v723_v42 = vadd.f32 %v12788_v41, %v12466_v8  ;;  %v11542_v8 = vld [vmem:[%s15311_s3 + $0x138] sm:$0xff]  }
 0x127   : > { %10101 = vmatmul.mubr.bf16.vlgmr.msra.gmra.mrb[0].mxu1 %v901_v47  ;;  %v1217_v47 = vsel %vm771_vm1, %v12447_v59, %v1213_v43  ;;  %v11561_v59 = vld [vmem:[%s15311_s3 + $0x170] sm:$0xff]  }
 0x128   : > { %10105 = vmatpush3.bf16.msra.mxu1 %v11496_v45  ;;  %10417 = vmatpush3.bf16.msra.mxu0 %v11497_v46  ;;  %v11541_v45 = vld [vmem:[%s15311_s3 + $0x120] sm:$0xff]   ;;  %v12801_v46 = vmax.f32 %v723_v42, 0.0  ;;  %v11575_v42 = vld [vmem:[%s15311_s3 + $0x1a8] sm:$0xff]  }
 0x129   : > { %10106 = vmatprep.subr.bf16.mxu1 %v12204_v3  ;;  %10418 = vmatprep.subr.bf16.mxu0 %v12204_v3 }
 0x12a   : > { %10120 = vmatprep.mubr.msk.bf16.mxu1 %vm12205_vm0, %v12204_v3 }
 0x12c   : > { %10107 = vmatpush3.bf16.msra.mxu1 %v11498_v49  ;;  %10419 = vmatpush3.bf16.msra.mxu0 %v11499_v50  ;;  %v9495_v49 = vpop.f32.mrb[8].mxu0  ;;  %v2101_v50 = vrot.slane %v12801_v46, 1 }
 0x12d   : > { %10108 = vmatprep.subr.bf16.mxu1 %v12204_v3  ;;  %10424 = vmatprep.subr.bf16.mxu0 %v12204_v3  ;;  %v9496_v51 = vpop.f32.mrb[9].mxu0 }
 0x12f   : > { %10421 = vmatmul.mubr.bf16.vlgmr.msra.gmra.mrb[16].mxu0 %v12601_v53 }
 0x130   : > { %10109 = vmatpush3.bf16.msra.mxu1 %v11500_v52  ;;  %10425 = vmatpush3.bf16.msra.mxu0 %v11501_v54  ;;  %v1218_v52 = vsel %vm773_vm2, %v1217_v47, %v12474_v11  ;;  %v11544_v54 = vld [vmem:[%s15311_s3 + $0x140] sm:$0xff]  }
 0x131   : > { %10110 = vmatprep.subr.bf16.mxu1 %v12204_v3  ;;  %10426 = vmatprep.subr.bf16.mxu0 %v12204_v3 }
 0x132   : > { %10440 = vmatprep.mubr.msk.bf16.mxu0 %vm12205_vm0, %v12204_v3 }
 0x134   : > { %10111 = vmatpush3.bf16.msra.mxu1 %v11502_v55  ;;  %10427 = vmatpush3.bf16.msra.mxu0 %v11503_v56  ;;  %v12821_v55 = vadd.f32 %v9496_v51, %v9495_v49  ;;  %v11545_v56 = vld [vmem:[%s15311_s3 + $0x130] sm:$0xff]   ;;  %v11579_v49 = vld [vmem:[%s15311_s3 + $0x1b8] sm:$0xff]  }
 0x135   : > { %10112 = vmatprep.subr.bf16.mxu1 %v12204_v3  ;;  %10428 = vmatprep.subr.bf16.mxu0 %v12204_v3 }
 0x138   : > { %10113 = vmatpush3.bf16.msra.mxu1 %v11504_v57  ;;  %10429 = vmatpush3.bf16.msra.mxu0 %v11505_v58  ;;  %v12827_v57 = vrot.slane %v12801_v46, 2  ;;  %v1235_v58 = vpack.c.bf16 %v1218_v52, %v1218_v52  ;;  %v11581_v52 = vld [vmem:[%s15311_s3 + $0x1c0] sm:$0xff]  }
 0x139   : > { %10114 = vmatprep.subr.bf16.mxu1 %v12204_v3  ;;  %10430 = vmatprep.subr.bf16.mxu0 %v12204_v3 }
 0x13c   : > { %10115 = vmatpush3.bf16.msra.mxu1 %v11506_v60  ;;  %10431 = vmatpush3.bf16.msra.mxu0 %v11507_v61  ;;  %v2105_v60 = vsel %vm771_vm1, %v12801_v46, %v2101_v50  ;;  %v11546_v61 = vld [vmem:[%s15311_s3 + $0x148] sm:$0xff]  }
 0x13d   : > { %10116 = vmatprep.subr.bf16.mxu1 %v12204_v3  ;;  %10432 = vmatprep.subr.bf16.mxu0 %v12204_v3 }
 0x140   : > { %10117 = vmatpush3.bf16.msra.mxu1 %v11508_v62  ;;  %10433 = vmatpush3.bf16.msra.mxu0 %v11509_v63  ;;  %v11547_v62 = vld [vmem:[%s15311_s3 + $0x138] sm:$0xff]   ;;  %v2106_v63 = vsel %vm773_vm2, %v2105_v60, %v12827_v57  ;;  %v11586_v60 = vld [vmem:[%s15311_s3 + $0x1e8] sm:$0xff]  }
 0x141   : > { %10118 = vmatprep.subr.bf16.mxu1 %v12204_v3  ;;  %10434 = vmatprep.subr.bf16.mxu0 %v12204_v3 }
 0x144   : > { %10119 = vmatpush3.bf16.msra.mxu1 %v11510_v0  ;;  %10435 = vmatpush3.bf16.msra.mxu0 %v11511_v2  ;;  %v11548_v0 = vld [vmem:[%s15311_s3 + $0x150] sm:$0xff]   ;;  %v12850_v2 = vpack.c.bf16 %v2106_v63, %v2106_v63  ;;  %v11589_v63 = vld [vmem:[%s15311_s3 + $0x1e0] sm:$0xff]  }
 0x145   : > { %10124 = vmatprep.subr.bf16.mxu1 %v12204_v3  ;;  %10436 = vmatprep.subr.bf16.mxu0 %v12204_v3 }
 0x147   : > { %10121 = vmatmul.mubr.bf16.vlgmr.msra.gmra.mrb[0].mxu1 %v1011_v6  ;;  %v11551_v6 = vld [vmem:[%s15311_s3 + $0x148] sm:$0xff]  }
 0x148   : > { %10125 = vmatpush3.bf16.msra.mxu1 %v11512_v4  ;;  %10437 = vmatpush3.bf16.msra.mxu0 %v11513_v5  ;;  %v11549_v4 = vld [vmem:[%s15311_s3 + $0x140] sm:$0xff]   ;;  %v11550_v5 = vld [vmem:[%s15311_s3 + $0x158] sm:$0xff]  }
 0x149   : > { %10126 = vmatprep.subr.bf16.mxu1 %v12204_v3  ;;  %10438 = vmatprep.subr.bf16.mxu0 %v12204_v3 }
 0x14a   : > { %10140 = vmatprep.mubr.msk.bf16.mxu1 %vm12205_vm0, %v12204_v3 }
 0x14c   : > { %10127 = vmatpush3.bf16.msra.mxu1 %v11514_v9  ;;  %10439 = vmatpush3.bf16.msra.mxu0 %v11515_v10  ;;  %v11552_v9 = vld [vmem:[%s15311_s3 + $0x160] sm:$0xff]   ;;  %v11553_v10 = vld [vmem:[%s15311_s3 + $0x150] sm:$0xff]  }
 0x14d   : > { %10128 = vmatprep.subr.bf16.mxu1 %v12204_v3  ;;  %10444 = vmatprep.subr.bf16.mxu0 %v12204_v3 }
 0x14f   : > { %10441 = vmatmul.mubr.bf16.vlgmr.msra.gmra.mrb[16].mxu0 %v12676_v13 }
 0x150   : > { %10129 = vmatpush3.bf16.msra.mxu1 %v11516_v1  ;;  %10445 = vmatpush3.bf16.msra.mxu0 %v11517_v14  ;;  %v11554_v1 = vld [vmem:[%s15311_s3 + $0x168] sm:$0xff]   ;;  %v11555_v14 = vld [vmem:[%s15311_s3 + $0x158] sm:$0xff]  }
 0x151   : > { %10130 = vmatprep.subr.bf16.mxu1 %v12204_v3  ;;  %10446 = vmatprep.subr.bf16.mxu0 %v12204_v3 }
 0x152   : > { %10460 = vmatprep.mubr.msk.bf16.mxu0 %vm12205_vm0, %v12204_v3 }
 0x154   : > { %10131 = vmatpush3.bf16.msra.mxu1 %v11518_v15  ;;  %10447 = vmatpush3.bf16.msra.mxu0 %v11519_v16  ;;  %v11556_v15 = vld [vmem:[%s15311_s3 + $0x170] sm:$0xff]   ;;  %v11557_v16 = vld [vmem:[%s15311_s3 + $0x160] sm:$0xff]  }
 0x155   : > { %10132 = vmatprep.subr.bf16.mxu1 %v12204_v3  ;;  %10448 = vmatprep.subr.bf16.mxu0 %v12204_v3 }
 0x158   : > { %10133 = vmatpush3.bf16.msra.mxu1 %v11520_v17  ;;  %10449 = vmatpush3.bf16.msra.mxu0 %v11521_v18  ;;  %v11558_v17 = vld [vmem:[%s15311_s3 + $0x178] sm:$0xff]   ;;  %v1327_v18 = vsel %vm771_vm1, %v1213_v43, %v12474_v11  ;;  %v12913_v11 = vrot.slane %v12801_v46, 3  ;;  %v11576_v43 = vld [vmem:[%s15311_s3 + $0x1c0] sm:$0xff]  }
 0x159   : > { %10134 = vmatprep.subr.bf16.mxu1 %v12204_v3  ;;  %10450 = vmatprep.subr.bf16.mxu0 %v12204_v3 }
 0x15a   : > { %v2325_v47 = vsel %vm771_vm1, %v12827_v57, %v12913_v11 }
 0x15c   : > { %10135 = vmatpush3.bf16.msra.mxu1 %v11522_v19  ;;  %10451 = vmatpush3.bf16.msra.mxu0 %v11523_v20  ;;  %v11559_v19 = vld [vmem:[%s15311_s3 + $0x168] sm:$0xff]   ;;  %v1328_v20 = vsel %vm773_vm2, %v1327_v18, %v12479_v12  ;;  %v2215_v12 = vsel %vm771_vm1, %v2101_v50, %v12827_v57  ;;  %v11580_v50 = vld [vmem:[%s15311_s3 + $0x1d0] sm:$0xff]   ;;  %v11584_v57 = vld [vmem:[%s15311_s3 + $0x1e0] sm:$0xff]  }
 0x15d   : > { %10136 = vmatprep.subr.bf16.mxu1 %v12204_v3  ;;  %10452 = vmatprep.subr.bf16.mxu0 %v12204_v3  ;;  %v11598_v18 = vld [vmem:[%s15311_s3 + $0x218] sm:$0xff]  }
 0x160   : > { %10137 = vmatpush3.bf16.msra.mxu1 %v11524_v21  ;;  %10453 = vmatpush3.bf16.msra.mxu0 %v11525_v22  ;;  %v11560_v21 = vld [vmem:[%s15311_s3 + $0x180] sm:$0xff]   ;;  %v1345_v22 = vpack.c.bf16 %v1328_v20, %v1328_v20 }
 0x161   : > { %10138 = vmatprep.subr.bf16.mxu1 %v12204_v3  ;;  %10454 = vmatprep.subr.bf16.mxu0 %v12204_v3  ;;  %v11600_v20 = vld [vmem:[%s15311_s3 + $0x220] sm:$0xff]  }
 0x164   : > { %10139 = vmatpush3.bf16.msra.mxu1 %v11526_v23  ;;  %10455 = vmatpush3.bf16.msra.mxu0 %v11527_v24  ;;  %v11562_v23 = vld [vmem:[%s15311_s3 + $0x188] sm:$0xff]   ;;  %v11563_v24 = vld [vmem:[%s15311_s3 + $0x178] sm:$0xff]  }
 0x165   : > { %10144 = vmatprep.subr.bf16.mxu1 %v12204_v3  ;;  %10456 = vmatprep.subr.bf16.mxu0 %v12204_v3 }
 0x167   : > { %10141 = vmatmul.mubr.bf16.vlgmr.msra.gmra.mrb[0].mxu1 %v1121_v29 }
 0x168   : > { %10145 = vmatpush3.bf16.msra.mxu1 %v11528_v25  ;;  %10457 = vmatpush3.bf16.msra.mxu0 %v11529_v26  ;;  %v2216_v25 = vsel %vm773_vm2, %v2215_v12, %v12913_v11  ;;  %v11564_v26 = vld [vmem:[%s15311_s3 + $0x190] sm:$0xff]  }
 0x169   : > { %10146 = vmatprep.subr.bf16.mxu1 %v12204_v3  ;;  %10458 = vmatprep.subr.bf16.mxu0 %v12204_v3  ;;  %v12936_v29 = vpack.c.bf16 %v2216_v25, %v2216_v25  ;;  %v11604_v12 = vld [vmem:[%s15311_s3 + $0x230] sm:$0xff]   ;;  %v9498_v25 = vpop.f32.mrb[10].mxu0 }
 0x16a   : > { %10160 = vmatprep.mubr.msk.bf16.mxu1 %vm12205_vm0, %v12204_v3 }
 0x16c   : > { %10147 = vmatpush3.bf16.msra.mxu1 %v11530_v30  ;;  %10459 = vmatpush3.bf16.msra.mxu0 %v11531_v31  ;;  %v11565_v30 = vld [vmem:[%s15311_s3 + $0x180] sm:$0xff]   ;;  %v11566_v31 = vld [vmem:[%s15311_s3 + $0x198] sm:$0xff]  }
 0x16d   : > { %10148 = vmatprep.subr.bf16.mxu1 %v12204_v3  ;;  %10464 = vmatprep.subr.bf16.mxu0 %v12204_v3 }
 0x16f   : > { %10461 = vmatmul.mubr.bf16.vlgmr.msra.gmra.mrb[16].mxu0 %v12751_v34 }
 0x170   : > { %10149 = vmatpush3.bf16.msra.mxu1 %v11532_v7  ;;  %10465 = vmatpush3.bf16.msra.mxu0 %v11533_v35  ;;  %v11567_v7 = vld [vmem:[%s15311_s3 + $0x188] sm:$0xff]   ;;  %v11568_v35 = vld [vmem:[%s15311_s3 + $0x1a0] sm:$0xff]  }
 0x171   : > { %10150 = vmatprep.subr.bf16.mxu1 %v12204_v3  ;;  %10466 = vmatprep.subr.bf16.mxu0 %v12204_v3 }
 0x172   : > { %10480 = vmatprep.mubr.msk.bf16.mxu0 %vm12205_vm0, %v12204_v3 }
 0x174   : > { %10151 = vmatpush3.bf16.msra.mxu1 %v11534_v36  ;;  %10467 = vmatpush3.bf16.msra.mxu0 %v11535_v27  ;;  %v11569_v36 = vld [vmem:[%s15311_s3 + $0x190] sm:$0xff]   ;;  %v11570_v27 = vld [vmem:[%s15311_s3 + $0x1a8] sm:$0xff]  }
 0x175   : > { %10152 = vmatprep.subr.bf16.mxu1 %v12204_v3  ;;  %10468 = vmatprep.subr.bf16.mxu0 %v12204_v3 }
 0x178   : > { %10153 = vmatpush3.bf16.msra.mxu1 %v11536_v37  ;;  %10469 = vmatpush3.bf16.msra.mxu0 %v11537_v38  ;;  %v11571_v37 = vld [vmem:[%s15311_s3 + $0x198] sm:$0xff]   ;;  %v11572_v38 = vld [vmem:[%s15311_s3 + $0x1b0] sm:$0xff]  }
 0x179   : > { %10154 = vmatprep.subr.bf16.mxu1 %v12204_v3  ;;  %10470 = vmatprep.subr.bf16.mxu0 %v12204_v3 }
 0x17c   : > { %10155 = vmatpush3.bf16.msra.mxu1 %v11538_v39  ;;  %10471 = vmatpush3.bf16.msra.mxu0 %v11539_v40  ;;  %v11573_v39 = vld [vmem:[%s15311_s3 + $0x1a0] sm:$0xff]   ;;  %v11574_v40 = vld [vmem:[%s15311_s3 + $0x1b8] sm:$0xff]  }
 0x17d   : > { %10156 = vmatprep.subr.bf16.mxu1 %v12204_v3  ;;  %10472 = vmatprep.subr.bf16.mxu0 %v12204_v3 }
 0x180   : > { %10157 = vmatpush3.bf16.msra.mxu1 %v11540_v44  ;;  %10473 = vmatpush3.bf16.msra.mxu0 %v11541_v45  ;;  %v11577_v44 = vld [vmem:[%s15311_s3 + $0x1b0] sm:$0xff]   ;;  %v2323_v45 = vrot.slane %v12801_v46, 4 }
 0x181   : > { %10158 = vmatprep.subr.bf16.mxu1 %v12204_v3  ;;  %10474 = vmatprep.subr.bf16.mxu0 %v12204_v3 }
 0x184   : > { %10159 = vmatpush3.bf16.msra.mxu1 %v11542_v8  ;;  %10475 = vmatpush3.bf16.msra.mxu0 %v11543_v48  ;;  %v1455_v8 = vpack.c.bf16 %v12525_v32, %v12525_v32  ;;  %v11578_v48 = vld [vmem:[%s15311_s3 + $0x1c8] sm:$0xff]   ;;  %v2326_v32 = vsel %vm773_vm2, %v2325_v47, %v2323_v45 }
 0x185   : > { %10164 = vmatprep.subr.bf16.mxu1 %v12204_v3  ;;  %10476 = vmatprep.subr.bf16.mxu0 %v12204_v3  ;;  %v13014_v51 = vpack.c.bf16 %v2326_v32, %v2326_v32  ;;  %v11618_v47 = vld [vmem:[%s15311_s3 + $0x268] sm:$0xff]   ;;  %v11621_v32 = vld [vmem:[%s15311_s3 + $0x260] sm:$0xff]  }
 0x187   : > { %10161 = vmatmul.mubr.bf16.vlgmr.msra.gmra.mrb[0].mxu1 %v1235_v58  ;;  %v11585_v58 = vld [vmem:[%s15311_s3 + $0x1d0] sm:$0xff]  }
 0x188   : > { %10165 = vmatpush3.bf16.msra.mxu1 %v11544_v54  ;;  %10477 = vmatpush3.bf16.msra.mxu0 %v11545_v56  ;;  %v11582_v54 = vld [vmem:[%s15311_s3 + $0x1d8] sm:$0xff]   ;;  %v11583_v56 = vld [vmem:[%s15311_s3 + $0x1c8] sm:$0xff]  }
 0x189   : > { %10166 = vmatprep.subr.bf16.mxu1 %v12204_v3  ;;  %10478 = vmatprep.subr.bf16.mxu0 %v12204_v3 }
 0x18a   : > { %10180 = vmatprep.mubr.msk.bf16.mxu1 %vm12205_vm0, %v12204_v3 }
 0x18c   : > { %10167 = vmatpush3.bf16.msra.mxu1 %v11546_v61  ;;  %10479 = vmatpush3.bf16.msra.mxu0 %v11547_v62  ;;  %v11587_v61 = vld [vmem:[%s15311_s3 + $0x1d8] sm:$0xff]   ;;  %v11588_v62 = vld [vmem:[%s15311_s3 + $0x1f0] sm:$0xff]  }
 0x18d   : > { %10168 = vmatprep.subr.bf16.mxu1 %v12204_v3  ;;  %10484 = vmatprep.subr.bf16.mxu0 %v12204_v3 }
 0x18f   : > { %10481 = vmatmul.mubr.bf16.vlgmr.msra.gmra.mrb[16].mxu0 %v12850_v2 }
 0x190   : > { %10169 = vmatpush3.bf16.msra.mxu1 %v11548_v0  ;;  %10485 = vmatpush3.bf16.msra.mxu0 %v11549_v4  ;;  %v11590_v0 = vld [vmem:[%s15311_s3 + $0x1f8] sm:$0xff]   ;;  %v11591_v4 = vld [vmem:[%s15311_s3 + $0x1e8] sm:$0xff]  }
 0x191   : > { %10170 = vmatprep.subr.bf16.mxu1 %v12204_v3  ;;  %10486 = vmatprep.subr.bf16.mxu0 %v12204_v3 }
 0x192   : > { %10500 = vmatprep.mubr.msk.bf16.mxu0 %vm12205_vm0, %v12204_v3 }
 0x194   : > { %10171 = vmatpush3.bf16.msra.mxu1 %v11550_v5  ;;  %10487 = vmatpush3.bf16.msra.mxu0 %v11551_v6  ;;  %v11592_v5 = vld [vmem:[%s15311_s3 + $0x200] sm:$0xff]   ;;  %v11593_v6 = vld [vmem:[%s15311_s3 + $0x1f0] sm:$0xff]  }
 0x195   : > { %10172 = vmatprep.subr.bf16.mxu1 %v12204_v3  ;;  %10488 = vmatprep.subr.bf16.mxu0 %v12204_v3 }
 0x198   : > { %10173 = vmatpush3.bf16.msra.mxu1 %v11552_v9  ;;  %10489 = vmatpush3.bf16.msra.mxu0 %v11553_v10  ;;  %v2433_v9 = vrot.slane %v12801_v46, 5  ;;  %v1565_v10 = vpack.c.bf16 %v12528_v33, %v12528_v33  ;;  %v11595_v46 = vld [vmem:[%s15311_s3 + $0x1f8] sm:$0xff]  }
 0x199   : > { %10174 = vmatprep.subr.bf16.mxu1 %v12204_v3  ;;  %10490 = vmatprep.subr.bf16.mxu0 %v12204_v3 }
 0x19c   : > { %10175 = vmatpush3.bf16.msra.mxu1 %v11554_v1  ;;  %10491 = vmatpush3.bf16.msra.mxu0 %v11555_v14  ;;  %v2435_v1 = vsel %vm771_vm1, %v12913_v11, %v2323_v45  ;;  %v11594_v14 = vld [vmem:[%s15311_s3 + $0x208] sm:$0xff]   ;;  %v11603_v11 = vld [vmem:[%s15311_s3 + $0x218] sm:$0xff]   ;;  %v11616_v45 = vld [vmem:[%s15311_s3 + $0x260] sm:$0xff]  }
 0x19d   : > { %10176 = vmatprep.subr.bf16.mxu1 %v12204_v3  ;;  %10492 = vmatprep.subr.bf16.mxu0 %v12204_v3  ;;  %v2436_v33 = vsel %vm773_vm2, %v2435_v1, %v2433_v9  ;;  %v11633_v9 = vld [vmem:[%s15311_s3 + $0x290] sm:$0xff]   ;;  %v11635_v1 = vld [vmem:[%s15311_s3 + $0x298] sm:$0xff]  }
 0x1a0   : > { %10177 = vmatpush3.bf16.msra.mxu1 %v11556_v15  ;;  %10493 = vmatpush3.bf16.msra.mxu0 %v11557_v16  ;;  %v13088_v15 = vpack.c.bf16 %v2436_v33, %v2436_v33  ;;  %v11596_v16 = vld [vmem:[%s15311_s3 + $0x210] sm:$0xff]   ;;  %v11638_v33 = vld [vmem:[%s15311_s3 + $0x2b8] sm:$0xff]  }
 0x1a1   : > { %10178 = vmatprep.subr.bf16.mxu1 %v12204_v3  ;;  %10494 = vmatprep.subr.bf16.mxu0 %v12204_v3 }
 0x1a4   : > { %10179 = vmatpush3.bf16.msra.mxu1 %v11558_v17  ;;  %10495 = vmatpush3.bf16.msra.mxu0 %v11559_v19  ;;  %v11597_v17 = vld [vmem:[%s15311_s3 + $0x200] sm:$0xff]   ;;  %v11599_v19 = vld [vmem:[%s15311_s3 + $0x208] sm:$0xff]  }
 0x1a5   : > { %10184 = vmatprep.subr.bf16.mxu1 %v12204_v3  ;;  %10496 = vmatprep.subr.bf16.mxu0 %v12204_v3 }
 0x1a7   : > { %10181 = vmatmul.mubr.bf16.vlgmr.msra.gmra.mrb[0].mxu1 %v1345_v22  ;;  %v728_v22 = vadd.f32 %v12788_v41, %v12821_v55  ;;  %v11606_v41 = vld [vmem:[%s15311_s3 + $0x238] sm:$0xff]   ;;  %v11607_v55 = vld [vmem:[%s15311_s3 + $0x228] sm:$0xff]  }
 0x1a8   : > { %10185 = vmatpush3.bf16.msra.mxu1 %v11560_v21  ;;  %10497 = vmatpush3.bf16.msra.mxu0 %v11561_v59  ;;  %v11601_v21 = vld [vmem:[%s15311_s3 + $0x210] sm:$0xff]   ;;  %v11602_v59 = vld [vmem:[%s15311_s3 + $0x228] sm:$0xff]  }
 0x1a9   : > { %10186 = vmatprep.subr.bf16.mxu1 %v12204_v3  ;;  %10498 = vmatprep.subr.bf16.mxu0 %v12204_v3 }
 0x1aa   : > { %10200 = vmatprep.mubr.msk.bf16.mxu1 %vm12205_vm0, %v12204_v3 }
 0x1ac   : > { %10187 = vmatpush3.bf16.msra.mxu1 %v11562_v23  ;;  %10499 = vmatpush3.bf16.msra.mxu0 %v11563_v24  ;;  %v11605_v23 = vld [vmem:[%s15311_s3 + $0x220] sm:$0xff]   ;;  %v13135_v24 = vmax.f32 %v728_v22, 0.0  ;;  %v11644_v22 = vld [vmem:[%s15311_s3 + $0x2d0] sm:$0xff]  }
 0x1ad   : > { %10188 = vmatprep.subr.bf16.mxu1 %v12204_v3  ;;  %10504 = vmatprep.subr.bf16.mxu0 %v12204_v3 }
 0x1af   : > { %10501 = vmatmul.mubr.bf16.vlgmr.msra.gmra.mrb[16].mxu0 %v12936_v29 }
 0x1b0   : > { %10189 = vmatpush3.bf16.msra.mxu1 %v11564_v26  ;;  %10505 = vmatpush3.bf16.msra.mxu0 %v11565_v30  ;;  %v3435_v26 = vrot.slane %v13135_v24, 1  ;;  %v9499_v30 = vpop.f32.mrb[11].mxu0 }
 0x1b1   : > { %10190 = vmatprep.subr.bf16.mxu1 %v12204_v3  ;;  %10506 = vmatprep.subr.bf16.mxu0 %v12204_v3 }
 0x1b2   : > { %10520 = vmatprep.mubr.msk.bf16.mxu0 %vm12205_vm0, %v12204_v3 }
 0x1b4   : > { %10191 = vmatpush3.bf16.msra.mxu1 %v11566_v31  ;;  %10507 = vmatpush3.bf16.msra.mxu0 %v11567_v7  ;;  %v13146_v31 = vadd.f32 %v9499_v30, %v9498_v25  ;;  %v11608_v7 = vld [vmem:[%s15311_s3 + $0x240] sm:$0xff]   ;;  %v11649_v25 = vld [vmem:[%s15311_s3 + $0x2d0] sm:$0xff]   ;;  %v11651_v30 = vld [vmem:[%s15311_s3 + $0x2d8] sm:$0xff]  }
 0x1b5   : > { %10192 = vmatprep.subr.bf16.mxu1 %v12204_v3  ;;  %10508 = vmatprep.subr.bf16.mxu0 %v12204_v3 }
 0x1b8   : > { %10193 = vmatpush3.bf16.msra.mxu1 %v11568_v35  ;;  %10509 = vmatpush3.bf16.msra.mxu0 %v11569_v36  ;;  %v11609_v35 = vld [vmem:[%s15311_s3 + $0x230] sm:$0xff]   ;;  %v13155_v36 = vrot.slane %v13135_v24, 2 }
 0x1b9   : > { %10194 = vmatprep.subr.bf16.mxu1 %v12204_v3  ;;  %10510 = vmatprep.subr.bf16.mxu0 %v12204_v3 }
 0x1bc   : > { %10195 = vmatpush3.bf16.msra.mxu1 %v11570_v27  ;;  %10511 = vmatpush3.bf16.msra.mxu0 %v11571_v37  ;;  %v3439_v27 = vsel %vm771_vm1, %v13135_v24, %v3435_v26  ;;  %v11610_v37 = vld [vmem:[%s15311_s3 + $0x248] sm:$0xff]  }
 0x1bd   : > { %10196 = vmatprep.subr.bf16.mxu1 %v12204_v3  ;;  %10512 = vmatprep.subr.bf16.mxu0 %v12204_v3 }
 0x1c0   : > { %10197 = vmatpush3.bf16.msra.mxu1 %v11572_v38  ;;  %10513 = vmatpush3.bf16.msra.mxu0 %v11573_v39  ;;  %v11611_v38 = vld [vmem:[%s15311_s3 + $0x238] sm:$0xff]   ;;  %v3440_v39 = vsel %vm773_vm2, %v3439_v27, %v13155_v36  ;;  %v11655_v27 = vld [vmem:[%s15311_s3 + $0x2e8] sm:$0xff]  }
 0x1c1   : > { %10198 = vmatprep.subr.bf16.mxu1 %v12204_v3  ;;  %10514 = vmatprep.subr.bf16.mxu0 %v12204_v3 }
 0x1c4   : > { %10199 = vmatpush3.bf16.msra.mxu1 %v11574_v40  ;;  %10515 = vmatpush3.bf16.msra.mxu0 %v11575_v42  ;;  %v11612_v40 = vld [vmem:[%s15311_s3 + $0x250] sm:$0xff]   ;;  %v11613_v42 = vld [vmem:[%s15311_s3 + $0x240] sm:$0xff]  }
 0x1c5   : > { %10204 = vmatprep.subr.bf16.mxu1 %v12204_v3  ;;  %10516 = vmatprep.subr.bf16.mxu0 %v12204_v3 }
 0x1c7   : > { %10201 = vmatmul.mubr.bf16.vlgmr.msra.gmra.mrb[0].mxu1 %v1455_v8  ;;  %v11617_v8 = vld [vmem:[%s15311_s3 + $0x250] sm:$0xff]  }
 0x1c8   : > { %10205 = vmatpush3.bf16.msra.mxu1 %v11576_v43  ;;  %10517 = vmatpush3.bf16.msra.mxu0 %v11577_v44  ;;  %v11614_v43 = vld [vmem:[%s15311_s3 + $0x258] sm:$0xff]   ;;  %v11615_v44 = vld [vmem:[%s15311_s3 + $0x248] sm:$0xff]  }
 0x1c9   : > { %10206 = vmatprep.subr.bf16.mxu1 %v12204_v3  ;;  %10518 = vmatprep.subr.bf16.mxu0 %v12204_v3 }
 0x1ca   : > { %10220 = vmatprep.mubr.msk.bf16.mxu1 %vm12205_vm0, %v12204_v3 }
 0x1cc   : > { %10207 = vmatpush3.bf16.msra.mxu1 %v11578_v48  ;;  %10519 = vmatpush3.bf16.msra.mxu0 %v11579_v49  ;;  %v11619_v48 = vld [vmem:[%s15311_s3 + $0x258] sm:$0xff]   ;;  %v11620_v49 = vld [vmem:[%s15311_s3 + $0x270] sm:$0xff]  }
 0x1cd   : > { %10208 = vmatprep.subr.bf16.mxu1 %v12204_v3  ;;  %10524 = vmatprep.subr.bf16.mxu0 %v12204_v3 }
 0x1cf   : > { %10521 = vmatmul.mubr.bf16.vlgmr.msra.gmra.mrb[16].mxu0 %v13014_v51 }
 0x1d0   : > { %10209 = vmatpush3.bf16.msra.mxu1 %v11580_v50  ;;  %10525 = vmatpush3.bf16.msra.mxu0 %v11581_v52  ;;  %v11622_v50 = vld [vmem:[%s15311_s3 + $0x278] sm:$0xff]   ;;  %v11623_v52 = vld [vmem:[%s15311_s3 + $0x268] sm:$0xff]  }
 0x1d1   : > { %10210 = vmatprep.subr.bf16.mxu1 %v12204_v3  ;;  %10526 = vmatprep.subr.bf16.mxu0 %v12204_v3 }
 0x1d2   : > { %10540 = vmatprep.mubr.msk.bf16.mxu0 %vm12205_vm0, %v12204_v3 }
 0x1d4   : > { %10211 = vmatpush3.bf16.msra.mxu1 %v11582_v54  ;;  %10527 = vmatpush3.bf16.msra.mxu0 %v11583_v56  ;;  %v11624_v54 = vld [vmem:[%s15311_s3 + $0x280] sm:$0xff]   ;;  %v11625_v56 = vld [vmem:[%s15311_s3 + $0x270] sm:$0xff]  }
 0x1d5   : > { %10212 = vmatprep.subr.bf16.mxu1 %v12204_v3  ;;  %10528 = vmatprep.subr.bf16.mxu0 %v12204_v3 }
 0x1d8   : > { %10213 = vmatpush3.bf16.msra.mxu1 %v11584_v57  ;;  %10529 = vmatpush3.bf16.msra.mxu0 %v11585_v58  ;;  %v13236_v57 = vrot.slane %v13135_v24, 3  ;;  %v3549_v58 = vsel %vm771_vm1, %v3435_v26, %v13155_v36  ;;  %v11650_v26 = vld [vmem:[%s15311_s3 + $0x2e8] sm:$0xff]  }
 0x1d9   : > { %10214 = vmatprep.subr.bf16.mxu1 %v12204_v3  ;;  %10530 = vmatprep.subr.bf16.mxu0 %v12204_v3 }
 0x1dc   : > { %10215 = vmatpush3.bf16.msra.mxu1 %v11586_v60  ;;  %10531 = vmatpush3.bf16.msra.mxu0 %v11587_v61  ;;  %v11626_v60 = vld [vmem:[%s15311_s3 + $0x288] sm:$0xff]   ;;  %v11627_v61 = vld [vmem:[%s15311_s3 + $0x278] sm:$0xff]  }
 0x1dd   : > { %10216 = vmatprep.subr.bf16.mxu1 %v12204_v3  ;;  %10532 = vmatprep.subr.bf16.mxu0 %v12204_v3 }
 0x1e0   : > { %10217 = vmatpush3.bf16.msra.mxu1 %v11588_v62  ;;  %10533 = vmatpush3.bf16.msra.mxu0 %v11589_v63  ;;  %v3550_v62 = vsel %vm773_vm2, %v3549_v58, %v13236_v57  ;;  %v11628_v63 = vld [vmem:[%s15311_s3 + $0x290] sm:$0xff]  }
 0x1e1   : > { %10218 = vmatprep.subr.bf16.mxu1 %v12204_v3  ;;  %10534 = vmatprep.subr.bf16.mxu0 %v12204_v3 }
 0x1e4   : > { %10219 = vmatpush3.bf16.msra.mxu1 %v11590_v0  ;;  %10535 = vmatpush3.bf16.msra.mxu0 %v11591_v4  ;;  %v11629_v0 = vld [vmem:[%s15311_s3 + $0x280] sm:$0xff]   ;;  %v11630_v4 = vld [vmem:[%s15311_s3 + $0x298] sm:$0xff]  }
 0x1e5   : > { %10224 = vmatprep.subr.bf16.mxu1 %v12204_v3  ;;  %10536 = vmatprep.subr.bf16.mxu0 %v12204_v3 }
 0x1e7   : > { %10221 = vmatmul.mubr.bf16.vlgmr.msra.gmra.mrb[0].mxu1 %v1565_v10  ;;  %v11634_v10 = vld [vmem:[%s15311_s3 + $0x2a8] sm:$0xff]  }
 0x1e8   : > { %10225 = vmatpush3.bf16.msra.mxu1 %v11592_v5  ;;  %10537 = vmatpush3.bf16.msra.mxu0 %v11593_v6  ;;  %v11631_v5 = vld [vmem:[%s15311_s3 + $0x288] sm:$0xff]   ;;  %v11632_v6 = vld [vmem:[%s15311_s3 + $0x2a0] sm:$0xff]  }
 0x1e9   : > { %10226 = vmatprep.subr.bf16.mxu1 %v12204_v3  ;;  %10538 = vmatprep.subr.bf16.mxu0 %v12204_v3 }
 0x1ea   : > { %10240 = vmatprep.mubr.msk.bf16.mxu1 %vm12205_vm0, %v12204_v3 }
 0x1ec   : > { %10227 = vmatpush3.bf16.msra.mxu1 %v11594_v14  ;;  %10539 = vmatpush3.bf16.msra.mxu0 %v11595_v46  ;;  %v11636_v14 = vld [vmem:[%s15311_s3 + $0x2b0] sm:$0xff]   ;;  %v11637_v46 = vld [vmem:[%s15311_s3 + $0x2a0] sm:$0xff]  }
 0x1ed   : > { %10228 = vmatprep.subr.bf16.mxu1 %v12204_v3  ;;  %10544 = vmatprep.subr.bf16.mxu0 %v12204_v3 }
 0x1ef   : > { %10541 = vmatmul.mubr.bf16.vlgmr.msra.gmra.mrb[16].mxu0 %v13088_v15 }
 0x1f0   : > { %10229 = vmatpush3.bf16.msra.mxu1 %v11596_v16  ;;  %10545 = vmatpush3.bf16.msra.mxu0 %v11597_v17  ;;  %v11639_v16 = vld [vmem:[%s15311_s3 + $0x2a8] sm:$0xff]   ;;  %v11640_v17 = vld [vmem:[%s15311_s3 + $0x2c0] sm:$0xff]  }
 0x1f1   : > { %10230 = vmatprep.subr.bf16.mxu1 %v12204_v3  ;;  %10546 = vmatprep.subr.bf16.mxu0 %v12204_v3 }
 0x1f2   : > { %10560 = vmatprep.mubr.msk.bf16.mxu0 %vm12205_vm0, %v12204_v3 }
 0x1f4   : > { %10231 = vmatpush3.bf16.msra.mxu1 %v11598_v18  ;;  %10547 = vmatpush3.bf16.msra.mxu0 %v11599_v19  ;;  %v11641_v18 = vld [vmem:[%s15311_s3 + $0x2b0] sm:$0xff]   ;;  %v3657_v19 = vrot.slane %v13135_v24, 4 }
 0x1f5   : > { %10232 = vmatprep.subr.bf16.mxu1 %v12204_v3  ;;  %10548 = vmatprep.subr.bf16.mxu0 %v12204_v3 }
 0x1f8   : > { %10233 = vmatpush3.bf16.msra.mxu1 %v11600_v20  ;;  %10549 = vmatpush3.bf16.msra.mxu0 %v11601_v21  ;;  %v3659_v20 = vsel %vm771_vm1, %v13155_v36, %v13236_v57  ;;  %v11642_v21 = vld [vmem:[%s15311_s3 + $0x2c8] sm:$0xff]   ;;  %v11654_v36 = vld [vmem:[%s15311_s3 + $0x2f8] sm:$0xff]  }
 0x1f9   : > { %10234 = vmatprep.subr.bf16.mxu1 %v12204_v3  ;;  %10550 = vmatprep.subr.bf16.mxu0 %v12204_v3 }
 0x1fc   : > { %10235 = vmatpush3.bf16.msra.mxu1 %v11602_v59  ;;  %10551 = vmatpush3.bf16.msra.mxu0 %v11603_v11  ;;  %v11643_v59 = vld [vmem:[%s15311_s3 + $0x2b8] sm:$0xff]   ;;  %v3660_v11 = vsel %vm773_vm2, %v3659_v20, %v3657_v19  ;;  %v11685_v20 = vld [vmem:[%s15311_s3 + $0x360] sm:$0xff]  }
 0x1fd   : > { %10236 = vmatprep.subr.bf16.mxu1 %v12204_v3  ;;  %10552 = vmatprep.subr.bf16.mxu0 %v12204_v3 }
 0x200   : > { %10237 = vmatpush3.bf16.msra.mxu1 %v11604_v12  ;;  %10553 = vmatpush3.bf16.msra.mxu0 %v11605_v23  ;;  %v11645_v12 = vld [vmem:[%s15311_s3 + $0x2c0] sm:$0xff]   ;;  %v11646_v23 = vld [vmem:[%s15311_s3 + $0x2d8] sm:$0xff]  }
 0x201   : > { %10238 = vmatprep.subr.bf16.mxu1 %v12204_v3  ;;  %10554 = vmatprep.subr.bf16.mxu0 %v12204_v3 }
 0x204   : > { %10239 = vmatpush3.bf16.msra.mxu1 %v11606_v41  ;;  %10555 = vmatpush3.bf16.msra.mxu0 %v11607_v55  ;;  %v11647_v41 = vld [vmem:[%s15311_s3 + $0x2c8] sm:$0xff]   ;;  %v11648_v55 = vld [vmem:[%s15311_s3 + $0x2e0] sm:$0xff]  }
 0x205   : > { %10244 = vmatprep.subr.bf16.mxu1 %v12204_v3  ;;  %10556 = vmatprep.subr.bf16.mxu0 %v12204_v3 }
 0x207   : > { %10241 = vmatmul.mubr.bf16.vlgmr.msra.gmra.mrb[0].mxu1 %v12513_v28  ;;  %v13176_v28 = vpack.c.bf16 %v3440_v39, %v3440_v39  ;;  %v3767_v39 = vrot.slane %v13135_v24, 5 }
 0x208   : > { %10245 = vmatpush3.bf16.msra.mxu1 %v11608_v7  ;;  %10557 = vmatpush3.bf16.msra.mxu0 %v11609_v35  ;;  %v11652_v7 = vld [vmem:[%s15311_s3 + $0x2f0] sm:$0xff]   ;;  %v11653_v35 = vld [vmem:[%s15311_s3 + $0x2e0] sm:$0xff]  }
 0x209   : > { %10246 = vmatprep.subr.bf16.mxu1 %v12204_v3  ;;  %10558 = vmatprep.subr.bf16.mxu0 %v12204_v3 }
 0x20a   : > { %10260 = vmatprep.mubr.msk.bf16.mxu1 %vm12205_vm0, %v12204_v3 }
 0x20c   : > { %10247 = vmatpush3.bf16.msra.mxu1 %v11610_v37  ;;  %10559 = vmatpush3.bf16.msra.mxu0 %v11611_v38  ;;  %v11656_v37 = vld [vmem:[%s15311_s3 + $0x300] sm:$0xff]   ;;  %v11657_v38 = vld [vmem:[%s15311_s3 + $0x2f0] sm:$0xff]  }
 0x20d   : > { %10248 = vmatprep.subr.bf16.mxu1 %v12204_v3  ;;  %10564 = vmatprep.subr.bf16.mxu0 %v12204_v3 }
 0x20f   : > { %10561 = vmatmul.mubr.bf16.vlgmr.msra.gmra.mrb[16].mxu0 %v13176_v28 }
 0x210   : > { %10249 = vmatpush3.bf16.msra.mxu1 %v11612_v40  ;;  %10565 = vmatpush3.bf16.msra.mxu0 %v11613_v42  ;;  %v3769_v40 = vsel %vm771_vm1, %v13236_v57, %v3657_v19  ;;  %v11658_v42 = vld [vmem:[%s15311_s3 + $0x308] sm:$0xff]   ;;  %v11669_v57 = vld [vmem:[%s15311_s3 + $0x320] sm:$0xff]   ;;  %v11684_v19 = vld [vmem:[%s15311_s3 + $0x370] sm:$0xff]  }
 0x211   : > { %10250 = vmatprep.subr.bf16.mxu1 %v12204_v3  ;;  %10566 = vmatprep.subr.bf16.mxu0 %v12204_v3  ;;  %v3770_v24 = vsel %vm773_vm2, %v3769_v40, %v3767_v39  ;;  %v11700_v39 = vld [vmem:[%s15311_s3 + $0x3b0] sm:$0xff]   ;;  %v11701_v40 = vld [vmem:[%s15311_s3 + $0x3a0] sm:$0xff]  }
 0x212   : > { %10580 = vmatprep.mubr.msk.bf16.mxu0 %vm12205_vm0, %v12204_v3 }
 0x214   : > { %10251 = vmatpush3.bf16.msra.mxu1 %v11614_v43  ;;  %10567 = vmatpush3.bf16.msra.mxu0 %v11615_v44  ;;  %v11659_v43 = vld [vmem:[%s15311_s3 + $0x2f8] sm:$0xff]   ;;  %v11660_v44 = vld [vmem:[%s15311_s3 + $0x310] sm:$0xff]  }
 0x215   : > { %10252 = vmatprep.subr.bf16.mxu1 %v12204_v3  ;;  %10568 = vmatprep.subr.bf16.mxu0 %v12204_v3 }
 0x218   : > { %10253 = vmatpush3.bf16.msra.mxu1 %v11616_v45  ;;  %10569 = vmatpush3.bf16.msra.mxu0 %v11617_v8  ;;  %v11661_v45 = vld [vmem:[%s15311_s3 + $0x300] sm:$0xff]   ;;  %v11662_v8 = vld [vmem:[%s15311_s3 + $0x318] sm:$0xff]  }
 0x219   : > { %10254 = vmatprep.subr.bf16.mxu1 %v12204_v3  ;;  %10570 = vmatprep.subr.bf16.mxu0 %v12204_v3 }
 0x21c   : > { %10255 = vmatpush3.bf16.msra.mxu1 %v11618_v47  ;;  %10571 = vmatpush3.bf16.msra.mxu0 %v11619_v48  ;;  %v11663_v47 = vld [vmem:[%s15311_s3 + $0x308] sm:$0xff]   ;;  %v11664_v48 = vld [vmem:[%s15311_s3 + $0x320] sm:$0xff]  }
 0x21d   : > { %10256 = vmatprep.subr.bf16.mxu1 %v12204_v3  ;;  %10572 = vmatprep.subr.bf16.mxu0 %v12204_v3 }
 0x220   : > { %10257 = vmatpush3.bf16.msra.mxu1 %v11620_v49  ;;  %10573 = vmatpush3.bf16.msra.mxu0 %v11621_v32  ;;  %v11665_v49 = vld [vmem:[%s15311_s3 + $0x310] sm:$0xff]   ;;  %v11666_v32 = vld [vmem:[%s15311_s3 + $0x328] sm:$0xff]  }
 0x221   : > { %10258 = vmatprep.subr.bf16.mxu1 %v12204_v3  ;;  %10574 = vmatprep.subr.bf16.mxu0 %v12204_v3 }
 0x224   : > { %10259 = vmatpush3.bf16.msra.mxu1 %v11622_v50  ;;  %10575 = vmatpush3.bf16.msra.mxu0 %v11623_v52  ;;  %v11667_v50 = vld [vmem:[%s15311_s3 + $0x318] sm:$0xff]   ;;  %v13450_v52 = vld [vmem:[%s15310_s2] ss:$0 sm:$0xff] }
 0x225   : > { %10264 = vmatprep.subr.bf16.mxu1 %v12204_v3  ;;  %10576 = vmatprep.subr.bf16.mxu0 %v12204_v3 }
 0x227   : > { %10261 = vmatmul.mubr.bf16.vlgmr.msra.gmra.mrb[0].mxu1 %v12601_v53  ;;  %v13257_v53 = vpack.c.bf16 %v3550_v62, %v3550_v62  ;;  %v11672_v62 = vld [vmem:[%s15311_s3 + $0x340] sm:$0xff]  }
 0x228   : > { %10265 = vmatpush3.bf16.msra.mxu1 %v11624_v54  ;;  %10577 = vmatpush3.bf16.msra.mxu0 %v11625_v56  ;;  %v731_v54 = vadd.f32 %v13450_v52, %v13146_v31  ;;  %v11668_v56 = vld [vmem:[%s15311_s3 + $0x330] sm:$0xff]   ;;  %v11670_v31 = vld [vmem:[%s15311_s3 + $0x338] sm:$0xff]  }
 0x229   : > { %10266 = vmatprep.subr.bf16.mxu1 %v12204_v3  ;;  %10578 = vmatprep.subr.bf16.mxu0 %v12204_v3 }
 0x22a   : > { %10280 = vmatprep.mubr.msk.bf16.mxu1 %vm12205_vm0, %v12204_v3  ;;  %v13462_v58 = vmax.f32 %v731_v54, 0.0  ;;  %v11710_v54 = vld [vmem:[%s15311_s3 + $0x3d8] sm:$0xff]  }
 0x22c   : > { %10267 = vmatpush3.bf16.msra.mxu1 %v11626_v60  ;;  %10579 = vmatpush3.bf16.msra.mxu0 %v11627_v61  ;;  %v11671_v60 = vld [vmem:[%s15311_s3 + $0x328] sm:$0xff]   ;;  %v3879_v61 = vrot.slane %v13462_v58, 1 }
 0x22d   : > { %10268 = vmatprep.subr.bf16.mxu1 %v12204_v3  ;;  %10584 = vmatprep.subr.bf16.mxu0 %v12204_v3 }
 0x22f   : > { %10581 = vmatmul.mubr.bf16.vlgmr.msra.gmra.mrb[16].mxu0 %v13257_v53 }
 0x230   : > { %10269 = vmatpush3.bf16.msra.mxu1 %v11628_v63  ;;  %10585 = vmatpush3.bf16.msra.mxu0 %v11629_v0  ;;  %v11673_v63 = vld [vmem:[%s15311_s3 + $0x330] sm:$0xff]   ;;  %v13480_v0 = vrot.slane %v13462_v58, 2 }
 0x231   : > { %10270 = vmatprep.subr.bf16.mxu1 %v12204_v3  ;;  %10586 = vmatprep.subr.bf16.mxu0 %v12204_v3 }
 0x232   : > { %10600 = vmatprep.mubr.msk.bf16.mxu0 %vm12205_vm0, %v12204_v3 }
 0x234   : > { %10271 = vmatpush3.bf16.msra.mxu1 %v11630_v4  ;;  %10587 = vmatpush3.bf16.msra.mxu0 %v11631_v5  ;;  %v3883_v4 = vsel %vm771_vm1, %v13462_v58, %v3879_v61  ;;  %v11674_v5 = vld [vmem:[%s15311_s3 + $0x348] sm:$0xff]  }
 0x235   : > { %10272 = vmatprep.subr.bf16.mxu1 %v12204_v3  ;;  %10588 = vmatprep.subr.bf16.mxu0 %v12204_v3 }
 0x238   : > { %10273 = vmatpush3.bf16.msra.mxu1 %v11632_v6  ;;  %10589 = vmatpush3.bf16.msra.mxu0 %v11633_v9  ;;  %v11675_v6 = vld [vmem:[%s15311_s3 + $0x338] sm:$0xff]   ;;  %v3884_v9 = vsel %vm773_vm2, %v3883_v4, %v13480_v0  ;;  %v11719_v4 = vld [vmem:[%s15311_s3 + $0x3e8] sm:$0xff]  }
 0x239   : > { %10274 = vmatprep.subr.bf16.mxu1 %v12204_v3  ;;  %10590 = vmatprep.subr.bf16.mxu0 %v12204_v3 }
 0x23c   : > { %10275 = vmatpush3.bf16.msra.mxu1 %v11634_v10  ;;  %10591 = vmatpush3.bf16.msra.mxu0 %v11635_v1  ;;  %v11676_v10 = vld [vmem:[%s15311_s3 + $0x350] sm:$0xff]   ;;  %v11677_v1 = vld [vmem:[%s15311_s3 + $0x340] sm:$0xff]  }
 0x23d   : > { %10276 = vmatprep.subr.bf16.mxu1 %v12204_v3  ;;  %10592 = vmatprep.subr.bf16.mxu0 %v12204_v3 }
 0x240   : > { %10277 = vmatpush3.bf16.msra.mxu1 %v11636_v14  ;;  %10593 = vmatpush3.bf16.msra.mxu0 %v11637_v46  ;;  %v11678_v14 = vld [vmem:[%s15311_s3 + $0x358] sm:$0xff]   ;;  %v11679_v46 = vld [vmem:[%s15311_s3 + $0x348] sm:$0xff]  }
 0x241   : > { %10278 = vmatprep.subr.bf16.mxu1 %v12204_v3  ;;  %10594 = vmatprep.subr.bf16.mxu0 %v12204_v3 }
 0x244   : > { %10279 = vmatpush3.bf16.msra.mxu1 %v11638_v33  ;;  %10595 = vmatpush3.bf16.msra.mxu0 %v11639_v16  ;;  %v11680_v33 = vld [vmem:[%s15311_s3 + $0x360] sm:$0xff]   ;;  %v11681_v16 = vld [vmem:[%s15311_s3 + $0x350] sm:$0xff]  }
 0x245   : > { %10284 = vmatprep.subr.bf16.mxu1 %v12204_v3  ;;  %10596 = vmatprep.subr.bf16.mxu0 %v12204_v3 }
 0x247   : > { %10281 = vmatmul.mubr.bf16.vlgmr.msra.gmra.mrb[0].mxu1 %v12676_v13  ;;  %v13334_v13 = vpack.c.bf16 %v3660_v11, %v3660_v11  ;;  %v11688_v11 = vld [vmem:[%s15311_s3 + $0x380] sm:$0xff]  }
 0x248   : > { %10285 = vmatpush3.bf16.msra.mxu1 %v11640_v17  ;;  %10597 = vmatpush3.bf16.msra.mxu0 %v11641_v18  ;;  %v11682_v17 = vld [vmem:[%s15311_s3 + $0x368] sm:$0xff]   ;;  %v11683_v18 = vld [vmem:[%s15311_s3 + $0x358] sm:$0xff]  }
 0x249   : > { %10286 = vmatprep.subr.bf16.mxu1 %v12204_v3  ;;  %10598 = vmatprep.subr.bf16.mxu0 %v12204_v3 }
 0x24a   : > { %10300 = vmatprep.mubr.msk.bf16.mxu1 %vm12205_vm0, %v12204_v3 }
 0x24c   : > { %10287 = vmatpush3.bf16.msra.mxu1 %v11642_v21  ;;  %10599 = vmatpush3.bf16.msra.mxu0 %v11643_v59  ;;  %v11686_v21 = vld [vmem:[%s15311_s3 + $0x378] sm:$0xff]   ;;  %v11687_v59 = vld [vmem:[%s15311_s3 + $0x368] sm:$0xff]  }
 0x24d   : > { %10288 = vmatprep.subr.bf16.mxu1 %v12204_v3  ;;  %10604 = vmatprep.subr.bf16.mxu0 %v12204_v3 }
 0x24f   : > { %10601 = vmatmul.mubr.bf16.vlgmr.msra.gmra.mrb[16].mxu0 %v13334_v13 }
 0x250   : > { %10289 = vmatpush3.bf16.msra.mxu1 %v11644_v22  ;;  %10605 = vmatpush3.bf16.msra.mxu0 %v11645_v12  ;;  %v11689_v22 = vld [vmem:[%s15311_s3 + $0x370] sm:$0xff]   ;;  %v13561_v12 = vrot.slane %v13462_v58, 3 }
 0x251   : > { %10290 = vmatprep.subr.bf16.mxu1 %v12204_v3  ;;  %10606 = vmatprep.subr.bf16.mxu0 %v12204_v3 }
 0x252   : > { %10620 = vmatprep.mubr.msk.bf16.mxu0 %vm12205_vm0, %v12204_v3 }
 0x254   : > { %10291 = vmatpush3.bf16.msra.mxu1 %v11646_v23  ;;  %10607 = vmatpush3.bf16.msra.mxu0 %v11647_v41  ;;  %v3993_v23 = vsel %vm771_vm1, %v3879_v61, %v13480_v0  ;;  %v11690_v41 = vld [vmem:[%s15311_s3 + $0x388] sm:$0xff]   ;;  %v11715_v61 = vld [vmem:[%s15311_s3 + $0x3d8] sm:$0xff]  }
 0x255   : > { %10292 = vmatprep.subr.bf16.mxu1 %v12204_v3  ;;  %10608 = vmatprep.subr.bf16.mxu0 %v12204_v3 }
 0x258   : > { %10293 = vmatpush3.bf16.msra.mxu1 %v11648_v55  ;;  %10609 = vmatpush3.bf16.msra.mxu0 %v11649_v25  ;;  %v11691_v55 = vld [vmem:[%s15311_s3 + $0x378] sm:$0xff]   ;;  %v3994_v25 = vsel %vm773_vm2, %v3993_v23, %v13561_v12  ;;  %v11728_v23 = vld [vmem:[%s15311_s3 + $0x30] sm:$0xff]  }
 0x259   : > { %10294 = vmatprep.subr.bf16.mxu1 %v12204_v3  ;;  %10610 = vmatprep.subr.bf16.mxu0 %v12204_v3 }
 0x25c   : > { %10295 = vmatpush3.bf16.msra.mxu1 %v11650_v26  ;;  %10611 = vmatpush3.bf16.msra.mxu0 %v11651_v30  ;;  %v11692_v26 = vld [vmem:[%s15311_s3 + $0x390] sm:$0xff]   ;;  %v11693_v30 = vld [vmem:[%s15311_s3 + $0x380] sm:$0xff]  }
 0x25d   : > { %10296 = vmatprep.subr.bf16.mxu1 %v12204_v3  ;;  %10612 = vmatprep.subr.bf16.mxu0 %v12204_v3 }
 0x260   : > { %10297 = vmatpush3.bf16.msra.mxu1 %v11652_v7  ;;  %10613 = vmatpush3.bf16.msra.mxu0 %v11653_v35  ;;  %v11694_v7 = vld [vmem:[%s15311_s3 + $0x398] sm:$0xff]   ;;  %v11695_v35 = vld [vmem:[%s15311_s3 + $0x388] sm:$0xff]  }
 0x261   : > { %10298 = vmatprep.subr.bf16.mxu1 %v12204_v3  ;;  %10614 = vmatprep.subr.bf16.mxu0 %v12204_v3 }
 0x264   : > { %10299 = vmatpush3.bf16.msra.mxu1 %v11654_v36  ;;  %10615 = vmatpush3.bf16.msra.mxu0 %v11655_v27  ;;  %v11696_v36 = vld [vmem:[%s15311_s3 + $0x3a0] sm:$0xff]   ;;  %v11697_v27 = vld [vmem:[%s15311_s3 + $0x390] sm:$0xff]  }
 0x265   : > { %10304 = vmatprep.subr.bf16.mxu1 %v12204_v3  ;;  %10616 = vmatprep.subr.bf16.mxu0 %v12204_v3 }
 0x267   : > { %10301 = vmatmul.mubr.bf16.vlgmr.msra.gmra.mrb[0].mxu1 %v12751_v34  ;;  %v13410_v34 = vpack.c.bf16 %v3770_v24, %v3770_v24  ;;  %v11704_v24 = vld [vmem:[%s15311_s3 + $0x3c0] sm:$0xff]  }
 0x268   : > { %10305 = vmatpush3.bf16.msra.mxu1 %v11656_v37  ;;  %10617 = vmatpush3.bf16.msra.mxu0 %v11657_v38  ;;  %v11698_v37 = vld [vmem:[%s15311_s3 + $0x3a8] sm:$0xff]   ;;  %v11699_v38 = vld [vmem:[%s15311_s3 + $0x398] sm:$0xff]  }
 0x269   : > { %10306 = vmatprep.subr.bf16.mxu1 %v12204_v3  ;;  %10618 = vmatprep.subr.bf16.mxu0 %v12204_v3 }
 0x26a   : > { %10320 = vmatprep.mubr.msk.bf16.mxu1 %vm12205_vm0, %v12204_v3 }
 0x26c   : > { %10307 = vmatpush3.bf16.msra.mxu1 %v11658_v42  ;;  %10619 = vmatpush3.bf16.msra.mxu0 %v11659_v43  ;;  %v11702_v42 = vld [vmem:[%s15311_s3 + $0x3b8] sm:$0xff]   ;;  %v11703_v43 = vld [vmem:[%s15311_s3 + $0x3a8] sm:$0xff]  }
 0x26d   : > { %10308 = vmatprep.subr.bf16.mxu1 %v12204_v3  ;;  %10624 = vmatprep.subr.bf16.mxu0 %v12204_v3 }
 0x26f   : > { %10621 = vmatmul.mubr.bf16.vlgmr.msra.gmra.mrb[16].mxu0 %v13410_v34 }
 0x270   : > { %10309 = vmatpush3.bf16.msra.mxu1 %v11660_v44  ;;  %10625 = vmatpush3.bf16.msra.mxu0 %v11661_v45  ;;  %v11705_v44 = vld [vmem:[%s15311_s3 + $0x3b0] sm:$0xff]   ;;  %v4101_v45 = vrot.slane %v13462_v58, 4 }
 0x271   : > { %10310 = vmatprep.subr.bf16.mxu1 %v12204_v3  ;;  %10626 = vmatprep.subr.bf16.mxu0 %v12204_v3 }
 0x272   : > { %10640 = vmatprep.mubr.msk.bf16.mxu0 %vm12205_vm0, %v12204_v3 }
 0x274   : > { %10311 = vmatpush3.bf16.msra.mxu1 %v11662_v8  ;;  %10627 = vmatpush3.bf16.msra.mxu0 %v11663_v47  ;;  %v4103_v8 = vsel %vm771_vm1, %v13480_v0, %v13561_v12  ;;  %v11706_v47 = vld [vmem:[%s15311_s3 + $0x3c8] sm:$0xff]   ;;  %v11718_v0 = vld [vmem:[%s15311_s3 + $0x3f8] sm:$0xff]  }
 0x275   : > { %10312 = vmatprep.subr.bf16.mxu1 %v12204_v3  ;;  %10628 = vmatprep.subr.bf16.mxu0 %v12204_v3 }
 0x278   : > { %10313 = vmatpush3.bf16.msra.mxu1 %v11664_v48  ;;  %10629 = vmatpush3.bf16.msra.mxu0 %v11665_v49  ;;  %v11707_v48 = vld [vmem:[%s15311_s3 + $0x3b8] sm:$0xff]   ;;  %v4104_v49 = vsel %vm773_vm2, %v4103_v8, %v4101_v45 }
 0x279   : > { %10314 = vmatprep.subr.bf16.mxu1 %v12204_v3  ;;  %10630 = vmatprep.subr.bf16.mxu0 %v12204_v3 }
 0x27c   : > { %10315 = vmatpush3.bf16.msra.mxu1 %v11666_v32  ;;  %10631 = vmatpush3.bf16.msra.mxu0 %v11667_v50  ;;  %v11708_v32 = vld [vmem:[%s15311_s3 + $0x3d0] sm:$0xff]   ;;  %v11709_v50 = vld [vmem:[%s15311_s3 + $0x3c0] sm:$0xff]  }
 0x27d   : > { %10316 = vmatprep.subr.bf16.mxu1 %v12204_v3  ;;  %10632 = vmatprep.subr.bf16.mxu0 %v12204_v3 }
 0x280   : > { %10317 = vmatpush3.bf16.msra.mxu1 %v11668_v56  ;;  %10633 = vmatpush3.bf16.msra.mxu0 %v11669_v57  ;;  %v11711_v56 = vld [vmem:[%s15311_s3 + $0x3c8] sm:$0xff]   ;;  %v11712_v57 = vld [vmem:[%s15311_s3 + $0x3e0] sm:$0xff]  }
 0x281   : > { %10318 = vmatprep.subr.bf16.mxu1 %v12204_v3  ;;  %10634 = vmatprep.subr.bf16.mxu0 %v12204_v3 }
 0x284   : > { %10319 = vmatpush3.bf16.msra.mxu1 %v11670_v31  ;;  %10635 = vmatpush3.bf16.msra.mxu0 %v11671_v60  ;;  %v11713_v31 = vld [vmem:[%s15311_s3 + $0x3d0] sm:$0xff]   ;;  %v11714_v60 = vld [vmem:[%s15311_s3 + $0x3e8] sm:$0xff]  }
 0x285   : > { %10324 = vmatprep.subr.bf16.mxu1 %v12204_v3  ;;  %10636 = vmatprep.subr.bf16.mxu0 %v12204_v3 }
 0x287   : > { %10321 = vmatmul.mubr.bf16.vlgmr.msra.gmra.mrb[0].mxu1 %v12850_v2  ;;  %v13501_v2 = vpack.c.bf16 %v3884_v9, %v3884_v9  ;;  %v4211_v9 = vrot.slane %v13462_v58, 5 }
 0x288   : > { %10325 = vmatpush3.bf16.msra.mxu1 %v11672_v62  ;;  %10637 = vmatpush3.bf16.msra.mxu0 %v11673_v63  ;;  %v11716_v62 = vld [vmem:[%s15311_s3 + $0x3f0] sm:$0xff]   ;;  %v11717_v63 = vld [vmem:[%s15311_s3 + $0x3e0] sm:$0xff]  }
 0x289   : > { %10326 = vmatprep.subr.bf16.mxu1 %v12204_v3  ;;  %10638 = vmatprep.subr.bf16.mxu0 %v12204_v3 }
 0x28a   : > { %10340 = vmatprep.mubr.msk.bf16.mxu1 %vm12205_vm0, %v12204_v3 }
 0x28c   : > { %10327 = vmatpush3.bf16.msra.mxu1 %v11674_v5  ;;  %10639 = vmatpush3.bf16.msra.mxu0 %v11675_v6  ;;  %v11720_v5 = vld [vmem:[%s15311_s3 + $0x3f0] sm:$0xff]   ;;  %v11721_v6 = vld [vmem:[%s15311_s3] sm:$0xff]  }
 0x28d   : > { %10328 = vmatprep.subr.bf16.mxu1 %v12204_v3  ;;  %10644 = vmatprep.subr.bf16.mxu0 %v12204_v3 }
 0x28f   : > { %10641 = vmatmul.mubr.bf16.vlgmr.msra.gmra.mrb[16].mxu0 %v13501_v2 }
 0x290   : > { %10329 = vmatpush3.bf16.msra.mxu1 %v11676_v10  ;;  %10645 = vmatpush3.bf16.msra.mxu0 %v11677_v1  ;;  %v4213_v10 = vsel %vm771_vm1, %v13561_v12, %v4101_v45  ;;  %v11722_v1 = vld [vmem:[%s15311_s3 + $0x3f8] sm:$0xff]  }
 0x291   : > { %10330 = vmatprep.subr.bf16.mxu1 %v12204_v3  ;;  %10646 = vmatprep.subr.bf16.mxu0 %v12204_v3  ;;  %v4214_v58 = vsel %vm773_vm2, %v4213_v10, %v4211_v9  ;;  %v11781_v9 = vld [vmem:[%s15313_s5 + $0x28] sm:$0xff]   ;;  %v11745_v10 = vld [vmem:[%s15311_s3 + $0xb8] sm:$0xff]  }
 0x292   : > { %10660 = vmatprep.mubr.msk.bf16.mxu0 %vm12205_vm0, %v12204_v3 }
 0x294   : > { %10331 = vmatpush3.bf16.msra.mxu1 %v11678_v14  ;;  %10647 = vmatpush3.bf16.msra.mxu0 %v11679_v46  ;;  %v11723_v14 = vld [vmem:[%s15311_s3 + $0x8] sm:$0xff]   ;;  %v11724_v46 = vld [vmem:[%s15311_s3 + $0x10] sm:$0xff]  }
 0x295   : > { %10332 = vmatprep.subr.bf16.mxu1 %v12204_v3  ;;  %10648 = vmatprep.subr.bf16.mxu0 %v12204_v3 }
 0x298   : > { %10333 = vmatpush3.bf16.msra.mxu1 %v11680_v33  ;;  %10649 = vmatpush3.bf16.msra.mxu0 %v11681_v16  ;;  %v9501_v33 = vpop.f32.mrb[12].mxu0 }
 0x299   : > { %10334 = vmatprep.subr.bf16.mxu1 %v12204_v3  ;;  %10650 = vmatprep.subr.bf16.mxu0 %v12204_v3  ;;  %v9502_v16 = vpop.f32.mrb[13].mxu0 }
 0x29c   : > { %10335 = vmatpush3.bf16.msra.mxu1 %v11682_v17  ;;  %10651 = vmatpush3.bf16.msra.mxu0 %v11683_v18  ;;  %v9503_v17 = vadd.f32 %v9502_v16, %v9501_v33  ;;  %v9504_v18 = vpop.f32.mrb[14].mxu0  ;;  %v11749_v33 = vld [vmem:[%s15311_s3 + $0xd8] sm:$0xff]   ;;  %v11750_v16 = vld [vmem:[%s15311_s3 + $0xe0] sm:$0xff]  }
 0x29d   : > { %10336 = vmatprep.subr.bf16.mxu1 %v12204_v3  ;;  %10652 = vmatprep.subr.bf16.mxu0 %v12204_v3 }
 0x2a0   : > { %10337 = vmatpush3.bf16.msra.mxu1 %v11684_v19  ;;  %10653 = vmatpush3.bf16.msra.mxu0 %v11685_v20  ;;  %v11725_v19 = vld [vmem:[%s15311_s3 + $0x18] sm:$0xff]   ;;  %v9505_v20 = vpop.f32.mrb[15].mxu0 }
 0x2a1   : > { %10338 = vmatprep.subr.bf16.mxu1 %v12204_v3  ;;  %10654 = vmatprep.subr.bf16.mxu0 %v12204_v3 }
 0x2a4   : > { %10339 = vmatpush3.bf16.msra.mxu1 %v11686_v21  ;;  %10655 = vmatpush3.bf16.msra.mxu0 %v11687_v59  ;;  %v9506_v21 = vadd.f32 %v9505_v20, %v9504_v18  ;;  %v11726_v59 = vld [vmem:[%s15311_s3 + $0x20] sm:$0xff]   ;;  %v11752_v18 = vld [vmem:[%s15311_s3 + $0xf0] sm:$0xff]  }
 0x2a5   : > { %10344 = vmatprep.subr.bf16.mxu1 %v12204_v3  ;;  %10656 = vmatprep.subr.bf16.mxu0 %v12204_v3  ;;  %v11754_v20 = vld [vmem:[%s15311_s3 + $0x100] sm:$0xff]  }
 0x2a6   : > { %v739_v12 = vadd.f32 %v13450_v52, %v9506_v21  ;;  %v11755_v21 = vld [vmem:[%s15311_s3 + $0x108] sm:$0xff]  }
 0x2a7   : > { %10341 = vmatmul.mubr.bf16.vlgmr.msra.gmra.mrb[0].mxu1 %v12936_v29  ;;  %v13582_v29 = vpack.c.bf16 %v3994_v25, %v3994_v25  ;;  %v11729_v25 = vld [vmem:[%s15311_s3 + $0x38] sm:$0xff]  }
 0x2a8   : > { %10345 = vmatpush3.bf16.msra.mxu1 %v11688_v11  ;;  %10657 = vmatpush3.bf16.msra.mxu0 %v11689_v22  ;;  %v11727_v11 = vld [vmem:[%s15311_s3 + $0x28] sm:$0xff]   ;;  %v736_v22 = vadd.f32 %v13450_v52, %v9503_v17 }
 0x2a9   : > { %10346 = vmatprep.subr.bf16.mxu1 %v12204_v3  ;;  %10658 = vmatprep.subr.bf16.mxu0 %v12204_v3  ;;  %v11751_v17 = vld [vmem:[%s15311_s3 + $0xe8] sm:$0xff]  }
 0x2aa   : > { %10360 = vmatprep.mubr.msk.bf16.mxu1 %vm12205_vm0, %v12204_v3 }
 0x2ac   : > { %10347 = vmatpush3.bf16.msra.mxu1 %v11690_v41  ;;  %10659 = vmatpush3.bf16.msra.mxu0 %v11691_v55  ;;  %v13763_v41 = vmax.f32 %v736_v22, 0.0  ;;  %v13765_v55 = vmax.f32 %v739_v12, 0.0  ;;  %v11759_v22 = vld [vmem:[%s15311_s3 + $0x128] sm:$0xff]   ;;  %v11760_v12 = vld [vmem:[%s15311_s3 + $0x130] sm:$0xff]  }
 0x2ad   : > { %10348 = vmatprep.subr.bf16.mxu1 %v12204_v3  ;;  %10664 = vmatprep.subr.bf16.mxu0 %v12204_v3 }
 0x2ae   : > { %v13772_v52 = vrot.slane %v13763_v41, 2 }
 0x2af   : > { %10661 = vmatmul.mubr.bf16.vlgmr.msra.gmra.mrb[16].mxu0 %v13582_v29 }
 0x2b0   : > { %10349 = vmatpush3.bf16.msra.mxu1 %v11692_v26  ;;  %10665 = vmatpush3.bf16.msra.mxu0 %v11693_v30  ;;  %v13775_v26 = vrot.slane %v13763_v41, 3  ;;  %v5435_v30 = vrot.slane %v13763_v41, 4 }
 0x2b1   : > { %10350 = vmatprep.subr.bf16.mxu1 %v12204_v3  ;;  %10666 = vmatprep.subr.bf16.mxu0 %v12204_v3 }
 0x2b2   : > { %10680 = vmatprep.mubr.msk.bf16.mxu0 %vm12205_vm0, %v12204_v3 }
 0x2b4   : > { %10351 = vmatpush3.bf16.msra.mxu1 %v11694_v7  ;;  %10667 = vmatpush3.bf16.msra.mxu0 %v11695_v35  ;;  %v5545_v7 = vrot.slane %v13763_v41, 5  ;;  %v13780_v35 = vrot.slane %v13765_v55, 2 }
 0x2b5   : > { %10352 = vmatprep.subr.bf16.mxu1 %v12204_v3  ;;  %10668 = vmatprep.subr.bf16.mxu0 %v12204_v3 }
 0x2b8   : > { %10353 = vmatpush3.bf16.msra.mxu1 %v11696_v36  ;;  %10669 = vmatpush3.bf16.msra.mxu0 %v11697_v27  ;;  %v13783_v36 = vrot.slane %v13765_v55, 3  ;;  %v5437_v27 = vsel %vm771_vm1, %v13772_v52, %v13775_v26 }
 0x2b9   : > { %10354 = vmatprep.subr.bf16.mxu1 %v12204_v3  ;;  %10670 = vmatprep.subr.bf16.mxu0 %v12204_v3 }
 0x2bc   : > { %10355 = vmatpush3.bf16.msra.mxu1 %v11698_v37  ;;  %10671 = vmatpush3.bf16.msra.mxu0 %v11699_v38  ;;  %v5547_v37 = vsel %vm771_vm1, %v13775_v26, %v5435_v30  ;;  %v11730_v38 = vld [vmem:[%s15311_s3 + $0x40] sm:$0xff]  }
 0x2bd   : > { %10356 = vmatprep.subr.bf16.mxu1 %v12204_v3  ;;  %10672 = vmatprep.subr.bf16.mxu0 %v12204_v3 }
 0x2c0   : > { %10357 = vmatpush3.bf16.msra.mxu1 %v11700_v39  ;;  %10673 = vmatpush3.bf16.msra.mxu0 %v11701_v40  ;;  %v13794_v39 = vsel %vm773_vm2, %v5437_v27, %v5435_v30  ;;  %v13797_v40 = vsel %vm773_vm2, %v5547_v37, %v5545_v7  ;;  %v11763_v30 = vld [vmem:[%s15311_s3 + $0x148] sm:$0xff]   ;;  %v11764_v7 = vld [vmem:[%s15311_s3 + $0x150] sm:$0xff]   ;;  %v11766_v27 = vld [vmem:[%s15311_s3 + $0x160] sm:$0xff]  }
 0x2c1   : > { %10358 = vmatprep.subr.bf16.mxu1 %v12204_v3  ;;  %10674 = vmatprep.subr.bf16.mxu0 %v12204_v3  ;;  %v11767_v37 = vld [vmem:[%s15311_s3 + $0x168] sm:$0xff]  }
 0x2c4   : > { %10359 = vmatpush3.bf16.msra.mxu1 %v11702_v42  ;;  %10675 = vmatpush3.bf16.msra.mxu0 %v11703_v43  ;;  %v5879_v42 = vrot.slane %v13765_v55, 4  ;;  %v5881_v43 = vsel %vm771_vm1, %v13780_v35, %v13783_v36 }
 0x2c5   : > { %10364 = vmatprep.subr.bf16.mxu1 %v12204_v3  ;;  %10676 = vmatprep.subr.bf16.mxu0 %v12204_v3 }
 0x2c6   : > { %v13812_v45 = vsel %vm773_vm2, %v5881_v43, %v5879_v42  ;;  %v5991_v8 = vsel %vm771_vm1, %v13783_v36, %v5879_v42  ;;  %v11769_v42 = vld [vmem:[%s15311_s3 + $0x178] sm:$0xff]   ;;  %v11770_v43 = vld [vmem:[%s15311_s3 + $0x180] sm:$0xff]  }
 0x2c7   : > { %10361 = vmatmul.mubr.bf16.vlgmr.msra.gmra.mrb[0].mxu1 %v13014_v51  ;;  %v13659_v51 = vpack.c.bf16 %v4104_v49, %v4104_v49  ;;  %v11734_v49 = vld [vmem:[%s15311_s3 + $0x60] sm:$0xff]  }
 0x2c8   : > { %10365 = vmatpush3.bf16.msra.mxu1 %v11704_v24  ;;  %10677 = vmatpush3.bf16.msra.mxu0 %v11705_v44  ;;  %v5989_v24 = vrot.slane %v13765_v55, 5  ;;  %v11731_v44 = vld [vmem:[%s15311_s3 + $0x48] sm:$0xff]  }
 0x2c9   : > { %10366 = vmatprep.subr.bf16.mxu1 %v12204_v3  ;;  %10678 = vmatprep.subr.bf16.mxu0 %v12204_v3 }
 0x2ca   : > { %10380 = vmatprep.mubr.msk.bf16.mxu1 %vm12205_vm0, %v12204_v3 }
 0x2cc   : > { %10367 = vmatpush3.bf16.msra.mxu1 %v11706_v47  ;;  %10679 = vmatpush3.bf16.msra.mxu0 %v11707_v48  ;;  %v11732_v47 = vld [vmem:[%s15311_s3 + $0x50] sm:$0xff]   ;;  %v11733_v48 = vld [vmem:[%s15311_s3 + $0x58] sm:$0xff]  }
 0x2cd   : > { %10368 = vmatprep.subr.bf16.mxu1 %v12204_v3  ;;  %10684 = vmatprep.subr.bf16.mxu0 %v12204_v3 }
 0x2cf   : > { %10681 = vmatmul.mubr.bf16.vlgmr.msra.gmra.mrb[16].mxu0 %v13659_v51 }
 0x2d0   : > { %10369 = vmatpush3.bf16.msra.mxu1 %v11708_v32  ;;  %10685 = vmatpush3.bf16.msra.mxu0 %v11709_v50  ;;  %v11735_v32 = vld [vmem:[%s15311_s3 + $0x68] sm:$0xff]   ;;  %v11736_v50 = vld [vmem:[%s15311_s3 + $0x70] sm:$0xff]  }
 0x2d1   : > { %10370 = vmatprep.subr.bf16.mxu1 %v12204_v3  ;;  %10686 = vmatprep.subr.bf16.mxu0 %v12204_v3 }
 0x2d2   : > { %10700 = vmatprep.mubr.msk.bf16.mxu0 %vm12205_vm0, %v12204_v3 }
 0x2d4   : > { %10371 = vmatpush3.bf16.msra.mxu1 %v11710_v54  ;;  %10687 = vmatpush3.bf16.msra.mxu0 %v11711_v56  ;;  %v11737_v54 = vld [vmem:[%s15311_s3 + $0x78] sm:$0xff]   ;;  %v11738_v56 = vld [vmem:[%s15311_s3 + $0x80] sm:$0xff]  }
 0x2d5   : > { %10372 = vmatprep.subr.bf16.mxu1 %v12204_v3  ;;  %10688 = vmatprep.subr.bf16.mxu0 %v12204_v3 }
 0x2d8   : > { %10373 = vmatpush3.bf16.msra.mxu1 %v11712_v57  ;;  %10689 = vmatpush3.bf16.msra.mxu0 %v11713_v31  ;;  %v11739_v57 = vld [vmem:[%s15311_s3 + $0x88] sm:$0xff]   ;;  %v11771_v31 = vld [vmem:[%s15313_s5] sm:$0xff]  }
 0x2d9   : > { %10374 = vmatprep.subr.bf16.mxu1 %v12204_v3  ;;  %10690 = vmatprep.subr.bf16.mxu0 %v12204_v3 }
 0x2dc   : > { %10375 = vmatpush3.bf16.msra.mxu1 %v11714_v60  ;;  %10691 = vmatpush3.bf16.msra.mxu0 %v11715_v61  ;;  %v11773_v60 = vld [vmem:[%s15313_s5 + $0x8] sm:$0xff]   ;;  %v11741_v61 = vld [vmem:[%s15311_s3 + $0x98] sm:$0xff]  }
 0x2dd   : > { %10376 = vmatprep.subr.bf16.mxu1 %v12204_v3  ;;  %10692 = vmatprep.subr.bf16.mxu0 %v12204_v3 }
 0x2e0   : > { %10377 = vmatpush3.bf16.msra.mxu1 %v11716_v62  ;;  %10693 = vmatpush3.bf16.msra.mxu0 %v11717_v63  ;;  %v11775_v62 = vld [vmem:[%s15313_s5 + $0x10] sm:$0xff]   ;;  %v11742_v63 = vld [vmem:[%s15311_s3 + $0xa0] sm:$0xff]  }
 0x2e1   : > { %10378 = vmatprep.subr.bf16.mxu1 %v12204_v3  ;;  %10694 = vmatprep.subr.bf16.mxu0 %v12204_v3 }
 0x2e4   : > { %10379 = vmatpush3.bf16.msra.mxu1 %v11718_v0  ;;  %10695 = vmatpush3.bf16.msra.mxu0 %v11719_v4  ;;  %v11777_v0 = vld [vmem:[%s15313_s5 + $0x18] sm:$0xff]   ;;  %v11743_v4 = vld [vmem:[%s15311_s3 + $0xa8] sm:$0xff]  }
 0x2e5   : > { %10696 = vmatprep.subr.bf16.mxu0 %v12204_v3  ;;  %10704 = vmatprep.subr.bf16.mxu1 %v12204_v3 }
 0x2e7   : > { %10381 = vmatmul.mubr.bf16.vlgmr.msra.gmra.mrb[0].mxu1 %v13088_v15  ;;  %v13735_v15 = vpack.c.bf16 %v4214_v58, %v4214_v58  ;;  %v11785_v58 = vld [vmem:[%s15313_s5 + $0x38] sm:$0xff]  }
 0x2e8   : > { %10697 = vmatpush3.bf16.msra.mxu0 %v11720_v5  ;;  %10705 = vmatpush3.bf16.msra.mxu1 %v11721_v6  ;;  %v11779_v5 = vld [vmem:[%s15313_s5 + $0x20] sm:$0xff]   ;;  %v11744_v6 = vld [vmem:[%s15311_s3 + $0xb0] sm:$0xff]  }
 0x2e9   : > { %10698 = vmatprep.subr.bf16.mxu0 %v12204_v3  ;;  %10706 = vmatprep.subr.bf16.mxu1 %v12204_v3 }
 0x2ea   : > { %10720 = vmatprep.mubr.msk.bf16.mxu1 %vm12205_vm0, %v12204_v3 }
 0x2ec   : > { %10699 = vmatpush3.bf16.msra.mxu0 %v11722_v1  ;;  %10707 = vmatpush3.bf16.msra.mxu1 %v11723_v14  ;;  %v11783_v1 = vld [vmem:[%s15313_s5 + $0x30] sm:$0xff]   ;;  %v11746_v14 = vld [vmem:[%s15311_s3 + $0xc0] sm:$0xff]  }
 0x2ed   : > { %10708 = vmatprep.subr.bf16.mxu1 %v12204_v3  ;;  %11024 = vmatprep.subr.bf16.mxu0 %v12204_v3 }
 0x2ef   : > { %10701 = vmatmul.mubr.bf16.vlgmr.msra.gmra.mrb[16].mxu0 %v13735_v15 }
 0x2f0   : > { %10709 = vmatpush3.bf16.msra.mxu1 %v11724_v46  ;;  %11040 = vmatprep.mubr.msk.bf16.mxu0 %vm12205_vm0, %v12204_v3  ;;  %v11747_v46 = vld [vmem:[%s15311_s3 + $0xc8] sm:$0xff]  }
 0x2f1   : > { %10710 = vmatprep.subr.bf16.mxu1 %v12204_v3  ;;  %11025 = vmatpush3.bf16.msra.mxu0 %v11771_v31 }
 0x2f2   : > { %11026 = vmatprep.subr.bf16.mxu0 %v12204_v3 }
 0x2f4   : > { %10711 = vmatpush3.bf16.msra.mxu1 %v11725_v19  ;;  %v11753_v19 = vld [vmem:[%s15311_s3 + $0xf8] sm:$0xff]  }
 0x2f5   : > { %10712 = vmatprep.subr.bf16.mxu1 %v12204_v3  ;;  %11027 = vmatpush3.bf16.msra.mxu0 %v11773_v60 }
 0x2f6   : > { %11028 = vmatprep.subr.bf16.mxu0 %v12204_v3 }
 0x2f8   : > { %10713 = vmatpush3.bf16.msra.mxu1 %v11726_v59  ;;  %v11756_v59 = vld [vmem:[%s15311_s3 + $0x110] sm:$0xff]  }
 0x2f9   : > { %10714 = vmatprep.subr.bf16.mxu1 %v12204_v3  ;;  %11029 = vmatpush3.bf16.msra.mxu0 %v11775_v62 }
 0x2fa   : > { %11030 = vmatprep.subr.bf16.mxu0 %v12204_v3 }
 0x2fc   : > { %10715 = vmatpush3.bf16.msra.mxu1 %v11727_v11  ;;  %v11758_v11 = vld [vmem:[%s15311_s3 + $0x120] sm:$0xff]  }
 0x2fd   : > { %10716 = vmatprep.subr.bf16.mxu1 %v12204_v3  ;;  %11031 = vmatpush3.bf16.msra.mxu0 %v11777_v0  ;;  %v11786_v0 = vld [vmem:[%s15311_s3 + $0x1c0] sm:$0xff]  }
 0x2fe   : > { %11032 = vmatprep.subr.bf16.mxu0 %v12204_v3 }
 0x300   : > { %10717 = vmatpush3.bf16.msra.mxu1 %v11728_v23  ;;  %v11761_v23 = vld [vmem:[%s15311_s3 + $0x138] sm:$0xff]  }
 0x301   : > { %10718 = vmatprep.subr.bf16.mxu1 %v12204_v3  ;;  %11033 = vmatpush3.bf16.msra.mxu0 %v11779_v5 }
 0x302   : > { %11034 = vmatprep.subr.bf16.mxu0 %v12204_v3 }
 0x304   : > { %10719 = vmatpush3.bf16.msra.mxu1 %v11729_v25  ;;  %v11762_v25 = vld [vmem:[%s15311_s3 + $0x140] sm:$0xff]  }
 0x305   : > { %10724 = vmatprep.subr.bf16.mxu1 %v12204_v3  ;;  %11035 = vmatpush3.bf16.msra.mxu0 %v11781_v9  ;;  %v11787_v9 = vld [vmem:[%s15313_s5 + $0x40] sm:$0xff]  }
 0x306   : > { %11036 = vmatprep.subr.bf16.mxu0 %v12204_v3 }
 0x307   : > { %10721 = vmatmul.mubr.bf16.vlgmr.msra.gmra.mrb[4].mxu1 %v13176_v28  ;;  %v13818_v28 = vsel %vm773_vm2, %v5991_v8, %v5989_v24  ;;  %v11772_v24 = vld [vmem:[%s15311_s3 + $0x188] sm:$0xff]   ;;  %v11778_v8 = vld [vmem:[%s15311_s3 + $0x1a0] sm:$0xff]  }
 0x308   : > { %10725 = vmatpush3.bf16.msra.mxu1 %v11730_v38  ;;  %10740 = vmatprep.mubr.msk.bf16.mxu1 %vm12205_vm0, %v12204_v3  ;;  %v11768_v38 = vld [vmem:[%s15311_s3 + $0x170] sm:$0xff]  }
 0x309   : > { %10726 = vmatprep.subr.bf16.mxu1 %v12204_v3  ;;  %11037 = vmatpush3.bf16.msra.mxu0 %v11783_v1  ;;  %v11788_v1 = vld [vmem:[%s15311_s3 + $0x1c8] sm:$0xff]  }
 0x30a   : > { %11038 = vmatprep.subr.bf16.mxu0 %v12204_v3 }
 0x30c   : > { %10727 = vmatpush3.bf16.msra.mxu1 %v11731_v44  ;;  %v11774_v44 = vld [vmem:[%s15311_s3 + $0x190] sm:$0xff]  }
 0x30d   : > { %10728 = vmatprep.subr.bf16.mxu1 %v12204_v3  ;;  %11039 = vmatpush3.bf16.msra.mxu0 %v11785_v58  ;;  %v11791_v58 = vld [vmem:[%s15313_s5 + $0x50] sm:$0xff]  }
 0x30e   : > { %11044 = vmatprep.subr.bf16.mxu0 %v12204_v3 }
 0x310   : > { %10729 = vmatpush3.bf16.msra.mxu1 %v11732_v47  ;;  %v14042_v47 = vld [vmem:[%s15312_s4] ss:$0 sm:$0xff] }
 0x311   : > { %10730 = vmatprep.subr.bf16.mxu1 %v12204_v3 }
 0x314   : > { %10731 = vmatpush3.bf16.msra.mxu1 %v11733_v48  ;;  %v11780_v48 = vld [vmem:[%s15311_s3 + $0x1a8] sm:$0xff]  }
 0x315   : > { %10732 = vmatprep.subr.bf16.mxu1 %v12204_v3 }
 0x318   : > { %10733 = vmatpush3.bf16.msra.mxu1 %v11734_v49 }
 0x319   : > { %10734 = vmatprep.subr.bf16.mxu1 %v12204_v3 }
 0x31c   : > { %10735 = vmatpush3.bf16.msra.mxu1 %v11735_v32 }
 0x31d   : > { %10736 = vmatprep.subr.bf16.mxu1 %v12204_v3 }
 0x320   : > { %10737 = vmatpush3.bf16.msra.mxu1 %v11736_v50 }
 0x321   : > { %10738 = vmatprep.subr.bf16.mxu1 %v12204_v3 }
 0x324   : > { %10739 = vmatpush3.bf16.msra.mxu1 %v11737_v54 }
 0x325   : > { %10744 = vmatprep.subr.bf16.mxu1 %v12204_v3 }
 0x327   : > { %10741 = vmatmul.mubr.bf16.vlgmr.msra.gmra.mrb[4].mxu1 %v13257_v53  ;;  %v11740_v53 = vld [vmem:[%s15311_s3 + $0x90] sm:$0xff]  }
 0x328   : > { %10745 = vmatpush3.bf16.msra.mxu1 %v11738_v56  ;;  %10760 = vmatprep.mubr.msk.bf16.mxu1 %vm12205_vm0, %v12204_v3  ;;  %v11782_v56 = vld [vmem:[%s15311_s3 + $0x1b0] sm:$0xff]  }
 0x329   : > { %10746 = vmatprep.subr.bf16.mxu1 %v12204_v3 }
 0x32c   : > { %10747 = vmatpush3.bf16.msra.mxu1 %v11739_v57 }
 0x32d   : > { %10748 = vmatprep.subr.bf16.mxu1 %v12204_v3 }
 0x330   : > { %10749 = vmatpush3.bf16.msra.mxu1 %v11740_v53  ;;  %v11784_v53 = vld [vmem:[%s15311_s3 + $0x1b8] sm:$0xff]  }
 0x331   : > { %10750 = vmatprep.subr.bf16.mxu1 %v12204_v3 }
 0x334   : > { %10751 = vmatpush3.bf16.msra.mxu1 %v11741_v61 }
 0x335   : > { %10752 = vmatprep.subr.bf16.mxu1 %v12204_v3 }
 0x338   : > { %10753 = vmatpush3.bf16.msra.mxu1 %v11742_v63 }
 0x339   : > { %10754 = vmatprep.subr.bf16.mxu1 %v12204_v3 }
 0x33c   : > { %10755 = vmatpush3.bf16.msra.mxu1 %v11743_v4 }
 0x33d   : > { %10756 = vmatprep.subr.bf16.mxu1 %v12204_v3 }
 0x340   : > { %10757 = vmatpush3.bf16.msra.mxu1 %v11744_v6 }
 0x341   : > { %10758 = vmatprep.subr.bf16.mxu1 %v12204_v3 }
 0x344   : > { %10759 = vmatpush3.bf16.msra.mxu1 %v11745_v10 }
 0x345   : > { %10764 = vmatprep.subr.bf16.mxu1 %v12204_v3 }
 0x347   : > { %10761 = vmatmul.mubr.bf16.vlgmr.msra.gmra.mrb[4].mxu1 %v13334_v13  ;;  %v11748_v13 = vld [vmem:[%s15311_s3 + $0xd0] sm:$0xff]  }
 0x348   : > { %10765 = vmatpush3.bf16.msra.mxu1 %v11746_v14  ;;  %10780 = vmatprep.mubr.msk.bf16.mxu1 %vm12205_vm0, %v12204_v3  ;;  %v11789_v14 = vld [vmem:[%s15313_s5 + $0x48] sm:$0xff]  }
 0x349   : > { %10766 = vmatprep.subr.bf16.mxu1 %v12204_v3 }
 0x34c   : > { %10767 = vmatpush3.bf16.msra.mxu1 %v11747_v46  ;;  %v11792_v46 = vld [vmem:[%s15311_s3 + $0x1d8] sm:$0xff]  }
 0x34d   : > { %10768 = vmatprep.subr.bf16.mxu1 %v12204_v3 }
 0x350   : > { %10769 = vmatpush3.bf16.msra.mxu1 %v11748_v13  ;;  %v11793_v13 = vld [vmem:[%s15313_s5 + $0x58] sm:$0xff]  }
 0x351   : > { %10770 = vmatprep.subr.bf16.mxu1 %v12204_v3 }
 0x354   : > { %10771 = vmatpush3.bf16.msra.mxu1 %v11749_v33  ;;  %v11794_v33 = vld [vmem:[%s15311_s3 + $0x1e0] sm:$0xff]  }
 0x355   : > { %10772 = vmatprep.subr.bf16.mxu1 %v12204_v3 }
 0x358   : > { %10773 = vmatpush3.bf16.msra.mxu1 %v11750_v16  ;;  %v11795_v16 = vld [vmem:[%s15313_s5 + $0x60] sm:$0xff]  }
 0x359   : > { %10774 = vmatprep.subr.bf16.mxu1 %v12204_v3 }
 0x35c   : > { %10775 = vmatpush3.bf16.msra.mxu1 %v11751_v17  ;;  %v11796_v17 = vld [vmem:[%s15311_s3 + $0x1e8] sm:$0xff]  }
 0x35d   : > { %10776 = vmatprep.subr.bf16.mxu1 %v12204_v3 }
 0x360   : > { %10777 = vmatpush3.bf16.msra.mxu1 %v11752_v18  ;;  %v11797_v18 = vld [vmem:[%s15313_s5 + $0x68] sm:$0xff]  }
 0x361   : > { %10778 = vmatprep.subr.bf16.mxu1 %v12204_v3 }
 0x364   : > { %10779 = vmatpush3.bf16.msra.mxu1 %v11753_v19  ;;  %v11798_v19 = vld [vmem:[%s15311_s3 + $0x1f0] sm:$0xff]  }
 0x365   : > { %10784 = vmatprep.subr.bf16.mxu1 %v12204_v3 }
 0x367   : > { %10781 = vmatmul.mubr.bf16.vlgmr.msra.gmra.mrb[4].mxu1 %v13410_v34  ;;  %v11757_v34 = vld [vmem:[%s15311_s3 + $0x118] sm:$0xff]  }
 0x368   : > { %10785 = vmatpush3.bf16.msra.mxu1 %v11754_v20  ;;  %10800 = vmatprep.mubr.msk.bf16.mxu1 %vm12205_vm0, %v12204_v3  ;;  %v11799_v20 = vld [vmem:[%s15313_s5 + $0x70] sm:$0xff]  }
 0x369   : > { %10786 = vmatprep.subr.bf16.mxu1 %v12204_v3 }
 0x36c   : > { %10787 = vmatpush3.bf16.msra.mxu1 %v11755_v21  ;;  %v11800_v21 = vld [vmem:[%s15311_s3 + $0x1f8] sm:$0xff]  }
 0x36d   : > { %10788 = vmatprep.subr.bf16.mxu1 %v12204_v3 }
 0x370   : > { %10789 = vmatpush3.bf16.msra.mxu1 %v11756_v59  ;;  %v11801_v59 = vld [vmem:[%s15313_s5 + $0x78] sm:$0xff]  }
 0x371   : > { %10790 = vmatprep.subr.bf16.mxu1 %v12204_v3 }
 0x374   : > { %10791 = vmatpush3.bf16.msra.mxu1 %v11757_v34  ;;  %v11802_v34 = vld [vmem:[%s15311_s3 + $0x200] sm:$0xff]  }
 0x375   : > { %10792 = vmatprep.subr.bf16.mxu1 %v12204_v3 }
 0x378   : > { %10793 = vmatpush3.bf16.msra.mxu1 %v11758_v11  ;;  %v11803_v11 = vld [vmem:[%s15313_s5 + $0x80] sm:$0xff]  }
 0x379   : > { %10794 = vmatprep.subr.bf16.mxu1 %v12204_v3 }
 0x37c   : > { %10795 = vmatpush3.bf16.msra.mxu1 %v11759_v22 }
 0x37d   : > { %10796 = vmatprep.subr.bf16.mxu1 %v12204_v3 }
 0x380   : > { %10797 = vmatpush3.bf16.msra.mxu1 %v11760_v12  ;;  %v11804_v12 = vld [vmem:[%s15311_s3 + $0x208] sm:$0xff]  }
 0x381   : > { %10798 = vmatprep.subr.bf16.mxu1 %v12204_v3 }
 0x384   : > { %10799 = vmatpush3.bf16.msra.mxu1 %v11761_v23  ;;  %v11806_v23 = vld [vmem:[%s15311_s3 + $0x210] sm:$0xff]  }
 0x385   : > { %10804 = vmatprep.subr.bf16.mxu1 %v12204_v3 }
 0x387   : > { %10801 = vmatmul.mubr.bf16.vlgmr.msra.gmra.mrb[4].mxu1 %v13501_v2  ;;  %v11765_v2 = vld [vmem:[%s15311_s3 + $0x158] sm:$0xff]  }
 0x388   : > { %10805 = vmatpush3.bf16.msra.mxu1 %v11762_v25  ;;  %10820 = vmatprep.mubr.msk.bf16.mxu1 %vm12205_vm0, %v12204_v3  ;;  %v11807_v25 = vld [vmem:[%s15313_s5 + $0x90] sm:$0xff]  }
 0x389   : > { %10806 = vmatprep.subr.bf16.mxu1 %v12204_v3 }
 0x38c   : > { %10807 = vmatpush3.bf16.msra.mxu1 %v11763_v30  ;;  %v11808_v30 = vld [vmem:[%s15311_s3 + $0x218] sm:$0xff]  }
 0x38d   : > { %10808 = vmatprep.subr.bf16.mxu1 %v12204_v3 }
 0x390   : > { %10809 = vmatpush3.bf16.msra.mxu1 %v11764_v7  ;;  %v11809_v7 = vld [vmem:[%s15313_s5 + $0x98] sm:$0xff]  }
 0x391   : > { %10810 = vmatprep.subr.bf16.mxu1 %v12204_v3 }
 0x394   : > { %10811 = vmatpush3.bf16.msra.mxu1 %v11765_v2  ;;  %v11810_v2 = vld [vmem:[%s15311_s3 + $0x220] sm:$0xff]  }
 0x395   : > { %10812 = vmatprep.subr.bf16.mxu1 %v12204_v3 }
 0x398   : > { %10813 = vmatpush3.bf16.msra.mxu1 %v11766_v27  ;;  %v11811_v27 = vld [vmem:[%s15313_s5 + $0xa0] sm:$0xff]  }
 0x399   : > { %10814 = vmatprep.subr.bf16.mxu1 %v12204_v3 }
 0x39c   : > { %10815 = vmatpush3.bf16.msra.mxu1 %v11767_v37  ;;  %v11812_v37 = vld [vmem:[%s15311_s3 + $0x228] sm:$0xff]  }
 0x39d   : > { %10816 = vmatprep.subr.bf16.mxu1 %v12204_v3 }
 0x3a0   : > { %10817 = vmatpush3.bf16.msra.mxu1 %v11768_v38  ;;  %v11813_v38 = vld [vmem:[%s15313_s5 + $0xa8] sm:$0xff]  }
 0x3a1   : > { %10818 = vmatprep.subr.bf16.mxu1 %v12204_v3 }
 0x3a4   : > { %10819 = vmatpush3.bf16.msra.mxu1 %v11769_v42  ;;  %v5213_v42 = vrot.slane %v13763_v41, 1 }
 0x3a5   : > { %10824 = vmatprep.subr.bf16.mxu1 %v12204_v3 }
 0x3a7   : > { %10821 = vmatmul.mubr.bf16.vlgmr.msra.gmra.mrb[4].mxu1 %v13582_v29  ;;  %v11776_v29 = vld [vmem:[%s15311_s3 + $0x198] sm:$0xff]  }
 0x3a8   : > { %10825 = vmatpush3.bf16.msra.mxu1 %v11770_v43  ;;  %10840 = vmatprep.mubr.msk.bf16.mxu1 %vm12205_vm0, %v12204_v3  ;;  %v11814_v43 = vld [vmem:[%s15311_s3 + $0x230] sm:$0xff]  }
 0x3a9   : > { %10826 = vmatprep.subr.bf16.mxu1 %v12204_v3 }
 0x3ac   : > { %10827 = vmatpush3.bf16.msra.mxu1 %v11772_v24  ;;  %v11815_v24 = vld [vmem:[%s15313_s5 + $0xb0] sm:$0xff]  }
 0x3ad   : > { %10828 = vmatprep.subr.bf16.mxu1 %v12204_v3 }
 0x3b0   : > { %10829 = vmatpush3.bf16.msra.mxu1 %v11774_v44  ;;  %v5217_v44 = vsel %vm771_vm1, %v13763_v41, %v5213_v42  ;;  %v11834_v41 = vld [vmem:[%s15311_s3 + $0x280] sm:$0xff]  }
 0x3b1   : > { %10830 = vmatprep.subr.bf16.mxu1 %v12204_v3 }
 0x3b4   : > { %10831 = vmatpush3.bf16.msra.mxu1 %v11776_v29  ;;  %v11816_v29 = vld [vmem:[%s15311_s3 + $0x238] sm:$0xff]  }
 0x3b5   : > { %10832 = vmatprep.subr.bf16.mxu1 %v12204_v3 }
 0x3b8   : > { %10833 = vmatpush3.bf16.msra.mxu1 %v11778_v8  ;;  %v11817_v8 = vld [vmem:[%s15313_s5 + $0xb8] sm:$0xff]  }
 0x3b9   : > { %10834 = vmatprep.subr.bf16.mxu1 %v12204_v3 }
 0x3ba   : > { %v2536_v49 = vpop.f32.mrb[0].mxu1 }
 0x3bb   : > { %v11204_v32 = vadd.f32 %v14042_v47, %v2536_v49  ;;  %v10382_v50 = vpop.f32.mrb[1].mxu1  ;;  %v11818_v49 = vld [vmem:[%s15311_s3 + $0x240] sm:$0xff]  }
 0x3bc   : > { %v2539_v54 = vpop.f32.mrb[2].mxu1  ;;  %10835 = vmatpush3.bf16.msra.mxu1 %v11780_v48  ;;  %v5218_v48 = vsel %vm773_vm2, %v5217_v44, %v13772_v52  ;;  %v11819_v50 = vld [vmem:[%s15313_s5 + $0xc0] sm:$0xff]   ;;  %v11861_v44 = vld [vmem:[%s15313_s5 + $0x168] sm:$0xff]  }
 0x3bd   : > { %v2543_v57 = vmax.f32 %v11204_v32, 0.0  ;;  %v10383_v31 = vpop.f32.mrb[3].mxu1  ;;  %10836 = vmatprep.subr.bf16.mxu1 %v12204_v3  ;;  %v5235_v32 = vpack.c.bf16 %v5218_v48, %v5218_v48  ;;  %v11864_v48 = vld [vmem:[%s15311_s3 + $0x2f8] sm:$0xff]  }
 0x3be   : > { %v11822_v31 = vld [vmem:[%s15311_s3 + $0x250] sm:$0xff]  }
 0x3bf   : > { %2544 = vst [vmem:[#allocation3] sm:$0x7] %v2543_v57  ;;  %v11821_v57 = vld [vmem:[%s15313_s5 + $0xc8] sm:$0xff]  }
 0x3c0   : > { %10837 = vmatpush3.bf16.msra.mxu1 %v11782_v56  ;;  %v11820_v56 = vld [vmem:[%s15311_s3 + $0x248] sm:$0xff]  }
 0x3c1   : > { %10838 = vmatprep.subr.bf16.mxu1 %v12204_v3 }
 0x3c2   : > { %v4314_v60 = vpop.f32.mrb[16].mxu0 }
 0x3c3   : > { %v11205_v61 = vadd.f32 %v14042_v47, %v4314_v60  ;;  %v10702_v62 = vpop.f32.mrb[17].mxu0  ;;  %v11824_v60 = vld [vmem:[%s15311_s3 + $0x258] sm:$0xff]  }
 0x3c4   : > { %v4317_v63 = vpop.f32.mrb[18].mxu0  ;;  %10839 = vmatpush3.bf16.msra.mxu1 %v11784_v53  ;;  %v11823_v53 = vld [vmem:[%s15313_s5 + $0xd0] sm:$0xff]   ;;  %v11826_v62 = vld [vmem:[%s15311_s3 + $0x260] sm:$0xff]  }
 0x3c5   : > { %v4321_v4 = vmax.f32 %v11205_v61, 0.0  ;;  %v10703_v5 = vpop.f32.mrb[19].mxu0  ;;  %10844 = vmatprep.subr.bf16.mxu1 %v12204_v3  ;;  %v11825_v61 = vld [vmem:[%s15313_s5 + $0xd8] sm:$0xff]   ;;  %v11827_v63 = vld [vmem:[%s15313_s5 + $0xe0] sm:$0xff]  }
 0x3c6   : > { %v6102_v6 = vld [vmem:[#allocation3] sm:$0x7]  ;;  %v11830_v5 = vld [vmem:[%s15311_s3 + $0x270] sm:$0xff]  }
 0x3c7   : > { %4322 = vst [vmem:[#allocation3 + $0x3] sm:$0x7] %v4321_v4  ;;  %10841 = vmatmul.mubr.bf16.vlgmr.msra.gmra.mrb[4].mxu1 %v13659_v51  ;;  %v14066_v10 = vpack.c.bf16 %v6102_v6, %v6102_v6  ;;  %v11790_v51 = vld [vmem:[%s15311_s3 + $0x1d0] sm:$0xff]   ;;  %v11829_v4 = vld [vmem:[%s15313_s5 + $0xe8] sm:$0xff]  }
 0x3c8   : > { %10845 = vmatpush3.bf16.msra.mxu1 %v11786_v0  ;;  %10860 = vmatprep.mubr.msk.bf16.mxu1 %vm12205_vm0, %v12204_v3  ;;  %v11828_v0 = vld [vmem:[%s15311_s3 + $0x268] sm:$0xff]   ;;  %v11831_v6 = vld [vmem:[%s15313_s5 + $0xf0] sm:$0xff]  }
 0x3c9   : > { %11041 = vmatmul.mubr.bf16.vlgmr.msra.gmra.mrb[20].mxu0 %v14066_v10  ;;  %10846 = vmatprep.subr.bf16.mxu1 %v12204_v3  ;;  %v6226_v22 = vshrl.u32 %v14066_v10, 16  ;;  %v6335_v54 = vrot.slane %v14066_v10, 1  ;;  %v11832_v10 = vld [vmem:[%s15311_s3 + $0x278] sm:$0xff]  }
 0x3ca   : > { %11045 = vmatpush3.bf16.msra.mxu0 %v11787_v9  ;;  %11060 = vmatprep.mubr.msk.bf16.mxu0 %vm12205_vm0, %v12204_v3  ;;  %v5327_v9 = vsel %vm771_vm1, %v5213_v42, %v13772_v52  ;;  %v11858_v42 = vld [vmem:[%s15311_s3 + $0x2e0] sm:$0xff]  }
 0x3cb   : > { %11046 = vmatprep.subr.bf16.mxu0 %v12204_v3 }
 0x3cc   : > { %10847 = vmatpush3.bf16.msra.mxu1 %v11788_v1  ;;  %v11833_v1 = vld [vmem:[%s15313_s5 + $0xf8] sm:$0xff]  }
 0x3cd   : > { %10848 = vmatprep.subr.bf16.mxu1 %v12204_v3 }
 0x3ce   : > { %11047 = vmatpush3.bf16.msra.mxu0 %v11789_v14  ;;  %v5328_v14 = vsel %vm773_vm2, %v5327_v9, %v13775_v26  ;;  %v6426_v52 = vld [vmem:[#allocation3 + $0x3] sm:$0x7]  ;;  %v11836_v26 = vld [vmem:[%s15311_s3 + $0x288] sm:$0xff]   ;;  %v11873_v9 = vld [vmem:[%s15311_s3 + $0x338] sm:$0xff]  }
 0x3cf   : > { %11048 = vmatprep.subr.bf16.mxu0 %v12204_v3 }
 0x3d0   : > { %10849 = vmatpush3.bf16.msra.mxu1 %v11790_v51  ;;  %v5345_v51 = vpack.c.bf16 %v5328_v14, %v5328_v14 }
 0x3d1   : > { %10850 = vmatprep.subr.bf16.mxu1 %v12204_v3 }
 0x3d2   : > { %11049 = vmatpush3.bf16.msra.mxu0 %v11791_v58  ;;  %v11835_v58 = vld [vmem:[%s15313_s5 + $0x100] sm:$0xff]  }
 0x3d3   : > { %11050 = vmatprep.subr.bf16.mxu0 %v12204_v3 }
 0x3d4   : > { %10851 = vmatpush3.bf16.msra.mxu1 %v11792_v46  ;;  %v14288_v46 = vpack.c.bf16 %v6426_v52, %v6426_v52  ;;  %v11877_v52 = vld [vmem:[%s15311_s3 + $0x358] sm:$0xff]  }
 0x3d5   : > { %10852 = vmatprep.subr.bf16.mxu1 %v12204_v3 }
 0x3d6   : > { %11051 = vmatpush3.bf16.msra.mxu0 %v11793_v13  ;;  %v11837_v13 = vld [vmem:[%s15313_s5 + $0x108] sm:$0xff]  }
 0x3d7   : > { %11052 = vmatprep.subr.bf16.mxu0 %v12204_v3 }
 0x3d8   : > { %10853 = vmatpush3.bf16.msra.mxu1 %v11794_v33  ;;  %v11838_v33 = vld [vmem:[%s15311_s3 + $0x290] sm:$0xff]  }
 0x3d9   : > { %10854 = vmatprep.subr.bf16.mxu1 %v12204_v3 }
 0x3da   : > { %11053 = vmatpush3.bf16.msra.mxu0 %v11795_v16  ;;  %v11839_v16 = vld [vmem:[%s15313_s5 + $0x110] sm:$0xff]  }
 0x3db   : > { %11054 = vmatprep.subr.bf16.mxu0 %v12204_v3 }
 0x3dc   : > { %10855 = vmatpush3.bf16.msra.mxu1 %v11796_v17  ;;  %v11840_v17 = vld [vmem:[%s15311_s3 + $0x298] sm:$0xff]  }
 0x3dd   : > { %10856 = vmatprep.subr.bf16.mxu1 %v12204_v3 }
 0x3de   : > { %11055 = vmatpush3.bf16.msra.mxu0 %v11797_v18  ;;  %v11841_v18 = vld [vmem:[%s15313_s5 + $0x118] sm:$0xff]  }
 0x3df   : > { %11056 = vmatprep.subr.bf16.mxu0 %v12204_v3 }
 0x3e0   : > { %10857 = vmatpush3.bf16.msra.mxu1 %v11798_v19  ;;  %v11842_v19 = vld [vmem:[%s15311_s3 + $0x2a0] sm:$0xff]  }
 0x3e1   : > { %10858 = vmatprep.subr.bf16.mxu1 %v12204_v3 }
 0x3e2   : > { %11057 = vmatpush3.bf16.msra.mxu0 %v11799_v20  ;;  %v11843_v20 = vld [vmem:[%s15313_s5 + $0x120] sm:$0xff]  }
 0x3e3   : > { %11058 = vmatprep.subr.bf16.mxu0 %v12204_v3 }
 0x3e4   : > { %10859 = vmatpush3.bf16.msra.mxu1 %v11800_v21  ;;  %v11844_v21 = vld [vmem:[%s15311_s3 + $0x2a8] sm:$0xff]  }
 0x3e5   : > { %10864 = vmatprep.subr.bf16.mxu1 %v12204_v3 }
 0x3e6   : > { %11059 = vmatpush3.bf16.msra.mxu0 %v11801_v59  ;;  %v11845_v59 = vld [vmem:[%s15313_s5 + $0x128] sm:$0xff]  }
 0x3e7   : > { %10861 = vmatmul.mubr.bf16.vlgmr.msra.gmra.mrb[4].mxu1 %v13735_v15  ;;  %11064 = vmatprep.subr.bf16.mxu0 %v12204_v3  ;;  %v11805_v15 = vld [vmem:[%s15313_s5 + $0x88] sm:$0xff]  }
 0x3e8   : > { %10865 = vmatpush3.bf16.msra.mxu1 %v11802_v34  ;;  %10880 = vmatprep.mubr.msk.bf16.mxu1 %vm12205_vm0, %v12204_v3  ;;  %v11846_v34 = vld [vmem:[%s15311_s3 + $0x2b0] sm:$0xff]  }
 0x3e9   : > { %11061 = vmatmul.mubr.bf16.vlgmr.msra.gmra.mrb[20].mxu0 %v6226_v22  ;;  %10866 = vmatprep.subr.bf16.mxu1 %v12204_v3  ;;  %v11848_v22 = vld [vmem:[%s15311_s3 + $0x2b8] sm:$0xff]  }
 0x3ea   : > { %11065 = vmatpush3.bf16.msra.mxu0 %v11803_v11  ;;  %11080 = vmatprep.mubr.msk.bf16.mxu0 %vm12205_vm0, %v12204_v3  ;;  %v11847_v11 = vld [vmem:[%s15313_s5 + $0x130] sm:$0xff]  }
 0x3eb   : > { %11066 = vmatprep.subr.bf16.mxu0 %v12204_v3 }
 0x3ec   : > { %10867 = vmatpush3.bf16.msra.mxu1 %v11804_v12  ;;  %v11849_v12 = vld [vmem:[%s15313_s5 + $0x138] sm:$0xff]  }
 0x3ed   : > { %10868 = vmatprep.subr.bf16.mxu1 %v12204_v3 }
 0x3ee   : > { %11067 = vmatpush3.bf16.msra.mxu0 %v11805_v15  ;;  %v11850_v15 = vld [vmem:[%s15311_s3 + $0x2c0] sm:$0xff]  }
 0x3ef   : > { %11068 = vmatprep.subr.bf16.mxu0 %v12204_v3 }
 0x3f0   : > { %10869 = vmatpush3.bf16.msra.mxu1 %v11806_v23  ;;  %v5455_v23 = vpack.c.bf16 %v13794_v39, %v13794_v39  ;;  %v11853_v39 = vld [vmem:[%s15313_s5 + $0x148] sm:$0xff]  }
 0x3f1   : > { %10870 = vmatprep.subr.bf16.mxu1 %v12204_v3 }
 0x3f2   : > { %11069 = vmatpush3.bf16.msra.mxu0 %v11807_v25  ;;  %v11851_v25 = vld [vmem:[%s15313_s5 + $0x140] sm:$0xff]  }
 0x3f3   : > { %11070 = vmatprep.subr.bf16.mxu0 %v12204_v3 }
 0x3f4   : > { %10871 = vmatpush3.bf16.msra.mxu1 %v11808_v30  ;;  %v6550_v30 = vshrl.u32 %v14288_v46, 16 }
 0x3f5   : > { %10872 = vmatprep.subr.bf16.mxu1 %v12204_v3 }
 0x3f6   : > { %11071 = vmatpush3.bf16.msra.mxu0 %v11809_v7  ;;  %v11852_v7 = vld [vmem:[%s15311_s3 + $0x2c8] sm:$0xff]  }
 0x3f7   : > { %11072 = vmatprep.subr.bf16.mxu0 %v12204_v3 }
 0x3f8   : > { %10873 = vmatpush3.bf16.msra.mxu1 %v11810_v2  ;;  %v11854_v2 = vld [vmem:[%s15311_s3 + $0x2d0] sm:$0xff]  }
 0x3f9   : > { %10874 = vmatprep.subr.bf16.mxu1 %v12204_v3 }
 0x3fa   : > { %11073 = vmatpush3.bf16.msra.mxu0 %v11811_v27  ;;  %v11855_v27 = vld [vmem:[%s15313_s5 + $0x150] sm:$0xff]  }
 0x3fb   : > { %11074 = vmatprep.subr.bf16.mxu0 %v12204_v3 }
 0x3fc   : > { %10875 = vmatpush3.bf16.msra.mxu1 %v11812_v37  ;;  %v11856_v37 = vld [vmem:[%s15311_s3 + $0x2d8] sm:$0xff]  }
 0x3fd   : > { %10876 = vmatprep.subr.bf16.mxu1 %v12204_v3 }
 0x3fe   : > { %11075 = vmatpush3.bf16.msra.mxu0 %v11813_v38  ;;  %v11857_v38 = vld [vmem:[%s15313_s5 + $0x158] sm:$0xff]  }
 0x3ff   : > { %11076 = vmatprep.subr.bf16.mxu0 %v12204_v3 }
 0x400   : > { %10877 = vmatpush3.bf16.msra.mxu1 %v11814_v43  ;;  %v11859_v43 = vld [vmem:[%s15313_s5 + $0x160] sm:$0xff]  }
 0x401   : > { %10878 = vmatprep.subr.bf16.mxu1 %v12204_v3 }
 0x402   : > { %11077 = vmatpush3.bf16.msra.mxu0 %v11815_v24  ;;  %v11860_v24 = vld [vmem:[%s15311_s3 + $0x2e8] sm:$0xff]  }
 0x403   : > { %11078 = vmatprep.subr.bf16.mxu0 %v12204_v3 }
 0x404   : > { %10879 = vmatpush3.bf16.msra.mxu1 %v11816_v29  ;;  %v11862_v29 = vld [vmem:[%s15311_s3 + $0x2f0] sm:$0xff]  }
 0x405   : > { %10884 = vmatprep.subr.bf16.mxu1 %v12204_v3 }
 0x406   : > { %11079 = vmatpush3.bf16.msra.mxu0 %v11817_v8  ;;  %v11863_v8 = vld [vmem:[%s15313_s5 + $0x170] sm:$0xff]  }
 0x407   : > { %10881 = vmatmul.mubr.bf16.vlgmr.msra.gmra.mrb[4].mxu1 %v5235_v32  ;;  %11084 = vmatprep.subr.bf16.mxu0 %v12204_v3  ;;  %v11866_v32 = vld [vmem:[%s15311_s3 + $0x300] sm:$0xff]  }
 0x408   : > { %10885 = vmatpush3.bf16.msra.mxu1 %v11818_v49  ;;  %10900 = vmatprep.mubr.msk.bf16.mxu1 %vm12205_vm0, %v12204_v3  ;;  %v11865_v49 = vld [vmem:[%s15313_s5 + $0x178] sm:$0xff]  }
 0x409   : > { %11081 = vmatmul.mubr.bf16.vlgmr.msra.gmra.mrb[20].mxu0 %v6335_v54  ;;  %10886 = vmatprep.subr.bf16.mxu1 %v12204_v3  ;;  %v6659_v54 = vrot.slane %v14288_v46, 1 }
 0x40a   : > { %11085 = vmatpush3.bf16.msra.mxu0 %v11819_v50  ;;  %11100 = vmatprep.mubr.msk.bf16.mxu0 %vm12205_vm0, %v12204_v3  ;;  %v5565_v50 = vpack.c.bf16 %v13797_v40, %v13797_v40  ;;  %v11899_v40 = vld [vmem:[%s15313_s5 + $0x188] sm:$0xff]  }
 0x40b   : > { %11086 = vmatprep.subr.bf16.mxu0 %v12204_v3 }
 0x40c   : > { %10887 = vmatpush3.bf16.msra.mxu1 %v11820_v56  ;;  %v11898_v56 = vld [vmem:[%s15313_s5 + $0x180] sm:$0xff]  }
 0x40d   : > { %10888 = vmatprep.subr.bf16.mxu1 %v12204_v3 }
 0x40e   : > { %11087 = vmatpush3.bf16.msra.mxu0 %v11821_v57  ;;  %v11867_v57 = vld [vmem:[%s15311_s3 + $0x308] sm:$0xff]  }
 0x40f   : > { %11088 = vmatprep.subr.bf16.mxu0 %v12204_v3 }
 0x410   : > { %10889 = vmatpush3.bf16.msra.mxu1 %v11822_v31  ;;  %v11868_v31 = vld [vmem:[%s15311_s3 + $0x310] sm:$0xff]  }
 0x411   : > { %10890 = vmatprep.subr.bf16.mxu1 %v12204_v3 }
 0x412   : > { %11089 = vmatpush3.bf16.msra.mxu0 %v11823_v53  ;;  %v11900_v53 = vld [vmem:[%s15313_s5 + $0x190] sm:$0xff]  }
 0x413   : > { %11090 = vmatprep.subr.bf16.mxu0 %v12204_v3 }
 0x414   : > { %10891 = vmatpush3.bf16.msra.mxu1 %v11824_v60  ;;  %v11869_v60 = vld [vmem:[%s15311_s3 + $0x318] sm:$0xff]  }
 0x415   : > { %10892 = vmatprep.subr.bf16.mxu1 %v12204_v3 }
 0x416   : > { %11091 = vmatpush3.bf16.msra.mxu0 %v11825_v61  ;;  %v11901_v61 = vld [vmem:[%s15313_s5 + $0x198] sm:$0xff]  }
 0x417   : > { %11092 = vmatprep.subr.bf16.mxu0 %v12204_v3 }
 0x418   : > { %10893 = vmatpush3.bf16.msra.mxu1 %v11826_v62  ;;  %v11870_v62 = vld [vmem:[%s15311_s3 + $0x320] sm:$0xff]  }
 0x419   : > { %10894 = vmatprep.subr.bf16.mxu1 %v12204_v3 }
 0x41a   : > { %11093 = vmatpush3.bf16.msra.mxu0 %v11827_v63  ;;  %v11902_v63 = vld [vmem:[%s15313_s5 + $0x1a0] sm:$0xff]  }
 0x41b   : > { %11094 = vmatprep.subr.bf16.mxu0 %v12204_v3 }
 0x41c   : > { %10895 = vmatpush3.bf16.msra.mxu1 %v11828_v0  ;;  %v11871_v0 = vld [vmem:[%s15311_s3 + $0x328] sm:$0xff]  }
 0x41d   : > { %10896 = vmatprep.subr.bf16.mxu1 %v12204_v3 }
 0x41e   : > { %11095 = vmatpush3.bf16.msra.mxu0 %v11829_v4  ;;  %v5657_v4 = vrot.slane %v13765_v55, 1 }
 0x41f   : > { %11096 = vmatprep.subr.bf16.mxu0 %v12204_v3 }
 0x420   : > { %10897 = vmatpush3.bf16.msra.mxu1 %v11830_v5  ;;  %v11872_v5 = vld [vmem:[%s15311_s3 + $0x330] sm:$0xff]  }
 0x421   : > { %10898 = vmatprep.subr.bf16.mxu1 %v12204_v3 }
 0x422   : > { %11097 = vmatpush3.bf16.msra.mxu0 %v11831_v6  ;;  %v5661_v6 = vsel %vm771_vm1, %v13765_v55, %v5657_v4  ;;  %v11875_v55 = vld [vmem:[%s15311_s3 + $0x348] sm:$0xff]  }
 0x423   : > { %11098 = vmatprep.subr.bf16.mxu0 %v12204_v3 }
 0x424   : > { %10899 = vmatpush3.bf16.msra.mxu1 %v11832_v10  ;;  %v5662_v10 = vsel %vm773_vm2, %v5661_v6, %v13780_v35 }
 0x425   : > { %10904 = vmatprep.subr.bf16.mxu1 %v12204_v3  ;;  %v5679_v14 = vpack.c.bf16 %v5662_v10, %v5662_v10  ;;  %v11930_v10 = vld [vmem:[%s15315_s7 + $0x44] ss:$16 sps:$4 sm:$0xff]  }
 0x426   : > { %11099 = vmatpush3.bf16.msra.mxu0 %v11833_v1  ;;  %v11874_v1 = vld [vmem:[%s15311_s3 + $0x340] sm:$0xff]  }
 0x427   : > { %10901 = vmatmul.mubr.bf16.vlgmr.msra.gmra.mrb[4].mxu1 %v5345_v51  ;;  %11104 = vmatprep.subr.bf16.mxu0 %v12204_v3  ;;  %v11878_v51 = vld [vmem:[%s15311_s3 + $0x360] sm:$0xff]  }
 0x428   : > { %10905 = vmatpush3.bf16.msra.mxu1 %v11834_v41  ;;  %10920 = vmatprep.mubr.msk.bf16.mxu1 %vm12205_vm0, %v12204_v3  ;;  %v11876_v41 = vld [vmem:[%s15311_s3 + $0x350] sm:$0xff]  }
 0x429   : > { %11101 = vmatmul.mubr.bf16.vlgmr.msra.gmra.mrb[20].mxu0 %v14288_v46  ;;  %10906 = vmatprep.subr.bf16.mxu1 %v12204_v3  ;;  %v11880_v46 = vld [vmem:[%s15311_s3 + $0x370] sm:$0xff]  }
 0x42a   : > { %11105 = vmatpush3.bf16.msra.mxu0 %v11835_v58  ;;  %11120 = vmatprep.mubr.msk.bf16.mxu0 %vm12205_vm0, %v12204_v3  ;;  %v11879_v58 = vld [vmem:[%s15311_s3 + $0x368] sm:$0xff]  }
 0x42b   : > { %11106 = vmatprep.subr.bf16.mxu0 %v12204_v3 }
 0x42c   : > { %10907 = vmatpush3.bf16.msra.mxu1 %v11836_v26  ;;  %v5771_v26 = vsel %vm771_vm1, %v5657_v4, %v13780_v35  ;;  %v11883_v35 = vld [vmem:[%s15311_s3 + $0x388] sm:$0xff]   ;;  %v11924_v4 = vld [vmem:[%s15315_s7 + $0x4] ss:$16 sps:$4 sm:$0xff]  }
 0x42d   : > { %10908 = vmatprep.subr.bf16.mxu1 %v12204_v3 }
 0x42e   : > { %11107 = vmatpush3.bf16.msra.mxu0 %v11837_v13  ;;  %v11881_v13 = vld [vmem:[%s15311_s3 + $0x378] sm:$0xff]  }
 0x42f   : > { %11108 = vmatprep.subr.bf16.mxu0 %v12204_v3 }
 0x430   : > { %10909 = vmatpush3.bf16.msra.mxu1 %v11838_v33  ;;  %v5772_v33 = vsel %vm773_vm2, %v5771_v26, %v13783_v36  ;;  %v11884_v36 = vld [vmem:[%s15311_s3 + $0x390] sm:$0xff]  }
 0x431   : > { %10910 = vmatprep.subr.bf16.mxu1 %v12204_v3  ;;  %v11940_v26 = vld [vmem:[%s15315_s7 + $0xc0] ss:$16 sps:$4 sm:$0xff]  }
 0x432   : > { %11109 = vmatpush3.bf16.msra.mxu0 %v11839_v16  ;;  %v11882_v16 = vld [vmem:[%s15311_s3 + $0x380] sm:$0xff]  }
 0x433   : > { %11110 = vmatprep.subr.bf16.mxu0 %v12204_v3 }
 0x434   : > { %10911 = vmatpush3.bf16.msra.mxu1 %v11840_v17  ;;  %v5789_v17 = vpack.c.bf16 %v5772_v33, %v5772_v33  ;;  %v11945_v33 = vld [vmem:[%s15315_s7 + $0xe4] ss:$16 sps:$4 sm:$0xff]  }
 0x435   : > { %10912 = vmatprep.subr.bf16.mxu1 %v12204_v3 }
 0x436   : > { %11111 = vmatpush3.bf16.msra.mxu0 %v11841_v18  ;;  %v11885_v18 = vld [vmem:[%s15311_s3 + $0x398] sm:$0xff]  }
 0x437   : > { %11112 = vmatprep.subr.bf16.mxu0 %v12204_v3 }
 0x438   : > { %10913 = vmatpush3.bf16.msra.mxu1 %v11842_v19  ;;  %v11886_v19 = vld [vmem:[%s15311_s3 + $0x3a0] sm:$0xff]  }
 0x439   : > { %10914 = vmatprep.subr.bf16.mxu1 %v12204_v3 }
 0x43a   : > { %11113 = vmatpush3.bf16.msra.mxu0 %v11843_v20  ;;  %v11887_v20 = vld [vmem:[%s15311_s3 + $0x3a8] sm:$0xff]  }
 0x43b   : > { %11114 = vmatprep.subr.bf16.mxu0 %v12204_v3 }
 0x43c   : > { %10915 = vmatpush3.bf16.msra.mxu1 %v11844_v21  ;;  %v11888_v21 = vld [vmem:[%s15311_s3 + $0x3b0] sm:$0xff]  }
 0x43d   : > { %10916 = vmatprep.subr.bf16.mxu1 %v12204_v3 }
 0x43e   : > { %11115 = vmatpush3.bf16.msra.mxu0 %v11845_v59  ;;  %v11889_v59 = vld [vmem:[%s15311_s3 + $0x3b8] sm:$0xff]  }
 0x43f   : > { %11116 = vmatprep.subr.bf16.mxu0 %v12204_v3 }
 0x440   : > { %10917 = vmatpush3.bf16.msra.mxu1 %v11846_v34  ;;  %v11890_v34 = vld [vmem:[%s15311_s3 + $0x3c0] sm:$0xff]  }
 0x441   : > { %10918 = vmatprep.subr.bf16.mxu1 %v12204_v3 }
 0x442   : > { %11117 = vmatpush3.bf16.msra.mxu0 %v11847_v11  ;;  %v5899_v11 = vpack.c.bf16 %v13812_v45, %v13812_v45  ;;  %v11893_v45 = vld [vmem:[%s15311_s3 + $0x3d8] sm:$0xff]  }
 0x443   : > { %11118 = vmatprep.subr.bf16.mxu0 %v12204_v3 }
 0x444   : > { %10919 = vmatpush3.bf16.msra.mxu1 %v11848_v22  ;;  %v11891_v22 = vld [vmem:[%s15311_s3 + $0x3c8] sm:$0xff]  }
 0x445   : > { %10924 = vmatprep.subr.bf16.mxu1 %v12204_v3 }
 0x446   : > { %11119 = vmatpush3.bf16.msra.mxu0 %v11849_v12  ;;  %v11892_v12 = vld [vmem:[%s15311_s3 + $0x3d0] sm:$0xff]  }
 0x447   : > { %10921 = vmatmul.mubr.bf16.vlgmr.msra.gmra.mrb[4].mxu1 %v5455_v23  ;;  %11124 = vmatprep.subr.bf16.mxu0 %v12204_v3  ;;  %v11895_v23 = vld [vmem:[%s15311_s3 + $0x3e8] sm:$0xff]  }
 0x448   : > { %10925 = vmatpush3.bf16.msra.mxu1 %v11850_v15  ;;  %10940 = vmatprep.mubr.msk.bf16.mxu1 %vm12205_vm0, %v12204_v3  ;;  %v11894_v15 = vld [vmem:[%s15311_s3 + $0x3e0] sm:$0xff]  }
 0x449   : > { %11121 = vmatmul.mubr.bf16.vlgmr.msra.gmra.mrb[20].mxu0 %v6550_v30  ;;  %10926 = vmatprep.subr.bf16.mxu1 %v12204_v3  ;;  %v11897_v30 = vld [vmem:[%s15311_s3 + $0x3f8] sm:$0xff]  }
 0x44a   : > { %11125 = vmatpush3.bf16.msra.mxu0 %v11851_v25  ;;  %11140 = vmatprep.mubr.msk.bf16.mxu0 %vm12205_vm0, %v12204_v3  ;;  %v11896_v25 = vld [vmem:[%s15311_s3 + $0x3f0] sm:$0xff]  }
 0x44b   : > { %11126 = vmatprep.subr.bf16.mxu0 %v12204_v3 }
 0x44c   : > { %10927 = vmatpush3.bf16.msra.mxu1 %v11852_v7  ;;  %v6009_v7 = vpack.c.bf16 %v13818_v28, %v13818_v28 }
 0x44d   : > { %10928 = vmatprep.subr.bf16.mxu1 %v12204_v3 }
 0x44e   : > { %11127 = vmatpush3.bf16.msra.mxu0 %v11853_v39  ;;  %v11903_v39 = vld [vmem:[%s15313_s5 + $0x1a8] sm:$0xff]  }
 0x44f   : > { %11128 = vmatprep.subr.bf16.mxu0 %v12204_v3 }
 0x450   : > { %10929 = vmatpush3.bf16.msra.mxu1 %v11854_v2  ;;  %v11904_v2 = vld [vmem:[%s15313_s5 + $0x1b0] sm:$0xff]  }
 0x451   : > { %10930 = vmatprep.subr.bf16.mxu1 %v12204_v3 }
 0x452   : > { %11129 = vmatpush3.bf16.msra.mxu0 %v11855_v27  ;;  %v11905_v27 = vld [vmem:[%s15313_s5 + $0x1b8] sm:$0xff]  }
 0x453   : > { %11130 = vmatprep.subr.bf16.mxu0 %v12204_v3 }
 0x454   : > { %10931 = vmatpush3.bf16.msra.mxu1 %v11856_v37 }
 0x455   : > { %10932 = vmatprep.subr.bf16.mxu1 %v12204_v3 }
 0x456   : > { %11131 = vmatpush3.bf16.msra.mxu0 %v11857_v38 }
 0x457   : > { %11132 = vmatprep.subr.bf16.mxu0 %v12204_v3 }
 0x458   : > { %10933 = vmatpush3.bf16.msra.mxu1 %v11858_v42 }
 0x459   : > { %10934 = vmatprep.subr.bf16.mxu1 %v12204_v3 }
 0x45a   : > { %11133 = vmatpush3.bf16.msra.mxu0 %v11859_v43 }
 0x45b   : > { %11134 = vmatprep.subr.bf16.mxu0 %v12204_v3 }
 0x45c   : > { %10935 = vmatpush3.bf16.msra.mxu1 %v11860_v24 }
 0x45d   : > { %10936 = vmatprep.subr.bf16.mxu1 %v12204_v3 }
 0x45e   : > { %11135 = vmatpush3.bf16.msra.mxu0 %v11861_v44 }
 0x45f   : > { %11136 = vmatprep.subr.bf16.mxu0 %v12204_v3 }
 0x460   : > { %10937 = vmatpush3.bf16.msra.mxu1 %v11862_v29  ;;  %v11906_v29 = vld [vmem:[%s15313_s5 + $0x1c0] sm:$0xff]  }
 0x461   : > { %10938 = vmatprep.subr.bf16.mxu1 %v12204_v3 }
 0x462   : > { %11137 = vmatpush3.bf16.msra.mxu0 %v11863_v8 }
 0x463   : > { %11138 = vmatprep.subr.bf16.mxu0 %v12204_v3 }
 0x464   : > { %10939 = vmatpush3.bf16.msra.mxu1 %v11864_v48  ;;  %v11907_v48 = vld [vmem:[%s15313_s5 + $0x1c8] sm:$0xff]  }
 0x465   : > { %10944 = vmatprep.subr.bf16.mxu1 %v12204_v3 }
 0x466   : > { %11139 = vmatpush3.bf16.msra.mxu0 %v11865_v49  ;;  %v11909_v49 = vld [vmem:[%s15313_s5 + $0x1d8] sm:$0xff]  }
 0x467   : > { %10941 = vmatmul.mubr.bf16.vlgmr.msra.gmra.mrb[4].mxu1 %v5565_v50  ;;  %11144 = vmatprep.subr.bf16.mxu0 %v12204_v3  ;;  %v11911_v50 = vld [vmem:[%s15313_s5 + $0x1e8] sm:$0xff]  }
 0x468   : > { %10945 = vmatpush3.bf16.msra.mxu1 %v11866_v32  ;;  %10960 = vmatprep.mubr.msk.bf16.mxu1 %vm12205_vm0, %v12204_v3  ;;  %v11910_v32 = vld [vmem:[%s15313_s5 + $0x1e0] sm:$0xff]  }
 0x469   : > { %11141 = vmatmul.mubr.bf16.vlgmr.msra.gmra.mrb[20].mxu0 %v6659_v54  ;;  %10946 = vmatprep.subr.bf16.mxu1 %v12204_v3  ;;  %v11912_v54 = vld [vmem:[%s15313_s5 + $0x1f0] sm:$0xff]  }
 0x46a   : > { %11145 = vmatpush3.bf16.msra.mxu0 %v11898_v56  ;;  %11160 = vmatprep.mubr.msk.bf16.mxu0 %vm12205_vm0, %v12204_v3  ;;  %v11913_v56 = vld [vmem:[%s15313_s5 + $0x1f8] sm:$0xff]  }
 0x46b   : > { %11146 = vmatprep.subr.bf16.mxu0 %v12204_v3 }
 0x46c   : > { %10947 = vmatpush3.bf16.msra.mxu1 %v11867_v57  ;;  %v11914_v57 = vld [vmem:[%s15313_s5 + $0x200] sm:$0xff]  }
 0x46d   : > { %10948 = vmatprep.subr.bf16.mxu1 %v12204_v3 }
 0x46e   : > { %11147 = vmatpush3.bf16.msra.mxu0 %v11899_v40 }
 0x46f   : > { %11148 = vmatprep.subr.bf16.mxu0 %v12204_v3 }
 0x470   : > { %10949 = vmatpush3.bf16.msra.mxu1 %v11868_v31  ;;  %v11915_v31 = vld [vmem:[%s15313_s5 + $0x208] sm:$0xff]  }
 0x471   : > { %10950 = vmatprep.subr.bf16.mxu1 %v12204_v3 }
 0x472   : > { %11149 = vmatpush3.bf16.msra.mxu0 %v11900_v53  ;;  %v11916_v53 = vld [vmem:[%s15313_s5 + $0x210] sm:$0xff]  }
 0x473   : > { %11150 = vmatprep.subr.bf16.mxu0 %v12204_v3 }
 0x474   : > { %10951 = vmatpush3.bf16.msra.mxu1 %v11869_v60  ;;  %v11917_v60 = vld [vmem:[%s15313_s5 + $0x218] sm:$0xff]  }
 0x475   : > { %10952 = vmatprep.subr.bf16.mxu1 %v12204_v3 }
 0x476   : > { %11151 = vmatpush3.bf16.msra.mxu0 %v11901_v61  ;;  %v11918_v61 = vld [vmem:[%s15313_s5 + $0x220] sm:$0xff]  }
 0x477   : > { %11152 = vmatprep.subr.bf16.mxu0 %v12204_v3 }
 0x478   : > { %10953 = vmatpush3.bf16.msra.mxu1 %v11870_v62  ;;  %v11919_v62 = vld [vmem:[%s15313_s5 + $0x228] sm:$0xff]  }
 0x479   : > { %10954 = vmatprep.subr.bf16.mxu1 %v12204_v3 }
 0x47a   : > { %11153 = vmatpush3.bf16.msra.mxu0 %v11902_v63  ;;  %v11920_v63 = vld [vmem:[%s15313_s5 + $0x230] sm:$0xff]  }
 0x47b   : > { %11154 = vmatprep.subr.bf16.mxu0 %v12204_v3 }
 0x47c   : > { %10955 = vmatpush3.bf16.msra.mxu1 %v11871_v0  ;;  %v11921_v0 = vld [vmem:[%s15313_s5 + $0x238] sm:$0xff]  }
 0x47d   : > { %10956 = vmatprep.subr.bf16.mxu1 %v12204_v3 }
 0x47e   : > { %11155 = vmatpush3.bf16.msra.mxu0 %v11903_v39  ;;  %v11958_v39 = vld [vmem:[%s15315_s7 + $0x88] ss:$16 sps:$4 sm:$0xff]  }
 0x47f   : > { %11156 = vmatprep.subr.bf16.mxu0 %v12204_v3 }
 0x480   : > { %10957 = vmatpush3.bf16.msra.mxu1 %v11872_v5  ;;  %v11922_v5 = vld [vmem:[%s15315_s7] ss:$16 sps:$4 sm:$0xff]  }
 0x481   : > { %10958 = vmatprep.subr.bf16.mxu1 %v12204_v3 }
 0x482   : > { %11157 = vmatpush3.bf16.msra.mxu0 %v11904_v2  ;;  %v11963_v2 = vld [vmem:[%s15315_s7 + $0xac] ss:$16 sps:$4 sm:$0xff]  }
 0x483   : > { %11158 = vmatprep.subr.bf16.mxu0 %v12204_v3 }
 0x484   : > { %10959 = vmatpush3.bf16.msra.mxu1 %v11873_v9  ;;  %v11927_v9 = vld [vmem:[%s15315_s7 + $0x24] ss:$16 sps:$4 sm:$0xff]  }
 0x485   : > { %10964 = vmatprep.subr.bf16.mxu1 %v12204_v3 }
 0x486   : > { %11159 = vmatpush3.bf16.msra.mxu0 %v11905_v27  ;;  %v11961_v27 = vld [vmem:[%s15315_s7 + $0xa8] ss:$16 sps:$4 sm:$0xff]  }
 0x487   : > { %10961 = vmatmul.mubr.bf16.vlgmr.msra.gmra.mrb[4].mxu1 %v5679_v14  ;;  %11164 = vmatprep.subr.bf16.mxu0 %v12204_v3  ;;  %v11933_v14 = vld [vmem:[%s15315_s7 + $0x64] ss:$16 sps:$4 sm:$0xff]  }
 0x488   : > { %10965 = vmatpush3.bf16.msra.mxu1 %v11874_v1  ;;  %10980 = vmatprep.mubr.msk.bf16.mxu1 %vm12205_vm0, %v12204_v3  ;;  %v11928_v1 = vld [vmem:[%s15315_s7 + $0x40] ss:$16 sps:$4 sm:$0xff]  }
 0x489   : > { %10966 = vmatprep.subr.bf16.mxu1 %v12204_v3 }
 0x48c   : > { %10967 = vmatpush3.bf16.msra.mxu1 %v11875_v55  ;;  %v11931_v55 = vld [vmem:[%s15315_s7 + $0x60] ss:$16 sps:$4 sm:$0xff]  }
 0x48d   : > { %10968 = vmatprep.subr.bf16.mxu1 %v12204_v3 }
 0x490   : > { %10969 = vmatpush3.bf16.msra.mxu1 %v11876_v41  ;;  %v11936_v41 = vld [vmem:[%s15315_s7 + $0x84] ss:$16 sps:$4 sm:$0xff]  }
 0x491   : > { %10970 = vmatprep.subr.bf16.mxu1 %v12204_v3 }
 0x494   : > { %10971 = vmatpush3.bf16.msra.mxu1 %v11877_v52  ;;  %v11934_v52 = vld [vmem:[%s15315_s7 + $0x80] ss:$16 sps:$4 sm:$0xff]  }
 0x495   : > { %10972 = vmatprep.subr.bf16.mxu1 %v12204_v3 }
 0x498   : > { %10973 = vmatpush3.bf16.msra.mxu1 %v11878_v51  ;;  %v11937_v51 = vld [vmem:[%s15315_s7 + $0xa0] ss:$16 sps:$4 sm:$0xff]  }
 0x499   : > { %10974 = vmatprep.subr.bf16.mxu1 %v12204_v3 }
 0x49c   : > { %10975 = vmatpush3.bf16.msra.mxu1 %v11879_v58  ;;  %v11939_v58 = vld [vmem:[%s15315_s7 + $0xa4] ss:$16 sps:$4 sm:$0xff]  }
 0x49d   : > { %10976 = vmatprep.subr.bf16.mxu1 %v12204_v3 }
 0x4a0   : > { %10977 = vmatpush3.bf16.msra.mxu1 %v11880_v46  ;;  %v11942_v46 = vld [vmem:[%s15315_s7 + $0xc4] ss:$16 sps:$4 sm:$0xff]  }
 0x4a1   : > { %10978 = vmatprep.subr.bf16.mxu1 %v12204_v3 }
 0x4a4   : > { %10979 = vmatpush3.bf16.msra.mxu1 %v11881_v13  ;;  %v12206_v13 = vmov 0  }
 0x4a5   : > { %10984 = vmatprep.subr.bf16.mxu1 %v12204_v3 }
 0x4a7   : > { %10981 = vmatmul.mubr.bf16.vlgmr.msra.gmra.mrb[4].mxu1 %v5789_v17  ;;  %v11948_v17 = vld [vmem:[%s15315_s7 + $0xc] ss:$16 sps:$4 sm:$0xff]  }
 0x4a8   : > { %10985 = vmatpush3.bf16.msra.mxu1 %v11882_v16  ;;  %11000 = vmatprep.mubr.msk.bf16.mxu1 %vm12205_vm0, %v12204_v3  ;;  %v11943_v16 = vld [vmem:[%s15315_s7 + $0xe0] ss:$16 sps:$4 sm:$0xff]  }
 0x4a9   : > { %10986 = vmatprep.subr.bf16.mxu1 %v12204_v3 }
 0x4ac   : > { %10987 = vmatpush3.bf16.msra.mxu1 %v11883_v35  ;;  %v6101_v35 = vld [vmem:[%s15314_s6] sm:$0x1] }
 0x4ad   : > { %10988 = vmatprep.subr.bf16.mxu1 %v12204_v3 }
 0x4b0   : > { %10989 = vmatpush3.bf16.msra.mxu1 %v11884_v36 }
 0x4b1   : > { %10990 = vmatprep.subr.bf16.mxu1 %v12204_v3 }
 0x4b4   : > { %10991 = vmatpush3.bf16.msra.mxu1 %v11885_v18 }
 0x4b5   : > { %10992 = vmatprep.subr.bf16.mxu1 %v12204_v3 }
 0x4b8   : > { %10993 = vmatpush3.bf16.msra.mxu1 %v11886_v19 }
 0x4b9   : > { %10994 = vmatprep.subr.bf16.mxu1 %v12204_v3 }
 0x4bc   : > { %10995 = vmatpush3.bf16.msra.mxu1 %v11887_v20 }
 0x4bd   : > { %10996 = vmatprep.subr.bf16.mxu1 %v12204_v3 }
 0x4c0   : > { %10997 = vmatpush3.bf16.msra.mxu1 %v11888_v21 }
 0x4c1   : > { %10998 = vmatprep.subr.bf16.mxu1 %v12204_v3 }
 0x4c4   : > { %10999 = vmatpush3.bf16.msra.mxu1 %v11889_v59 }
 0x4c5   : > { %11004 = vmatprep.subr.bf16.mxu1 %v12204_v3 }
 0x4c7   : > { %11001 = vmatmul.mubr.bf16.vlgmr.msra.gmra.mrb[4].mxu1 %v5899_v11 }
 0x4c8   : > { %11005 = vmatpush3.bf16.msra.mxu1 %v11890_v34  ;;  %11020 = vmatprep.mubr.msk.bf16.mxu1 %vm12205_vm0, %v12204_v3  ;;  %v11946_v34 = vld [vmem:[%s15315_s7 + $0x8] ss:$16 sps:$4 sm:$0xff]  }
 0x4c9   : > { %11006 = vmatprep.subr.bf16.mxu1 %v12204_v3 }
 0x4cc   : > { %11007 = vmatpush3.bf16.msra.mxu1 %v11891_v22 }
 0x4cd   : > { %11008 = vmatprep.subr.bf16.mxu1 %v12204_v3 }
 0x4d0   : > { %11009 = vmatpush3.bf16.msra.mxu1 %v11892_v12  ;;  %v11951_v12 = vld [vmem:[%s15315_s7 + $0x2c] ss:$16 sps:$4 sm:$0xff]  }
 0x4d1   : > { %11010 = vmatprep.subr.bf16.mxu1 %v12204_v3 }
 0x4d4   : > { %11011 = vmatpush3.bf16.msra.mxu1 %v11893_v45  ;;  %v11949_v45 = vld [vmem:[%s15315_s7 + $0x28] ss:$16 sps:$4 sm:$0xff]  }
 0x4d5   : > { %11012 = vmatprep.subr.bf16.mxu1 %v12204_v3 }
 0x4d8   : > { %11013 = vmatpush3.bf16.msra.mxu1 %v11894_v15  ;;  %v11954_v15 = vld [vmem:[%s15315_s7 + $0x4c] ss:$16 sps:$4 sm:$0xff]  }
 0x4d9   : > { %11014 = vmatprep.subr.bf16.mxu1 %v12204_v3 }
 0x4dc   : > { %11015 = vmatpush3.bf16.msra.mxu1 %v11895_v23  ;;  %v11952_v23 = vld [vmem:[%s15315_s7 + $0x48] ss:$16 sps:$4 sm:$0xff]  }
 0x4dd   : > { %11016 = vmatprep.subr.bf16.mxu1 %v12204_v3 }
 0x4e0   : > { %11017 = vmatpush3.bf16.msra.mxu1 %v11896_v25  ;;  %v11957_v25 = vld [vmem:[%s15315_s7 + $0x6c] ss:$16 sps:$4 sm:$0xff]  }
 0x4e1   : > { %11018 = vmatprep.subr.bf16.mxu1 %v12204_v3 }
 0x4e4   : > { %11019 = vmatpush3.bf16.msra.mxu1 %v11897_v30  ;;  %v11955_v30 = vld [vmem:[%s15315_s7 + $0x68] ss:$16 sps:$4 sm:$0xff]  }
 0x4e7   : > { %11021 = vmatmul.mubr.bf16.vlgmr.msra.gmra.mrb[4].mxu1 %v6009_v7  ;;  %v11960_v7 = vld [vmem:[%s15315_s7 + $0x8c] ss:$16 sps:$4 sm:$0xff]  }
 0x5ba   : > { %v6092_v28 = vpop.f32.mrb[4].mxu1 }
 0x5bb   : > { %v11206_v37 = vadd.f32 %v14042_v47, %v6092_v28  ;;  %v11022_v38 = vpop.f32.mrb[5].mxu1  ;;  %v11908_v47 = vld [vmem:[%s15313_s5 + $0x1d0] sm:$0xff]   ;;  %v11966_v28 = vld [vmem:[%s15315_s7 + $0xcc] ss:$16 sps:$4 sm:$0xff]  }
 0x5bc   : > { %v6095_v42 = vpop.f32.mrb[6].mxu1  ;;  %v11969_v38 = vld [vmem:[%s15315_s7 + $0xec] ss:$16 sps:$4 sm:$0xff]  }
 0x5bd   : > { %v6099_v43 = vmax.f32 %v11206_v37, 0.0  ;;  %v11023_v24 = vpop.f32.mrb[7].mxu1  ;;  %v11964_v37 = vld [vmem:[%s15315_s7 + $0xc8] ss:$16 sps:$4 sm:$0xff]  }
 0x5be   : > { %v11967_v42 = vld [vmem:[%s15315_s7 + $0xe8] ss:$16 sps:$4 sm:$0xff]  }
 0x5bf   : > { %6100 = vst [vmem:[#allocation3 + $0x6] sm:$0x7] %v6099_v43  ;;  %v11972_v43 = vld [vmem:[%s15317_s9 + $0x4] ss:$8 sps:$4 sm:$0xff]   ;;  %v11970_v24 = vld [vmem:[%s15317_s9] ss:$8 sps:$4 sm:$0xff]  }
 0x5c6   : > { %v6750_v44 = vld [vmem:[#allocation3 + $0x6] sm:$0x7] }
 0x5c7   : > { %v6767_v8 = vpack.c.bf16 %v6750_v44, %v6750_v44  ;;  %v11975_v44 = vld [vmem:[%s15317_s9 + $0x14] ss:$8 sps:$4 sm:$0xff]  }
 0x5c9   : > { %11161 = vmatmul.mubr.bf16.vlgmr.msra.gmra.mrb[20].mxu0 %v6767_v8  ;;  %v6874_v40 = vshrl.u32 %v6767_v8, 16  ;;  %v6983_v6 = vrot.slane %v6767_v8, 1  ;;  %v11978_v8 = vld [vmem:[%s15317_s9 + $0x24] ss:$8 sps:$4 sm:$0xff]  }
 0x5ca   : > { %11165 = vmatpush3.bf16.msra.mxu0 %v11906_v29  ;;  %11180 = vmatprep.mubr.msk.bf16.mxu0 %vm12205_vm0, %v12204_v3  ;;  %v11973_v29 = vld [vmem:[%s15317_s9 + $0x10] ss:$8 sps:$4 sm:$0xff]  }
 0x5cb   : > { %11166 = vmatprep.subr.bf16.mxu0 %v12204_v3 }
 0x5ce   : > { %11167 = vmatpush3.bf16.msra.mxu0 %v11907_v48  ;;  %v11976_v48 = vld [vmem:[%s15317_s9 + $0x20] ss:$8 sps:$4 sm:$0xff]  }
 0x5cf   : > { %11168 = vmatprep.subr.bf16.mxu0 %v12204_v3 }
 0x5d2   : > { %11169 = vmatpush3.bf16.msra.mxu0 %v11908_v47  ;;  %v11981_v47 = vld [vmem:[%s15317_s9 + $0x34] ss:$8 sps:$4 sm:$0xff]  }
 0x5d3   : > { %11170 = vmatprep.subr.bf16.mxu0 %v12204_v3 }
 0x5d6   : > { %11171 = vmatpush3.bf16.msra.mxu0 %v11909_v49  ;;  %v11979_v49 = vld [vmem:[%s15317_s9 + $0x30] ss:$8 sps:$4 sm:$0xff]  }
 0x5d7   : > { %11172 = vmatprep.subr.bf16.mxu0 %v12204_v3 }
 0x5da   : > { %11173 = vmatpush3.bf16.msra.mxu0 %v11910_v32  ;;  %v11982_v32 = vld [vmem:[%s15317_s9 + $0x40] ss:$8 sps:$4 sm:$0xff]  }
 0x5db   : > { %11174 = vmatprep.subr.bf16.mxu0 %v12204_v3 }
 0x5de   : > { %11175 = vmatpush3.bf16.msra.mxu0 %v11911_v50  ;;  %v11984_v50 = vld [vmem:[%s15317_s9 + $0x44] ss:$8 sps:$4 sm:$0xff]  }
 0x5df   : > { %11176 = vmatprep.subr.bf16.mxu0 %v12204_v3 }
 0x5e2   : > { %11177 = vmatpush3.bf16.msra.mxu0 %v11912_v54  ;;  %v11987_v54 = vld [vmem:[%s15317_s9 + $0x54] ss:$8 sps:$4 sm:$0xff]  }
 0x5e3   : > { %11178 = vmatprep.subr.bf16.mxu0 %v12204_v3 }
 0x5e6   : > { %11179 = vmatpush3.bf16.msra.mxu0 %v11913_v56  ;;  %v11985_v56 = vld [vmem:[%s15317_s9 + $0x50] ss:$8 sps:$4 sm:$0xff]  }
 0x5e7   : > { %11184 = vmatprep.subr.bf16.mxu0 %v12204_v3 }
 0x5e9   : > { %11181 = vmatmul.mubr.bf16.vlgmr.msra.gmra.mrb[20].mxu0 %v6874_v40  ;;  %v11988_v40 = vld [vmem:[%s15317_s9 + $0x60] ss:$8 sps:$4 sm:$0xff]  }
 0x5ea   : > { %11185 = vmatpush3.bf16.msra.mxu0 %v11914_v57  ;;  %11200 = vmatprep.mubr.msk.bf16.mxu0 %vm12205_vm0, %v12204_v3  ;;  %v11990_v57 = vld [vmem:[%s15317_s9 + $0x64] ss:$8 sps:$4 sm:$0xff]  }
 0x5eb   : > { %11186 = vmatprep.subr.bf16.mxu0 %v12204_v3 }
 0x5ee   : > { %11187 = vmatpush3.bf16.msra.mxu0 %v11915_v31  ;;  %v11993_v31 = vld [vmem:[%s15317_s9 + $0x74] ss:$8 sps:$4 sm:$0xff]  }
 0x5ef   : > { %11188 = vmatprep.subr.bf16.mxu0 %v12204_v3 }
 0x5f2   : > { %11189 = vmatpush3.bf16.msra.mxu0 %v11916_v53  ;;  %v11991_v53 = vld [vmem:[%s15317_s9 + $0x70] ss:$8 sps:$4 sm:$0xff]  }
 0x5f3   : > { %11190 = vmatprep.subr.bf16.mxu0 %v12204_v3 }
 0x5f6   : > { %11191 = vmatpush3.bf16.msra.mxu0 %v11917_v60  ;;  %v11996_v60 = vld [vmem:[%s15317_s9 + $0x84] ss:$8 sps:$4 sm:$0xff]  }
 0x5f7   : > { %11192 = vmatprep.subr.bf16.mxu0 %v12204_v3 }
 0x5fa   : > { %11193 = vmatpush3.bf16.msra.mxu0 %v11918_v61  ;;  %v11994_v61 = vld [vmem:[%s15317_s9 + $0x80] ss:$8 sps:$4 sm:$0xff]  }
 0x5fb   : > { %11194 = vmatprep.subr.bf16.mxu0 %v12204_v3 }
 0x5fe   : > { %11195 = vmatpush3.bf16.msra.mxu0 %v11919_v62  ;;  %v11999_v62 = vld [vmem:[%s15317_s9 + $0x94] ss:$8 sps:$4 sm:$0xff]  }
 0x5ff   : > { %11196 = vmatprep.subr.bf16.mxu0 %v12204_v3 }
 0x602   : > { %11197 = vmatpush3.bf16.msra.mxu0 %v11920_v63  ;;  %v11997_v63 = vld [vmem:[%s15317_s9 + $0x90] ss:$8 sps:$4 sm:$0xff]  }
 0x603   : > { %11198 = vmatprep.subr.bf16.mxu0 %v12204_v3  ;;  %v11925_v3 = vld [vmem:[%s15315_s7 + $0x20] ss:$16 sps:$4 sm:$0xff]  }
 0x606   : > { %11199 = vmatpush3.bf16.msra.mxu0 %v11921_v0  ;;  %v12002_v0 = vld [vmem:[%s15317_s9 + $0xa4] ss:$8 sps:$4 sm:$0xff]  }
 0x607   : > { %7271 = vmatprep.subr.bf16.mxu0 %v11924_v4  ;;  %v12000_v4 = vld [vmem:[%s15317_s9 + $0xa0] ss:$8 sps:$4 sm:$0xff]  }
 0x609   : > { %11201 = vmatmul.mubr.bf16.vlgmr.msra.gmra.mrb[20].mxu0 %v6983_v6  ;;  %v12003_v6 = vld [vmem:[%s15317_s9 + $0xb0] ss:$8 sps:$4 sm:$0xff]  }
 0x60a   : > { %7272 = vmatpush1.bf16.msra.mxu0 %v11922_v5  ;;  %7303 = vmatprep.mubr.bf16.mxu0 %v12206_v13  ;;  %v12005_v5 = vld [vmem:[%s15317_s9 + $0xb4] ss:$8 sps:$4 sm:$0xff]  }
 0x60b   : > { %7273 = vmatprep.subr.bf16.mxu0 %v11927_v9  ;;  %v12008_v9 = vld [vmem:[%s15317_s9 + $0xc4] ss:$8 sps:$4 sm:$0xff]  }
 0x60e   : > { %7274 = vmatpush1.bf16.msra.mxu0 %v11925_v3  ;;  %v12006_v3 = vld [vmem:[%s15317_s9 + $0xc0] ss:$8 sps:$4 sm:$0xff]  }
 0x60f   : > { %7275 = vmatprep.subr.bf16.mxu0 %v11930_v10  ;;  %v12011_v10 = vld [vmem:[%s15317_s9 + $0xd4] ss:$8 sps:$4 sm:$0xff]  }
 0x612   : > { %7276 = vmatpush1.bf16.msra.mxu0 %v11928_v1  ;;  %v12009_v1 = vld [vmem:[%s15317_s9 + $0xd0] ss:$8 sps:$4 sm:$0xff]  }
 0x613   : > { %7277 = vmatprep.subr.bf16.mxu0 %v11933_v14  ;;  %v12014_v14 = vld [vmem:[%s15317_s9 + $0xe4] ss:$8 sps:$4 sm:$0xff]  }
 0x616   : > { %7278 = vmatpush1.bf16.msra.mxu0 %v11931_v55  ;;  %v12012_v55 = vld [vmem:[%s15317_s9 + $0xe0] ss:$8 sps:$4 sm:$0xff]  }
 0x617   : > { %7279 = vmatprep.subr.bf16.mxu0 %v11936_v41  ;;  %v12017_v41 = vld [vmem:[%s15317_s9 + $0xf4] ss:$8 sps:$4 sm:$0xff]  }
 0x61a   : > { %7280 = vmatpush1.bf16.msra.mxu0 %v11934_v52  ;;  %v12015_v52 = vld [vmem:[%s15317_s9 + $0xf0] ss:$8 sps:$4 sm:$0xff]  }
 0x61b   : > { %7281 = vmatprep.subr.bf16.mxu0 %v11939_v58  ;;  %v12069_v58 = vld [vmem:[%s15319_s11 + $0x8] ss:$16 sps:$4 sm:$0xff]  }
 0x61e   : > { %7282 = vmatpush1.bf16.msra.mxu0 %v11937_v51  ;;  %v12020_v51 = vld [vmem:[%s15317_s9 + $0x104] ss:$8 sps:$4 sm:$0xff]  }
 0x61f   : > { %7283 = vmatprep.subr.bf16.mxu0 %v11942_v46  ;;  %v12071_v46 = vld [vmem:[%s15319_s11 + $0xc] ss:$16 sps:$4 sm:$0xff]  }
 0x620   : > { %8338 = vmatprep.subr.bf16.mxu1 %v12071_v46  ;;  %v12029_v46 = vld [vmem:[%s15317_s9 + $0x134] ss:$8 sps:$4 sm:$0xff]  }
 0x621   : > { %8339 = vmatpush1.bf16.msra.mxu1 %v12069_v58  ;;  %v12024_v58 = vld [vmem:[%s15317_s9 + $0x120] ss:$8 sps:$4 sm:$0xff]  }
 0x622   : > { %7284 = vmatpush1.bf16.msra.mxu0 %v11940_v26  ;;  %v12077_v26 = vld [vmem:[%s15319_s11 + $0x2c] ss:$16 sps:$4 sm:$0xff]  }
 0x623   : > { %7285 = vmatprep.subr.bf16.mxu0 %v11945_v33  ;;  %8340 = vmatprep.subr.bf16.mxu1 %v12077_v26  ;;  %v12083_v33 = vld [vmem:[%s15319_s11 + $0x4c] ss:$16 sps:$4 sm:$0xff]   ;;  %v12027_v26 = vld [vmem:[%s15317_s9 + $0x130] ss:$8 sps:$4 sm:$0xff]  }
 0x626   : > { %7286 = vmatpush1.bf16.msra.mxu0 %v11943_v16  ;;  %v12081_v16 = vld [vmem:[%s15319_s11 + $0x48] ss:$16 sps:$4 sm:$0xff]  }
 0x627   : > { %7312 = vmatprep.subr.bf16.mxu0 %v11948_v17  ;;  %v12089_v17 = vld [vmem:[%s15319_s11 + $0x6c] ss:$16 sps:$4 sm:$0xff]  }
 0x6dc   : > { %v7067_v36 = vpop.f32.mrb[20].mxu0 }
 0x6dd   : > { %v11207_v18 = vadd.f32 %v7067_v36, %v6101_v35  ;;  %v11202_v19 = vpop.f32.mrb[21].mxu0  ;;  %v12087_v35 = vld [vmem:[%s15319_s11 + $0x68] ss:$16 sps:$4 sm:$0xff]  }
 0x6de   : > { %v7070_v20 = vpop.f32.mrb[22].mxu0  ;;  %v12095_v19 = vld [vmem:[%s15319_s11 + $0x8c] ss:$16 sps:$4 sm:$0xff]  }
 0x6df   : > { %v7074_v21 = vmax.f32 %v11207_v18, 0.0  ;;  %v11203_v59 = vpop.f32.mrb[23].mxu0 }
 0x6e1   : > { %7075 = vst [vmem:[#allocation4] sm:$0x1] %v7074_v21 }
 0x6e8   : > { %v7077_v11 = vld [vmem:[#allocation4] sm:$0x1] }
 0x6e9   : > { %v7078_v22 = vpack.c.bf16 %v7077_v11, %v7077_v11  ;;  %v12101_v11 = vld [vmem:[%s15319_s11 + $0xac] ss:$16 sps:$4 sm:$0xff]  }
 0x6eb   : > { %7304 = vmatmul.mubr.bf16.vlgmr.msra.gmra.mrb[24].mxu0 %v7078_v22 }
 0x6ec   : > { %7313 = vmatpush1.bf16.msra.mxu0 %v11946_v34  ;;  %7344 = vmatprep.mubr.bf16.mxu0 %v12206_v13  ;;  %v12075_v13 = vld [vmem:[%s15319_s11 + $0x28] ss:$16 sps:$4 sm:$0xff]  }
 0x6ed   : > { %7314 = vmatprep.subr.bf16.mxu0 %v11951_v12  ;;  %8341 = vmatpush1.bf16.msra.mxu1 %v12075_v13  ;;  %v12093_v34 = vld [vmem:[%s15319_s11 + $0x88] ss:$16 sps:$4 sm:$0xff]   ;;  %v12107_v12 = vld [vmem:[%s15319_s11 + $0xcc] ss:$16 sps:$4 sm:$0xff]  }
 0x6ee   : > { %8342 = vmatprep.subr.bf16.mxu1 %v12083_v33  ;;  %v12032_v13 = vld [vmem:[%s15317_s9 + $0x144] ss:$8 sps:$4 sm:$0xff]   ;;  %v12030_v33 = vld [vmem:[%s15317_s9 + $0x140] ss:$8 sps:$4 sm:$0xff]  }
 0x6f0   : > { %7315 = vmatpush1.bf16.msra.mxu0 %v11949_v45  ;;  %v12105_v45 = vld [vmem:[%s15319_s11 + $0xc8] ss:$16 sps:$4 sm:$0xff]  }
 0x6f1   : > { %7316 = vmatprep.subr.bf16.mxu0 %v11954_v15  ;;  %8343 = vmatpush1.bf16.msra.mxu1 %v12081_v16  ;;  %v12113_v15 = vld [vmem:[%s15319_s11 + $0xec] ss:$16 sps:$4 sm:$0xff]  }
 0x6f2   : > { %8344 = vmatprep.subr.bf16.mxu1 %v12089_v17  ;;  %v12035_v16 = vld [vmem:[%s15317_s9 + $0x154] ss:$8 sps:$4 sm:$0xff]   ;;  %v12033_v17 = vld [vmem:[%s15317_s9 + $0x150] ss:$8 sps:$4 sm:$0xff]  }
 0x6f4   : > { %7317 = vmatpush1.bf16.msra.mxu0 %v11952_v23  ;;  %v12111_v23 = vld [vmem:[%s15319_s11 + $0xe8] ss:$16 sps:$4 sm:$0xff]  }
 0x6f5   : > { %7318 = vmatprep.subr.bf16.mxu0 %v11957_v25  ;;  %8345 = vmatpush1.bf16.msra.mxu1 %v12087_v35  ;;  %v12119_v25 = vld [vmem:[%s15319_s11 + $0x10c] ss:$16 sps:$4 sm:$0xff]  }
 0x6f6   : > { %8346 = vmatprep.subr.bf16.mxu1 %v12095_v19  ;;  %v12038_v35 = vld [vmem:[%s15317_s9 + $0x164] ss:$8 sps:$4 sm:$0xff]   ;;  %v12039_v19 = vld [vmem:[%s15317_s9 + $0x170] ss:$8 sps:$4 sm:$0xff]  }
 0x6f8   : > { %7319 = vmatpush1.bf16.msra.mxu0 %v11955_v30  ;;  %v12117_v30 = vld [vmem:[%s15319_s11 + $0x108] ss:$16 sps:$4 sm:$0xff]  }
 0x6f9   : > { %7320 = vmatprep.subr.bf16.mxu0 %v11960_v7  ;;  %8347 = vmatpush1.bf16.msra.mxu1 %v12093_v34  ;;  %v12125_v7 = vld [vmem:[%s15319_s11 + $0x12c] ss:$16 sps:$4 sm:$0xff]   ;;  %v12045_v34 = vld [vmem:[%s15317_s9 + $0x190] ss:$8 sps:$4 sm:$0xff]  }
 0x6fa   : > { %8348 = vmatprep.subr.bf16.mxu1 %v12101_v11  ;;  %v12050_v11 = vld [vmem:[%s15317_s9 + $0x1a4] ss:$8 sps:$4 sm:$0xff]  }
 0x6fc   : > { %7321 = vmatpush1.bf16.msra.mxu0 %v11958_v39  ;;  %v12123_v39 = vld [vmem:[%s15319_s11 + $0x128] ss:$16 sps:$4 sm:$0xff]  }
 0x6fd   : > { %7322 = vmatprep.subr.bf16.mxu0 %v11963_v2  ;;  %v12207_v2 = vmov 1966171168  }
 0x700   : > { %7323 = vmatpush1.bf16.msra.mxu0 %v11961_v27  ;;  %v7360_v27 = vunpack.c.l.s4 %v12207_v2  ;;  %v12065_v2 = vld [vmem:[%s15317_s9 + $0x1f4] ss:$8 sps:$4 sm:$0xff]  }
 0x701   : > { %7324 = vmatprep.subr.bf16.mxu0 %v11966_v28  ;;  %v7362_v28 = vlaneseq }
 0x704   : > { %7325 = vmatpush1.bf16.msra.mxu0 %v11964_v37  ;;  %v12131_v37 = vld [vmem:[%s15319_s11 + $0x14c] ss:$16 sps:$4 sm:$0xff]  }
 0x705   : > { %7326 = vmatprep.subr.bf16.mxu0 %v11969_v38  ;;  %v12129_v38 = vld [vmem:[%s15319_s11 + $0x148] ss:$16 sps:$4 sm:$0xff]  }
 0x708   : > { %7327 = vmatpush1.bf16.msra.mxu0 %v11967_v42  ;;  %v7361_v42 = vunpack.c.0.s8 %v7360_v27 }
 0x709   : > { %7805 = vmatprep.subr.bf16.mxu0 %v11972_v43  ;;  %v14942_v43 = vshrl.u32 %v7362_v28, 7  ;;  %v12063_v28 = vld [vmem:[%s15317_s9 + $0x1f0] ss:$8 sps:$4 sm:$0xff]  }
 0x70b   : > { %7345 = vmatmul.mubr.bf16.vlgmr.msra.gmra.mrb[28].mxu0 %v7078_v22  ;;  %v12099_v22 = vld [vmem:[%s15319_s11 + $0xa8] ss:$16 sps:$4 sm:$0xff]   ;;  %v7395_v27 = vsub.s32 2, %v14942_v43 }
 0x70c   : > { %7806 = vmatpush1.bf16.msra.mxu0 %v11970_v24  ;;  %8349 = vmatpush1.bf16.msra.mxu1 %v12099_v22  ;;  %v12137_v24 = vld [vmem:[%s15319_s11 + $0x16c] ss:$16 sps:$4 sm:$0xff]   ;;  %v12048_v22 = vld [vmem:[%s15317_s9 + $0x1a0] ss:$8 sps:$4 sm:$0xff]  }
 0x70d   : > { %7807 = vmatprep.subr.bf16.mxu0 %v11975_v44  ;;  %8350 = vmatprep.subr.bf16.mxu1 %v12107_v12  ;;  %v12135_v44 = vld [vmem:[%s15319_s11 + $0x168] ss:$16 sps:$4 sm:$0xff]   ;;  %v12053_v12 = vld [vmem:[%s15317_s9 + $0x1b4] ss:$8 sps:$4 sm:$0xff]  }
 0x710   : > { %7808 = vmatpush1.bf16.msra.mxu0 %v11973_v29  ;;  %8351 = vmatpush1.bf16.msra.mxu1 %v12105_v45  ;;  %v7364_v29 = vsub.s32 %v7361_v42, %v14942_v43  ;;  %v12051_v45 = vld [vmem:[%s15317_s9 + $0x1b0] ss:$8 sps:$4 sm:$0xff]  }
 0x711   : > { %7809 = vmatprep.subr.bf16.mxu0 %v11978_v8  ;;  %8352 = vmatprep.subr.bf16.mxu1 %v12113_v15  ;;  %v12056_v15 = vld [vmem:[%s15317_s9 + $0x1c4] ss:$8 sps:$4 sm:$0xff]   ;;  %v12066_v42 = vld [vmem:[%s15319_s11] ss:$16 sps:$4 sm:$0xff]  }
 0x714   : > { %7810 = vmatpush1.bf16.msra.mxu0 %v11976_v48  ;;  %8353 = vmatpush1.bf16.msra.mxu1 %v12111_v23  ;;  %v12054_v23 = vld [vmem:[%s15317_s9 + $0x1c0] ss:$8 sps:$4 sm:$0xff]  }
 0x715   : > { %7811 = vmatprep.subr.bf16.mxu0 %v11981_v47  ;;  %8354 = vmatprep.subr.bf16.mxu1 %v12119_v25  ;;  %v12143_v47 = vld [vmem:[%s15319_s11 + $0x18c] ss:$16 sps:$4 sm:$0xff]  }
 0x716   : > { %v12059_v25 = vld [vmem:[%s15317_s9 + $0x1d4] ss:$8 sps:$4 sm:$0xff]  }
 0x718   : > { %7812 = vmatpush1.bf16.msra.mxu0 %v11979_v49  ;;  %8355 = vmatpush1.bf16.msra.mxu1 %v12117_v30  ;;  %v12057_v30 = vld [vmem:[%s15317_s9 + $0x1d0] ss:$8 sps:$4 sm:$0xff]  }
 0x719   : > { %7813 = vmatprep.subr.bf16.mxu0 %v11984_v50  ;;  %8356 = vmatprep.subr.bf16.mxu1 %v12125_v7  ;;  %v12062_v7 = vld [vmem:[%s15317_s9 + $0x1e4] ss:$8 sps:$4 sm:$0xff]  }
 0x71c   : > { %7814 = vmatpush1.bf16.msra.mxu0 %v11982_v32  ;;  %8357 = vmatpush1.bf16.msra.mxu1 %v12123_v39  ;;  %v12060_v39 = vld [vmem:[%s15317_s9 + $0x1e0] ss:$8 sps:$4 sm:$0xff]  }
 0x71d   : > { %7815 = vmatprep.subr.bf16.mxu0 %v11987_v54  ;;  %8358 = vmatprep.subr.bf16.mxu1 %v12131_v37  ;;  %v12141_v54 = vld [vmem:[%s15319_s11 + $0x188] ss:$16 sps:$4 sm:$0xff]  }
 0x720   : > { %7816 = vmatpush1.bf16.msra.mxu0 %v11985_v56  ;;  %8359 = vmatpush1.bf16.msra.mxu1 %v12129_v38  ;;  %v12068_v38 = vld [vmem:[%s15319_s11 + $0x4] ss:$16 sps:$4 sm:$0xff]  }
 0x721   : > { %7817 = vmatprep.subr.bf16.mxu0 %v11990_v57  ;;  %8360 = vmatprep.subr.bf16.mxu1 %v12137_v24 }
 0x724   : > { %7818 = vmatpush1.bf16.msra.mxu0 %v11988_v40  ;;  %8361 = vmatpush1.bf16.msra.mxu1 %v12135_v44  ;;  %v12149_v40 = vld [vmem:[%s15319_s11 + $0x1ac] ss:$16 sps:$4 sm:$0xff]   ;;  %v12074_v44 = vld [vmem:[%s15319_s11 + $0x24] ss:$16 sps:$4 sm:$0xff]  }
 0x725   : > { %7819 = vmatprep.subr.bf16.mxu0 %v11993_v31  ;;  %8362 = vmatprep.subr.bf16.mxu1 %v12143_v47  ;;  %v12086_v47 = vld [vmem:[%s15319_s11 + $0x64] ss:$16 sps:$4 sm:$0xff]  }
 0x728   : > { %7820 = vmatpush1.bf16.msra.mxu0 %v11991_v53  ;;  %v7076_v53 = vld [vmem:[%s15316_s8] sm:$0xf]  ;;  %8363 = vmatpush1.bf16.msra.mxu1 %v12141_v54  ;;  %v12098_v54 = vld [vmem:[%s15319_s11 + $0xa4] ss:$16 sps:$4 sm:$0xff]  }
 0x729   : > { %7821 = vmatprep.subr.bf16.mxu0 %v11996_v60  ;;  %v12147_v60 = vld [vmem:[%s15319_s11 + $0x1a8] ss:$16 sps:$4 sm:$0xff]   ;;  %8364 = vmatprep.subr.bf16.mxu1 %v12149_v40  ;;  %v12102_v40 = vld [vmem:[%s15319_s11 + $0xc0] ss:$16 sps:$4 sm:$0xff]  }
 0x72c   : > { %7822 = vmatpush1.bf16.msra.mxu0 %v11994_v61  ;;  %8365 = vmatpush1.bf16.msra.mxu1 %v12147_v60  ;;  %v12116_v60 = vld [vmem:[%s15319_s11 + $0x104] ss:$16 sps:$4 sm:$0xff]  }
 0x72d   : > { %7823 = vmatprep.subr.bf16.mxu0 %v11999_v62 }
 0x730   : > { %7824 = vmatpush1.bf16.msra.mxu0 %v11997_v63  ;;  %v14967_v63 = vsub.s32 1, %v14942_v43 }
 0x731   : > { %7825 = vmatprep.subr.bf16.mxu0 %v12002_v0  ;;  %v14970_v0 = vsub.s32 0, %v14942_v43 }
 0x734   : > { %7826 = vmatpush1.bf16.msra.mxu0 %v12000_v4  ;;  %v7399_v4 = vsub.s32 3, %v14942_v43 }
 0x735   : > { %7827 = vmatprep.subr.bf16.mxu0 %v12005_v5 }
 0x738   : > { %7828 = vmatpush1.bf16.msra.mxu0 %v12003_v6 }
 0x739   : > { %7829 = vmatprep.subr.bf16.mxu0 %v12008_v9 }
 0x73c   : > { %7830 = vmatpush1.bf16.msra.mxu0 %v12006_v3 }
 0x73d   : > { %7831 = vmatprep.subr.bf16.mxu0 %v12011_v10 }
 0x740   : > { %7832 = vmatpush1.bf16.msra.mxu0 %v12009_v1  ;;  %v12018_v1 = vld [vmem:[%s15317_s9 + $0x100] ss:$8 sps:$4 sm:$0xff]  }
 0x741   : > { %7833 = vmatprep.subr.bf16.mxu0 %v12014_v14 }
 0x744   : > { %7834 = vmatpush1.bf16.msra.mxu0 %v12012_v55  ;;  %v12023_v55 = vld [vmem:[%s15317_s9 + $0x114] ss:$8 sps:$4 sm:$0xff]  }
 0x745   : > { %7835 = vmatprep.subr.bf16.mxu0 %v12017_v41 }
 0x748   : > { %7836 = vmatpush1.bf16.msra.mxu0 %v12015_v52  ;;  %v12021_v52 = vld [vmem:[%s15317_s9 + $0x110] ss:$8 sps:$4 sm:$0xff]  }
 0x749   : > { %7846 = vmatprep.subr.bf16.mxu0 %v12020_v51  ;;  %v12026_v51 = vld [vmem:[%s15317_s9 + $0x124] ss:$8 sps:$4 sm:$0xff]  }
 0x7be   : > { %v7305_v36 = vpop.f32.mrb[24].mxu0 }
 0x7bf   : > { %v7307_v18 = vpop.f32.mrb[25].mxu0 }
 0x7c0   : > { %v7357_v20 = vcombine.low %v7305_v36, %v7307_v18  ;;  %v7309_v21 = vpop.f32.mrb[26].mxu0  ;;  %v12036_v36 = vld [vmem:[%s15317_s9 + $0x160] ss:$8 sps:$4 sm:$0xff]   ;;  %v12041_v18 = vld [vmem:[%s15317_s9 + $0x174] ss:$8 sps:$4 sm:$0xff]  }
 0x7c1   : > { %v7310_v59 = vpop.f32.mrb[27].mxu0  ;;  %v12042_v21 = vld [vmem:[%s15317_s9 + $0x180] ss:$8 sps:$4 sm:$0xff]  }
 0x7c2   : > { %v7365_v56 = vrot.slane %v7357_v20, %v7364_v29  ;;  %v12044_v20 = vld [vmem:[%s15317_s9 + $0x184] ss:$8 sps:$4 sm:$0xff]   ;;  %v12047_v59 = vld [vmem:[%s15317_s9 + $0x194] ss:$8 sps:$4 sm:$0xff]  }
 0x7de   : > { %v7346_v8 = vpop.f32.mrb[28].mxu0 }
 0x7df   : > { %v7348_v48 = vpop.f32.mrb[29].mxu0 }
 0x7e0   : > { %v7358_v49 = vcombine.low %v7346_v8, %v7348_v48  ;;  %v7350_v32 = vpop.f32.mrb[30].mxu0  ;;  %v12080_v8 = vld [vmem:[%s15319_s11 + $0x44] ss:$16 sps:$4 sm:$0xff]   ;;  %v12078_v48 = vld [vmem:[%s15319_s11 + $0x40] ss:$16 sps:$4 sm:$0xff]  }
 0x7e1   : > { %v7351_v50 = vpop.f32.mrb[31].mxu0  ;;  %v12092_v32 = vld [vmem:[%s15319_s11 + $0x84] ss:$16 sps:$4 sm:$0xff]  }
 0x7e2   : > { %v7372_v57 = vrot.slane %v7358_v49, %v7364_v29  ;;  %v12084_v49 = vld [vmem:[%s15319_s11 + $0x60] ss:$16 sps:$4 sm:$0xff]  }
 0x7e3   : > { %v12090_v50 = vld [vmem:[%s15319_s11 + $0x80] ss:$16 sps:$4 sm:$0xff]  }
 0x7e4   : > { %v7373_v31 = vcombine.low %v7365_v56, %v7372_v57  ;;  %v12096_v56 = vld [vmem:[%s15319_s11 + $0xa0] ss:$16 sps:$4 sm:$0xff]   ;;  %v12104_v57 = vld [vmem:[%s15319_s11 + $0xc4] ss:$16 sps:$4 sm:$0xff]  }
 0x7e6   : > { %v7380_v61 = vrot.slane %v7373_v31, %v7364_v29  ;;  %v12072_v29 = vld [vmem:[%s15319_s11 + $0x20] ss:$16 sps:$4 sm:$0xff]   ;;  %v12110_v31 = vld [vmem:[%s15319_s11 + $0xe4] ss:$16 sps:$4 sm:$0xff]  }
 0x7e8   : > { %v7382_v62 = vadd.f32 %v7380_v61, %v7076_v53  ;;  %v12108_v53 = vld [vmem:[%s15319_s11 + $0xe0] ss:$16 sps:$4 sm:$0xff]  }
 0x7e9   : > { %v12114_v61 = vld [vmem:[%s15319_s11 + $0x100] ss:$16 sps:$4 sm:$0xff]  }
 0x7ea   : > { %v14973_v5 = vmax.f32 %v7382_v62, 0.0  ;;  %v12122_v62 = vld [vmem:[%s15319_s11 + $0x124] ss:$16 sps:$4 sm:$0xff]  }
 0x7ec   : > { %v7392_v6 = vrot.slane %v14973_v5, %v14967_v63  ;;  %v7388_v9 = vrot.slane %v14973_v5, %v14970_v0  ;;  %v7400_v3 = vrot.slane %v14973_v5, %v7399_v4  ;;  %v7396_v37 = vrot.slane %v14973_v5, %v7395_v27  ;;  %v12120_v5 = vld [vmem:[%s15319_s11 + $0x120] ss:$16 sps:$4 sm:$0xff]  }
 0x7ee   : > { %v7406_v10 = vpack.c.bf16 %v7392_v6, %v7392_v6  ;;  %v7405_v14 = vpack.c.bf16 %v7388_v9, %v7388_v9  ;;  %v7408_v41 = vpack.c.bf16 %v7400_v3, %v7400_v3  ;;  %v7407_v24 = vpack.c.bf16 %v7396_v37, %v7396_v37  ;;  %v12128_v6 = vld [vmem:[%s15319_s11 + $0x144] ss:$16 sps:$4 sm:$0xff]   ;;  %v12126_v9 = vld [vmem:[%s15319_s11 + $0x140] ss:$16 sps:$4 sm:$0xff]  }
 0x7ef   : > { %v12134_v3 = vld [vmem:[%s15319_s11 + $0x164] ss:$16 sps:$4 sm:$0xff]  }
 0x7f0   : > { %7837 = vmatprep.mubr.bf16.mxu0 %v7406_v10  ;;  %v12132_v10 = vld [vmem:[%s15319_s11 + $0x160] ss:$16 sps:$4 sm:$0xff]  }
 0x7f1   : > { %7838 = vmatmul.mubr.bf16.vlgmr.msra.gmra.mrb[32].mxu0 %v7405_v14  ;;  %v12138_v14 = vld [vmem:[%s15319_s11 + $0x180] ss:$16 sps:$4 sm:$0xff]  }
 0x7f2   : > { %7847 = vmatpush1.bf16.msra.mxu0 %v12018_v1  ;;  %7878 = vmatprep.mubr.bf16.mxu0 %v7408_v41  ;;  %v12140_v1 = vld [vmem:[%s15319_s11 + $0x184] ss:$16 sps:$4 sm:$0xff]   ;;  %v12144_v41 = vld [vmem:[%s15319_s11 + $0x1a0] ss:$16 sps:$4 sm:$0xff]  }
 0x7f3   : > { %7848 = vmatprep.subr.bf16.mxu0 %v12023_v55  ;;  %v12146_v55 = vld [vmem:[%s15319_s11 + $0x1a4] ss:$16 sps:$4 sm:$0xff]  }
 0x7f4   : > { %v12170_v37 = vld [vmem:[%s15321_s13 + $0x50] sm:$0xff]  }
 0x7f6   : > { %7849 = vmatpush1.bf16.msra.mxu0 %v12021_v52  ;;  %v12152_v52 = vld [vmem:[%s15319_s11 + $0x1c4] ss:$16 sps:$4 sm:$0xff]  }
 0x7f7   : > { %7850 = vmatprep.subr.bf16.mxu0 %v12026_v51  ;;  %v12155_v51 = vld [vmem:[%s15319_s11 + $0x1cc] ss:$16 sps:$4 sm:$0xff]  }
 0x7f8   : > { %8366 = vmatprep.subr.bf16.mxu1 %v12155_v51 }
 0x7fa   : > { %7851 = vmatpush1.bf16.msra.mxu0 %v12024_v58  ;;  %v12150_v58 = vld [vmem:[%s15319_s11 + $0x1c0] ss:$16 sps:$4 sm:$0xff]  }
 0x7fb   : > { %7852 = vmatprep.subr.bf16.mxu0 %v12029_v46  ;;  %v12153_v46 = vld [vmem:[%s15319_s11 + $0x1c8] ss:$16 sps:$4 sm:$0xff]  }
 0x7fc   : > { %8367 = vmatpush1.bf16.msra.mxu1 %v12153_v46 }
 0x7fe   : > { %7853 = vmatpush1.bf16.msra.mxu0 %v12027_v26  ;;  %v12158_v26 = vld [vmem:[%s15319_s11 + $0x1e4] ss:$16 sps:$4 sm:$0xff]  }
 0x7ff   : > { %7854 = vmatprep.subr.bf16.mxu0 %v12032_v13  ;;  %v12156_v13 = vld [vmem:[%s15319_s11 + $0x1e0] ss:$16 sps:$4 sm:$0xff]  }
 0x802   : > { %7855 = vmatpush1.bf16.msra.mxu0 %v12030_v33  ;;  %v12159_v33 = vld [vmem:[%s15319_s11 + $0x1e8] ss:$16 sps:$4 sm:$0xff]  }
 0x803   : > { %7856 = vmatprep.subr.bf16.mxu0 %v12035_v16  ;;  %v12161_v16 = vld [vmem:[%s15319_s11 + $0x1ec] ss:$16 sps:$4 sm:$0xff]  }
 0x804   : > { %8368 = vmatprep.subr.bf16.mxu1 %v12161_v16 }
 0x805   : > { %8369 = vmatpush1.bf16.msra.mxu1 %v12159_v33 }
 0x806   : > { %7857 = vmatpush1.bf16.msra.mxu0 %v12033_v17  ;;  %v12162_v17 = vld [vmem:[%s15321_s13 + $0x40] sm:$0xff]  }
 0x807   : > { %7858 = vmatprep.subr.bf16.mxu0 %v12038_v35  ;;  %v12163_v35 = vld [vmem:[%s15321_s13 + $0xc0] sm:$0xff]  }
 0x808   : > { %10042 = vmatprep.subr.bf16.mxu1 %v12163_v35 }
 0x80a   : > { %7859 = vmatpush1.bf16.msra.mxu0 %v12036_v36  ;;  %v7473_v36 = vld [vmem:[%s15318_s10] sm:$0x3] }
 0x80b   : > { %7860 = vmatprep.subr.bf16.mxu0 %v12041_v18  ;;  %v7798_v18 = vrot.slane %v7473_v36, %v14970_v0 }
 0x80e   : > { %7861 = vmatpush1.bf16.msra.mxu0 %v12039_v19  ;;  %v7802_v19 = vrot.slane %v7473_v36, %v14967_v63 }
 0x80f   : > { %7862 = vmatprep.subr.bf16.mxu0 %v12044_v20 }
 0x812   : > { %7863 = vmatpush1.bf16.msra.mxu0 %v12042_v21 }
 0x813   : > { %7864 = vmatprep.subr.bf16.mxu0 %v12047_v59 }
 0x816   : > { %7865 = vmatpush1.bf16.msra.mxu0 %v12045_v34 }
 0x817   : > { %7866 = vmatprep.subr.bf16.mxu0 %v12050_v11 }
 0x81a   : > { %7867 = vmatpush1.bf16.msra.mxu0 %v12048_v22 }
 0x81b   : > { %7868 = vmatprep.subr.bf16.mxu0 %v12053_v12 }
 0x81e   : > { %7869 = vmatpush1.bf16.msra.mxu0 %v12051_v45 }
 0x81f   : > { %7870 = vmatprep.subr.bf16.mxu0 %v12056_v15 }
 0x822   : > { %7871 = vmatpush1.bf16.msra.mxu0 %v12054_v23  ;;  %v12164_v23 = vld [vmem:[%s15321_s13] sm:$0xff]  }
 0x823   : > { %7872 = vmatprep.subr.bf16.mxu0 %v12059_v25  ;;  %v12165_v25 = vld [vmem:[%s15321_s13 + $0x80] sm:$0xff]  }
 0x826   : > { %7873 = vmatpush1.bf16.msra.mxu0 %v12057_v30 }
 0x827   : > { %7874 = vmatprep.subr.bf16.mxu0 %v12062_v7  ;;  %v12166_v7 = vld [vmem:[%s15321_s13 + $0x48] sm:$0xff]  }
 0x82a   : > { %7875 = vmatpush1.bf16.msra.mxu0 %v12060_v39  ;;  %v12167_v39 = vld [vmem:[%s15321_s13 + $0xc8] sm:$0xff]  }
 0x82b   : > { %7876 = vmatprep.subr.bf16.mxu0 %v12065_v2  ;;  %v12168_v2 = vld [vmem:[%s15321_s13 + $0x8] sm:$0xff]  }
 0x82e   : > { %7877 = vmatpush1.bf16.msra.mxu0 %v12063_v28  ;;  %v12169_v28 = vld [vmem:[%s15321_s13 + $0x88] sm:$0xff]  }
 0x82f   : > { %8297 = vmatprep.subr.bf16.mxu0 %v12068_v38  ;;  %v12171_v38 = vld [vmem:[%s15321_s13 + $0xd0] sm:$0xff]  }
 0x831   : > { %7879 = vmatmul.mubr.bf16.vlgmr.msra.gmra.mrb[32].mxu0 %v7407_v24  ;;  %v12173_v24 = vld [vmem:[%s15321_s13 + $0x90] sm:$0xff]  }
 0x832   : > { %8298 = vmatpush1.bf16.msra.mxu0 %v12066_v42  ;;  %v12172_v42 = vld [vmem:[%s15321_s13 + $0x10] sm:$0xff]  }
 0x833   : > { %8299 = vmatprep.subr.bf16.mxu0 %v12074_v44  ;;  %v12174_v44 = vld [vmem:[%s15321_s13 + $0x58] sm:$0xff]  }
 0x836   : > { %8300 = vmatpush1.bf16.msra.mxu0 %v12072_v29  ;;  %v12175_v29 = vld [vmem:[%s15321_s13 + $0xd8] sm:$0xff]  }
 0x837   : > { %8301 = vmatprep.subr.bf16.mxu0 %v12080_v8  ;;  %v12176_v8 = vld [vmem:[%s15321_s13 + $0x18] sm:$0xff]  }
 0x83a   : > { %8302 = vmatpush1.bf16.msra.mxu0 %v12078_v48  ;;  %v12177_v48 = vld [vmem:[%s15321_s13 + $0x98] sm:$0xff]  }
 0x83b   : > { %8303 = vmatprep.subr.bf16.mxu0 %v12086_v47  ;;  %v12178_v47 = vld [vmem:[%s15321_s13 + $0x60] sm:$0xff]  }
 0x83e   : > { %8304 = vmatpush1.bf16.msra.mxu0 %v12084_v49  ;;  %v12179_v49 = vld [vmem:[%s15321_s13 + $0xe0] sm:$0xff]  }
 0x83f   : > { %8305 = vmatprep.subr.bf16.mxu0 %v12092_v32  ;;  %v12180_v32 = vld [vmem:[%s15321_s13 + $0x20] sm:$0xff]  }
 0x842   : > { %8306 = vmatpush1.bf16.msra.mxu0 %v12090_v50  ;;  %v12181_v50 = vld [vmem:[%s15321_s13 + $0xa0] sm:$0xff]  }
 0x843   : > { %8307 = vmatprep.subr.bf16.mxu0 %v12098_v54  ;;  %v12182_v54 = vld [vmem:[%s15321_s13 + $0x68] sm:$0xff]  }
 0x846   : > { %8308 = vmatpush1.bf16.msra.mxu0 %v12096_v56  ;;  %v12183_v56 = vld [vmem:[%s15321_s13 + $0xe8] sm:$0xff]  }
 0x847   : > { %8309 = vmatprep.subr.bf16.mxu0 %v12104_v57  ;;  %v12184_v57 = vld [vmem:[%s15321_s13 + $0x28] sm:$0xff]  }
 0x84a   : > { %8310 = vmatpush1.bf16.msra.mxu0 %v12102_v40  ;;  %v12185_v40 = vld [vmem:[%s15321_s13 + $0xa8] sm:$0xff]  }
 0x84b   : > { %8311 = vmatprep.subr.bf16.mxu0 %v12110_v31  ;;  %v12186_v31 = vld [vmem:[%s15321_s13 + $0x70] sm:$0xff]  }
 0x84e   : > { %8312 = vmatpush1.bf16.msra.mxu0 %v12108_v53  ;;  %v12187_v53 = vld [vmem:[%s15321_s13 + $0xf0] sm:$0xff]  }
 0x84f   : > { %8313 = vmatprep.subr.bf16.mxu0 %v12116_v60  ;;  %v12188_v60 = vld [vmem:[%s15321_s13 + $0x30] sm:$0xff]  }
 0x852   : > { %8314 = vmatpush1.bf16.msra.mxu0 %v12114_v61  ;;  %v12189_v61 = vld [vmem:[%s15321_s13 + $0xb0] sm:$0xff]  }
 0x853   : > { %8315 = vmatprep.subr.bf16.mxu0 %v12122_v62  ;;  %v12190_v62 = vld [vmem:[%s15321_s13 + $0x78] sm:$0xff]  }
 0x856   : > { %8316 = vmatpush1.bf16.msra.mxu0 %v12120_v5  ;;  %v12191_v5 = vld [vmem:[%s15321_s13 + $0xf8] sm:$0xff]  }
 0x857   : > { %8317 = vmatprep.subr.bf16.mxu0 %v12128_v6  ;;  %v12192_v6 = vld [vmem:[%s15321_s13 + $0x38] sm:$0xff]  }
 0x85a   : > { %8318 = vmatpush1.bf16.msra.mxu0 %v12126_v9  ;;  %v12193_v9 = vld [vmem:[%s15321_s13 + $0xb8] sm:$0xff]  }
 0x85b   : > { %8319 = vmatprep.subr.bf16.mxu0 %v12134_v3  ;;  %v7955_v3 = vld [vmem:[%s15320_s12] sm:$0xf] }
 0x85e   : > { %8320 = vmatpush1.bf16.msra.mxu0 %v12132_v10  ;;  %v8280_v10 = vrot.slane %v7955_v3, %v14970_v0 }
 0x85f   : > { %8321 = vmatprep.subr.bf16.mxu0 %v12140_v1  ;;  %v8288_v1 = vrot.slane %v7955_v3, %v7395_v27 }
 0x862   : > { %8322 = vmatpush1.bf16.msra.mxu0 %v12138_v14  ;;  %v8284_v14 = vrot.slane %v7955_v3, %v14967_v63 }
 0x863   : > { %8323 = vmatprep.subr.bf16.mxu0 %v12146_v55  ;;  %v8292_v55 = vrot.slane %v7955_v3, %v7399_v4 }
 0x866   : > { %8324 = vmatpush1.bf16.msra.mxu0 %v12144_v41 }
 0x867   : > { %8325 = vmatprep.subr.bf16.mxu0 %v12152_v52 }
 0x86a   : > { %8326 = vmatpush1.bf16.msra.mxu0 %v12150_v58 }
 0x86b   : > { %8327 = vmatprep.subr.bf16.mxu0 %v12158_v26 }
 0x86e   : > { %8328 = vmatpush1.bf16.msra.mxu0 %v12156_v13 }
 0x86f   : > { %10020 = vmatprep.subr.bf16.mxu0 %v12162_v17 }
 0x904   : > { %v7880_v20 = vpop.f32.mrb[32].mxu0 }
 0x905   : > { %v11208_v21 = vadd.f32 %v7880_v20, %v7798_v18  ;;  %v7882_v59 = vpop.f32.mrb[33].mxu0 }
 0x906   : > { %v11209_v34 = vadd.f32 %v7882_v59, %v7802_v19  ;;  %v7884_v11 = vpop.f32.mrb[34].mxu0 }
 0x907   : > { %v7887_v22 = vmax.f32 %v11208_v21, 0.0  ;;  %v7885_v12 = vpop.f32.mrb[35].mxu0  ;;  %v8451_v11 = vld [vmem:[%s15322_s14] sm:$0x1] }
 0x908   : > { %v7888_v45 = vmax.f32 %v11209_v34, 0.0 }
 0x909   : > { %v7889_v30 = vpack.c.bf16 %v7887_v22, %v7887_v22 }
 0x90a   : > { %v7890_v15 = vpack.c.bf16 %v7888_v45, %v7888_v45 }
 0x90c   : > { %8329 = vmatprep.mubr.bf16.mxu0 %v7890_v15  ;;  %8370 = vmatprep.mubr.bf16.mxu1 %v7890_v15 }
 0x90d   : > { %8330 = vmatmul.mubr.bf16.vlgmr.msra.gmra.mrb[36].mxu0 %v7889_v30  ;;  %8371 = vmatmul.mubr.bf16.vlgmr.msra.gmra.mrb[8].mxu1 %v7889_v30 }
 0x90e   : > { %10021 = vmatpush3.bf16.msra.mxu0 %v12164_v23  ;;  %10043 = vmatpush3.bf16.msra.mxu1 %v12165_v25 }
 0x90f   : > { %10022 = vmatprep.subr.bf16.mxu0 %v12166_v7  ;;  %10044 = vmatprep.subr.bf16.mxu1 %v12167_v39 }
 0x912   : > { %10023 = vmatpush3.bf16.msra.mxu0 %v12168_v2  ;;  %10045 = vmatpush3.bf16.msra.mxu1 %v12169_v28 }
 0x913   : > { %10024 = vmatprep.subr.bf16.mxu0 %v12170_v37  ;;  %10046 = vmatprep.subr.bf16.mxu1 %v12171_v38 }
 0x916   : > { %10025 = vmatpush3.bf16.msra.mxu0 %v12172_v42  ;;  %10047 = vmatpush3.bf16.msra.mxu1 %v12173_v24 }
 0x917   : > { %10026 = vmatprep.subr.bf16.mxu0 %v12174_v44  ;;  %10048 = vmatprep.subr.bf16.mxu1 %v12175_v29 }
 0x91a   : > { %10027 = vmatpush3.bf16.msra.mxu0 %v12176_v8  ;;  %10049 = vmatpush3.bf16.msra.mxu1 %v12177_v48 }
 0x91b   : > { %10028 = vmatprep.subr.bf16.mxu0 %v12178_v47  ;;  %10050 = vmatprep.subr.bf16.mxu1 %v12179_v49 }
 0x91e   : > { %10029 = vmatpush3.bf16.msra.mxu0 %v12180_v32  ;;  %10051 = vmatpush3.bf16.msra.mxu1 %v12181_v50 }
 0x91f   : > { %10030 = vmatprep.subr.bf16.mxu0 %v12182_v54  ;;  %10052 = vmatprep.subr.bf16.mxu1 %v12183_v56 }
 0x922   : > { %10031 = vmatpush3.bf16.msra.mxu0 %v12184_v57  ;;  %10053 = vmatpush3.bf16.msra.mxu1 %v12185_v40 }
 0x923   : > { %10032 = vmatprep.subr.bf16.mxu0 %v12186_v31  ;;  %10054 = vmatprep.subr.bf16.mxu1 %v12187_v53 }
 0x926   : > { %10033 = vmatpush3.bf16.msra.mxu0 %v12188_v60  ;;  %10055 = vmatpush3.bf16.msra.mxu1 %v12189_v61 }
 0x927   : > { %10034 = vmatprep.subr.bf16.mxu0 %v12190_v62  ;;  %10056 = vmatprep.subr.bf16.mxu1 %v12191_v5 }
 0x92a   : > { %10035 = vmatpush3.bf16.msra.mxu0 %v12192_v6  ;;  %10057 = vmatpush3.bf16.msra.mxu1 %v12193_v9 }
 0x9e0   : > { %v8331_v41 = vpop.f32.mrb[36].mxu0  ;;  %v8372_v52 = vpop.f32.mrb[8].mxu1 }
 0x9e1   : > { %v8332_v51 = vadd.f32 %v8331_v41, %v8280_v10  ;;  %v8373_v58 = vadd.f32 %v8372_v52, %v8288_v1  ;;  %v8333_v46 = vpop.f32.mrb[37].mxu0  ;;  %v8374_v26 = vpop.f32.mrb[9].mxu1 }
 0x9e2   : > { %v8334_v13 = vadd.f32 %v8333_v46, %v8284_v14  ;;  %v8375_v33 = vadd.f32 %v8374_v26, %v8292_v55  ;;  %v8335_v16 = vpop.f32.mrb[38].mxu0  ;;  %v8376_v17 = vpop.f32.mrb[10].mxu1 }
 0x9e3   : > { %v8379_v35 = vmax.f32 %v8332_v51, 0.0  ;;  %v8381_v36 = vmax.f32 %v8373_v58, 0.0  ;;  %v8336_v18 = vpop.f32.mrb[39].mxu0  ;;  %v8377_v19 = vpop.f32.mrb[11].mxu1 }
 0x9e4   : > { %v8380_v27 = vmax.f32 %v8334_v13, 0.0  ;;  %v8382_v20 = vmax.f32 %v8375_v33, 0.0 }
 0x9e5   : > { %v8383_v43 = vpack.c.bf16 %v8379_v35, %v8379_v35  ;;  %v8385_v4 = vpack.c.bf16 %v8381_v36, %v8381_v36 }
 0x9e6   : > { %v8384_v63 = vpack.c.bf16 %v8380_v27, %v8380_v27  ;;  %v8386_v21 = vpack.c.bf16 %v8382_v20, %v8382_v20 }
 0x9e8   : > { %8676 = vmatprep.mubr.bf16.mxu0 %v8384_v63  ;;  %8716 = vmatprep.mubr.bf16.mxu1 %v8386_v21 }
 0x9e9   : > { %8677 = vmatmul.mubr.bf16.vlgmr.msra.gmra.mrb[40].mxu0 %v8383_v43  ;;  %8717 = vmatmul.mubr.bf16.vlgmr.msra.gmra.mrb[12].mxu1 %v8385_v4 }
 0xabc   : > { %v10036_v59 = vpop.f32.mrb[40].mxu0  ;;  %v10058_v34 = vpop.f32.mrb[12].mxu1 }
 0xabd   : > { %v10037_v22 = vpop.f32.mrb[41].mxu0  ;;  %v10059_v12 = vpop.f32.mrb[13].mxu1 }
 0xabe   : > { %v10038_v45 = vadd.f32 %v10037_v22, %v10036_v59  ;;  %v10060_v15 = vadd.f32 %v10059_v12, %v10058_v34  ;;  %v10039_v23 = vpop.f32.mrb[42].mxu0  ;;  %v10061_v25 = vpop.f32.mrb[14].mxu1 }
 0xabf   : > { %v10040_v30 = vpop.f32.mrb[43].mxu0  ;;  %v10062_v7 = vpop.f32.mrb[15].mxu1 }
 0xac0   : > { %v8679_v39 = vadd.f32 %v10038_v45, %v8451_v11 }
 0xac2   : > { %v8719_v2 = vadd.f32 %v10060_v15, %v8679_v39 }
 0xac4   : > { %v8727_v28 = vrot.slane %v8719_v2, %v14970_v0 }
 0xac6   : > { %8728 = vst [vmem:[%s492_s24] sm:$0xff] %v8727_v28 }
 0xac7 PF: > { %s25_s18 = sadd.s32 1, %s12202_s18  }
 0xac8   : > { %p22_p4 = scmp.ge.s32.totalorder %s25_s18, 4  }
 0xaca   :  { %24 = sbr.rel (!%p22_p4) target bundleno = 1 (0x1), region = 110 }

</bundles_post_ra>
